<compile_context>
chip_gen: v7x
topology: tpu7x:2x2x1
jax: 0.10.0
libtpu: 0.0.40
codegen_flags: <defaults>
</compile_context>

<pallas_src>
import jax
import jax.numpy as jnp
from jax import lax
from jax.experimental import pallas as pl
from jax.experimental.pallas import tpu as pltpu

# ----- small synthetic model config (consistent with the module's forward) -----
B, S, D = 2, 8, 32          # batch, seqlen, hidden size
H, HD = 4, 8                # num attention heads, head dim (H * HD == D)
I = 64                      # MLP intermediate size
VOCAB = 64                  # vocab size
N_LAYERS = 7                # Part1 keeps layers[:7]
EPS = 1e-6                  # RMSNorm eps
ROPE_THETA = 10000.0
BS = B * S                  # flattened token count
NEG = -1e30                 # finite stand-in for -inf inside the kernel


# --------------------- single fused kernel: embed + 7 layers ---------------------
def part1_kernel(ids_ref, embed_ref, cos_ref, sin_ref,
                 ln1_ref, wqkv_ref, wo_ref, ln2_ref, wgu_ref, wd_ref,
                 o_ref):
    # ---- embedding lookup fused in-kernel (one-hot matmul on the MXU) ----
    ids = ids_ref[...]                                             # (BS, 1) int32
    vocab_ids = lax.broadcasted_iota(jnp.int32, (BS, VOCAB), 1)    # (BS, VOCAB)
    onehot = (vocab_ids == ids).astype(jnp.float32)
    x = jnp.dot(onehot, embed_ref[...],
                preferred_element_type=jnp.float32)                # (BS, D)

    # ---- loop-invariant values hoisted ONCE above the layer loop ----
    cos = cos_ref[...]                                             # (BS, D)
    sin = sin_ref[...]                                             # (BS, D)
    row = lax.broadcasted_iota(jnp.int32, (B, S, S), 1)
    col = lax.broadcasted_iota(jnp.int32, (B, S, S), 2)
    neg_mask = jnp.where(col <= row, 0.0, NEG).astype(jnp.float32) # additive causal
    scale = 1.0 / (HD ** 0.5)

    def rmsnorm(h, w):
        var = jnp.mean(h * h, axis=-1, keepdims=True)
        return h * lax.rsqrt(var + EPS) * w

    # ---- unrolled layer loop; all 7 layers' weights resident in VMEM ----
    for l in range(N_LAYERS):
        ln1 = ln1_ref[l]                 # (1, D)
        wqkv = wqkv_ref[l]               # (D, 5D) = [Wq | Wq@P | Wk | Wk@P | Wv]
        wo = wo_ref[l]                   # (D, D)
        ln2 = ln2_ref[l]                 # (1, D)
        wgu = wgu_ref[l]                 # (D, 2I)
        wd = wd_ref[l]                   # (I, D)

        # ---------------- self attention ----------------
        xn = rmsnorm(x, ln1)
        proj = jnp.dot(xn, wqkv, preferred_element_type=jnp.float32)   # (BS, 5D)
        # q/q_rot share lanes 0..63, k/k_rot share lanes 64..127 (one lane tile each)
        q = proj[:, 0 * D:1 * D] * cos + proj[:, 1 * D:2 * D] * sin
        k = proj[:, 2 * D:3 * D] * cos + proj[:, 3 * D:4 * D] * sin
        v = proj[:, 4 * D:5 * D]

        # Per-head scores/softmax/context (H=4, static); head contexts are
        # concatenated in vregs and hit Wo with a single matmul.
        ctx_heads = []
        for h in range(H):
            sl = slice(h * HD, (h + 1) * HD)
            qh = q[:, sl].reshape(B, S, HD)
            kh = k[:, sl].reshape(B, S, HD)
            vh = v[:, sl].reshape(B, S, HD)
            s = jnp.einsum('bqd,bkd->bqk', qh, kh,
                           preferred_element_type=jnp.float32) * scale
            s = s + neg_mask
            s = s - jnp.max(s, axis=-1, keepdims=True)
            p = jnp.exp(s)
            p = p * pl.reciprocal(jnp.sum(p, axis=-1, keepdims=True), approx=True)
            ctx = jnp.einsum('bqk,bkd->bqd', p, vh,
                             preferred_element_type=jnp.float32)
            ctx_heads.append(ctx.reshape(BS, HD))
        ctx_all = jnp.concatenate(ctx_heads, axis=-1)                  # (BS, D)
        attn = jnp.dot(ctx_all, wo, preferred_element_type=jnp.float32)

        h1 = x + attn

        # ---------------- SwiGLU MLP (fused gate|up) ----------------
        hn = rmsnorm(h1, ln2)
        gu = jnp.dot(hn, wgu, preferred_element_type=jnp.float32)      # (BS, 2I)
        g = gu[:, :I]
        u = gu[:, I:]
        g = g * (1.0 / (1.0 + jnp.exp(-g)))                            # SiLU
        mlp = jnp.dot(g * u, wd, preferred_element_type=jnp.float32)

        x = h1 + mlp

    o_ref[...] = x


def part1_layers(input_ids_flat, cos_full, sin_full, pk):
    vmem = lambda: pl.BlockSpec(memory_space=pltpu.MemorySpace.VMEM)
    return pl.pallas_call(
        part1_kernel,
        out_shape=jax.ShapeDtypeStruct((BS, D), jnp.float32),
        in_specs=[vmem() for _ in range(10)],
        out_specs=vmem(),
    )(input_ids_flat, pk["embed"], cos_full, sin_full,
      pk["ln1"], pk["wqkv"], pk["wo"], pk["ln2"], pk["wgu"], pk["wd"])


# ------------------------------ parameter setup ------------------------------
def init_params(key):
    keys = jax.random.split(key, 1 + N_LAYERS * 7)
    params = {"embed": jax.random.normal(keys[0], (VOCAB, D), jnp.float32) * 0.02}
    layers = []
    k_idx = 1
    for _ in range(N_LAYERS):
        def nrm(shape):
            nonlocal k_idx
            w = jax.random.normal(keys[k_idx], shape, jnp.float32) * 0.05
            k_idx += 1
            return w
        layers.append({
            "ln1": jnp.ones((1, D), jnp.float32),
            "wq": nrm((D, D)), "wk": nrm((D, D)),
            "wv": nrm((D, D)), "wo": nrm((D, D)),
            "ln2": jnp.ones((1, D), jnp.float32),
            "wg": nrm((D, I)), "wu": nrm((D, I)), "wd": nrm((I, D)),
        })
    params["layers"] = layers
    return params


def rope_perm_matrix():
    """(D, D) matrix P with q @ P == rotate_half(q) (per-head, sign included)."""
    half = HD // 2
    idx = jnp.arange(half)
    ph = jnp.zeros((HD, HD), jnp.float32)
    ph = ph.at[idx, idx + half].set(1.0)      # q1 -> second half
    ph = ph.at[idx + half, idx].set(-1.0)     # -q2 -> first half
    return jnp.kron(jnp.eye(H, dtype=jnp.float32), ph)


def pack_params(params):
    """Stack per-layer weights with a leading N_LAYERS axis and fuse projections.

    wqkv column order is [Wq | Wq@P | Wk | Wk@P | Wv] so that the operands of each
    RoPE FMA share a 128-lane tile inside the kernel.
    """
    P = rope_perm_matrix()
    ln1 = jnp.stack([lp["ln1"] for lp in params["layers"]])                 # (N,1,D)
    ln2 = jnp.stack([lp["ln2"] for lp in params["layers"]])                 # (N,1,D)
    wqkv = jnp.stack([
        jnp.concatenate([lp["wq"], lp["wq"] @ P,
                         lp["wk"], lp["wk"] @ P,
                         lp["wv"]], axis=1)
        for lp in params["layers"]])                                        # (N,D,5D)
    wo = jnp.stack([lp["wo"] for lp in params["layers"]])                   # (N,D,D)
    wgu = jnp.stack([jnp.concatenate([lp["wg"], lp["wu"]], axis=1)
                     for lp in params["layers"]])                           # (N,D,2I)
    wd = jnp.stack([lp["wd"] for lp in params["layers"]])                   # (N,I,D)
    return {"embed": params["embed"], "ln1": ln1, "ln2": ln2,
            "wqkv": wqkv, "wo": wo, "wgu": wgu, "wd": wd}


def rotary_full():
    """cos/sin tables pre-broadcast (hoisted out of the kernel) to (B*S, D).

    Row order matches hidden.reshape(BS, D), i.e. batch-major (b*S + s).
    """
    inv_freq = 1.0 / (ROPE_THETA ** (jnp.arange(0, HD, 2, dtype=jnp.float32) / HD))
    pos = jnp.arange(S, dtype=jnp.float32)
    freqs = jnp.outer(pos, inv_freq)                     # (S, HD/2)
    emb = jnp.concatenate([freqs, freqs], axis=-1)       # (S, HD)
    cos, sin = jnp.cos(emb), jnp.sin(emb)
    return jnp.tile(cos, (B, H)), jnp.tile(sin, (B, H))  # (B*S, D) each


# --------------------------------- forward -----------------------------------
@jax.jit
def part1_forward(input_ids, packed):
    cos_full, sin_full = rotary_full()
    ids_flat = input_ids.reshape(BS, 1).astype(jnp.int32)
    out = part1_layers(ids_flat, cos_full, sin_full, packed)
    hidden = out.reshape(B, S, D)
    # additive causal mask, matching torch.triu(full(-inf), 1) expanded to (B,1,S,S)
    # (kernel internally uses -1e30; post-softmax equivalent)
    mask = jnp.triu(jnp.full((S, S), -jnp.inf, jnp.float32), k=1)
    attn_mask = jnp.broadcast_to(mask[None, None], (B, 1, S, S))
    return hidden, attn_mask


if __name__ == "__main__":
    key = jax.random.PRNGKey(0)
    pkey, ikey = jax.random.split(key)
    params = init_params(pkey)
    packed = pack_params(params)
    input_ids = jax.random.randint(ikey, (B, S), 0, VOCAB, dtype=jnp.int32)

    hidden, attn_mask = part1_forward(input_ids, packed)
    hidden = jax.block_until_ready(hidden)
    attn_mask = jax.block_until_ready(attn_mask)

    assert hidden.shape == (B, S, D) and hidden.dtype == jnp.float32
    assert attn_mask.shape == (B, 1, S, S)
    assert bool(jnp.all(jnp.isfinite(hidden)))
    print("KERNEL_OK")
</pallas_src>

<mosaic_0001>
module attributes {stable_mosaic.version = 11 : i64} {
  func.func @part1_kernel(%arg0: memref<16x1xi32, #tpu.memory_space<vmem>>, %arg1: memref<64x32xf32, #tpu.memory_space<vmem>>, %arg2: memref<16x32xf32, #tpu.memory_space<vmem>>, %arg3: memref<16x32xf32, #tpu.memory_space<vmem>>, %arg4: memref<7x1x32xf32, #tpu.memory_space<vmem>>, %arg5: memref<7x32x160xf32, #tpu.memory_space<vmem>>, %arg6: memref<7x32x32xf32, #tpu.memory_space<vmem>>, %arg7: memref<7x1x32xf32, #tpu.memory_space<vmem>>, %arg8: memref<7x32x128xf32, #tpu.memory_space<vmem>>, %arg9: memref<7x64x32xf32, #tpu.memory_space<vmem>>, %arg10: memref<16x32xf32, #tpu.memory_space<vmem>>) attributes {dimension_semantics = [], scalar_prefetch = 0 : i64, scratch_operands = 0 : i64, tpu.core_type = #tpu.core_type<tc>} {
    %c0 = arith.constant 0 : index
    %c0_0 = arith.constant 0 : index
    %0 = vector.load %arg0[%c0, %c0_0] : memref<16x1xi32, #tpu.memory_space<vmem>>, vector<16x1xi32>
    %1 = tpu.iota {dimensions = array<i32: 1>} : vector<16x64xi32>
    %2 = vector.broadcast %0 : vector<16x1xi32> to vector<16x64xi32>
    %3 = arith.cmpi eq, %1, %2 : vector<16x64xi32>
    %4 = arith.extui %3 : vector<16x64xi1> to vector<16x64xi32>
    %5 = arith.sitofp %4 : vector<16x64xi32> to vector<16x64xf32>
    %c0_1 = arith.constant 0 : index
    %c0_2 = arith.constant 0 : index
    %6 = vector.load %arg1[%c0_1, %c0_2] : memref<64x32xf32, #tpu.memory_space<vmem>>, vector<64x32xf32>
    %cst = arith.constant dense<0.000000e+00> : vector<16x32xf32>
    %7 = tpu.matmul %5, %6, %cst {dimension_numbers = #tpu.dot_dimension_numbers<[1], [0], [0], [1], [0, 0, 1, 1], [], []>} : vector<16x64xf32>, vector<64x32xf32>, vector<16x32xf32> -> vector<16x32xf32>
    %c0_3 = arith.constant 0 : index
    %c0_4 = arith.constant 0 : index
    %8 = vector.load %arg2[%c0_3, %c0_4] : memref<16x32xf32, #tpu.memory_space<vmem>>, vector<16x32xf32>
    %c0_5 = arith.constant 0 : index
    %c0_6 = arith.constant 0 : index
    %9 = vector.load %arg3[%c0_5, %c0_6] : memref<16x32xf32, #tpu.memory_space<vmem>>, vector<16x32xf32>
    %10 = tpu.iota {dimensions = array<i32: 1>} : vector<2x8x8xi32>
    %11 = tpu.iota {dimensions = array<i32: 2>} : vector<2x8x8xi32>
    %12 = arith.cmpi sle, %11, %10 : vector<2x8x8xi32>
    %cst_7 = arith.constant 0.000000e+00 : f32
    %cst_8 = arith.constant -1.000000e+30 : f32
    %13 = vector.broadcast %cst_7 : f32 to vector<2x8x8xf32>
    %14 = vector.broadcast %cst_8 : f32 to vector<2x8x8xf32>
    %15 = arith.select %12, %13, %14 : vector<2x8x8xi1>, vector<2x8x8xf32>
    %c0_9 = arith.constant 0 : index
    %c0_10 = arith.constant 0 : index
    %c0_11 = arith.constant 0 : index
    %16 = vector.load %arg4[%c0_9, %c0_10, %c0_11] : memref<7x1x32xf32, #tpu.memory_space<vmem>>, vector<1x1x32xf32>
    %17 = vector.shape_cast %16 : vector<1x1x32xf32> to vector<1x32xf32>
    %c0_12 = arith.constant 0 : index
    %c0_13 = arith.constant 0 : index
    %c0_14 = arith.constant 0 : index
    %18 = vector.load %arg5[%c0_12, %c0_13, %c0_14] : memref<7x32x160xf32, #tpu.memory_space<vmem>>, vector<1x32x160xf32>
    %19 = vector.shape_cast %18 : vector<1x32x160xf32> to vector<32x160xf32>
    %c0_15 = arith.constant 0 : index
    %c0_16 = arith.constant 0 : index
    %c0_17 = arith.constant 0 : index
    %20 = vector.load %arg6[%c0_15, %c0_16, %c0_17] : memref<7x32x32xf32, #tpu.memory_space<vmem>>, vector<1x32x32xf32>
    %21 = vector.shape_cast %20 : vector<1x32x32xf32> to vector<32x32xf32>
    %c0_18 = arith.constant 0 : index
    %c0_19 = arith.constant 0 : index
    %c0_20 = arith.constant 0 : index
    %22 = vector.load %arg7[%c0_18, %c0_19, %c0_20] : memref<7x1x32xf32, #tpu.memory_space<vmem>>, vector<1x1x32xf32>
    %23 = vector.shape_cast %22 : vector<1x1x32xf32> to vector<1x32xf32>
    %c0_21 = arith.constant 0 : index
    %c0_22 = arith.constant 0 : index
    %c0_23 = arith.constant 0 : index
    %24 = vector.load %arg8[%c0_21, %c0_22, %c0_23] : memref<7x32x128xf32, #tpu.memory_space<vmem>>, vector<1x32x128xf32>
    %25 = vector.shape_cast %24 : vector<1x32x128xf32> to vector<32x128xf32>
    %c0_24 = arith.constant 0 : index
    %c0_25 = arith.constant 0 : index
    %c0_26 = arith.constant 0 : index
    %26 = vector.load %arg9[%c0_24, %c0_25, %c0_26] : memref<7x64x32xf32, #tpu.memory_space<vmem>>, vector<1x64x32xf32>
    %27 = vector.shape_cast %26 : vector<1x64x32xf32> to vector<64x32xf32>
    %28 = arith.mulf %7, %7 : vector<16x32xf32>
    %cst_27 = arith.constant dense<0.000000e+00> : vector<16xf32>
    %29 = vector.multi_reduction <add>, %28, %cst_27 [1] : vector<16x32xf32> to vector<16xf32>
    %30 = vector.shape_cast %29 : vector<16xf32> to vector<16x1xf32>
    %cst_28 = arith.constant 3.200000e+01 : f32
    %31 = vector.broadcast %cst_28 : f32 to vector<16x1xf32>
    %32 = arith.divf %30, %31 : vector<16x1xf32>
    %cst_29 = arith.constant 9.99999997E-7 : f32
    %33 = vector.broadcast %cst_29 : f32 to vector<16x1xf32>
    %34 = arith.addf %32, %33 : vector<16x1xf32>
    %35 = math.rsqrt %34 : vector<16x1xf32>
    %36 = vector.broadcast %35 : vector<16x1xf32> to vector<16x32xf32>
    %37 = arith.mulf %7, %36 : vector<16x32xf32>
    %38 = vector.broadcast %17 : vector<1x32xf32> to vector<16x32xf32>
    %39 = arith.mulf %37, %38 : vector<16x32xf32>
    %cst_30 = arith.constant dense<0.000000e+00> : vector<16x160xf32>
    %40 = tpu.matmul %39, %19, %cst_30 {dimension_numbers = #tpu.dot_dimension_numbers<[1], [0], [0], [1], [0, 0, 1, 1], [], []>} : vector<16x32xf32>, vector<32x160xf32>, vector<16x160xf32> -> vector<16x160xf32>
    %41 = vector.extract_strided_slice %40 {offsets = [0, 0], sizes = [16, 32], strides = [1, 1]} : vector<16x160xf32> to vector<16x32xf32>
    %42 = arith.mulf %41, %8 : vector<16x32xf32>
    %43 = vector.extract_strided_slice %40 {offsets = [0, 32], sizes = [16, 32], strides = [1, 1]} : vector<16x160xf32> to vector<16x32xf32>
    %44 = arith.mulf %43, %9 : vector<16x32xf32>
    %45 = arith.addf %42, %44 : vector<16x32xf32>
    %46 = vector.extract_strided_slice %40 {offsets = [0, 64], sizes = [16, 32], strides = [1, 1]} : vector<16x160xf32> to vector<16x32xf32>
    %47 = arith.mulf %46, %8 : vector<16x32xf32>
    %48 = vector.extract_strided_slice %40 {offsets = [0, 96], sizes = [16, 32], strides = [1, 1]} : vector<16x160xf32> to vector<16x32xf32>
    %49 = arith.mulf %48, %9 : vector<16x32xf32>
    %50 = arith.addf %47, %49 : vector<16x32xf32>
    %51 = vector.extract_strided_slice %40 {offsets = [0, 128], sizes = [16, 32], strides = [1, 1]} : vector<16x160xf32> to vector<16x32xf32>
    %52 = vector.extract_strided_slice %45 {offsets = [0, 0], sizes = [16, 8], strides = [1, 1]} : vector<16x32xf32> to vector<16x8xf32>
    %53 = vector.shape_cast %52 : vector<16x8xf32> to vector<2x8x8xf32>
    %54 = vector.extract_strided_slice %50 {offsets = [0, 0], sizes = [16, 8], strides = [1, 1]} : vector<16x32xf32> to vector<16x8xf32>
    %55 = vector.shape_cast %54 : vector<16x8xf32> to vector<2x8x8xf32>
    %56 = vector.extract_strided_slice %51 {offsets = [0, 0], sizes = [16, 8], strides = [1, 1]} : vector<16x32xf32> to vector<16x8xf32>
    %57 = vector.shape_cast %56 : vector<16x8xf32> to vector<2x8x8xf32>
    "tpu.trace_start"() <{level = 10 : i32, message = "bqd,bkd->bqk"}> : () -> ()
    %cst_31 = arith.constant dense<0.000000e+00> : vector<2x8x8xf32>
    %58 = tpu.matmul %53, %55, %cst_31 {dimension_numbers = #tpu.dot_dimension_numbers<[2], [2], [1], [1], [0, 0, 0, 1, 1, 1], [0], [0]>} : vector<2x8x8xf32>, vector<2x8x8xf32>, vector<2x8x8xf32> -> vector<2x8x8xf32>
    "tpu.trace_stop"() : () -> ()
    %cst_32 = arith.constant 0.353553385 : f32
    %59 = vector.broadcast %cst_32 : f32 to vector<2x8x8xf32>
    %60 = arith.mulf %58, %59 : vector<2x8x8xf32>
    %61 = arith.addf %60, %15 : vector<2x8x8xf32>
    %cst_33 = arith.constant dense<0xFF800000> : vector<2x8xf32>
    %62 = vector.multi_reduction <maximumf>, %61, %cst_33 [2] : vector<2x8x8xf32> to vector<2x8xf32>
    %63 = vector.shape_cast %62 : vector<2x8xf32> to vector<2x8x1xf32>
    %64 = vector.broadcast %63 : vector<2x8x1xf32> to vector<2x8x8xf32>
    %65 = arith.subf %61, %64 : vector<2x8x8xf32>
    %66 = math.exp %65 : vector<2x8x8xf32>
    %cst_34 = arith.constant dense<0.000000e+00> : vector<2x8xf32>
    %67 = vector.multi_reduction <add>, %66, %cst_34 [2] : vector<2x8x8xf32> to vector<2x8xf32>
    %68 = vector.shape_cast %67 : vector<2x8xf32> to vector<2x8x1xf32>
    %69 = tpu.reciprocal %68 {approx = true} : vector<2x8x1xf32> -> vector<2x8x1xf32>
    %70 = vector.broadcast %69 : vector<2x8x1xf32> to vector<2x8x8xf32>
    %71 = arith.mulf %66, %70 : vector<2x8x8xf32>
    "tpu.trace_start"() <{level = 10 : i32, message = "bqk,bkd->bqd"}> : () -> ()
    %cst_35 = arith.constant dense<0.000000e+00> : vector<2x8x8xf32>
    %72 = tpu.matmul %71, %57, %cst_35 {dimension_numbers = #tpu.dot_dimension_numbers<[2], [1], [1], [2], [0, 0, 0, 1, 1, 2], [0], [0]>} : vector<2x8x8xf32>, vector<2x8x8xf32>, vector<2x8x8xf32> -> vector<2x8x8xf32>
    "tpu.trace_stop"() : () -> ()
    %73 = vector.shape_cast %72 : vector<2x8x8xf32> to vector<16x8xf32>
    %74 = vector.extract_strided_slice %45 {offsets = [0, 8], sizes = [16, 8], strides = [1, 1]} : vector<16x32xf32> to vector<16x8xf32>
    %75 = vector.shape_cast %74 : vector<16x8xf32> to vector<2x8x8xf32>
    %76 = vector.extract_strided_slice %50 {offsets = [0, 8], sizes = [16, 8], strides = [1, 1]} : vector<16x32xf32> to vector<16x8xf32>
    %77 = vector.shape_cast %76 : vector<16x8xf32> to vector<2x8x8xf32>
    %78 = vector.extract_strided_slice %51 {offsets = [0, 8], sizes = [16, 8], strides = [1, 1]} : vector<16x32xf32> to vector<16x8xf32>
    %79 = vector.shape_cast %78 : vector<16x8xf32> to vector<2x8x8xf32>
    "tpu.trace_start"() <{level = 10 : i32, message = "bqd,bkd->bqk"}> : () -> ()
    %cst_36 = arith.constant dense<0.000000e+00> : vector<2x8x8xf32>
    %80 = tpu.matmul %75, %77, %cst_36 {dimension_numbers = #tpu.dot_dimension_numbers<[2], [2], [1], [1], [0, 0, 0, 1, 1, 1], [0], [0]>} : vector<2x8x8xf32>, vector<2x8x8xf32>, vector<2x8x8xf32> -> vector<2x8x8xf32>
    "tpu.trace_stop"() : () -> ()
    %cst_37 = arith.constant 0.353553385 : f32
    %81 = vector.broadcast %cst_37 : f32 to vector<2x8x8xf32>
    %82 = arith.mulf %80, %81 : vector<2x8x8xf32>
    %83 = arith.addf %82, %15 : vector<2x8x8xf32>
    %cst_38 = arith.constant dense<0xFF800000> : vector<2x8xf32>
    %84 = vector.multi_reduction <maximumf>, %83, %cst_38 [2] : vector<2x8x8xf32> to vector<2x8xf32>
    %85 = vector.shape_cast %84 : vector<2x8xf32> to vector<2x8x1xf32>
    %86 = vector.broadcast %85 : vector<2x8x1xf32> to vector<2x8x8xf32>
    %87 = arith.subf %83, %86 : vector<2x8x8xf32>
    %88 = math.exp %87 : vector<2x8x8xf32>
    %cst_39 = arith.constant dense<0.000000e+00> : vector<2x8xf32>
    %89 = vector.multi_reduction <add>, %88, %cst_39 [2] : vector<2x8x8xf32> to vector<2x8xf32>
    %90 = vector.shape_cast %89 : vector<2x8xf32> to vector<2x8x1xf32>
    %91 = tpu.reciprocal %90 {approx = true} : vector<2x8x1xf32> -> vector<2x8x1xf32>
    %92 = vector.broadcast %91 : vector<2x8x1xf32> to vector<2x8x8xf32>
    %93 = arith.mulf %88, %92 : vector<2x8x8xf32>
    "tpu.trace_start"() <{level = 10 : i32, message = "bqk,bkd->bqd"}> : () -> ()
    %cst_40 = arith.constant dense<0.000000e+00> : vector<2x8x8xf32>
    %94 = tpu.matmul %93, %79, %cst_40 {dimension_numbers = #tpu.dot_dimension_numbers<[2], [1], [1], [2], [0, 0, 0, 1, 1, 2], [0], [0]>} : vector<2x8x8xf32>, vector<2x8x8xf32>, vector<2x8x8xf32> -> vector<2x8x8xf32>
    "tpu.trace_stop"() : () -> ()
    %95 = vector.shape_cast %94 : vector<2x8x8xf32> to vector<16x8xf32>
    %96 = vector.extract_strided_slice %45 {offsets = [0, 16], sizes = [16, 8], strides = [1, 1]} : vector<16x32xf32> to vector<16x8xf32>
    %97 = vector.shape_cast %96 : vector<16x8xf32> to vector<2x8x8xf32>
    %98 = vector.extract_strided_slice %50 {offsets = [0, 16], sizes = [16, 8], strides = [1, 1]} : vector<16x32xf32> to vector<16x8xf32>
    %99 = vector.shape_cast %98 : vector<16x8xf32> to vector<2x8x8xf32>
    %100 = vector.extract_strided_slice %51 {offsets = [0, 16], sizes = [16, 8], strides = [1, 1]} : vector<16x32xf32> to vector<16x8xf32>
    %101 = vector.shape_cast %100 : vector<16x8xf32> to vector<2x8x8xf32>
    "tpu.trace_start"() <{level = 10 : i32, message = "bqd,bkd->bqk"}> : () -> ()
    %cst_41 = arith.constant dense<0.000000e+00> : vector<2x8x8xf32>
    %102 = tpu.matmul %97, %99, %cst_41 {dimension_numbers = #tpu.dot_dimension_numbers<[2], [2], [1], [1], [0, 0, 0, 1, 1, 1], [0], [0]>} : vector<2x8x8xf32>, vector<2x8x8xf32>, vector<2x8x8xf32> -> vector<2x8x8xf32>
    "tpu.trace_stop"() : () -> ()
    %cst_42 = arith.constant 0.353553385 : f32
    %103 = vector.broadcast %cst_42 : f32 to vector<2x8x8xf32>
    %104 = arith.mulf %102, %103 : vector<2x8x8xf32>
    %105 = arith.addf %104, %15 : vector<2x8x8xf32>
    %cst_43 = arith.constant dense<0xFF800000> : vector<2x8xf32>
    %106 = vector.multi_reduction <maximumf>, %105, %cst_43 [2] : vector<2x8x8xf32> to vector<2x8xf32>
    %107 = vector.shape_cast %106 : vector<2x8xf32> to vector<2x8x1xf32>
    %108 = vector.broadcast %107 : vector<2x8x1xf32> to vector<2x8x8xf32>
    %109 = arith.subf %105, %108 : vector<2x8x8xf32>
    %110 = math.exp %109 : vector<2x8x8xf32>
    %cst_44 = arith.constant dense<0.000000e+00> : vector<2x8xf32>
    %111 = vector.multi_reduction <add>, %110, %cst_44 [2] : vector<2x8x8xf32> to vector<2x8xf32>
    %112 = vector.shape_cast %111 : vector<2x8xf32> to vector<2x8x1xf32>
    %113 = tpu.reciprocal %112 {approx = true} : vector<2x8x1xf32> -> vector<2x8x1xf32>
    %114 = vector.broadcast %113 : vector<2x8x1xf32> to vector<2x8x8xf32>
    %115 = arith.mulf %110, %114 : vector<2x8x8xf32>
    "tpu.trace_start"() <{level = 10 : i32, message = "bqk,bkd->bqd"}> : () -> ()
    %cst_45 = arith.constant dense<0.000000e+00> : vector<2x8x8xf32>
    %116 = tpu.matmul %115, %101, %cst_45 {dimension_numbers = #tpu.dot_dimension_numbers<[2], [1], [1], [2], [0, 0, 0, 1, 1, 2], [0], [0]>} : vector<2x8x8xf32>, vector<2x8x8xf32>, vector<2x8x8xf32> -> vector<2x8x8xf32>
    "tpu.trace_stop"() : () -> ()
    %117 = vector.shape_cast %116 : vector<2x8x8xf32> to vector<16x8xf32>
    %118 = vector.extract_strided_slice %45 {offsets = [0, 24], sizes = [16, 8], strides = [1, 1]} : vector<16x32xf32> to vector<16x8xf32>
    %119 = vector.shape_cast %118 : vector<16x8xf32> to vector<2x8x8xf32>
    %120 = vector.extract_strided_slice %50 {offsets = [0, 24], sizes = [16, 8], strides = [1, 1]} : vector<16x32xf32> to vector<16x8xf32>
    %121 = vector.shape_cast %120 : vector<16x8xf32> to vector<2x8x8xf32>
    %122 = vector.extract_strided_slice %51 {offsets = [0, 24], sizes = [16, 8], strides = [1, 1]} : vector<16x32xf32> to vector<16x8xf32>
    %123 = vector.shape_cast %122 : vector<16x8xf32> to vector<2x8x8xf32>
    "tpu.trace_start"() <{level = 10 : i32, message = "bqd,bkd->bqk"}> : () -> ()
    %cst_46 = arith.constant dense<0.000000e+00> : vector<2x8x8xf32>
    %124 = tpu.matmul %119, %121, %cst_46 {dimension_numbers = #tpu.dot_dimension_numbers<[2], [2], [1], [1], [0, 0, 0, 1, 1, 1], [0], [0]>} : vector<2x8x8xf32>, vector<2x8x8xf32>, vector<2x8x8xf32> -> vector<2x8x8xf32>
    "tpu.trace_stop"() : () -> ()
    %cst_47 = arith.constant 0.353553385 : f32
    %125 = vector.broadcast %cst_47 : f32 to vector<2x8x8xf32>
    %126 = arith.mulf %124, %125 : vector<2x8x8xf32>
    %127 = arith.addf %126, %15 : vector<2x8x8xf32>
    %cst_48 = arith.constant dense<0xFF800000> : vector<2x8xf32>
    %128 = vector.multi_reduction <maximumf>, %127, %cst_48 [2] : vector<2x8x8xf32> to vector<2x8xf32>
    %129 = vector.shape_cast %128 : vector<2x8xf32> to vector<2x8x1xf32>
    %130 = vector.broadcast %129 : vector<2x8x1xf32> to vector<2x8x8xf32>
    %131 = arith.subf %127, %130 : vector<2x8x8xf32>
    %132 = math.exp %131 : vector<2x8x8xf32>
    %cst_49 = arith.constant dense<0.000000e+00> : vector<2x8xf32>
    %133 = vector.multi_reduction <add>, %132, %cst_49 [2] : vector<2x8x8xf32> to vector<2x8xf32>
    %134 = vector.shape_cast %133 : vector<2x8xf32> to vector<2x8x1xf32>
    %135 = tpu.reciprocal %134 {approx = true} : vector<2x8x1xf32> -> vector<2x8x1xf32>
    %136 = vector.broadcast %135 : vector<2x8x1xf32> to vector<2x8x8xf32>
    %137 = arith.mulf %132, %136 : vector<2x8x8xf32>
    "tpu.trace_start"() <{level = 10 : i32, message = "bqk,bkd->bqd"}> : () -> ()
    %cst_50 = arith.constant dense<0.000000e+00> : vector<2x8x8xf32>
    %138 = tpu.matmul %137, %123, %cst_50 {dimension_numbers = #tpu.dot_dimension_numbers<[2], [1], [1], [2], [0, 0, 0, 1, 1, 2], [0], [0]>} : vector<2x8x8xf32>, vector<2x8x8xf32>, vector<2x8x8xf32> -> vector<2x8x8xf32>
    "tpu.trace_stop"() : () -> ()
    %139 = vector.shape_cast %138 : vector<2x8x8xf32> to vector<16x8xf32>
    %140 = tpu.concatenate %73, %95, %117, %139 in 1 : vector<16x8xf32>, vector<16x8xf32>, vector<16x8xf32>, vector<16x8xf32> -> vector<16x32xf32>
    %cst_51 = arith.constant dense<0.000000e+00> : vector<16x32xf32>
    %141 = tpu.matmul %140, %21, %cst_51 {dimension_numbers = #tpu.dot_dimension_numbers<[1], [0], [0], [1], [0, 0, 1, 1], [], []>} : vector<16x32xf32>, vector<32x32xf32>, vector<16x32xf32> -> vector<16x32xf32>
    %142 = arith.addf %7, %141 : vector<16x32xf32>
    %143 = arith.mulf %142, %142 : vector<16x32xf32>
    %cst_52 = arith.constant dense<0.000000e+00> : vector<16xf32>
    %144 = vector.multi_reduction <add>, %143, %cst_52 [1] : vector<16x32xf32> to vector<16xf32>
    %145 = vector.shape_cast %144 : vector<16xf32> to vector<16x1xf32>
    %cst_53 = arith.constant 3.200000e+01 : f32
    %146 = vector.broadcast %cst_53 : f32 to vector<16x1xf32>
    %147 = arith.divf %145, %146 : vector<16x1xf32>
    %cst_54 = arith.constant 9.99999997E-7 : f32
    %148 = vector.broadcast %cst_54 : f32 to vector<16x1xf32>
    %149 = arith.addf %147, %148 : vector<16x1xf32>
    %150 = math.rsqrt %149 : vector<16x1xf32>
    %151 = vector.broadcast %150 : vector<16x1xf32> to vector<16x32xf32>
    %152 = arith.mulf %142, %151 : vector<16x32xf32>
    %153 = vector.broadcast %23 : vector<1x32xf32> to vector<16x32xf32>
    %154 = arith.mulf %152, %153 : vector<16x32xf32>
    %cst_55 = arith.constant dense<0.000000e+00> : vector<16x128xf32>
    %155 = tpu.matmul %154, %25, %cst_55 {dimension_numbers = #tpu.dot_dimension_numbers<[1], [0], [0], [1], [0, 0, 1, 1], [], []>} : vector<16x32xf32>, vector<32x128xf32>, vector<16x128xf32> -> vector<16x128xf32>
    %156 = vector.extract_strided_slice %155 {offsets = [0, 0], sizes = [16, 64], strides = [1, 1]} : vector<16x128xf32> to vector<16x64xf32>
    %157 = vector.extract_strided_slice %155 {offsets = [0, 64], sizes = [16, 64], strides = [1, 1]} : vector<16x128xf32> to vector<16x64xf32>
    %cst_56 = arith.constant 0.000000e+00 : f32
    %158 = vector.broadcast %cst_56 : f32 to vector<16x64xf32>
    %159 = arith.subf %158, %156 : vector<16x64xf32>
    %160 = math.exp %159 : vector<16x64xf32>
    %cst_57 = arith.constant 1.000000e+00 : f32
    %161 = vector.broadcast %cst_57 : f32 to vector<16x64xf32>
    %162 = arith.addf %161, %160 : vector<16x64xf32>
    %cst_58 = arith.constant 1.000000e+00 : f32
    %163 = vector.broadcast %cst_58 : f32 to vector<16x64xf32>
    %164 = arith.divf %163, %162 : vector<16x64xf32>
    %165 = arith.mulf %156, %164 : vector<16x64xf32>
    %166 = arith.mulf %165, %157 : vector<16x64xf32>
    %cst_59 = arith.constant dense<0.000000e+00> : vector<16x32xf32>
    %167 = tpu.matmul %166, %27, %cst_59 {dimension_numbers = #tpu.dot_dimension_numbers<[1], [0], [0], [1], [0, 0, 1, 1], [], []>} : vector<16x64xf32>, vector<64x32xf32>, vector<16x32xf32> -> vector<16x32xf32>
    %168 = arith.addf %142, %167 : vector<16x32xf32>
    %c1 = arith.constant 1 : index
    %c0_60 = arith.constant 0 : index
    %c0_61 = arith.constant 0 : index
    %169 = vector.load %arg4[%c1, %c0_60, %c0_61] : memref<7x1x32xf32, #tpu.memory_space<vmem>>, vector<1x1x32xf32>
    %170 = vector.shape_cast %169 : vector<1x1x32xf32> to vector<1x32xf32>
    %c1_62 = arith.constant 1 : index
    %c0_63 = arith.constant 0 : index
    %c0_64 = arith.constant 0 : index
    %171 = vector.load %arg5[%c1_62, %c0_63, %c0_64] : memref<7x32x160xf32, #tpu.memory_space<vmem>>, vector<1x32x160xf32>
    %172 = vector.shape_cast %171 : vector<1x32x160xf32> to vector<32x160xf32>
    %c1_65 = arith.constant 1 : index
    %c0_66 = arith.constant 0 : index
    %c0_67 = arith.constant 0 : index
    %173 = vector.load %arg6[%c1_65, %c0_66, %c0_67] : memref<7x32x32xf32, #tpu.memory_space<vmem>>, vector<1x32x32xf32>
    %174 = vector.shape_cast %173 : vector<1x32x32xf32> to vector<32x32xf32>
    %c1_68 = arith.constant 1 : index
    %c0_69 = arith.constant 0 : index
    %c0_70 = arith.constant 0 : index
    %175 = vector.load %arg7[%c1_68, %c0_69, %c0_70] : memref<7x1x32xf32, #tpu.memory_space<vmem>>, vector<1x1x32xf32>
    %176 = vector.shape_cast %175 : vector<1x1x32xf32> to vector<1x32xf32>
    %c1_71 = arith.constant 1 : index
    %c0_72 = arith.constant 0 : index
    %c0_73 = arith.constant 0 : index
    %177 = vector.load %arg8[%c1_71, %c0_72, %c0_73] : memref<7x32x128xf32, #tpu.memory_space<vmem>>, vector<1x32x128xf32>
    %178 = vector.shape_cast %177 : vector<1x32x128xf32> to vector<32x128xf32>
    %c1_74 = arith.constant 1 : index
    %c0_75 = arith.constant 0 : index
    %c0_76 = arith.constant 0 : index
    %179 = vector.load %arg9[%c1_74, %c0_75, %c0_76] : memref<7x64x32xf32, #tpu.memory_space<vmem>>, vector<1x64x32xf32>
    %180 = vector.shape_cast %179 : vector<1x64x32xf32> to vector<64x32xf32>
    %181 = arith.mulf %168, %168 : vector<16x32xf32>
    %cst_77 = arith.constant dense<0.000000e+00> : vector<16xf32>
    %182 = vector.multi_reduction <add>, %181, %cst_77 [1] : vector<16x32xf32> to vector<16xf32>
    %183 = vector.shape_cast %182 : vector<16xf32> to vector<16x1xf32>
    %cst_78 = arith.constant 3.200000e+01 : f32
    %184 = vector.broadcast %cst_78 : f32 to vector<16x1xf32>
    %185 = arith.divf %183, %184 : vector<16x1xf32>
    %cst_79 = arith.constant 9.99999997E-7 : f32
    %186 = vector.broadcast %cst_79 : f32 to vector<16x1xf32>
    %187 = arith.addf %185, %186 : vector<16x1xf32>
    %188 = math.rsqrt %187 : vector<16x1xf32>
    %189 = vector.broadcast %188 : vector<16x1xf32> to vector<16x32xf32>
    %190 = arith.mulf %168, %189 : vector<16x32xf32>
    %191 = vector.broadcast %170 : vector<1x32xf32> to vector<16x32xf32>
    %192 = arith.mulf %190, %191 : vector<16x32xf32>
    %cst_80 = arith.constant dense<0.000000e+00> : vector<16x160xf32>
    %193 = tpu.matmul %192, %172, %cst_80 {dimension_numbers = #tpu.dot_dimension_numbers<[1], [0], [0], [1], [0, 0, 1, 1], [], []>} : vector<16x32xf32>, vector<32x160xf32>, vector<16x160xf32> -> vector<16x160xf32>
    %194 = vector.extract_strided_slice %193 {offsets = [0, 0], sizes = [16, 32], strides = [1, 1]} : vector<16x160xf32> to vector<16x32xf32>
    %195 = arith.mulf %194, %8 : vector<16x32xf32>
    %196 = vector.extract_strided_slice %193 {offsets = [0, 32], sizes = [16, 32], strides = [1, 1]} : vector<16x160xf32> to vector<16x32xf32>
    %197 = arith.mulf %196, %9 : vector<16x32xf32>
    %198 = arith.addf %195, %197 : vector<16x32xf32>
    %199 = vector.extract_strided_slice %193 {offsets = [0, 64], sizes = [16, 32], strides = [1, 1]} : vector<16x160xf32> to vector<16x32xf32>
    %200 = arith.mulf %199, %8 : vector<16x32xf32>
    %201 = vector.extract_strided_slice %193 {offsets = [0, 96], sizes = [16, 32], strides = [1, 1]} : vector<16x160xf32> to vector<16x32xf32>
    %202 = arith.mulf %201, %9 : vector<16x32xf32>
    %203 = arith.addf %200, %202 : vector<16x32xf32>
    %204 = vector.extract_strided_slice %193 {offsets = [0, 128], sizes = [16, 32], strides = [1, 1]} : vector<16x160xf32> to vector<16x32xf32>
    %205 = vector.extract_strided_slice %198 {offsets = [0, 0], sizes = [16, 8], strides = [1, 1]} : vector<16x32xf32> to vector<16x8xf32>
    %206 = vector.shape_cast %205 : vector<16x8xf32> to vector<2x8x8xf32>
    %207 = vector.extract_strided_slice %203 {offsets = [0, 0], sizes = [16, 8], strides = [1, 1]} : vector<16x32xf32> to vector<16x8xf32>
    %208 = vector.shape_cast %207 : vector<16x8xf32> to vector<2x8x8xf32>
    %209 = vector.extract_strided_slice %204 {offsets = [0, 0], sizes = [16, 8], strides = [1, 1]} : vector<16x32xf32> to vector<16x8xf32>
    %210 = vector.shape_cast %209 : vector<16x8xf32> to vector<2x8x8xf32>
    "tpu.trace_start"() <{level = 10 : i32, message = "bqd,bkd->bqk"}> : () -> ()
    %cst_81 = arith.constant dense<0.000000e+00> : vector<2x8x8xf32>
    %211 = tpu.matmul %206, %208, %cst_81 {dimension_numbers = #tpu.dot_dimension_numbers<[2], [2], [1], [1], [0, 0, 0, 1, 1, 1], [0], [0]>} : vector<2x8x8xf32>, vector<2x8x8xf32>, vector<2x8x8xf32> -> vector<2x8x8xf32>
    "tpu.trace_stop"() : () -> ()
    %cst_82 = arith.constant 0.353553385 : f32
    %212 = vector.broadcast %cst_82 : f32 to vector<2x8x8xf32>
    %213 = arith.mulf %211, %212 : vector<2x8x8xf32>
    %214 = arith.addf %213, %15 : vector<2x8x8xf32>
    %cst_83 = arith.constant dense<0xFF800000> : vector<2x8xf32>
    %215 = vector.multi_reduction <maximumf>, %214, %cst_83 [2] : vector<2x8x8xf32> to vector<2x8xf32>
    %216 = vector.shape_cast %215 : vector<2x8xf32> to vector<2x8x1xf32>
    %217 = vector.broadcast %216 : vector<2x8x1xf32> to vector<2x8x8xf32>
    %218 = arith.subf %214, %217 : vector<2x8x8xf32>
    %219 = math.exp %218 : vector<2x8x8xf32>
    %cst_84 = arith.constant dense<0.000000e+00> : vector<2x8xf32>
    %220 = vector.multi_reduction <add>, %219, %cst_84 [2] : vector<2x8x8xf32> to vector<2x8xf32>
    %221 = vector.shape_cast %220 : vector<2x8xf32> to vector<2x8x1xf32>
    %222 = tpu.reciprocal %221 {approx = true} : vector<2x8x1xf32> -> vector<2x8x1xf32>
    %223 = vector.broadcast %222 : vector<2x8x1xf32> to vector<2x8x8xf32>
    %224 = arith.mulf %219, %223 : vector<2x8x8xf32>
    "tpu.trace_start"() <{level = 10 : i32, message = "bqk,bkd->bqd"}> : () -> ()
    %cst_85 = arith.constant dense<0.000000e+00> : vector<2x8x8xf32>
    %225 = tpu.matmul %224, %210, %cst_85 {dimension_numbers = #tpu.dot_dimension_numbers<[2], [1], [1], [2], [0, 0, 0, 1, 1, 2], [0], [0]>} : vector<2x8x8xf32>, vector<2x8x8xf32>, vector<2x8x8xf32> -> vector<2x8x8xf32>
    "tpu.trace_stop"() : () -> ()
    %226 = vector.shape_cast %225 : vector<2x8x8xf32> to vector<16x8xf32>
    %227 = vector.extract_strided_slice %198 {offsets = [0, 8], sizes = [16, 8], strides = [1, 1]} : vector<16x32xf32> to vector<16x8xf32>
    %228 = vector.shape_cast %227 : vector<16x8xf32> to vector<2x8x8xf32>
    %229 = vector.extract_strided_slice %203 {offsets = [0, 8], sizes = [16, 8], strides = [1, 1]} : vector<16x32xf32> to vector<16x8xf32>
    %230 = vector.shape_cast %229 : vector<16x8xf32> to vector<2x8x8xf32>
    %231 = vector.extract_strided_slice %204 {offsets = [0, 8], sizes = [16, 8], strides = [1, 1]} : vector<16x32xf32> to vector<16x8xf32>
    %232 = vector.shape_cast %231 : vector<16x8xf32> to vector<2x8x8xf32>
    "tpu.trace_start"() <{level = 10 : i32, message = "bqd,bkd->bqk"}> : () -> ()
    %cst_86 = arith.constant dense<0.000000e+00> : vector<2x8x8xf32>
    %233 = tpu.matmul %228, %230, %cst_86 {dimension_numbers = #tpu.dot_dimension_numbers<[2], [2], [1], [1], [0, 0, 0, 1, 1, 1], [0], [0]>} : vector<2x8x8xf32>, vector<2x8x8xf32>, vector<2x8x8xf32> -> vector<2x8x8xf32>
    "tpu.trace_stop"() : () -> ()
    %cst_87 = arith.constant 0.353553385 : f32
    %234 = vector.broadcast %cst_87 : f32 to vector<2x8x8xf32>
    %235 = arith.mulf %233, %234 : vector<2x8x8xf32>
    %236 = arith.addf %235, %15 : vector<2x8x8xf32>
    %cst_88 = arith.constant dense<0xFF800000> : vector<2x8xf32>
    %237 = vector.multi_reduction <maximumf>, %236, %cst_88 [2] : vector<2x8x8xf32> to vector<2x8xf32>
    %238 = vector.shape_cast %237 : vector<2x8xf32> to vector<2x8x1xf32>
    %239 = vector.broadcast %238 : vector<2x8x1xf32> to vector<2x8x8xf32>
    %240 = arith.subf %236, %239 : vector<2x8x8xf32>
    %241 = math.exp %240 : vector<2x8x8xf32>
    %cst_89 = arith.constant dense<0.000000e+00> : vector<2x8xf32>
    %242 = vector.multi_reduction <add>, %241, %cst_89 [2] : vector<2x8x8xf32> to vector<2x8xf32>
    %243 = vector.shape_cast %242 : vector<2x8xf32> to vector<2x8x1xf32>
    %244 = tpu.reciprocal %243 {approx = true} : vector<2x8x1xf32> -> vector<2x8x1xf32>
    %245 = vector.broadcast %244 : vector<2x8x1xf32> to vector<2x8x8xf32>
    %246 = arith.mulf %241, %245 : vector<2x8x8xf32>
    "tpu.trace_start"() <{level = 10 : i32, message = "bqk,bkd->bqd"}> : () -> ()
    %cst_90 = arith.constant dense<0.000000e+00> : vector<2x8x8xf32>
    %247 = tpu.matmul %246, %232, %cst_90 {dimension_numbers = #tpu.dot_dimension_numbers<[2], [1], [1], [2], [0, 0, 0, 1, 1, 2], [0], [0]>} : vector<2x8x8xf32>, vector<2x8x8xf32>, vector<2x8x8xf32> -> vector<2x8x8xf32>
    "tpu.trace_stop"() : () -> ()
    %248 = vector.shape_cast %247 : vector<2x8x8xf32> to vector<16x8xf32>
    %249 = vector.extract_strided_slice %198 {offsets = [0, 16], sizes = [16, 8], strides = [1, 1]} : vector<16x32xf32> to vector<16x8xf32>
    %250 = vector.shape_cast %249 : vector<16x8xf32> to vector<2x8x8xf32>
    %251 = vector.extract_strided_slice %203 {offsets = [0, 16], sizes = [16, 8], strides = [1, 1]} : vector<16x32xf32> to vector<16x8xf32>
    %252 = vector.shape_cast %251 : vector<16x8xf32> to vector<2x8x8xf32>
    %253 = vector.extract_strided_slice %204 {offsets = [0, 16], sizes = [16, 8], strides = [1, 1]} : vector<16x32xf32> to vector<16x8xf32>
    %254 = vector.shape_cast %253 : vector<16x8xf32> to vector<2x8x8xf32>
    "tpu.trace_start"() <{level = 10 : i32, message = "bqd,bkd->bqk"}> : () -> ()
    %cst_91 = arith.constant dense<0.000000e+00> : vector<2x8x8xf32>
    %255 = tpu.matmul %250, %252, %cst_91 {dimension_numbers = #tpu.dot_dimension_numbers<[2], [2], [1], [1], [0, 0, 0, 1, 1, 1], [0], [0]>} : vector<2x8x8xf32>, vector<2x8x8xf32>, vector<2x8x8xf32> -> vector<2x8x8xf32>
    "tpu.trace_stop"() : () -> ()
    %cst_92 = arith.constant 0.353553385 : f32
    %256 = vector.broadcast %cst_92 : f32 to vector<2x8x8xf32>
    %257 = arith.mulf %255, %256 : vector<2x8x8xf32>
    %258 = arith.addf %257, %15 : vector<2x8x8xf32>
    %cst_93 = arith.constant dense<0xFF800000> : vector<2x8xf32>
    %259 = vector.multi_reduction <maximumf>, %258, %cst_93 [2] : vector<2x8x8xf32> to vector<2x8xf32>
    %260 = vector.shape_cast %259 : vector<2x8xf32> to vector<2x8x1xf32>
    %261 = vector.broadcast %260 : vector<2x8x1xf32> to vector<2x8x8xf32>
    %262 = arith.subf %258, %261 : vector<2x8x8xf32>
    %263 = math.exp %262 : vector<2x8x8xf32>
    %cst_94 = arith.constant dense<0.000000e+00> : vector<2x8xf32>
    %264 = vector.multi_reduction <add>, %263, %cst_94 [2] : vector<2x8x8xf32> to vector<2x8xf32>
    %265 = vector.shape_cast %264 : vector<2x8xf32> to vector<2x8x1xf32>
    %266 = tpu.reciprocal %265 {approx = true} : vector<2x8x1xf32> -> vector<2x8x1xf32>
    %267 = vector.broadcast %266 : vector<2x8x1xf32> to vector<2x8x8xf32>
    %268 = arith.mulf %263, %267 : vector<2x8x8xf32>
    "tpu.trace_start"() <{level = 10 : i32, message = "bqk,bkd->bqd"}> : () -> ()
    %cst_95 = arith.constant dense<0.000000e+00> : vector<2x8x8xf32>
    %269 = tpu.matmul %268, %254, %cst_95 {dimension_numbers = #tpu.dot_dimension_numbers<[2], [1], [1], [2], [0, 0, 0, 1, 1, 2], [0], [0]>} : vector<2x8x8xf32>, vector<2x8x8xf32>, vector<2x8x8xf32> -> vector<2x8x8xf32>
    "tpu.trace_stop"() : () -> ()
    %270 = vector.shape_cast %269 : vector<2x8x8xf32> to vector<16x8xf32>
    %271 = vector.extract_strided_slice %198 {offsets = [0, 24], sizes = [16, 8], strides = [1, 1]} : vector<16x32xf32> to vector<16x8xf32>
    %272 = vector.shape_cast %271 : vector<16x8xf32> to vector<2x8x8xf32>
    %273 = vector.extract_strided_slice %203 {offsets = [0, 24], sizes = [16, 8], strides = [1, 1]} : vector<16x32xf32> to vector<16x8xf32>
    %274 = vector.shape_cast %273 : vector<16x8xf32> to vector<2x8x8xf32>
    %275 = vector.extract_strided_slice %204 {offsets = [0, 24], sizes = [16, 8], strides = [1, 1]} : vector<16x32xf32> to vector<16x8xf32>
    %276 = vector.shape_cast %275 : vector<16x8xf32> to vector<2x8x8xf32>
    "tpu.trace_start"() <{level = 10 : i32, message = "bqd,bkd->bqk"}> : () -> ()
    %cst_96 = arith.constant dense<0.000000e+00> : vector<2x8x8xf32>
    %277 = tpu.matmul %272, %274, %cst_96 {dimension_numbers = #tpu.dot_dimension_numbers<[2], [2], [1], [1], [0, 0, 0, 1, 1, 1], [0], [0]>} : vector<2x8x8xf32>, vector<2x8x8xf32>, vector<2x8x8xf32> -> vector<2x8x8xf32>
    "tpu.trace_stop"() : () -> ()
    %cst_97 = arith.constant 0.353553385 : f32
    %278 = vector.broadcast %cst_97 : f32 to vector<2x8x8xf32>
    %279 = arith.mulf %277, %278 : vector<2x8x8xf32>
    %280 = arith.addf %279, %15 : vector<2x8x8xf32>
    %cst_98 = arith.constant dense<0xFF800000> : vector<2x8xf32>
    %281 = vector.multi_reduction <maximumf>, %280, %cst_98 [2] : vector<2x8x8xf32> to vector<2x8xf32>
    %282 = vector.shape_cast %281 : vector<2x8xf32> to vector<2x8x1xf32>
    %283 = vector.broadcast %282 : vector<2x8x1xf32> to vector<2x8x8xf32>
    %284 = arith.subf %280, %283 : vector<2x8x8xf32>
    %285 = math.exp %284 : vector<2x8x8xf32>
    %cst_99 = arith.constant dense<0.000000e+00> : vector<2x8xf32>
    %286 = vector.multi_reduction <add>, %285, %cst_99 [2] : vector<2x8x8xf32> to vector<2x8xf32>
    %287 = vector.shape_cast %286 : vector<2x8xf32> to vector<2x8x1xf32>
    %288 = tpu.reciprocal %287 {approx = true} : vector<2x8x1xf32> -> vector<2x8x1xf32>
    %289 = vector.broadcast %288 : vector<2x8x1xf32> to vector<2x8x8xf32>
    %290 = arith.mulf %285, %289 : vector<2x8x8xf32>
    "tpu.trace_start"() <{level = 10 : i32, message = "bqk,bkd->bqd"}> : () -> ()
    %cst_100 = arith.constant dense<0.000000e+00> : vector<2x8x8xf32>
    %291 = tpu.matmul %290, %276, %cst_100 {dimension_numbers = #tpu.dot_dimension_numbers<[2], [1], [1], [2], [0, 0, 0, 1, 1, 2], [0], [0]>} : vector<2x8x8xf32>, vector<2x8x8xf32>, vector<2x8x8xf32> -> vector<2x8x8xf32>
    "tpu.trace_stop"() : () -> ()
    %292 = vector.shape_cast %291 : vector<2x8x8xf32> to vector<16x8xf32>
    %293 = tpu.concatenate %226, %248, %270, %292 in 1 : vector<16x8xf32>, vector<16x8xf32>, vector<16x8xf32>, vector<16x8xf32> -> vector<16x32xf32>
    %cst_101 = arith.constant dense<0.000000e+00> : vector<16x32xf32>
    %294 = tpu.matmul %293, %174, %cst_101 {dimension_numbers = #tpu.dot_dimension_numbers<[1], [0], [0], [1], [0, 0, 1, 1], [], []>} : vector<16x32xf32>, vector<32x32xf32>, vector<16x32xf32> -> vector<16x32xf32>
    %295 = arith.addf %168, %294 : vector<16x32xf32>
    %296 = arith.mulf %295, %295 : vector<16x32xf32>
    %cst_102 = arith.constant dense<0.000000e+00> : vector<16xf32>
    %297 = vector.multi_reduction <add>, %296, %cst_102 [1] : vector<16x32xf32> to vector<16xf32>
    %298 = vector.shape_cast %297 : vector<16xf32> to vector<16x1xf32>
    %cst_103 = arith.constant 3.200000e+01 : f32
    %299 = vector.broadcast %cst_103 : f32 to vector<16x1xf32>
    %300 = arith.divf %298, %299 : vector<16x1xf32>
    %cst_104 = arith.constant 9.99999997E-7 : f32
    %301 = vector.broadcast %cst_104 : f32 to vector<16x1xf32>
    %302 = arith.addf %300, %301 : vector<16x1xf32>
    %303 = math.rsqrt %302 : vector<16x1xf32>
    %304 = vector.broadcast %303 : vector<16x1xf32> to vector<16x32xf32>
    %305 = arith.mulf %295, %304 : vector<16x32xf32>
    %306 = vector.broadcast %176 : vector<1x32xf32> to vector<16x32xf32>
    %307 = arith.mulf %305, %306 : vector<16x32xf32>
    %cst_105 = arith.constant dense<0.000000e+00> : vector<16x128xf32>
    %308 = tpu.matmul %307, %178, %cst_105 {dimension_numbers = #tpu.dot_dimension_numbers<[1], [0], [0], [1], [0, 0, 1, 1], [], []>} : vector<16x32xf32>, vector<32x128xf32>, vector<16x128xf32> -> vector<16x128xf32>
    %309 = vector.extract_strided_slice %308 {offsets = [0, 0], sizes = [16, 64], strides = [1, 1]} : vector<16x128xf32> to vector<16x64xf32>
    %310 = vector.extract_strided_slice %308 {offsets = [0, 64], sizes = [16, 64], strides = [1, 1]} : vector<16x128xf32> to vector<16x64xf32>
    %cst_106 = arith.constant 0.000000e+00 : f32
    %311 = vector.broadcast %cst_106 : f32 to vector<16x64xf32>
    %312 = arith.subf %311, %309 : vector<16x64xf32>
    %313 = math.exp %312 : vector<16x64xf32>
    %cst_107 = arith.constant 1.000000e+00 : f32
    %314 = vector.broadcast %cst_107 : f32 to vector<16x64xf32>
    %315 = arith.addf %314, %313 : vector<16x64xf32>
    %cst_108 = arith.constant 1.000000e+00 : f32
    %316 = vector.broadcast %cst_108 : f32 to vector<16x64xf32>
    %317 = arith.divf %316, %315 : vector<16x64xf32>
    %318 = arith.mulf %309, %317 : vector<16x64xf32>
    %319 = arith.mulf %318, %310 : vector<16x64xf32>
    %cst_109 = arith.constant dense<0.000000e+00> : vector<16x32xf32>
    %320 = tpu.matmul %319, %180, %cst_109 {dimension_numbers = #tpu.dot_dimension_numbers<[1], [0], [0], [1], [0, 0, 1, 1], [], []>} : vector<16x64xf32>, vector<64x32xf32>, vector<16x32xf32> -> vector<16x32xf32>
    %321 = arith.addf %295, %320 : vector<16x32xf32>
    %c2 = arith.constant 2 : index
    %c0_110 = arith.constant 0 : index
    %c0_111 = arith.constant 0 : index
    %322 = vector.load %arg4[%c2, %c0_110, %c0_111] : memref<7x1x32xf32, #tpu.memory_space<vmem>>, vector<1x1x32xf32>
    %323 = vector.shape_cast %322 : vector<1x1x32xf32> to vector<1x32xf32>
    %c2_112 = arith.constant 2 : index
    %c0_113 = arith.constant 0 : index
    %c0_114 = arith.constant 0 : index
    %324 = vector.load %arg5[%c2_112, %c0_113, %c0_114] : memref<7x32x160xf32, #tpu.memory_space<vmem>>, vector<1x32x160xf32>
    %325 = vector.shape_cast %324 : vector<1x32x160xf32> to vector<32x160xf32>
    %c2_115 = arith.constant 2 : index
    %c0_116 = arith.constant 0 : index
    %c0_117 = arith.constant 0 : index
    %326 = vector.load %arg6[%c2_115, %c0_116, %c0_117] : memref<7x32x32xf32, #tpu.memory_space<vmem>>, vector<1x32x32xf32>
    %327 = vector.shape_cast %326 : vector<1x32x32xf32> to vector<32x32xf32>
    %c2_118 = arith.constant 2 : index
    %c0_119 = arith.constant 0 : index
    %c0_120 = arith.constant 0 : index
    %328 = vector.load %arg7[%c2_118, %c0_119, %c0_120] : memref<7x1x32xf32, #tpu.memory_space<vmem>>, vector<1x1x32xf32>
    %329 = vector.shape_cast %328 : vector<1x1x32xf32> to vector<1x32xf32>
    %c2_121 = arith.constant 2 : index
    %c0_122 = arith.constant 0 : index
    %c0_123 = arith.constant 0 : index
    %330 = vector.load %arg8[%c2_121, %c0_122, %c0_123] : memref<7x32x128xf32, #tpu.memory_space<vmem>>, vector<1x32x128xf32>
    %331 = vector.shape_cast %330 : vector<1x32x128xf32> to vector<32x128xf32>
    %c2_124 = arith.constant 2 : index
    %c0_125 = arith.constant 0 : index
    %c0_126 = arith.constant 0 : index
    %332 = vector.load %arg9[%c2_124, %c0_125, %c0_126] : memref<7x64x32xf32, #tpu.memory_space<vmem>>, vector<1x64x32xf32>
    %333 = vector.shape_cast %332 : vector<1x64x32xf32> to vector<64x32xf32>
    %334 = arith.mulf %321, %321 : vector<16x32xf32>
    %cst_127 = arith.constant dense<0.000000e+00> : vector<16xf32>
    %335 = vector.multi_reduction <add>, %334, %cst_127 [1] : vector<16x32xf32> to vector<16xf32>
    %336 = vector.shape_cast %335 : vector<16xf32> to vector<16x1xf32>
    %cst_128 = arith.constant 3.200000e+01 : f32
    %337 = vector.broadcast %cst_128 : f32 to vector<16x1xf32>
    %338 = arith.divf %336, %337 : vector<16x1xf32>
    %cst_129 = arith.constant 9.99999997E-7 : f32
    %339 = vector.broadcast %cst_129 : f32 to vector<16x1xf32>
    %340 = arith.addf %338, %339 : vector<16x1xf32>
    %341 = math.rsqrt %340 : vector<16x1xf32>
    %342 = vector.broadcast %341 : vector<16x1xf32> to vector<16x32xf32>
    %343 = arith.mulf %321, %342 : vector<16x32xf32>
    %344 = vector.broadcast %323 : vector<1x32xf32> to vector<16x32xf32>
    %345 = arith.mulf %343, %344 : vector<16x32xf32>
    %cst_130 = arith.constant dense<0.000000e+00> : vector<16x160xf32>
    %346 = tpu.matmul %345, %325, %cst_130 {dimension_numbers = #tpu.dot_dimension_numbers<[1], [0], [0], [1], [0, 0, 1, 1], [], []>} : vector<16x32xf32>, vector<32x160xf32>, vector<16x160xf32> -> vector<16x160xf32>
    %347 = vector.extract_strided_slice %346 {offsets = [0, 0], sizes = [16, 32], strides = [1, 1]} : vector<16x160xf32> to vector<16x32xf32>
    %348 = arith.mulf %347, %8 : vector<16x32xf32>
    %349 = vector.extract_strided_slice %346 {offsets = [0, 32], sizes = [16, 32], strides = [1, 1]} : vector<16x160xf32> to vector<16x32xf32>
    %350 = arith.mulf %349, %9 : vector<16x32xf32>
    %351 = arith.addf %348, %350 : vector<16x32xf32>
    %352 = vector.extract_strided_slice %346 {offsets = [0, 64], sizes = [16, 32], strides = [1, 1]} : vector<16x160xf32> to vector<16x32xf32>
    %353 = arith.mulf %352, %8 : vector<16x32xf32>
    %354 = vector.extract_strided_slice %346 {offsets = [0, 96], sizes = [16, 32], strides = [1, 1]} : vector<16x160xf32> to vector<16x32xf32>
    %355 = arith.mulf %354, %9 : vector<16x32xf32>
    %356 = arith.addf %353, %355 : vector<16x32xf32>
    %357 = vector.extract_strided_slice %346 {offsets = [0, 128], sizes = [16, 32], strides = [1, 1]} : vector<16x160xf32> to vector<16x32xf32>
    %358 = vector.extract_strided_slice %351 {offsets = [0, 0], sizes = [16, 8], strides = [1, 1]} : vector<16x32xf32> to vector<16x8xf32>
    %359 = vector.shape_cast %358 : vector<16x8xf32> to vector<2x8x8xf32>
    %360 = vector.extract_strided_slice %356 {offsets = [0, 0], sizes = [16, 8], strides = [1, 1]} : vector<16x32xf32> to vector<16x8xf32>
    %361 = vector.shape_cast %360 : vector<16x8xf32> to vector<2x8x8xf32>
    %362 = vector.extract_strided_slice %357 {offsets = [0, 0], sizes = [16, 8], strides = [1, 1]} : vector<16x32xf32> to vector<16x8xf32>
    %363 = vector.shape_cast %362 : vector<16x8xf32> to vector<2x8x8xf32>
    "tpu.trace_start"() <{level = 10 : i32, message = "bqd,bkd->bqk"}> : () -> ()
    %cst_131 = arith.constant dense<0.000000e+00> : vector<2x8x8xf32>
    %364 = tpu.matmul %359, %361, %cst_131 {dimension_numbers = #tpu.dot_dimension_numbers<[2], [2], [1], [1], [0, 0, 0, 1, 1, 1], [0], [0]>} : vector<2x8x8xf32>, vector<2x8x8xf32>, vector<2x8x8xf32> -> vector<2x8x8xf32>
    "tpu.trace_stop"() : () -> ()
    %cst_132 = arith.constant 0.353553385 : f32
    %365 = vector.broadcast %cst_132 : f32 to vector<2x8x8xf32>
    %366 = arith.mulf %364, %365 : vector<2x8x8xf32>
    %367 = arith.addf %366, %15 : vector<2x8x8xf32>
    %cst_133 = arith.constant dense<0xFF800000> : vector<2x8xf32>
    %368 = vector.multi_reduction <maximumf>, %367, %cst_133 [2] : vector<2x8x8xf32> to vector<2x8xf32>
    %369 = vector.shape_cast %368 : vector<2x8xf32> to vector<2x8x1xf32>
    %370 = vector.broadcast %369 : vector<2x8x1xf32> to vector<2x8x8xf32>
    %371 = arith.subf %367, %370 : vector<2x8x8xf32>
    %372 = math.exp %371 : vector<2x8x8xf32>
    %cst_134 = arith.constant dense<0.000000e+00> : vector<2x8xf32>
    %373 = vector.multi_reduction <add>, %372, %cst_134 [2] : vector<2x8x8xf32> to vector<2x8xf32>
    %374 = vector.shape_cast %373 : vector<2x8xf32> to vector<2x8x1xf32>
    %375 = tpu.reciprocal %374 {approx = true} : vector<2x8x1xf32> -> vector<2x8x1xf32>
    %376 = vector.broadcast %375 : vector<2x8x1xf32> to vector<2x8x8xf32>
    %377 = arith.mulf %372, %376 : vector<2x8x8xf32>
    "tpu.trace_start"() <{level = 10 : i32, message = "bqk,bkd->bqd"}> : () -> ()
    %cst_135 = arith.constant dense<0.000000e+00> : vector<2x8x8xf32>
    %378 = tpu.matmul %377, %363, %cst_135 {dimension_numbers = #tpu.dot_dimension_numbers<[2], [1], [1], [2], [0, 0, 0, 1, 1, 2], [0], [0]>} : vector<2x8x8xf32>, vector<2x8x8xf32>, vector<2x8x8xf32> -> vector<2x8x8xf32>
    "tpu.trace_stop"() : () -> ()
    %379 = vector.shape_cast %378 : vector<2x8x8xf32> to vector<16x8xf32>
    %380 = vector.extract_strided_slice %351 {offsets = [0, 8], sizes = [16, 8], strides = [1, 1]} : vector<16x32xf32> to vector<16x8xf32>
    %381 = vector.shape_cast %380 : vector<16x8xf32> to vector<2x8x8xf32>
    %382 = vector.extract_strided_slice %356 {offsets = [0, 8], sizes = [16, 8], strides = [1, 1]} : vector<16x32xf32> to vector<16x8xf32>
    %383 = vector.shape_cast %382 : vector<16x8xf32> to vector<2x8x8xf32>
    %384 = vector.extract_strided_slice %357 {offsets = [0, 8], sizes = [16, 8], strides = [1, 1]} : vector<16x32xf32> to vector<16x8xf32>
    %385 = vector.shape_cast %384 : vector<16x8xf32> to vector<2x8x8xf32>
    "tpu.trace_start"() <{level = 10 : i32, message = "bqd,bkd->bqk"}> : () -> ()
    %cst_136 = arith.constant dense<0.000000e+00> : vector<2x8x8xf32>
    %386 = tpu.matmul %381, %383, %cst_136 {dimension_numbers = #tpu.dot_dimension_numbers<[2], [2], [1], [1], [0, 0, 0, 1, 1, 1], [0], [0]>} : vector<2x8x8xf32>, vector<2x8x8xf32>, vector<2x8x8xf32> -> vector<2x8x8xf32>
    "tpu.trace_stop"() : () -> ()
    %cst_137 = arith.constant 0.353553385 : f32
    %387 = vector.broadcast %cst_137 : f32 to vector<2x8x8xf32>
    %388 = arith.mulf %386, %387 : vector<2x8x8xf32>
    %389 = arith.addf %388, %15 : vector<2x8x8xf32>
    %cst_138 = arith.constant dense<0xFF800000> : vector<2x8xf32>
    %390 = vector.multi_reduction <maximumf>, %389, %cst_138 [2] : vector<2x8x8xf32> to vector<2x8xf32>
    %391 = vector.shape_cast %390 : vector<2x8xf32> to vector<2x8x1xf32>
    %392 = vector.broadcast %391 : vector<2x8x1xf32> to vector<2x8x8xf32>
    %393 = arith.subf %389, %392 : vector<2x8x8xf32>
    %394 = math.exp %393 : vector<2x8x8xf32>
    %cst_139 = arith.constant dense<0.000000e+00> : vector<2x8xf32>
    %395 = vector.multi_reduction <add>, %394, %cst_139 [2] : vector<2x8x8xf32> to vector<2x8xf32>
    %396 = vector.shape_cast %395 : vector<2x8xf32> to vector<2x8x1xf32>
    %397 = tpu.reciprocal %396 {approx = true} : vector<2x8x1xf32> -> vector<2x8x1xf32>
    %398 = vector.broadcast %397 : vector<2x8x1xf32> to vector<2x8x8xf32>
    %399 = arith.mulf %394, %398 : vector<2x8x8xf32>
    "tpu.trace_start"() <{level = 10 : i32, message = "bqk,bkd->bqd"}> : () -> ()
    %cst_140 = arith.constant dense<0.000000e+00> : vector<2x8x8xf32>
    %400 = tpu.matmul %399, %385, %cst_140 {dimension_numbers = #tpu.dot_dimension_numbers<[2], [1], [1], [2], [0, 0, 0, 1, 1, 2], [0], [0]>} : vector<2x8x8xf32>, vector<2x8x8xf32>, vector<2x8x8xf32> -> vector<2x8x8xf32>
    "tpu.trace_stop"() : () -> ()
    %401 = vector.shape_cast %400 : vector<2x8x8xf32> to vector<16x8xf32>
    %402 = vector.extract_strided_slice %351 {offsets = [0, 16], sizes = [16, 8], strides = [1, 1]} : vector<16x32xf32> to vector<16x8xf32>
    %403 = vector.shape_cast %402 : vector<16x8xf32> to vector<2x8x8xf32>
    %404 = vector.extract_strided_slice %356 {offsets = [0, 16], sizes = [16, 8], strides = [1, 1]} : vector<16x32xf32> to vector<16x8xf32>
    %405 = vector.shape_cast %404 : vector<16x8xf32> to vector<2x8x8xf32>
    %406 = vector.extract_strided_slice %357 {offsets = [0, 16], sizes = [16, 8], strides = [1, 1]} : vector<16x32xf32> to vector<16x8xf32>
    %407 = vector.shape_cast %406 : vector<16x8xf32> to vector<2x8x8xf32>
    "tpu.trace_start"() <{level = 10 : i32, message = "bqd,bkd->bqk"}> : () -> ()
    %cst_141 = arith.constant dense<0.000000e+00> : vector<2x8x8xf32>
    %408 = tpu.matmul %403, %405, %cst_141 {dimension_numbers = #tpu.dot_dimension_numbers<[2], [2], [1], [1], [0, 0, 0, 1, 1, 1], [0], [0]>} : vector<2x8x8xf32>, vector<2x8x8xf32>, vector<2x8x8xf32> -> vector<2x8x8xf32>
    "tpu.trace_stop"() : () -> ()
    %cst_142 = arith.constant 0.353553385 : f32
    %409 = vector.broadcast %cst_142 : f32 to vector<2x8x8xf32>
    %410 = arith.mulf %408, %409 : vector<2x8x8xf32>
    %411 = arith.addf %410, %15 : vector<2x8x8xf32>
    %cst_143 = arith.constant dense<0xFF800000> : vector<2x8xf32>
    %412 = vector.multi_reduction <maximumf>, %411, %cst_143 [2] : vector<2x8x8xf32> to vector<2x8xf32>
    %413 = vector.shape_cast %412 : vector<2x8xf32> to vector<2x8x1xf32>
    %414 = vector.broadcast %413 : vector<2x8x1xf32> to vector<2x8x8xf32>
    %415 = arith.subf %411, %414 : vector<2x8x8xf32>
    %416 = math.exp %415 : vector<2x8x8xf32>
    %cst_144 = arith.constant dense<0.000000e+00> : vector<2x8xf32>
    %417 = vector.multi_reduction <add>, %416, %cst_144 [2] : vector<2x8x8xf32> to vector<2x8xf32>
    %418 = vector.shape_cast %417 : vector<2x8xf32> to vector<2x8x1xf32>
    %419 = tpu.reciprocal %418 {approx = true} : vector<2x8x1xf32> -> vector<2x8x1xf32>
    %420 = vector.broadcast %419 : vector<2x8x1xf32> to vector<2x8x8xf32>
    %421 = arith.mulf %416, %420 : vector<2x8x8xf32>
    "tpu.trace_start"() <{level = 10 : i32, message = "bqk,bkd->bqd"}> : () -> ()
    %cst_145 = arith.constant dense<0.000000e+00> : vector<2x8x8xf32>
    %422 = tpu.matmul %421, %407, %cst_145 {dimension_numbers = #tpu.dot_dimension_numbers<[2], [1], [1], [2], [0, 0, 0, 1, 1, 2], [0], [0]>} : vector<2x8x8xf32>, vector<2x8x8xf32>, vector<2x8x8xf32> -> vector<2x8x8xf32>
    "tpu.trace_stop"() : () -> ()
    %423 = vector.shape_cast %422 : vector<2x8x8xf32> to vector<16x8xf32>
    %424 = vector.extract_strided_slice %351 {offsets = [0, 24], sizes = [16, 8], strides = [1, 1]} : vector<16x32xf32> to vector<16x8xf32>
    %425 = vector.shape_cast %424 : vector<16x8xf32> to vector<2x8x8xf32>
    %426 = vector.extract_strided_slice %356 {offsets = [0, 24], sizes = [16, 8], strides = [1, 1]} : vector<16x32xf32> to vector<16x8xf32>
    %427 = vector.shape_cast %426 : vector<16x8xf32> to vector<2x8x8xf32>
    %428 = vector.extract_strided_slice %357 {offsets = [0, 24], sizes = [16, 8], strides = [1, 1]} : vector<16x32xf32> to vector<16x8xf32>
    %429 = vector.shape_cast %428 : vector<16x8xf32> to vector<2x8x8xf32>
    "tpu.trace_start"() <{level = 10 : i32, message = "bqd,bkd->bqk"}> : () -> ()
    %cst_146 = arith.constant dense<0.000000e+00> : vector<2x8x8xf32>
    %430 = tpu.matmul %425, %427, %cst_146 {dimension_numbers = #tpu.dot_dimension_numbers<[2], [2], [1], [1], [0, 0, 0, 1, 1, 1], [0], [0]>} : vector<2x8x8xf32>, vector<2x8x8xf32>, vector<2x8x8xf32> -> vector<2x8x8xf32>
    "tpu.trace_stop"() : () -> ()
    %cst_147 = arith.constant 0.353553385 : f32
    %431 = vector.broadcast %cst_147 : f32 to vector<2x8x8xf32>
    %432 = arith.mulf %430, %431 : vector<2x8x8xf32>
    %433 = arith.addf %432, %15 : vector<2x8x8xf32>
    %cst_148 = arith.constant dense<0xFF800000> : vector<2x8xf32>
    %434 = vector.multi_reduction <maximumf>, %433, %cst_148 [2] : vector<2x8x8xf32> to vector<2x8xf32>
    %435 = vector.shape_cast %434 : vector<2x8xf32> to vector<2x8x1xf32>
    %436 = vector.broadcast %435 : vector<2x8x1xf32> to vector<2x8x8xf32>
    %437 = arith.subf %433, %436 : vector<2x8x8xf32>
    %438 = math.exp %437 : vector<2x8x8xf32>
    %cst_149 = arith.constant dense<0.000000e+00> : vector<2x8xf32>
    %439 = vector.multi_reduction <add>, %438, %cst_149 [2] : vector<2x8x8xf32> to vector<2x8xf32>
    %440 = vector.shape_cast %439 : vector<2x8xf32> to vector<2x8x1xf32>
    %441 = tpu.reciprocal %440 {approx = true} : vector<2x8x1xf32> -> vector<2x8x1xf32>
    %442 = vector.broadcast %441 : vector<2x8x1xf32> to vector<2x8x8xf32>
    %443 = arith.mulf %438, %442 : vector<2x8x8xf32>
    "tpu.trace_start"() <{level = 10 : i32, message = "bqk,bkd->bqd"}> : () -> ()
    %cst_150 = arith.constant dense<0.000000e+00> : vector<2x8x8xf32>
    %444 = tpu.matmul %443, %429, %cst_150 {dimension_numbers = #tpu.dot_dimension_numbers<[2], [1], [1], [2], [0, 0, 0, 1, 1, 2], [0], [0]>} : vector<2x8x8xf32>, vector<2x8x8xf32>, vector<2x8x8xf32> -> vector<2x8x8xf32>
    "tpu.trace_stop"() : () -> ()
    %445 = vector.shape_cast %444 : vector<2x8x8xf32> to vector<16x8xf32>
    %446 = tpu.concatenate %379, %401, %423, %445 in 1 : vector<16x8xf32>, vector<16x8xf32>, vector<16x8xf32>, vector<16x8xf32> -> vector<16x32xf32>
    %cst_151 = arith.constant dense<0.000000e+00> : vector<16x32xf32>
    %447 = tpu.matmul %446, %327, %cst_151 {dimension_numbers = #tpu.dot_dimension_numbers<[1], [0], [0], [1], [0, 0, 1, 1], [], []>} : vector<16x32xf32>, vector<32x32xf32>, vector<16x32xf32> -> vector<16x32xf32>
    %448 = arith.addf %321, %447 : vector<16x32xf32>
    %449 = arith.mulf %448, %448 : vector<16x32xf32>
    %cst_152 = arith.constant dense<0.000000e+00> : vector<16xf32>
    %450 = vector.multi_reduction <add>, %449, %cst_152 [1] : vector<16x32xf32> to vector<16xf32>
    %451 = vector.shape_cast %450 : vector<16xf32> to vector<16x1xf32>
    %cst_153 = arith.constant 3.200000e+01 : f32
    %452 = vector.broadcast %cst_153 : f32 to vector<16x1xf32>
    %453 = arith.divf %451, %452 : vector<16x1xf32>
    %cst_154 = arith.constant 9.99999997E-7 : f32
    %454 = vector.broadcast %cst_154 : f32 to vector<16x1xf32>
    %455 = arith.addf %453, %454 : vector<16x1xf32>
    %456 = math.rsqrt %455 : vector<16x1xf32>
    %457 = vector.broadcast %456 : vector<16x1xf32> to vector<16x32xf32>
    %458 = arith.mulf %448, %457 : vector<16x32xf32>
    %459 = vector.broadcast %329 : vector<1x32xf32> to vector<16x32xf32>
    %460 = arith.mulf %458, %459 : vector<16x32xf32>
    %cst_155 = arith.constant dense<0.000000e+00> : vector<16x128xf32>
    %461 = tpu.matmul %460, %331, %cst_155 {dimension_numbers = #tpu.dot_dimension_numbers<[1], [0], [0], [1], [0, 0, 1, 1], [], []>} : vector<16x32xf32>, vector<32x128xf32>, vector<16x128xf32> -> vector<16x128xf32>
    %462 = vector.extract_strided_slice %461 {offsets = [0, 0], sizes = [16, 64], strides = [1, 1]} : vector<16x128xf32> to vector<16x64xf32>
    %463 = vector.extract_strided_slice %461 {offsets = [0, 64], sizes = [16, 64], strides = [1, 1]} : vector<16x128xf32> to vector<16x64xf32>
    %cst_156 = arith.constant 0.000000e+00 : f32
    %464 = vector.broadcast %cst_156 : f32 to vector<16x64xf32>
    %465 = arith.subf %464, %462 : vector<16x64xf32>
    %466 = math.exp %465 : vector<16x64xf32>
    %cst_157 = arith.constant 1.000000e+00 : f32
    %467 = vector.broadcast %cst_157 : f32 to vector<16x64xf32>
    %468 = arith.addf %467, %466 : vector<16x64xf32>
    %cst_158 = arith.constant 1.000000e+00 : f32
    %469 = vector.broadcast %cst_158 : f32 to vector<16x64xf32>
    %470 = arith.divf %469, %468 : vector<16x64xf32>
    %471 = arith.mulf %462, %470 : vector<16x64xf32>
    %472 = arith.mulf %471, %463 : vector<16x64xf32>
    %cst_159 = arith.constant dense<0.000000e+00> : vector<16x32xf32>
    %473 = tpu.matmul %472, %333, %cst_159 {dimension_numbers = #tpu.dot_dimension_numbers<[1], [0], [0], [1], [0, 0, 1, 1], [], []>} : vector<16x64xf32>, vector<64x32xf32>, vector<16x32xf32> -> vector<16x32xf32>
    %474 = arith.addf %448, %473 : vector<16x32xf32>
    %c3 = arith.constant 3 : index
    %c0_160 = arith.constant 0 : index
    %c0_161 = arith.constant 0 : index
    %475 = vector.load %arg4[%c3, %c0_160, %c0_161] : memref<7x1x32xf32, #tpu.memory_space<vmem>>, vector<1x1x32xf32>
    %476 = vector.shape_cast %475 : vector<1x1x32xf32> to vector<1x32xf32>
    %c3_162 = arith.constant 3 : index
    %c0_163 = arith.constant 0 : index
    %c0_164 = arith.constant 0 : index
    %477 = vector.load %arg5[%c3_162, %c0_163, %c0_164] : memref<7x32x160xf32, #tpu.memory_space<vmem>>, vector<1x32x160xf32>
    %478 = vector.shape_cast %477 : vector<1x32x160xf32> to vector<32x160xf32>
    %c3_165 = arith.constant 3 : index
    %c0_166 = arith.constant 0 : index
    %c0_167 = arith.constant 0 : index
    %479 = vector.load %arg6[%c3_165, %c0_166, %c0_167] : memref<7x32x32xf32, #tpu.memory_space<vmem>>, vector<1x32x32xf32>
    %480 = vector.shape_cast %479 : vector<1x32x32xf32> to vector<32x32xf32>
    %c3_168 = arith.constant 3 : index
    %c0_169 = arith.constant 0 : index
    %c0_170 = arith.constant 0 : index
    %481 = vector.load %arg7[%c3_168, %c0_169, %c0_170] : memref<7x1x32xf32, #tpu.memory_space<vmem>>, vector<1x1x32xf32>
    %482 = vector.shape_cast %481 : vector<1x1x32xf32> to vector<1x32xf32>
    %c3_171 = arith.constant 3 : index
    %c0_172 = arith.constant 0 : index
    %c0_173 = arith.constant 0 : index
    %483 = vector.load %arg8[%c3_171, %c0_172, %c0_173] : memref<7x32x128xf32, #tpu.memory_space<vmem>>, vector<1x32x128xf32>
    %484 = vector.shape_cast %483 : vector<1x32x128xf32> to vector<32x128xf32>
    %c3_174 = arith.constant 3 : index
    %c0_175 = arith.constant 0 : index
    %c0_176 = arith.constant 0 : index
    %485 = vector.load %arg9[%c3_174, %c0_175, %c0_176] : memref<7x64x32xf32, #tpu.memory_space<vmem>>, vector<1x64x32xf32>
    %486 = vector.shape_cast %485 : vector<1x64x32xf32> to vector<64x32xf32>
    %487 = arith.mulf %474, %474 : vector<16x32xf32>
    %cst_177 = arith.constant dense<0.000000e+00> : vector<16xf32>
    %488 = vector.multi_reduction <add>, %487, %cst_177 [1] : vector<16x32xf32> to vector<16xf32>
    %489 = vector.shape_cast %488 : vector<16xf32> to vector<16x1xf32>
    %cst_178 = arith.constant 3.200000e+01 : f32
    %490 = vector.broadcast %cst_178 : f32 to vector<16x1xf32>
    %491 = arith.divf %489, %490 : vector<16x1xf32>
    %cst_179 = arith.constant 9.99999997E-7 : f32
    %492 = vector.broadcast %cst_179 : f32 to vector<16x1xf32>
    %493 = arith.addf %491, %492 : vector<16x1xf32>
    %494 = math.rsqrt %493 : vector<16x1xf32>
    %495 = vector.broadcast %494 : vector<16x1xf32> to vector<16x32xf32>
    %496 = arith.mulf %474, %495 : vector<16x32xf32>
    %497 = vector.broadcast %476 : vector<1x32xf32> to vector<16x32xf32>
    %498 = arith.mulf %496, %497 : vector<16x32xf32>
    %cst_180 = arith.constant dense<0.000000e+00> : vector<16x160xf32>
    %499 = tpu.matmul %498, %478, %cst_180 {dimension_numbers = #tpu.dot_dimension_numbers<[1], [0], [0], [1], [0, 0, 1, 1], [], []>} : vector<16x32xf32>, vector<32x160xf32>, vector<16x160xf32> -> vector<16x160xf32>
    %500 = vector.extract_strided_slice %499 {offsets = [0, 0], sizes = [16, 32], strides = [1, 1]} : vector<16x160xf32> to vector<16x32xf32>
    %501 = arith.mulf %500, %8 : vector<16x32xf32>
    %502 = vector.extract_strided_slice %499 {offsets = [0, 32], sizes = [16, 32], strides = [1, 1]} : vector<16x160xf32> to vector<16x32xf32>
    %503 = arith.mulf %502, %9 : vector<16x32xf32>
    %504 = arith.addf %501, %503 : vector<16x32xf32>
    %505 = vector.extract_strided_slice %499 {offsets = [0, 64], sizes = [16, 32], strides = [1, 1]} : vector<16x160xf32> to vector<16x32xf32>
    %506 = arith.mulf %505, %8 : vector<16x32xf32>
    %507 = vector.extract_strided_slice %499 {offsets = [0, 96], sizes = [16, 32], strides = [1, 1]} : vector<16x160xf32> to vector<16x32xf32>
    %508 = arith.mulf %507, %9 : vector<16x32xf32>
    %509 = arith.addf %506, %508 : vector<16x32xf32>
    %510 = vector.extract_strided_slice %499 {offsets = [0, 128], sizes = [16, 32], strides = [1, 1]} : vector<16x160xf32> to vector<16x32xf32>
    %511 = vector.extract_strided_slice %504 {offsets = [0, 0], sizes = [16, 8], strides = [1, 1]} : vector<16x32xf32> to vector<16x8xf32>
    %512 = vector.shape_cast %511 : vector<16x8xf32> to vector<2x8x8xf32>
    %513 = vector.extract_strided_slice %509 {offsets = [0, 0], sizes = [16, 8], strides = [1, 1]} : vector<16x32xf32> to vector<16x8xf32>
    %514 = vector.shape_cast %513 : vector<16x8xf32> to vector<2x8x8xf32>
    %515 = vector.extract_strided_slice %510 {offsets = [0, 0], sizes = [16, 8], strides = [1, 1]} : vector<16x32xf32> to vector<16x8xf32>
    %516 = vector.shape_cast %515 : vector<16x8xf32> to vector<2x8x8xf32>
    "tpu.trace_start"() <{level = 10 : i32, message = "bqd,bkd->bqk"}> : () -> ()
    %cst_181 = arith.constant dense<0.000000e+00> : vector<2x8x8xf32>
    %517 = tpu.matmul %512, %514, %cst_181 {dimension_numbers = #tpu.dot_dimension_numbers<[2], [2], [1], [1], [0, 0, 0, 1, 1, 1], [0], [0]>} : vector<2x8x8xf32>, vector<2x8x8xf32>, vector<2x8x8xf32> -> vector<2x8x8xf32>
    "tpu.trace_stop"() : () -> ()
    %cst_182 = arith.constant 0.353553385 : f32
    %518 = vector.broadcast %cst_182 : f32 to vector<2x8x8xf32>
    %519 = arith.mulf %517, %518 : vector<2x8x8xf32>
    %520 = arith.addf %519, %15 : vector<2x8x8xf32>
    %cst_183 = arith.constant dense<0xFF800000> : vector<2x8xf32>
    %521 = vector.multi_reduction <maximumf>, %520, %cst_183 [2] : vector<2x8x8xf32> to vector<2x8xf32>
    %522 = vector.shape_cast %521 : vector<2x8xf32> to vector<2x8x1xf32>
    %523 = vector.broadcast %522 : vector<2x8x1xf32> to vector<2x8x8xf32>
    %524 = arith.subf %520, %523 : vector<2x8x8xf32>
    %525 = math.exp %524 : vector<2x8x8xf32>
    %cst_184 = arith.constant dense<0.000000e+00> : vector<2x8xf32>
    %526 = vector.multi_reduction <add>, %525, %cst_184 [2] : vector<2x8x8xf32> to vector<2x8xf32>
    %527 = vector.shape_cast %526 : vector<2x8xf32> to vector<2x8x1xf32>
    %528 = tpu.reciprocal %527 {approx = true} : vector<2x8x1xf32> -> vector<2x8x1xf32>
    %529 = vector.broadcast %528 : vector<2x8x1xf32> to vector<2x8x8xf32>
    %530 = arith.mulf %525, %529 : vector<2x8x8xf32>
    "tpu.trace_start"() <{level = 10 : i32, message = "bqk,bkd->bqd"}> : () -> ()
    %cst_185 = arith.constant dense<0.000000e+00> : vector<2x8x8xf32>
    %531 = tpu.matmul %530, %516, %cst_185 {dimension_numbers = #tpu.dot_dimension_numbers<[2], [1], [1], [2], [0, 0, 0, 1, 1, 2], [0], [0]>} : vector<2x8x8xf32>, vector<2x8x8xf32>, vector<2x8x8xf32> -> vector<2x8x8xf32>
    "tpu.trace_stop"() : () -> ()
    %532 = vector.shape_cast %531 : vector<2x8x8xf32> to vector<16x8xf32>
    %533 = vector.extract_strided_slice %504 {offsets = [0, 8], sizes = [16, 8], strides = [1, 1]} : vector<16x32xf32> to vector<16x8xf32>
    %534 = vector.shape_cast %533 : vector<16x8xf32> to vector<2x8x8xf32>
    %535 = vector.extract_strided_slice %509 {offsets = [0, 8], sizes = [16, 8], strides = [1, 1]} : vector<16x32xf32> to vector<16x8xf32>
    %536 = vector.shape_cast %535 : vector<16x8xf32> to vector<2x8x8xf32>
    %537 = vector.extract_strided_slice %510 {offsets = [0, 8], sizes = [16, 8], strides = [1, 1]} : vector<16x32xf32> to vector<16x8xf32>
    %538 = vector.shape_cast %537 : vector<16x8xf32> to vector<2x8x8xf32>
    "tpu.trace_start"() <{level = 10 : i32, message = "bqd,bkd->bqk"}> : () -> ()
    %cst_186 = arith.constant dense<0.000000e+00> : vector<2x8x8xf32>
    %539 = tpu.matmul %534, %536, %cst_186 {dimension_numbers = #tpu.dot_dimension_numbers<[2], [2], [1], [1], [0, 0, 0, 1, 1, 1], [0], [0]>} : vector<2x8x8xf32>, vector<2x8x8xf32>, vector<2x8x8xf32> -> vector<2x8x8xf32>
    "tpu.trace_stop"() : () -> ()
    %cst_187 = arith.constant 0.353553385 : f32
    %540 = vector.broadcast %cst_187 : f32 to vector<2x8x8xf32>
    %541 = arith.mulf %539, %540 : vector<2x8x8xf32>
    %542 = arith.addf %541, %15 : vector<2x8x8xf32>
    %cst_188 = arith.constant dense<0xFF800000> : vector<2x8xf32>
    %543 = vector.multi_reduction <maximumf>, %542, %cst_188 [2] : vector<2x8x8xf32> to vector<2x8xf32>
    %544 = vector.shape_cast %543 : vector<2x8xf32> to vector<2x8x1xf32>
    %545 = vector.broadcast %544 : vector<2x8x1xf32> to vector<2x8x8xf32>
    %546 = arith.subf %542, %545 : vector<2x8x8xf32>
    %547 = math.exp %546 : vector<2x8x8xf32>
    %cst_189 = arith.constant dense<0.000000e+00> : vector<2x8xf32>
    %548 = vector.multi_reduction <add>, %547, %cst_189 [2] : vector<2x8x8xf32> to vector<2x8xf32>
    %549 = vector.shape_cast %548 : vector<2x8xf32> to vector<2x8x1xf32>
    %550 = tpu.reciprocal %549 {approx = true} : vector<2x8x1xf32> -> vector<2x8x1xf32>
    %551 = vector.broadcast %550 : vector<2x8x1xf32> to vector<2x8x8xf32>
    %552 = arith.mulf %547, %551 : vector<2x8x8xf32>
    "tpu.trace_start"() <{level = 10 : i32, message = "bqk,bkd->bqd"}> : () -> ()
    %cst_190 = arith.constant dense<0.000000e+00> : vector<2x8x8xf32>
    %553 = tpu.matmul %552, %538, %cst_190 {dimension_numbers = #tpu.dot_dimension_numbers<[2], [1], [1], [2], [0, 0, 0, 1, 1, 2], [0], [0]>} : vector<2x8x8xf32>, vector<2x8x8xf32>, vector<2x8x8xf32> -> vector<2x8x8xf32>
    "tpu.trace_stop"() : () -> ()
    %554 = vector.shape_cast %553 : vector<2x8x8xf32> to vector<16x8xf32>
    %555 = vector.extract_strided_slice %504 {offsets = [0, 16], sizes = [16, 8], strides = [1, 1]} : vector<16x32xf32> to vector<16x8xf32>
    %556 = vector.shape_cast %555 : vector<16x8xf32> to vector<2x8x8xf32>
    %557 = vector.extract_strided_slice %509 {offsets = [0, 16], sizes = [16, 8], strides = [1, 1]} : vector<16x32xf32> to vector<16x8xf32>
    %558 = vector.shape_cast %557 : vector<16x8xf32> to vector<2x8x8xf32>
    %559 = vector.extract_strided_slice %510 {offsets = [0, 16], sizes = [16, 8], strides = [1, 1]} : vector<16x32xf32> to vector<16x8xf32>
    %560 = vector.shape_cast %559 : vector<16x8xf32> to vector<2x8x8xf32>
    "tpu.trace_start"() <{level = 10 : i32, message = "bqd,bkd->bqk"}> : () -> ()
    %cst_191 = arith.constant dense<0.000000e+00> : vector<2x8x8xf32>
    %561 = tpu.matmul %556, %558, %cst_191 {dimension_numbers = #tpu.dot_dimension_numbers<[2], [2], [1], [1], [0, 0, 0, 1, 1, 1], [0], [0]>} : vector<2x8x8xf32>, vector<2x8x8xf32>, vector<2x8x8xf32> -> vector<2x8x8xf32>
    "tpu.trace_stop"() : () -> ()
    %cst_192 = arith.constant 0.353553385 : f32
    %562 = vector.broadcast %cst_192 : f32 to vector<2x8x8xf32>
    %563 = arith.mulf %561, %562 : vector<2x8x8xf32>
    %564 = arith.addf %563, %15 : vector<2x8x8xf32>
    %cst_193 = arith.constant dense<0xFF800000> : vector<2x8xf32>
    %565 = vector.multi_reduction <maximumf>, %564, %cst_193 [2] : vector<2x8x8xf32> to vector<2x8xf32>
    %566 = vector.shape_cast %565 : vector<2x8xf32> to vector<2x8x1xf32>
    %567 = vector.broadcast %566 : vector<2x8x1xf32> to vector<2x8x8xf32>
    %568 = arith.subf %564, %567 : vector<2x8x8xf32>
    %569 = math.exp %568 : vector<2x8x8xf32>
    %cst_194 = arith.constant dense<0.000000e+00> : vector<2x8xf32>
    %570 = vector.multi_reduction <add>, %569, %cst_194 [2] : vector<2x8x8xf32> to vector<2x8xf32>
    %571 = vector.shape_cast %570 : vector<2x8xf32> to vector<2x8x1xf32>
    %572 = tpu.reciprocal %571 {approx = true} : vector<2x8x1xf32> -> vector<2x8x1xf32>
    %573 = vector.broadcast %572 : vector<2x8x1xf32> to vector<2x8x8xf32>
    %574 = arith.mulf %569, %573 : vector<2x8x8xf32>
    "tpu.trace_start"() <{level = 10 : i32, message = "bqk,bkd->bqd"}> : () -> ()
    %cst_195 = arith.constant dense<0.000000e+00> : vector<2x8x8xf32>
    %575 = tpu.matmul %574, %560, %cst_195 {dimension_numbers = #tpu.dot_dimension_numbers<[2], [1], [1], [2], [0, 0, 0, 1, 1, 2], [0], [0]>} : vector<2x8x8xf32>, vector<2x8x8xf32>, vector<2x8x8xf32> -> vector<2x8x8xf32>
    "tpu.trace_stop"() : () -> ()
    %576 = vector.shape_cast %575 : vector<2x8x8xf32> to vector<16x8xf32>
    %577 = vector.extract_strided_slice %504 {offsets = [0, 24], sizes = [16, 8], strides = [1, 1]} : vector<16x32xf32> to vector<16x8xf32>
    %578 = vector.shape_cast %577 : vector<16x8xf32> to vector<2x8x8xf32>
    %579 = vector.extract_strided_slice %509 {offsets = [0, 24], sizes = [16, 8], strides = [1, 1]} : vector<16x32xf32> to vector<16x8xf32>
    %580 = vector.shape_cast %579 : vector<16x8xf32> to vector<2x8x8xf32>
    %581 = vector.extract_strided_slice %510 {offsets = [0, 24], sizes = [16, 8], strides = [1, 1]} : vector<16x32xf32> to vector<16x8xf32>
    %582 = vector.shape_cast %581 : vector<16x8xf32> to vector<2x8x8xf32>
    "tpu.trace_start"() <{level = 10 : i32, message = "bqd,bkd->bqk"}> : () -> ()
    %cst_196 = arith.constant dense<0.000000e+00> : vector<2x8x8xf32>
    %583 = tpu.matmul %578, %580, %cst_196 {dimension_numbers = #tpu.dot_dimension_numbers<[2], [2], [1], [1], [0, 0, 0, 1, 1, 1], [0], [0]>} : vector<2x8x8xf32>, vector<2x8x8xf32>, vector<2x8x8xf32> -> vector<2x8x8xf32>
    "tpu.trace_stop"() : () -> ()
    %cst_197 = arith.constant 0.353553385 : f32
    %584 = vector.broadcast %cst_197 : f32 to vector<2x8x8xf32>
    %585 = arith.mulf %583, %584 : vector<2x8x8xf32>
    %586 = arith.addf %585, %15 : vector<2x8x8xf32>
    %cst_198 = arith.constant dense<0xFF800000> : vector<2x8xf32>
    %587 = vector.multi_reduction <maximumf>, %586, %cst_198 [2] : vector<2x8x8xf32> to vector<2x8xf32>
    %588 = vector.shape_cast %587 : vector<2x8xf32> to vector<2x8x1xf32>
    %589 = vector.broadcast %588 : vector<2x8x1xf32> to vector<2x8x8xf32>
    %590 = arith.subf %586, %589 : vector<2x8x8xf32>
    %591 = math.exp %590 : vector<2x8x8xf32>
    %cst_199 = arith.constant dense<0.000000e+00> : vector<2x8xf32>
    %592 = vector.multi_reduction <add>, %591, %cst_199 [2] : vector<2x8x8xf32> to vector<2x8xf32>
    %593 = vector.shape_cast %592 : vector<2x8xf32> to vector<2x8x1xf32>
    %594 = tpu.reciprocal %593 {approx = true} : vector<2x8x1xf32> -> vector<2x8x1xf32>
    %595 = vector.broadcast %594 : vector<2x8x1xf32> to vector<2x8x8xf32>
    %596 = arith.mulf %591, %595 : vector<2x8x8xf32>
    "tpu.trace_start"() <{level = 10 : i32, message = "bqk,bkd->bqd"}> : () -> ()
    %cst_200 = arith.constant dense<0.000000e+00> : vector<2x8x8xf32>
    %597 = tpu.matmul %596, %582, %cst_200 {dimension_numbers = #tpu.dot_dimension_numbers<[2], [1], [1], [2], [0, 0, 0, 1, 1, 2], [0], [0]>} : vector<2x8x8xf32>, vector<2x8x8xf32>, vector<2x8x8xf32> -> vector<2x8x8xf32>
    "tpu.trace_stop"() : () -> ()
    %598 = vector.shape_cast %597 : vector<2x8x8xf32> to vector<16x8xf32>
    %599 = tpu.concatenate %532, %554, %576, %598 in 1 : vector<16x8xf32>, vector<16x8xf32>, vector<16x8xf32>, vector<16x8xf32> -> vector<16x32xf32>
    %cst_201 = arith.constant dense<0.000000e+00> : vector<16x32xf32>
    %600 = tpu.matmul %599, %480, %cst_201 {dimension_numbers = #tpu.dot_dimension_numbers<[1], [0], [0], [1], [0, 0, 1, 1], [], []>} : vector<16x32xf32>, vector<32x32xf32>, vector<16x32xf32> -> vector<16x32xf32>
    %601 = arith.addf %474, %600 : vector<16x32xf32>
    %602 = arith.mulf %601, %601 : vector<16x32xf32>
    %cst_202 = arith.constant dense<0.000000e+00> : vector<16xf32>
    %603 = vector.multi_reduction <add>, %602, %cst_202 [1] : vector<16x32xf32> to vector<16xf32>
    %604 = vector.shape_cast %603 : vector<16xf32> to vector<16x1xf32>
    %cst_203 = arith.constant 3.200000e+01 : f32
    %605 = vector.broadcast %cst_203 : f32 to vector<16x1xf32>
    %606 = arith.divf %604, %605 : vector<16x1xf32>
    %cst_204 = arith.constant 9.99999997E-7 : f32
    %607 = vector.broadcast %cst_204 : f32 to vector<16x1xf32>
    %608 = arith.addf %606, %607 : vector<16x1xf32>
    %609 = math.rsqrt %608 : vector<16x1xf32>
    %610 = vector.broadcast %609 : vector<16x1xf32> to vector<16x32xf32>
    %611 = arith.mulf %601, %610 : vector<16x32xf32>
    %612 = vector.broadcast %482 : vector<1x32xf32> to vector<16x32xf32>
    %613 = arith.mulf %611, %612 : vector<16x32xf32>
    %cst_205 = arith.constant dense<0.000000e+00> : vector<16x128xf32>
    %614 = tpu.matmul %613, %484, %cst_205 {dimension_numbers = #tpu.dot_dimension_numbers<[1], [0], [0], [1], [0, 0, 1, 1], [], []>} : vector<16x32xf32>, vector<32x128xf32>, vector<16x128xf32> -> vector<16x128xf32>
    %615 = vector.extract_strided_slice %614 {offsets = [0, 0], sizes = [16, 64], strides = [1, 1]} : vector<16x128xf32> to vector<16x64xf32>
    %616 = vector.extract_strided_slice %614 {offsets = [0, 64], sizes = [16, 64], strides = [1, 1]} : vector<16x128xf32> to vector<16x64xf32>
    %cst_206 = arith.constant 0.000000e+00 : f32
    %617 = vector.broadcast %cst_206 : f32 to vector<16x64xf32>
    %618 = arith.subf %617, %615 : vector<16x64xf32>
    %619 = math.exp %618 : vector<16x64xf32>
    %cst_207 = arith.constant 1.000000e+00 : f32
    %620 = vector.broadcast %cst_207 : f32 to vector<16x64xf32>
    %621 = arith.addf %620, %619 : vector<16x64xf32>
    %cst_208 = arith.constant 1.000000e+00 : f32
    %622 = vector.broadcast %cst_208 : f32 to vector<16x64xf32>
    %623 = arith.divf %622, %621 : vector<16x64xf32>
    %624 = arith.mulf %615, %623 : vector<16x64xf32>
    %625 = arith.mulf %624, %616 : vector<16x64xf32>
    %cst_209 = arith.constant dense<0.000000e+00> : vector<16x32xf32>
    %626 = tpu.matmul %625, %486, %cst_209 {dimension_numbers = #tpu.dot_dimension_numbers<[1], [0], [0], [1], [0, 0, 1, 1], [], []>} : vector<16x64xf32>, vector<64x32xf32>, vector<16x32xf32> -> vector<16x32xf32>
    %627 = arith.addf %601, %626 : vector<16x32xf32>
    %c4 = arith.constant 4 : index
    %c0_210 = arith.constant 0 : index
    %c0_211 = arith.constant 0 : index
    %628 = vector.load %arg4[%c4, %c0_210, %c0_211] : memref<7x1x32xf32, #tpu.memory_space<vmem>>, vector<1x1x32xf32>
    %629 = vector.shape_cast %628 : vector<1x1x32xf32> to vector<1x32xf32>
    %c4_212 = arith.constant 4 : index
    %c0_213 = arith.constant 0 : index
    %c0_214 = arith.constant 0 : index
    %630 = vector.load %arg5[%c4_212, %c0_213, %c0_214] : memref<7x32x160xf32, #tpu.memory_space<vmem>>, vector<1x32x160xf32>
    %631 = vector.shape_cast %630 : vector<1x32x160xf32> to vector<32x160xf32>
    %c4_215 = arith.constant 4 : index
    %c0_216 = arith.constant 0 : index
    %c0_217 = arith.constant 0 : index
    %632 = vector.load %arg6[%c4_215, %c0_216, %c0_217] : memref<7x32x32xf32, #tpu.memory_space<vmem>>, vector<1x32x32xf32>
    %633 = vector.shape_cast %632 : vector<1x32x32xf32> to vector<32x32xf32>
    %c4_218 = arith.constant 4 : index
    %c0_219 = arith.constant 0 : index
    %c0_220 = arith.constant 0 : index
    %634 = vector.load %arg7[%c4_218, %c0_219, %c0_220] : memref<7x1x32xf32, #tpu.memory_space<vmem>>, vector<1x1x32xf32>
    %635 = vector.shape_cast %634 : vector<1x1x32xf32> to vector<1x32xf32>
    %c4_221 = arith.constant 4 : index
    %c0_222 = arith.constant 0 : index
    %c0_223 = arith.constant 0 : index
    %636 = vector.load %arg8[%c4_221, %c0_222, %c0_223] : memref<7x32x128xf32, #tpu.memory_space<vmem>>, vector<1x32x128xf32>
    %637 = vector.shape_cast %636 : vector<1x32x128xf32> to vector<32x128xf32>
    %c4_224 = arith.constant 4 : index
    %c0_225 = arith.constant 0 : index
    %c0_226 = arith.constant 0 : index
    %638 = vector.load %arg9[%c4_224, %c0_225, %c0_226] : memref<7x64x32xf32, #tpu.memory_space<vmem>>, vector<1x64x32xf32>
    %639 = vector.shape_cast %638 : vector<1x64x32xf32> to vector<64x32xf32>
    %640 = arith.mulf %627, %627 : vector<16x32xf32>
    %cst_227 = arith.constant dense<0.000000e+00> : vector<16xf32>
    %641 = vector.multi_reduction <add>, %640, %cst_227 [1] : vector<16x32xf32> to vector<16xf32>
    %642 = vector.shape_cast %641 : vector<16xf32> to vector<16x1xf32>
    %cst_228 = arith.constant 3.200000e+01 : f32
    %643 = vector.broadcast %cst_228 : f32 to vector<16x1xf32>
    %644 = arith.divf %642, %643 : vector<16x1xf32>
    %cst_229 = arith.constant 9.99999997E-7 : f32
    %645 = vector.broadcast %cst_229 : f32 to vector<16x1xf32>
    %646 = arith.addf %644, %645 : vector<16x1xf32>
    %647 = math.rsqrt %646 : vector<16x1xf32>
    %648 = vector.broadcast %647 : vector<16x1xf32> to vector<16x32xf32>
    %649 = arith.mulf %627, %648 : vector<16x32xf32>
    %650 = vector.broadcast %629 : vector<1x32xf32> to vector<16x32xf32>
    %651 = arith.mulf %649, %650 : vector<16x32xf32>
    %cst_230 = arith.constant dense<0.000000e+00> : vector<16x160xf32>
    %652 = tpu.matmul %651, %631, %cst_230 {dimension_numbers = #tpu.dot_dimension_numbers<[1], [0], [0], [1], [0, 0, 1, 1], [], []>} : vector<16x32xf32>, vector<32x160xf32>, vector<16x160xf32> -> vector<16x160xf32>
    %653 = vector.extract_strided_slice %652 {offsets = [0, 0], sizes = [16, 32], strides = [1, 1]} : vector<16x160xf32> to vector<16x32xf32>
    %654 = arith.mulf %653, %8 : vector<16x32xf32>
    %655 = vector.extract_strided_slice %652 {offsets = [0, 32], sizes = [16, 32], strides = [1, 1]} : vector<16x160xf32> to vector<16x32xf32>
    %656 = arith.mulf %655, %9 : vector<16x32xf32>
    %657 = arith.addf %654, %656 : vector<16x32xf32>
    %658 = vector.extract_strided_slice %652 {offsets = [0, 64], sizes = [16, 32], strides = [1, 1]} : vector<16x160xf32> to vector<16x32xf32>
    %659 = arith.mulf %658, %8 : vector<16x32xf32>
    %660 = vector.extract_strided_slice %652 {offsets = [0, 96], sizes = [16, 32], strides = [1, 1]} : vector<16x160xf32> to vector<16x32xf32>
    %661 = arith.mulf %660, %9 : vector<16x32xf32>
    %662 = arith.addf %659, %661 : vector<16x32xf32>
    %663 = vector.extract_strided_slice %652 {offsets = [0, 128], sizes = [16, 32], strides = [1, 1]} : vector<16x160xf32> to vector<16x32xf32>
    %664 = vector.extract_strided_slice %657 {offsets = [0, 0], sizes = [16, 8], strides = [1, 1]} : vector<16x32xf32> to vector<16x8xf32>
    %665 = vector.shape_cast %664 : vector<16x8xf32> to vector<2x8x8xf32>
    %666 = vector.extract_strided_slice %662 {offsets = [0, 0], sizes = [16, 8], strides = [1, 1]} : vector<16x32xf32> to vector<16x8xf32>
    %667 = vector.shape_cast %666 : vector<16x8xf32> to vector<2x8x8xf32>
    %668 = vector.extract_strided_slice %663 {offsets = [0, 0], sizes = [16, 8], strides = [1, 1]} : vector<16x32xf32> to vector<16x8xf32>
    %669 = vector.shape_cast %668 : vector<16x8xf32> to vector<2x8x8xf32>
    "tpu.trace_start"() <{level = 10 : i32, message = "bqd,bkd->bqk"}> : () -> ()
    %cst_231 = arith.constant dense<0.000000e+00> : vector<2x8x8xf32>
    %670 = tpu.matmul %665, %667, %cst_231 {dimension_numbers = #tpu.dot_dimension_numbers<[2], [2], [1], [1], [0, 0, 0, 1, 1, 1], [0], [0]>} : vector<2x8x8xf32>, vector<2x8x8xf32>, vector<2x8x8xf32> -> vector<2x8x8xf32>
    "tpu.trace_stop"() : () -> ()
    %cst_232 = arith.constant 0.353553385 : f32
    %671 = vector.broadcast %cst_232 : f32 to vector<2x8x8xf32>
    %672 = arith.mulf %670, %671 : vector<2x8x8xf32>
    %673 = arith.addf %672, %15 : vector<2x8x8xf32>
    %cst_233 = arith.constant dense<0xFF800000> : vector<2x8xf32>
    %674 = vector.multi_reduction <maximumf>, %673, %cst_233 [2] : vector<2x8x8xf32> to vector<2x8xf32>
    %675 = vector.shape_cast %674 : vector<2x8xf32> to vector<2x8x1xf32>
    %676 = vector.broadcast %675 : vector<2x8x1xf32> to vector<2x8x8xf32>
    %677 = arith.subf %673, %676 : vector<2x8x8xf32>
    %678 = math.exp %677 : vector<2x8x8xf32>
    %cst_234 = arith.constant dense<0.000000e+00> : vector<2x8xf32>
    %679 = vector.multi_reduction <add>, %678, %cst_234 [2] : vector<2x8x8xf32> to vector<2x8xf32>
    %680 = vector.shape_cast %679 : vector<2x8xf32> to vector<2x8x1xf32>
    %681 = tpu.reciprocal %680 {approx = true} : vector<2x8x1xf32> -> vector<2x8x1xf32>
    %682 = vector.broadcast %681 : vector<2x8x1xf32> to vector<2x8x8xf32>
    %683 = arith.mulf %678, %682 : vector<2x8x8xf32>
    "tpu.trace_start"() <{level = 10 : i32, message = "bqk,bkd->bqd"}> : () -> ()
    %cst_235 = arith.constant dense<0.000000e+00> : vector<2x8x8xf32>
    %684 = tpu.matmul %683, %669, %cst_235 {dimension_numbers = #tpu.dot_dimension_numbers<[2], [1], [1], [2], [0, 0, 0, 1, 1, 2], [0], [0]>} : vector<2x8x8xf32>, vector<2x8x8xf32>, vector<2x8x8xf32> -> vector<2x8x8xf32>
    "tpu.trace_stop"() : () -> ()
    %685 = vector.shape_cast %684 : vector<2x8x8xf32> to vector<16x8xf32>
    %686 = vector.extract_strided_slice %657 {offsets = [0, 8], sizes = [16, 8], strides = [1, 1]} : vector<16x32xf32> to vector<16x8xf32>
    %687 = vector.shape_cast %686 : vector<16x8xf32> to vector<2x8x8xf32>
    %688 = vector.extract_strided_slice %662 {offsets = [0, 8], sizes = [16, 8], strides = [1, 1]} : vector<16x32xf32> to vector<16x8xf32>
    %689 = vector.shape_cast %688 : vector<16x8xf32> to vector<2x8x8xf32>
    %690 = vector.extract_strided_slice %663 {offsets = [0, 8], sizes = [16, 8], strides = [1, 1]} : vector<16x32xf32> to vector<16x8xf32>
    %691 = vector.shape_cast %690 : vector<16x8xf32> to vector<2x8x8xf32>
    "tpu.trace_start"() <{level = 10 : i32, message = "bqd,bkd->bqk"}> : () -> ()
    %cst_236 = arith.constant dense<0.000000e+00> : vector<2x8x8xf32>
    %692 = tpu.matmul %687, %689, %cst_236 {dimension_numbers = #tpu.dot_dimension_numbers<[2], [2], [1], [1], [0, 0, 0, 1, 1, 1], [0], [0]>} : vector<2x8x8xf32>, vector<2x8x8xf32>, vector<2x8x8xf32> -> vector<2x8x8xf32>
    "tpu.trace_stop"() : () -> ()
    %cst_237 = arith.constant 0.353553385 : f32
    %693 = vector.broadcast %cst_237 : f32 to vector<2x8x8xf32>
    %694 = arith.mulf %692, %693 : vector<2x8x8xf32>
    %695 = arith.addf %694, %15 : vector<2x8x8xf32>
    %cst_238 = arith.constant dense<0xFF800000> : vector<2x8xf32>
    %696 = vector.multi_reduction <maximumf>, %695, %cst_238 [2] : vector<2x8x8xf32> to vector<2x8xf32>
    %697 = vector.shape_cast %696 : vector<2x8xf32> to vector<2x8x1xf32>
    %698 = vector.broadcast %697 : vector<2x8x1xf32> to vector<2x8x8xf32>
    %699 = arith.subf %695, %698 : vector<2x8x8xf32>
    %700 = math.exp %699 : vector<2x8x8xf32>
    %cst_239 = arith.constant dense<0.000000e+00> : vector<2x8xf32>
    %701 = vector.multi_reduction <add>, %700, %cst_239 [2] : vector<2x8x8xf32> to vector<2x8xf32>
    %702 = vector.shape_cast %701 : vector<2x8xf32> to vector<2x8x1xf32>
    %703 = tpu.reciprocal %702 {approx = true} : vector<2x8x1xf32> -> vector<2x8x1xf32>
    %704 = vector.broadcast %703 : vector<2x8x1xf32> to vector<2x8x8xf32>
    %705 = arith.mulf %700, %704 : vector<2x8x8xf32>
    "tpu.trace_start"() <{level = 10 : i32, message = "bqk,bkd->bqd"}> : () -> ()
    %cst_240 = arith.constant dense<0.000000e+00> : vector<2x8x8xf32>
    %706 = tpu.matmul %705, %691, %cst_240 {dimension_numbers = #tpu.dot_dimension_numbers<[2], [1], [1], [2], [0, 0, 0, 1, 1, 2], [0], [0]>} : vector<2x8x8xf32>, vector<2x8x8xf32>, vector<2x8x8xf32> -> vector<2x8x8xf32>
    "tpu.trace_stop"() : () -> ()
    %707 = vector.shape_cast %706 : vector<2x8x8xf32> to vector<16x8xf32>
    %708 = vector.extract_strided_slice %657 {offsets = [0, 16], sizes = [16, 8], strides = [1, 1]} : vector<16x32xf32> to vector<16x8xf32>
    %709 = vector.shape_cast %708 : vector<16x8xf32> to vector<2x8x8xf32>
    %710 = vector.extract_strided_slice %662 {offsets = [0, 16], sizes = [16, 8], strides = [1, 1]} : vector<16x32xf32> to vector<16x8xf32>
    %711 = vector.shape_cast %710 : vector<16x8xf32> to vector<2x8x8xf32>
    %712 = vector.extract_strided_slice %663 {offsets = [0, 16], sizes = [16, 8], strides = [1, 1]} : vector<16x32xf32> to vector<16x8xf32>
    %713 = vector.shape_cast %712 : vector<16x8xf32> to vector<2x8x8xf32>
    "tpu.trace_start"() <{level = 10 : i32, message = "bqd,bkd->bqk"}> : () -> ()
    %cst_241 = arith.constant dense<0.000000e+00> : vector<2x8x8xf32>
    %714 = tpu.matmul %709, %711, %cst_241 {dimension_numbers = #tpu.dot_dimension_numbers<[2], [2], [1], [1], [0, 0, 0, 1, 1, 1], [0], [0]>} : vector<2x8x8xf32>, vector<2x8x8xf32>, vector<2x8x8xf32> -> vector<2x8x8xf32>
    "tpu.trace_stop"() : () -> ()
    %cst_242 = arith.constant 0.353553385 : f32
    %715 = vector.broadcast %cst_242 : f32 to vector<2x8x8xf32>
    %716 = arith.mulf %714, %715 : vector<2x8x8xf32>
    %717 = arith.addf %716, %15 : vector<2x8x8xf32>
    %cst_243 = arith.constant dense<0xFF800000> : vector<2x8xf32>
    %718 = vector.multi_reduction <maximumf>, %717, %cst_243 [2] : vector<2x8x8xf32> to vector<2x8xf32>
    %719 = vector.shape_cast %718 : vector<2x8xf32> to vector<2x8x1xf32>
    %720 = vector.broadcast %719 : vector<2x8x1xf32> to vector<2x8x8xf32>
    %721 = arith.subf %717, %720 : vector<2x8x8xf32>
    %722 = math.exp %721 : vector<2x8x8xf32>
    %cst_244 = arith.constant dense<0.000000e+00> : vector<2x8xf32>
    %723 = vector.multi_reduction <add>, %722, %cst_244 [2] : vector<2x8x8xf32> to vector<2x8xf32>
    %724 = vector.shape_cast %723 : vector<2x8xf32> to vector<2x8x1xf32>
    %725 = tpu.reciprocal %724 {approx = true} : vector<2x8x1xf32> -> vector<2x8x1xf32>
    %726 = vector.broadcast %725 : vector<2x8x1xf32> to vector<2x8x8xf32>
    %727 = arith.mulf %722, %726 : vector<2x8x8xf32>
    "tpu.trace_start"() <{level = 10 : i32, message = "bqk,bkd->bqd"}> : () -> ()
    %cst_245 = arith.constant dense<0.000000e+00> : vector<2x8x8xf32>
    %728 = tpu.matmul %727, %713, %cst_245 {dimension_numbers = #tpu.dot_dimension_numbers<[2], [1], [1], [2], [0, 0, 0, 1, 1, 2], [0], [0]>} : vector<2x8x8xf32>, vector<2x8x8xf32>, vector<2x8x8xf32> -> vector<2x8x8xf32>
    "tpu.trace_stop"() : () -> ()
    %729 = vector.shape_cast %728 : vector<2x8x8xf32> to vector<16x8xf32>
    %730 = vector.extract_strided_slice %657 {offsets = [0, 24], sizes = [16, 8], strides = [1, 1]} : vector<16x32xf32> to vector<16x8xf32>
    %731 = vector.shape_cast %730 : vector<16x8xf32> to vector<2x8x8xf32>
    %732 = vector.extract_strided_slice %662 {offsets = [0, 24], sizes = [16, 8], strides = [1, 1]} : vector<16x32xf32> to vector<16x8xf32>
    %733 = vector.shape_cast %732 : vector<16x8xf32> to vector<2x8x8xf32>
    %734 = vector.extract_strided_slice %663 {offsets = [0, 24], sizes = [16, 8], strides = [1, 1]} : vector<16x32xf32> to vector<16x8xf32>
    %735 = vector.shape_cast %734 : vector<16x8xf32> to vector<2x8x8xf32>
    "tpu.trace_start"() <{level = 10 : i32, message = "bqd,bkd->bqk"}> : () -> ()
    %cst_246 = arith.constant dense<0.000000e+00> : vector<2x8x8xf32>
    %736 = tpu.matmul %731, %733, %cst_246 {dimension_numbers = #tpu.dot_dimension_numbers<[2], [2], [1], [1], [0, 0, 0, 1, 1, 1], [0], [0]>} : vector<2x8x8xf32>, vector<2x8x8xf32>, vector<2x8x8xf32> -> vector<2x8x8xf32>
    "tpu.trace_stop"() : () -> ()
    %cst_247 = arith.constant 0.353553385 : f32
    %737 = vector.broadcast %cst_247 : f32 to vector<2x8x8xf32>
    %738 = arith.mulf %736, %737 : vector<2x8x8xf32>
    %739 = arith.addf %738, %15 : vector<2x8x8xf32>
    %cst_248 = arith.constant dense<0xFF800000> : vector<2x8xf32>
    %740 = vector.multi_reduction <maximumf>, %739, %cst_248 [2] : vector<2x8x8xf32> to vector<2x8xf32>
    %741 = vector.shape_cast %740 : vector<2x8xf32> to vector<2x8x1xf32>
    %742 = vector.broadcast %741 : vector<2x8x1xf32> to vector<2x8x8xf32>
    %743 = arith.subf %739, %742 : vector<2x8x8xf32>
    %744 = math.exp %743 : vector<2x8x8xf32>
    %cst_249 = arith.constant dense<0.000000e+00> : vector<2x8xf32>
    %745 = vector.multi_reduction <add>, %744, %cst_249 [2] : vector<2x8x8xf32> to vector<2x8xf32>
    %746 = vector.shape_cast %745 : vector<2x8xf32> to vector<2x8x1xf32>
    %747 = tpu.reciprocal %746 {approx = true} : vector<2x8x1xf32> -> vector<2x8x1xf32>
    %748 = vector.broadcast %747 : vector<2x8x1xf32> to vector<2x8x8xf32>
    %749 = arith.mulf %744, %748 : vector<2x8x8xf32>
    "tpu.trace_start"() <{level = 10 : i32, message = "bqk,bkd->bqd"}> : () -> ()
    %cst_250 = arith.constant dense<0.000000e+00> : vector<2x8x8xf32>
    %750 = tpu.matmul %749, %735, %cst_250 {dimension_numbers = #tpu.dot_dimension_numbers<[2], [1], [1], [2], [0, 0, 0, 1, 1, 2], [0], [0]>} : vector<2x8x8xf32>, vector<2x8x8xf32>, vector<2x8x8xf32> -> vector<2x8x8xf32>
    "tpu.trace_stop"() : () -> ()
    %751 = vector.shape_cast %750 : vector<2x8x8xf32> to vector<16x8xf32>
    %752 = tpu.concatenate %685, %707, %729, %751 in 1 : vector<16x8xf32>, vector<16x8xf32>, vector<16x8xf32>, vector<16x8xf32> -> vector<16x32xf32>
    %cst_251 = arith.constant dense<0.000000e+00> : vector<16x32xf32>
    %753 = tpu.matmul %752, %633, %cst_251 {dimension_numbers = #tpu.dot_dimension_numbers<[1], [0], [0], [1], [0, 0, 1, 1], [], []>} : vector<16x32xf32>, vector<32x32xf32>, vector<16x32xf32> -> vector<16x32xf32>
    %754 = arith.addf %627, %753 : vector<16x32xf32>
    %755 = arith.mulf %754, %754 : vector<16x32xf32>
    %cst_252 = arith.constant dense<0.000000e+00> : vector<16xf32>
    %756 = vector.multi_reduction <add>, %755, %cst_252 [1] : vector<16x32xf32> to vector<16xf32>
    %757 = vector.shape_cast %756 : vector<16xf32> to vector<16x1xf32>
    %cst_253 = arith.constant 3.200000e+01 : f32
    %758 = vector.broadcast %cst_253 : f32 to vector<16x1xf32>
    %759 = arith.divf %757, %758 : vector<16x1xf32>
    %cst_254 = arith.constant 9.99999997E-7 : f32
    %760 = vector.broadcast %cst_254 : f32 to vector<16x1xf32>
    %761 = arith.addf %759, %760 : vector<16x1xf32>
    %762 = math.rsqrt %761 : vector<16x1xf32>
    %763 = vector.broadcast %762 : vector<16x1xf32> to vector<16x32xf32>
    %764 = arith.mulf %754, %763 : vector<16x32xf32>
    %765 = vector.broadcast %635 : vector<1x32xf32> to vector<16x32xf32>
    %766 = arith.mulf %764, %765 : vector<16x32xf32>
    %cst_255 = arith.constant dense<0.000000e+00> : vector<16x128xf32>
    %767 = tpu.matmul %766, %637, %cst_255 {dimension_numbers = #tpu.dot_dimension_numbers<[1], [0], [0], [1], [0, 0, 1, 1], [], []>} : vector<16x32xf32>, vector<32x128xf32>, vector<16x128xf32> -> vector<16x128xf32>
    %768 = vector.extract_strided_slice %767 {offsets = [0, 0], sizes = [16, 64], strides = [1, 1]} : vector<16x128xf32> to vector<16x64xf32>
    %769 = vector.extract_strided_slice %767 {offsets = [0, 64], sizes = [16, 64], strides = [1, 1]} : vector<16x128xf32> to vector<16x64xf32>
    %cst_256 = arith.constant 0.000000e+00 : f32
    %770 = vector.broadcast %cst_256 : f32 to vector<16x64xf32>
    %771 = arith.subf %770, %768 : vector<16x64xf32>
    %772 = math.exp %771 : vector<16x64xf32>
    %cst_257 = arith.constant 1.000000e+00 : f32
    %773 = vector.broadcast %cst_257 : f32 to vector<16x64xf32>
    %774 = arith.addf %773, %772 : vector<16x64xf32>
    %cst_258 = arith.constant 1.000000e+00 : f32
    %775 = vector.broadcast %cst_258 : f32 to vector<16x64xf32>
    %776 = arith.divf %775, %774 : vector<16x64xf32>
    %777 = arith.mulf %768, %776 : vector<16x64xf32>
    %778 = arith.mulf %777, %769 : vector<16x64xf32>
    %cst_259 = arith.constant dense<0.000000e+00> : vector<16x32xf32>
    %779 = tpu.matmul %778, %639, %cst_259 {dimension_numbers = #tpu.dot_dimension_numbers<[1], [0], [0], [1], [0, 0, 1, 1], [], []>} : vector<16x64xf32>, vector<64x32xf32>, vector<16x32xf32> -> vector<16x32xf32>
    %780 = arith.addf %754, %779 : vector<16x32xf32>
    %c5 = arith.constant 5 : index
    %c0_260 = arith.constant 0 : index
    %c0_261 = arith.constant 0 : index
    %781 = vector.load %arg4[%c5, %c0_260, %c0_261] : memref<7x1x32xf32, #tpu.memory_space<vmem>>, vector<1x1x32xf32>
    %782 = vector.shape_cast %781 : vector<1x1x32xf32> to vector<1x32xf32>
    %c5_262 = arith.constant 5 : index
    %c0_263 = arith.constant 0 : index
    %c0_264 = arith.constant 0 : index
    %783 = vector.load %arg5[%c5_262, %c0_263, %c0_264] : memref<7x32x160xf32, #tpu.memory_space<vmem>>, vector<1x32x160xf32>
    %784 = vector.shape_cast %783 : vector<1x32x160xf32> to vector<32x160xf32>
    %c5_265 = arith.constant 5 : index
    %c0_266 = arith.constant 0 : index
    %c0_267 = arith.constant 0 : index
    %785 = vector.load %arg6[%c5_265, %c0_266, %c0_267] : memref<7x32x32xf32, #tpu.memory_space<vmem>>, vector<1x32x32xf32>
    %786 = vector.shape_cast %785 : vector<1x32x32xf32> to vector<32x32xf32>
    %c5_268 = arith.constant 5 : index
    %c0_269 = arith.constant 0 : index
    %c0_270 = arith.constant 0 : index
    %787 = vector.load %arg7[%c5_268, %c0_269, %c0_270] : memref<7x1x32xf32, #tpu.memory_space<vmem>>, vector<1x1x32xf32>
    %788 = vector.shape_cast %787 : vector<1x1x32xf32> to vector<1x32xf32>
    %c5_271 = arith.constant 5 : index
    %c0_272 = arith.constant 0 : index
    %c0_273 = arith.constant 0 : index
    %789 = vector.load %arg8[%c5_271, %c0_272, %c0_273] : memref<7x32x128xf32, #tpu.memory_space<vmem>>, vector<1x32x128xf32>
    %790 = vector.shape_cast %789 : vector<1x32x128xf32> to vector<32x128xf32>
    %c5_274 = arith.constant 5 : index
    %c0_275 = arith.constant 0 : index
    %c0_276 = arith.constant 0 : index
    %791 = vector.load %arg9[%c5_274, %c0_275, %c0_276] : memref<7x64x32xf32, #tpu.memory_space<vmem>>, vector<1x64x32xf32>
    %792 = vector.shape_cast %791 : vector<1x64x32xf32> to vector<64x32xf32>
    %793 = arith.mulf %780, %780 : vector<16x32xf32>
    %cst_277 = arith.constant dense<0.000000e+00> : vector<16xf32>
    %794 = vector.multi_reduction <add>, %793, %cst_277 [1] : vector<16x32xf32> to vector<16xf32>
    %795 = vector.shape_cast %794 : vector<16xf32> to vector<16x1xf32>
    %cst_278 = arith.constant 3.200000e+01 : f32
    %796 = vector.broadcast %cst_278 : f32 to vector<16x1xf32>
    %797 = arith.divf %795, %796 : vector<16x1xf32>
    %cst_279 = arith.constant 9.99999997E-7 : f32
    %798 = vector.broadcast %cst_279 : f32 to vector<16x1xf32>
    %799 = arith.addf %797, %798 : vector<16x1xf32>
    %800 = math.rsqrt %799 : vector<16x1xf32>
    %801 = vector.broadcast %800 : vector<16x1xf32> to vector<16x32xf32>
    %802 = arith.mulf %780, %801 : vector<16x32xf32>
    %803 = vector.broadcast %782 : vector<1x32xf32> to vector<16x32xf32>
    %804 = arith.mulf %802, %803 : vector<16x32xf32>
    %cst_280 = arith.constant dense<0.000000e+00> : vector<16x160xf32>
    %805 = tpu.matmul %804, %784, %cst_280 {dimension_numbers = #tpu.dot_dimension_numbers<[1], [0], [0], [1], [0, 0, 1, 1], [], []>} : vector<16x32xf32>, vector<32x160xf32>, vector<16x160xf32> -> vector<16x160xf32>
    %806 = vector.extract_strided_slice %805 {offsets = [0, 0], sizes = [16, 32], strides = [1, 1]} : vector<16x160xf32> to vector<16x32xf32>
    %807 = arith.mulf %806, %8 : vector<16x32xf32>
    %808 = vector.extract_strided_slice %805 {offsets = [0, 32], sizes = [16, 32], strides = [1, 1]} : vector<16x160xf32> to vector<16x32xf32>
    %809 = arith.mulf %808, %9 : vector<16x32xf32>
    %810 = arith.addf %807, %809 : vector<16x32xf32>
    %811 = vector.extract_strided_slice %805 {offsets = [0, 64], sizes = [16, 32], strides = [1, 1]} : vector<16x160xf32> to vector<16x32xf32>
    %812 = arith.mulf %811, %8 : vector<16x32xf32>
    %813 = vector.extract_strided_slice %805 {offsets = [0, 96], sizes = [16, 32], strides = [1, 1]} : vector<16x160xf32> to vector<16x32xf32>
    %814 = arith.mulf %813, %9 : vector<16x32xf32>
    %815 = arith.addf %812, %814 : vector<16x32xf32>
    %816 = vector.extract_strided_slice %805 {offsets = [0, 128], sizes = [16, 32], strides = [1, 1]} : vector<16x160xf32> to vector<16x32xf32>
    %817 = vector.extract_strided_slice %810 {offsets = [0, 0], sizes = [16, 8], strides = [1, 1]} : vector<16x32xf32> to vector<16x8xf32>
    %818 = vector.shape_cast %817 : vector<16x8xf32> to vector<2x8x8xf32>
    %819 = vector.extract_strided_slice %815 {offsets = [0, 0], sizes = [16, 8], strides = [1, 1]} : vector<16x32xf32> to vector<16x8xf32>
    %820 = vector.shape_cast %819 : vector<16x8xf32> to vector<2x8x8xf32>
    %821 = vector.extract_strided_slice %816 {offsets = [0, 0], sizes = [16, 8], strides = [1, 1]} : vector<16x32xf32> to vector<16x8xf32>
    %822 = vector.shape_cast %821 : vector<16x8xf32> to vector<2x8x8xf32>
    "tpu.trace_start"() <{level = 10 : i32, message = "bqd,bkd->bqk"}> : () -> ()
    %cst_281 = arith.constant dense<0.000000e+00> : vector<2x8x8xf32>
    %823 = tpu.matmul %818, %820, %cst_281 {dimension_numbers = #tpu.dot_dimension_numbers<[2], [2], [1], [1], [0, 0, 0, 1, 1, 1], [0], [0]>} : vector<2x8x8xf32>, vector<2x8x8xf32>, vector<2x8x8xf32> -> vector<2x8x8xf32>
    "tpu.trace_stop"() : () -> ()
    %cst_282 = arith.constant 0.353553385 : f32
    %824 = vector.broadcast %cst_282 : f32 to vector<2x8x8xf32>
    %825 = arith.mulf %823, %824 : vector<2x8x8xf32>
    %826 = arith.addf %825, %15 : vector<2x8x8xf32>
    %cst_283 = arith.constant dense<0xFF800000> : vector<2x8xf32>
    %827 = vector.multi_reduction <maximumf>, %826, %cst_283 [2] : vector<2x8x8xf32> to vector<2x8xf32>
    %828 = vector.shape_cast %827 : vector<2x8xf32> to vector<2x8x1xf32>
    %829 = vector.broadcast %828 : vector<2x8x1xf32> to vector<2x8x8xf32>
    %830 = arith.subf %826, %829 : vector<2x8x8xf32>
    %831 = math.exp %830 : vector<2x8x8xf32>
    %cst_284 = arith.constant dense<0.000000e+00> : vector<2x8xf32>
    %832 = vector.multi_reduction <add>, %831, %cst_284 [2] : vector<2x8x8xf32> to vector<2x8xf32>
    %833 = vector.shape_cast %832 : vector<2x8xf32> to vector<2x8x1xf32>
    %834 = tpu.reciprocal %833 {approx = true} : vector<2x8x1xf32> -> vector<2x8x1xf32>
    %835 = vector.broadcast %834 : vector<2x8x1xf32> to vector<2x8x8xf32>
    %836 = arith.mulf %831, %835 : vector<2x8x8xf32>
    "tpu.trace_start"() <{level = 10 : i32, message = "bqk,bkd->bqd"}> : () -> ()
    %cst_285 = arith.constant dense<0.000000e+00> : vector<2x8x8xf32>
    %837 = tpu.matmul %836, %822, %cst_285 {dimension_numbers = #tpu.dot_dimension_numbers<[2], [1], [1], [2], [0, 0, 0, 1, 1, 2], [0], [0]>} : vector<2x8x8xf32>, vector<2x8x8xf32>, vector<2x8x8xf32> -> vector<2x8x8xf32>
    "tpu.trace_stop"() : () -> ()
    %838 = vector.shape_cast %837 : vector<2x8x8xf32> to vector<16x8xf32>
    %839 = vector.extract_strided_slice %810 {offsets = [0, 8], sizes = [16, 8], strides = [1, 1]} : vector<16x32xf32> to vector<16x8xf32>
    %840 = vector.shape_cast %839 : vector<16x8xf32> to vector<2x8x8xf32>
    %841 = vector.extract_strided_slice %815 {offsets = [0, 8], sizes = [16, 8], strides = [1, 1]} : vector<16x32xf32> to vector<16x8xf32>
    %842 = vector.shape_cast %841 : vector<16x8xf32> to vector<2x8x8xf32>
    %843 = vector.extract_strided_slice %816 {offsets = [0, 8], sizes = [16, 8], strides = [1, 1]} : vector<16x32xf32> to vector<16x8xf32>
    %844 = vector.shape_cast %843 : vector<16x8xf32> to vector<2x8x8xf32>
    "tpu.trace_start"() <{level = 10 : i32, message = "bqd,bkd->bqk"}> : () -> ()
    %cst_286 = arith.constant dense<0.000000e+00> : vector<2x8x8xf32>
    %845 = tpu.matmul %840, %842, %cst_286 {dimension_numbers = #tpu.dot_dimension_numbers<[2], [2], [1], [1], [0, 0, 0, 1, 1, 1], [0], [0]>} : vector<2x8x8xf32>, vector<2x8x8xf32>, vector<2x8x8xf32> -> vector<2x8x8xf32>
    "tpu.trace_stop"() : () -> ()
    %cst_287 = arith.constant 0.353553385 : f32
    %846 = vector.broadcast %cst_287 : f32 to vector<2x8x8xf32>
    %847 = arith.mulf %845, %846 : vector<2x8x8xf32>
    %848 = arith.addf %847, %15 : vector<2x8x8xf32>
    %cst_288 = arith.constant dense<0xFF800000> : vector<2x8xf32>
    %849 = vector.multi_reduction <maximumf>, %848, %cst_288 [2] : vector<2x8x8xf32> to vector<2x8xf32>
    %850 = vector.shape_cast %849 : vector<2x8xf32> to vector<2x8x1xf32>
    %851 = vector.broadcast %850 : vector<2x8x1xf32> to vector<2x8x8xf32>
    %852 = arith.subf %848, %851 : vector<2x8x8xf32>
    %853 = math.exp %852 : vector<2x8x8xf32>
    %cst_289 = arith.constant dense<0.000000e+00> : vector<2x8xf32>
    %854 = vector.multi_reduction <add>, %853, %cst_289 [2] : vector<2x8x8xf32> to vector<2x8xf32>
    %855 = vector.shape_cast %854 : vector<2x8xf32> to vector<2x8x1xf32>
    %856 = tpu.reciprocal %855 {approx = true} : vector<2x8x1xf32> -> vector<2x8x1xf32>
    %857 = vector.broadcast %856 : vector<2x8x1xf32> to vector<2x8x8xf32>
    %858 = arith.mulf %853, %857 : vector<2x8x8xf32>
    "tpu.trace_start"() <{level = 10 : i32, message = "bqk,bkd->bqd"}> : () -> ()
    %cst_290 = arith.constant dense<0.000000e+00> : vector<2x8x8xf32>
    %859 = tpu.matmul %858, %844, %cst_290 {dimension_numbers = #tpu.dot_dimension_numbers<[2], [1], [1], [2], [0, 0, 0, 1, 1, 2], [0], [0]>} : vector<2x8x8xf32>, vector<2x8x8xf32>, vector<2x8x8xf32> -> vector<2x8x8xf32>
    "tpu.trace_stop"() : () -> ()
    %860 = vector.shape_cast %859 : vector<2x8x8xf32> to vector<16x8xf32>
    %861 = vector.extract_strided_slice %810 {offsets = [0, 16], sizes = [16, 8], strides = [1, 1]} : vector<16x32xf32> to vector<16x8xf32>
    %862 = vector.shape_cast %861 : vector<16x8xf32> to vector<2x8x8xf32>
    %863 = vector.extract_strided_slice %815 {offsets = [0, 16], sizes = [16, 8], strides = [1, 1]} : vector<16x32xf32> to vector<16x8xf32>
    %864 = vector.shape_cast %863 : vector<16x8xf32> to vector<2x8x8xf32>
    %865 = vector.extract_strided_slice %816 {offsets = [0, 16], sizes = [16, 8], strides = [1, 1]} : vector<16x32xf32> to vector<16x8xf32>
    %866 = vector.shape_cast %865 : vector<16x8xf32> to vector<2x8x8xf32>
    "tpu.trace_start"() <{level = 10 : i32, message = "bqd,bkd->bqk"}> : () -> ()
    %cst_291 = arith.constant dense<0.000000e+00> : vector<2x8x8xf32>
    %867 = tpu.matmul %862, %864, %cst_291 {dimension_numbers = #tpu.dot_dimension_numbers<[2], [2], [1], [1], [0, 0, 0, 1, 1, 1], [0], [0]>} : vector<2x8x8xf32>, vector<2x8x8xf32>, vector<2x8x8xf32> -> vector<2x8x8xf32>
    "tpu.trace_stop"() : () -> ()
    %cst_292 = arith.constant 0.353553385 : f32
    %868 = vector.broadcast %cst_292 : f32 to vector<2x8x8xf32>
    %869 = arith.mulf %867, %868 : vector<2x8x8xf32>
    %870 = arith.addf %869, %15 : vector<2x8x8xf32>
    %cst_293 = arith.constant dense<0xFF800000> : vector<2x8xf32>
    %871 = vector.multi_reduction <maximumf>, %870, %cst_293 [2] : vector<2x8x8xf32> to vector<2x8xf32>
    %872 = vector.shape_cast %871 : vector<2x8xf32> to vector<2x8x1xf32>
    %873 = vector.broadcast %872 : vector<2x8x1xf32> to vector<2x8x8xf32>
    %874 = arith.subf %870, %873 : vector<2x8x8xf32>
    %875 = math.exp %874 : vector<2x8x8xf32>
    %cst_294 = arith.constant dense<0.000000e+00> : vector<2x8xf32>
    %876 = vector.multi_reduction <add>, %875, %cst_294 [2] : vector<2x8x8xf32> to vector<2x8xf32>
    %877 = vector.shape_cast %876 : vector<2x8xf32> to vector<2x8x1xf32>
    %878 = tpu.reciprocal %877 {approx = true} : vector<2x8x1xf32> -> vector<2x8x1xf32>
    %879 = vector.broadcast %878 : vector<2x8x1xf32> to vector<2x8x8xf32>
    %880 = arith.mulf %875, %879 : vector<2x8x8xf32>
    "tpu.trace_start"() <{level = 10 : i32, message = "bqk,bkd->bqd"}> : () -> ()
    %cst_295 = arith.constant dense<0.000000e+00> : vector<2x8x8xf32>
    %881 = tpu.matmul %880, %866, %cst_295 {dimension_numbers = #tpu.dot_dimension_numbers<[2], [1], [1], [2], [0, 0, 0, 1, 1, 2], [0], [0]>} : vector<2x8x8xf32>, vector<2x8x8xf32>, vector<2x8x8xf32> -> vector<2x8x8xf32>
    "tpu.trace_stop"() : () -> ()
    %882 = vector.shape_cast %881 : vector<2x8x8xf32> to vector<16x8xf32>
    %883 = vector.extract_strided_slice %810 {offsets = [0, 24], sizes = [16, 8], strides = [1, 1]} : vector<16x32xf32> to vector<16x8xf32>
    %884 = vector.shape_cast %883 : vector<16x8xf32> to vector<2x8x8xf32>
    %885 = vector.extract_strided_slice %815 {offsets = [0, 24], sizes = [16, 8], strides = [1, 1]} : vector<16x32xf32> to vector<16x8xf32>
    %886 = vector.shape_cast %885 : vector<16x8xf32> to vector<2x8x8xf32>
    %887 = vector.extract_strided_slice %816 {offsets = [0, 24], sizes = [16, 8], strides = [1, 1]} : vector<16x32xf32> to vector<16x8xf32>
    %888 = vector.shape_cast %887 : vector<16x8xf32> to vector<2x8x8xf32>
    "tpu.trace_start"() <{level = 10 : i32, message = "bqd,bkd->bqk"}> : () -> ()
    %cst_296 = arith.constant dense<0.000000e+00> : vector<2x8x8xf32>
    %889 = tpu.matmul %884, %886, %cst_296 {dimension_numbers = #tpu.dot_dimension_numbers<[2], [2], [1], [1], [0, 0, 0, 1, 1, 1], [0], [0]>} : vector<2x8x8xf32>, vector<2x8x8xf32>, vector<2x8x8xf32> -> vector<2x8x8xf32>
    "tpu.trace_stop"() : () -> ()
    %cst_297 = arith.constant 0.353553385 : f32
    %890 = vector.broadcast %cst_297 : f32 to vector<2x8x8xf32>
    %891 = arith.mulf %889, %890 : vector<2x8x8xf32>
    %892 = arith.addf %891, %15 : vector<2x8x8xf32>
    %cst_298 = arith.constant dense<0xFF800000> : vector<2x8xf32>
    %893 = vector.multi_reduction <maximumf>, %892, %cst_298 [2] : vector<2x8x8xf32> to vector<2x8xf32>
    %894 = vector.shape_cast %893 : vector<2x8xf32> to vector<2x8x1xf32>
    %895 = vector.broadcast %894 : vector<2x8x1xf32> to vector<2x8x8xf32>
    %896 = arith.subf %892, %895 : vector<2x8x8xf32>
    %897 = math.exp %896 : vector<2x8x8xf32>
    %cst_299 = arith.constant dense<0.000000e+00> : vector<2x8xf32>
    %898 = vector.multi_reduction <add>, %897, %cst_299 [2] : vector<2x8x8xf32> to vector<2x8xf32>
    %899 = vector.shape_cast %898 : vector<2x8xf32> to vector<2x8x1xf32>
    %900 = tpu.reciprocal %899 {approx = true} : vector<2x8x1xf32> -> vector<2x8x1xf32>
    %901 = vector.broadcast %900 : vector<2x8x1xf32> to vector<2x8x8xf32>
    %902 = arith.mulf %897, %901 : vector<2x8x8xf32>
    "tpu.trace_start"() <{level = 10 : i32, message = "bqk,bkd->bqd"}> : () -> ()
    %cst_300 = arith.constant dense<0.000000e+00> : vector<2x8x8xf32>
    %903 = tpu.matmul %902, %888, %cst_300 {dimension_numbers = #tpu.dot_dimension_numbers<[2], [1], [1], [2], [0, 0, 0, 1, 1, 2], [0], [0]>} : vector<2x8x8xf32>, vector<2x8x8xf32>, vector<2x8x8xf32> -> vector<2x8x8xf32>
    "tpu.trace_stop"() : () -> ()
    %904 = vector.shape_cast %903 : vector<2x8x8xf32> to vector<16x8xf32>
    %905 = tpu.concatenate %838, %860, %882, %904 in 1 : vector<16x8xf32>, vector<16x8xf32>, vector<16x8xf32>, vector<16x8xf32> -> vector<16x32xf32>
    %cst_301 = arith.constant dense<0.000000e+00> : vector<16x32xf32>
    %906 = tpu.matmul %905, %786, %cst_301 {dimension_numbers = #tpu.dot_dimension_numbers<[1], [0], [0], [1], [0, 0, 1, 1], [], []>} : vector<16x32xf32>, vector<32x32xf32>, vector<16x32xf32> -> vector<16x32xf32>
    %907 = arith.addf %780, %906 : vector<16x32xf32>
    %908 = arith.mulf %907, %907 : vector<16x32xf32>
    %cst_302 = arith.constant dense<0.000000e+00> : vector<16xf32>
    %909 = vector.multi_reduction <add>, %908, %cst_302 [1] : vector<16x32xf32> to vector<16xf32>
    %910 = vector.shape_cast %909 : vector<16xf32> to vector<16x1xf32>
    %cst_303 = arith.constant 3.200000e+01 : f32
    %911 = vector.broadcast %cst_303 : f32 to vector<16x1xf32>
    %912 = arith.divf %910, %911 : vector<16x1xf32>
    %cst_304 = arith.constant 9.99999997E-7 : f32
    %913 = vector.broadcast %cst_304 : f32 to vector<16x1xf32>
    %914 = arith.addf %912, %913 : vector<16x1xf32>
    %915 = math.rsqrt %914 : vector<16x1xf32>
    %916 = vector.broadcast %915 : vector<16x1xf32> to vector<16x32xf32>
    %917 = arith.mulf %907, %916 : vector<16x32xf32>
    %918 = vector.broadcast %788 : vector<1x32xf32> to vector<16x32xf32>
    %919 = arith.mulf %917, %918 : vector<16x32xf32>
    %cst_305 = arith.constant dense<0.000000e+00> : vector<16x128xf32>
    %920 = tpu.matmul %919, %790, %cst_305 {dimension_numbers = #tpu.dot_dimension_numbers<[1], [0], [0], [1], [0, 0, 1, 1], [], []>} : vector<16x32xf32>, vector<32x128xf32>, vector<16x128xf32> -> vector<16x128xf32>
    %921 = vector.extract_strided_slice %920 {offsets = [0, 0], sizes = [16, 64], strides = [1, 1]} : vector<16x128xf32> to vector<16x64xf32>
    %922 = vector.extract_strided_slice %920 {offsets = [0, 64], sizes = [16, 64], strides = [1, 1]} : vector<16x128xf32> to vector<16x64xf32>
    %cst_306 = arith.constant 0.000000e+00 : f32
    %923 = vector.broadcast %cst_306 : f32 to vector<16x64xf32>
    %924 = arith.subf %923, %921 : vector<16x64xf32>
    %925 = math.exp %924 : vector<16x64xf32>
    %cst_307 = arith.constant 1.000000e+00 : f32
    %926 = vector.broadcast %cst_307 : f32 to vector<16x64xf32>
    %927 = arith.addf %926, %925 : vector<16x64xf32>
    %cst_308 = arith.constant 1.000000e+00 : f32
    %928 = vector.broadcast %cst_308 : f32 to vector<16x64xf32>
    %929 = arith.divf %928, %927 : vector<16x64xf32>
    %930 = arith.mulf %921, %929 : vector<16x64xf32>
    %931 = arith.mulf %930, %922 : vector<16x64xf32>
    %cst_309 = arith.constant dense<0.000000e+00> : vector<16x32xf32>
    %932 = tpu.matmul %931, %792, %cst_309 {dimension_numbers = #tpu.dot_dimension_numbers<[1], [0], [0], [1], [0, 0, 1, 1], [], []>} : vector<16x64xf32>, vector<64x32xf32>, vector<16x32xf32> -> vector<16x32xf32>
    %933 = arith.addf %907, %932 : vector<16x32xf32>
    %c6 = arith.constant 6 : index
    %c0_310 = arith.constant 0 : index
    %c0_311 = arith.constant 0 : index
    %934 = vector.load %arg4[%c6, %c0_310, %c0_311] : memref<7x1x32xf32, #tpu.memory_space<vmem>>, vector<1x1x32xf32>
    %935 = vector.shape_cast %934 : vector<1x1x32xf32> to vector<1x32xf32>
    %c6_312 = arith.constant 6 : index
    %c0_313 = arith.constant 0 : index
    %c0_314 = arith.constant 0 : index
    %936 = vector.load %arg5[%c6_312, %c0_313, %c0_314] : memref<7x32x160xf32, #tpu.memory_space<vmem>>, vector<1x32x160xf32>
    %937 = vector.shape_cast %936 : vector<1x32x160xf32> to vector<32x160xf32>
    %c6_315 = arith.constant 6 : index
    %c0_316 = arith.constant 0 : index
    %c0_317 = arith.constant 0 : index
    %938 = vector.load %arg6[%c6_315, %c0_316, %c0_317] : memref<7x32x32xf32, #tpu.memory_space<vmem>>, vector<1x32x32xf32>
    %939 = vector.shape_cast %938 : vector<1x32x32xf32> to vector<32x32xf32>
    %c6_318 = arith.constant 6 : index
    %c0_319 = arith.constant 0 : index
    %c0_320 = arith.constant 0 : index
    %940 = vector.load %arg7[%c6_318, %c0_319, %c0_320] : memref<7x1x32xf32, #tpu.memory_space<vmem>>, vector<1x1x32xf32>
    %941 = vector.shape_cast %940 : vector<1x1x32xf32> to vector<1x32xf32>
    %c6_321 = arith.constant 6 : index
    %c0_322 = arith.constant 0 : index
    %c0_323 = arith.constant 0 : index
    %942 = vector.load %arg8[%c6_321, %c0_322, %c0_323] : memref<7x32x128xf32, #tpu.memory_space<vmem>>, vector<1x32x128xf32>
    %943 = vector.shape_cast %942 : vector<1x32x128xf32> to vector<32x128xf32>
    %c6_324 = arith.constant 6 : index
    %c0_325 = arith.constant 0 : index
    %c0_326 = arith.constant 0 : index
    %944 = vector.load %arg9[%c6_324, %c0_325, %c0_326] : memref<7x64x32xf32, #tpu.memory_space<vmem>>, vector<1x64x32xf32>
    %945 = vector.shape_cast %944 : vector<1x64x32xf32> to vector<64x32xf32>
    %946 = arith.mulf %933, %933 : vector<16x32xf32>
    %cst_327 = arith.constant dense<0.000000e+00> : vector<16xf32>
    %947 = vector.multi_reduction <add>, %946, %cst_327 [1] : vector<16x32xf32> to vector<16xf32>
    %948 = vector.shape_cast %947 : vector<16xf32> to vector<16x1xf32>
    %cst_328 = arith.constant 3.200000e+01 : f32
    %949 = vector.broadcast %cst_328 : f32 to vector<16x1xf32>
    %950 = arith.divf %948, %949 : vector<16x1xf32>
    %cst_329 = arith.constant 9.99999997E-7 : f32
    %951 = vector.broadcast %cst_329 : f32 to vector<16x1xf32>
    %952 = arith.addf %950, %951 : vector<16x1xf32>
    %953 = math.rsqrt %952 : vector<16x1xf32>
    %954 = vector.broadcast %953 : vector<16x1xf32> to vector<16x32xf32>
    %955 = arith.mulf %933, %954 : vector<16x32xf32>
    %956 = vector.broadcast %935 : vector<1x32xf32> to vector<16x32xf32>
    %957 = arith.mulf %955, %956 : vector<16x32xf32>
    %cst_330 = arith.constant dense<0.000000e+00> : vector<16x160xf32>
    %958 = tpu.matmul %957, %937, %cst_330 {dimension_numbers = #tpu.dot_dimension_numbers<[1], [0], [0], [1], [0, 0, 1, 1], [], []>} : vector<16x32xf32>, vector<32x160xf32>, vector<16x160xf32> -> vector<16x160xf32>
    %959 = vector.extract_strided_slice %958 {offsets = [0, 0], sizes = [16, 32], strides = [1, 1]} : vector<16x160xf32> to vector<16x32xf32>
    %960 = arith.mulf %959, %8 : vector<16x32xf32>
    %961 = vector.extract_strided_slice %958 {offsets = [0, 32], sizes = [16, 32], strides = [1, 1]} : vector<16x160xf32> to vector<16x32xf32>
    %962 = arith.mulf %961, %9 : vector<16x32xf32>
    %963 = arith.addf %960, %962 : vector<16x32xf32>
    %964 = vector.extract_strided_slice %958 {offsets = [0, 64], sizes = [16, 32], strides = [1, 1]} : vector<16x160xf32> to vector<16x32xf32>
    %965 = arith.mulf %964, %8 : vector<16x32xf32>
    %966 = vector.extract_strided_slice %958 {offsets = [0, 96], sizes = [16, 32], strides = [1, 1]} : vector<16x160xf32> to vector<16x32xf32>
    %967 = arith.mulf %966, %9 : vector<16x32xf32>
    %968 = arith.addf %965, %967 : vector<16x32xf32>
    %969 = vector.extract_strided_slice %958 {offsets = [0, 128], sizes = [16, 32], strides = [1, 1]} : vector<16x160xf32> to vector<16x32xf32>
    %970 = vector.extract_strided_slice %963 {offsets = [0, 0], sizes = [16, 8], strides = [1, 1]} : vector<16x32xf32> to vector<16x8xf32>
    %971 = vector.shape_cast %970 : vector<16x8xf32> to vector<2x8x8xf32>
    %972 = vector.extract_strided_slice %968 {offsets = [0, 0], sizes = [16, 8], strides = [1, 1]} : vector<16x32xf32> to vector<16x8xf32>
    %973 = vector.shape_cast %972 : vector<16x8xf32> to vector<2x8x8xf32>
    %974 = vector.extract_strided_slice %969 {offsets = [0, 0], sizes = [16, 8], strides = [1, 1]} : vector<16x32xf32> to vector<16x8xf32>
    %975 = vector.shape_cast %974 : vector<16x8xf32> to vector<2x8x8xf32>
    "tpu.trace_start"() <{level = 10 : i32, message = "bqd,bkd->bqk"}> : () -> ()
    %cst_331 = arith.constant dense<0.000000e+00> : vector<2x8x8xf32>
    %976 = tpu.matmul %971, %973, %cst_331 {dimension_numbers = #tpu.dot_dimension_numbers<[2], [2], [1], [1], [0, 0, 0, 1, 1, 1], [0], [0]>} : vector<2x8x8xf32>, vector<2x8x8xf32>, vector<2x8x8xf32> -> vector<2x8x8xf32>
    "tpu.trace_stop"() : () -> ()
    %cst_332 = arith.constant 0.353553385 : f32
    %977 = vector.broadcast %cst_332 : f32 to vector<2x8x8xf32>
    %978 = arith.mulf %976, %977 : vector<2x8x8xf32>
    %979 = arith.addf %978, %15 : vector<2x8x8xf32>
    %cst_333 = arith.constant dense<0xFF800000> : vector<2x8xf32>
    %980 = vector.multi_reduction <maximumf>, %979, %cst_333 [2] : vector<2x8x8xf32> to vector<2x8xf32>
    %981 = vector.shape_cast %980 : vector<2x8xf32> to vector<2x8x1xf32>
    %982 = vector.broadcast %981 : vector<2x8x1xf32> to vector<2x8x8xf32>
    %983 = arith.subf %979, %982 : vector<2x8x8xf32>
    %984 = math.exp %983 : vector<2x8x8xf32>
    %cst_334 = arith.constant dense<0.000000e+00> : vector<2x8xf32>
    %985 = vector.multi_reduction <add>, %984, %cst_334 [2] : vector<2x8x8xf32> to vector<2x8xf32>
    %986 = vector.shape_cast %985 : vector<2x8xf32> to vector<2x8x1xf32>
    %987 = tpu.reciprocal %986 {approx = true} : vector<2x8x1xf32> -> vector<2x8x1xf32>
    %988 = vector.broadcast %987 : vector<2x8x1xf32> to vector<2x8x8xf32>
    %989 = arith.mulf %984, %988 : vector<2x8x8xf32>
    "tpu.trace_start"() <{level = 10 : i32, message = "bqk,bkd->bqd"}> : () -> ()
    %cst_335 = arith.constant dense<0.000000e+00> : vector<2x8x8xf32>
    %990 = tpu.matmul %989, %975, %cst_335 {dimension_numbers = #tpu.dot_dimension_numbers<[2], [1], [1], [2], [0, 0, 0, 1, 1, 2], [0], [0]>} : vector<2x8x8xf32>, vector<2x8x8xf32>, vector<2x8x8xf32> -> vector<2x8x8xf32>
    "tpu.trace_stop"() : () -> ()
    %991 = vector.shape_cast %990 : vector<2x8x8xf32> to vector<16x8xf32>
    %992 = vector.extract_strided_slice %963 {offsets = [0, 8], sizes = [16, 8], strides = [1, 1]} : vector<16x32xf32> to vector<16x8xf32>
    %993 = vector.shape_cast %992 : vector<16x8xf32> to vector<2x8x8xf32>
    %994 = vector.extract_strided_slice %968 {offsets = [0, 8], sizes = [16, 8], strides = [1, 1]} : vector<16x32xf32> to vector<16x8xf32>
    %995 = vector.shape_cast %994 : vector<16x8xf32> to vector<2x8x8xf32>
    %996 = vector.extract_strided_slice %969 {offsets = [0, 8], sizes = [16, 8], strides = [1, 1]} : vector<16x32xf32> to vector<16x8xf32>
    %997 = vector.shape_cast %996 : vector<16x8xf32> to vector<2x8x8xf32>
    "tpu.trace_start"() <{level = 10 : i32, message = "bqd,bkd->bqk"}> : () -> ()
    %cst_336 = arith.constant dense<0.000000e+00> : vector<2x8x8xf32>
    %998 = tpu.matmul %993, %995, %cst_336 {dimension_numbers = #tpu.dot_dimension_numbers<[2], [2], [1], [1], [0, 0, 0, 1, 1, 1], [0], [0]>} : vector<2x8x8xf32>, vector<2x8x8xf32>, vector<2x8x8xf32> -> vector<2x8x8xf32>
    "tpu.trace_stop"() : () -> ()
    %cst_337 = arith.constant 0.353553385 : f32
    %999 = vector.broadcast %cst_337 : f32 to vector<2x8x8xf32>
    %1000 = arith.mulf %998, %999 : vector<2x8x8xf32>
    %1001 = arith.addf %1000, %15 : vector<2x8x8xf32>
    %cst_338 = arith.constant dense<0xFF800000> : vector<2x8xf32>
    %1002 = vector.multi_reduction <maximumf>, %1001, %cst_338 [2] : vector<2x8x8xf32> to vector<2x8xf32>
    %1003 = vector.shape_cast %1002 : vector<2x8xf32> to vector<2x8x1xf32>
    %1004 = vector.broadcast %1003 : vector<2x8x1xf32> to vector<2x8x8xf32>
    %1005 = arith.subf %1001, %1004 : vector<2x8x8xf32>
    %1006 = math.exp %1005 : vector<2x8x8xf32>
    %cst_339 = arith.constant dense<0.000000e+00> : vector<2x8xf32>
    %1007 = vector.multi_reduction <add>, %1006, %cst_339 [2] : vector<2x8x8xf32> to vector<2x8xf32>
    %1008 = vector.shape_cast %1007 : vector<2x8xf32> to vector<2x8x1xf32>
    %1009 = tpu.reciprocal %1008 {approx = true} : vector<2x8x1xf32> -> vector<2x8x1xf32>
    %1010 = vector.broadcast %1009 : vector<2x8x1xf32> to vector<2x8x8xf32>
    %1011 = arith.mulf %1006, %1010 : vector<2x8x8xf32>
    "tpu.trace_start"() <{level = 10 : i32, message = "bqk,bkd->bqd"}> : () -> ()
    %cst_340 = arith.constant dense<0.000000e+00> : vector<2x8x8xf32>
    %1012 = tpu.matmul %1011, %997, %cst_340 {dimension_numbers = #tpu.dot_dimension_numbers<[2], [1], [1], [2], [0, 0, 0, 1, 1, 2], [0], [0]>} : vector<2x8x8xf32>, vector<2x8x8xf32>, vector<2x8x8xf32> -> vector<2x8x8xf32>
    "tpu.trace_stop"() : () -> ()
    %1013 = vector.shape_cast %1012 : vector<2x8x8xf32> to vector<16x8xf32>
    %1014 = vector.extract_strided_slice %963 {offsets = [0, 16], sizes = [16, 8], strides = [1, 1]} : vector<16x32xf32> to vector<16x8xf32>
    %1015 = vector.shape_cast %1014 : vector<16x8xf32> to vector<2x8x8xf32>
    %1016 = vector.extract_strided_slice %968 {offsets = [0, 16], sizes = [16, 8], strides = [1, 1]} : vector<16x32xf32> to vector<16x8xf32>
    %1017 = vector.shape_cast %1016 : vector<16x8xf32> to vector<2x8x8xf32>
    %1018 = vector.extract_strided_slice %969 {offsets = [0, 16], sizes = [16, 8], strides = [1, 1]} : vector<16x32xf32> to vector<16x8xf32>
    %1019 = vector.shape_cast %1018 : vector<16x8xf32> to vector<2x8x8xf32>
    "tpu.trace_start"() <{level = 10 : i32, message = "bqd,bkd->bqk"}> : () -> ()
    %cst_341 = arith.constant dense<0.000000e+00> : vector<2x8x8xf32>
    %1020 = tpu.matmul %1015, %1017, %cst_341 {dimension_numbers = #tpu.dot_dimension_numbers<[2], [2], [1], [1], [0, 0, 0, 1, 1, 1], [0], [0]>} : vector<2x8x8xf32>, vector<2x8x8xf32>, vector<2x8x8xf32> -> vector<2x8x8xf32>
    "tpu.trace_stop"() : () -> ()
    %cst_342 = arith.constant 0.353553385 : f32
    %1021 = vector.broadcast %cst_342 : f32 to vector<2x8x8xf32>
    %1022 = arith.mulf %1020, %1021 : vector<2x8x8xf32>
    %1023 = arith.addf %1022, %15 : vector<2x8x8xf32>
    %cst_343 = arith.constant dense<0xFF800000> : vector<2x8xf32>
    %1024 = vector.multi_reduction <maximumf>, %1023, %cst_343 [2] : vector<2x8x8xf32> to vector<2x8xf32>
    %1025 = vector.shape_cast %1024 : vector<2x8xf32> to vector<2x8x1xf32>
    %1026 = vector.broadcast %1025 : vector<2x8x1xf32> to vector<2x8x8xf32>
    %1027 = arith.subf %1023, %1026 : vector<2x8x8xf32>
    %1028 = math.exp %1027 : vector<2x8x8xf32>
    %cst_344 = arith.constant dense<0.000000e+00> : vector<2x8xf32>
    %1029 = vector.multi_reduction <add>, %1028, %cst_344 [2] : vector<2x8x8xf32> to vector<2x8xf32>
    %1030 = vector.shape_cast %1029 : vector<2x8xf32> to vector<2x8x1xf32>
    %1031 = tpu.reciprocal %1030 {approx = true} : vector<2x8x1xf32> -> vector<2x8x1xf32>
    %1032 = vector.broadcast %1031 : vector<2x8x1xf32> to vector<2x8x8xf32>
    %1033 = arith.mulf %1028, %1032 : vector<2x8x8xf32>
    "tpu.trace_start"() <{level = 10 : i32, message = "bqk,bkd->bqd"}> : () -> ()
    %cst_345 = arith.constant dense<0.000000e+00> : vector<2x8x8xf32>
    %1034 = tpu.matmul %1033, %1019, %cst_345 {dimension_numbers = #tpu.dot_dimension_numbers<[2], [1], [1], [2], [0, 0, 0, 1, 1, 2], [0], [0]>} : vector<2x8x8xf32>, vector<2x8x8xf32>, vector<2x8x8xf32> -> vector<2x8x8xf32>
    "tpu.trace_stop"() : () -> ()
    %1035 = vector.shape_cast %1034 : vector<2x8x8xf32> to vector<16x8xf32>
    %1036 = vector.extract_strided_slice %963 {offsets = [0, 24], sizes = [16, 8], strides = [1, 1]} : vector<16x32xf32> to vector<16x8xf32>
    %1037 = vector.shape_cast %1036 : vector<16x8xf32> to vector<2x8x8xf32>
    %1038 = vector.extract_strided_slice %968 {offsets = [0, 24], sizes = [16, 8], strides = [1, 1]} : vector<16x32xf32> to vector<16x8xf32>
    %1039 = vector.shape_cast %1038 : vector<16x8xf32> to vector<2x8x8xf32>
    %1040 = vector.extract_strided_slice %969 {offsets = [0, 24], sizes = [16, 8], strides = [1, 1]} : vector<16x32xf32> to vector<16x8xf32>
    %1041 = vector.shape_cast %1040 : vector<16x8xf32> to vector<2x8x8xf32>
    "tpu.trace_start"() <{level = 10 : i32, message = "bqd,bkd->bqk"}> : () -> ()
    %cst_346 = arith.constant dense<0.000000e+00> : vector<2x8x8xf32>
    %1042 = tpu.matmul %1037, %1039, %cst_346 {dimension_numbers = #tpu.dot_dimension_numbers<[2], [2], [1], [1], [0, 0, 0, 1, 1, 1], [0], [0]>} : vector<2x8x8xf32>, vector<2x8x8xf32>, vector<2x8x8xf32> -> vector<2x8x8xf32>
    "tpu.trace_stop"() : () -> ()
    %cst_347 = arith.constant 0.353553385 : f32
    %1043 = vector.broadcast %cst_347 : f32 to vector<2x8x8xf32>
    %1044 = arith.mulf %1042, %1043 : vector<2x8x8xf32>
    %1045 = arith.addf %1044, %15 : vector<2x8x8xf32>
    %cst_348 = arith.constant dense<0xFF800000> : vector<2x8xf32>
    %1046 = vector.multi_reduction <maximumf>, %1045, %cst_348 [2] : vector<2x8x8xf32> to vector<2x8xf32>
    %1047 = vector.shape_cast %1046 : vector<2x8xf32> to vector<2x8x1xf32>
    %1048 = vector.broadcast %1047 : vector<2x8x1xf32> to vector<2x8x8xf32>
    %1049 = arith.subf %1045, %1048 : vector<2x8x8xf32>
    %1050 = math.exp %1049 : vector<2x8x8xf32>
    %cst_349 = arith.constant dense<0.000000e+00> : vector<2x8xf32>
    %1051 = vector.multi_reduction <add>, %1050, %cst_349 [2] : vector<2x8x8xf32> to vector<2x8xf32>
    %1052 = vector.shape_cast %1051 : vector<2x8xf32> to vector<2x8x1xf32>
    %1053 = tpu.reciprocal %1052 {approx = true} : vector<2x8x1xf32> -> vector<2x8x1xf32>
    %1054 = vector.broadcast %1053 : vector<2x8x1xf32> to vector<2x8x8xf32>
    %1055 = arith.mulf %1050, %1054 : vector<2x8x8xf32>
    "tpu.trace_start"() <{level = 10 : i32, message = "bqk,bkd->bqd"}> : () -> ()
    %cst_350 = arith.constant dense<0.000000e+00> : vector<2x8x8xf32>
    %1056 = tpu.matmul %1055, %1041, %cst_350 {dimension_numbers = #tpu.dot_dimension_numbers<[2], [1], [1], [2], [0, 0, 0, 1, 1, 2], [0], [0]>} : vector<2x8x8xf32>, vector<2x8x8xf32>, vector<2x8x8xf32> -> vector<2x8x8xf32>
    "tpu.trace_stop"() : () -> ()
    %1057 = vector.shape_cast %1056 : vector<2x8x8xf32> to vector<16x8xf32>
    %1058 = tpu.concatenate %991, %1013, %1035, %1057 in 1 : vector<16x8xf32>, vector<16x8xf32>, vector<16x8xf32>, vector<16x8xf32> -> vector<16x32xf32>
    %cst_351 = arith.constant dense<0.000000e+00> : vector<16x32xf32>
    %1059 = tpu.matmul %1058, %939, %cst_351 {dimension_numbers = #tpu.dot_dimension_numbers<[1], [0], [0], [1], [0, 0, 1, 1], [], []>} : vector<16x32xf32>, vector<32x32xf32>, vector<16x32xf32> -> vector<16x32xf32>
    %1060 = arith.addf %933, %1059 : vector<16x32xf32>
    %1061 = arith.mulf %1060, %1060 : vector<16x32xf32>
    %cst_352 = arith.constant dense<0.000000e+00> : vector<16xf32>
    %1062 = vector.multi_reduction <add>, %1061, %cst_352 [1] : vector<16x32xf32> to vector<16xf32>
    %1063 = vector.shape_cast %1062 : vector<16xf32> to vector<16x1xf32>
    %cst_353 = arith.constant 3.200000e+01 : f32
    %1064 = vector.broadcast %cst_353 : f32 to vector<16x1xf32>
    %1065 = arith.divf %1063, %1064 : vector<16x1xf32>
    %cst_354 = arith.constant 9.99999997E-7 : f32
    %1066 = vector.broadcast %cst_354 : f32 to vector<16x1xf32>
    %1067 = arith.addf %1065, %1066 : vector<16x1xf32>
    %1068 = math.rsqrt %1067 : vector<16x1xf32>
    %1069 = vector.broadcast %1068 : vector<16x1xf32> to vector<16x32xf32>
    %1070 = arith.mulf %1060, %1069 : vector<16x32xf32>
    %1071 = vector.broadcast %941 : vector<1x32xf32> to vector<16x32xf32>
    %1072 = arith.mulf %1070, %1071 : vector<16x32xf32>
    %cst_355 = arith.constant dense<0.000000e+00> : vector<16x128xf32>
    %1073 = tpu.matmul %1072, %943, %cst_355 {dimension_numbers = #tpu.dot_dimension_numbers<[1], [0], [0], [1], [0, 0, 1, 1], [], []>} : vector<16x32xf32>, vector<32x128xf32>, vector<16x128xf32> -> vector<16x128xf32>
    %1074 = vector.extract_strided_slice %1073 {offsets = [0, 0], sizes = [16, 64], strides = [1, 1]} : vector<16x128xf32> to vector<16x64xf32>
    %1075 = vector.extract_strided_slice %1073 {offsets = [0, 64], sizes = [16, 64], strides = [1, 1]} : vector<16x128xf32> to vector<16x64xf32>
    %cst_356 = arith.constant 0.000000e+00 : f32
    %1076 = vector.broadcast %cst_356 : f32 to vector<16x64xf32>
    %1077 = arith.subf %1076, %1074 : vector<16x64xf32>
    %1078 = math.exp %1077 : vector<16x64xf32>
    %cst_357 = arith.constant 1.000000e+00 : f32
    %1079 = vector.broadcast %cst_357 : f32 to vector<16x64xf32>
    %1080 = arith.addf %1079, %1078 : vector<16x64xf32>
    %cst_358 = arith.constant 1.000000e+00 : f32
    %1081 = vector.broadcast %cst_358 : f32 to vector<16x64xf32>
    %1082 = arith.divf %1081, %1080 : vector<16x64xf32>
    %1083 = arith.mulf %1074, %1082 : vector<16x64xf32>
    %1084 = arith.mulf %1083, %1075 : vector<16x64xf32>
    %cst_359 = arith.constant dense<0.000000e+00> : vector<16x32xf32>
    %1085 = tpu.matmul %1084, %945, %cst_359 {dimension_numbers = #tpu.dot_dimension_numbers<[1], [0], [0], [1], [0, 0, 1, 1], [], []>} : vector<16x64xf32>, vector<64x32xf32>, vector<16x32xf32> -> vector<16x32xf32>
    %1086 = arith.addf %1060, %1085 : vector<16x32xf32>
    %c0_360 = arith.constant 0 : index
    %c0_361 = arith.constant 0 : index
    %1087 = vector.load %arg10[%c0_360, %c0_361] : memref<16x32xf32, #tpu.memory_space<vmem>>, vector<16x32xf32>
    tpu.vector_store %arg10[%c0_360, %c0_361], %1086 {strides = array<i32>} : memref<16x32xf32, #tpu.memory_space<vmem>>, vector<16x32xf32>,
    return
  }
}

</mosaic_0001>

<bundles_post_ra>
// kernel: tile.13
= control target key start
LH: loop header
LB: loop body
LE: loop exit
PB: predicated region body
PF: predicated region fallthrough
CT: control target
= control target key end

     0   :  { %s154_s0 = inlined_call_operand.vmem [shape: f32[8,8], index: 0, kind: input, shape index: {}]   ;;  %s155_s1 = inlined_call_operand.vmem [shape: f32[2,8,4,8], index: 1, kind: output, shape index: {}]  }
   0x1   :  { %v4_v0 = vld [vmem:[%s154_s0] ss:$0 sm:$0xff]  ;;  %v51_v1 = vld [vmem:[%s154_s0 + $0x1] ss:$0 sm:$0xff]  ;;  %v54_v2 = vld [vmem:[%s154_s0 + $0x2] ss:$0 sm:$0xff] }
   0x2   :  { %5 = vst [vmem:[%s155_s1] sm:$0xf] %v4_v0  ;;  %50 = vst [vmem:[%s155_s1 + $0x20] sm:$0xf] %v4_v0  ;;  %v57_v3 = vld [vmem:[%s154_s0 + $0x3] ss:$0 sm:$0xff] }
   0x3   :  { %52 = vst [vmem:[%s155_s1 + $0x4] sm:$0xf] %v51_v1  ;;  %53 = vst [vmem:[%s155_s1 + $0x24] sm:$0xf] %v51_v1  ;;  %v60_v4 = vld [vmem:[%s154_s0 + $0x4] ss:$0 sm:$0xff] }
   0x4   :  { %55 = vst [vmem:[%s155_s1 + $0x8] sm:$0xf] %v54_v2  ;;  %56 = vst [vmem:[%s155_s1 + $0x28] sm:$0xf] %v54_v2  ;;  %v63_v5 = vld [vmem:[%s154_s0 + $0x5] ss:$0 sm:$0xff] }
   0x5   :  { %58 = vst [vmem:[%s155_s1 + $0xc] sm:$0xf] %v57_v3  ;;  %59 = vst [vmem:[%s155_s1 + $0x2c] sm:$0xf] %v57_v3  ;;  %v66_v6 = vld [vmem:[%s154_s0 + $0x6] ss:$0 sm:$0xff] }
   0x6   :  { %61 = vst [vmem:[%s155_s1 + $0x10] sm:$0xf] %v60_v4  ;;  %62 = vst [vmem:[%s155_s1 + $0x30] sm:$0xf] %v60_v4  ;;  %v69_v7 = vld [vmem:[%s154_s0 + $0x7] ss:$0 sm:$0xff] }
   0x7   :  { %64 = vst [vmem:[%s155_s1 + $0x14] sm:$0xf] %v63_v5  ;;  %65 = vst [vmem:[%s155_s1 + $0x34] sm:$0xf] %v63_v5 }
   0x8   :  { %67 = vst [vmem:[%s155_s1 + $0x18] sm:$0xf] %v66_v6  ;;  %68 = vst [vmem:[%s155_s1 + $0x38] sm:$0xf] %v66_v6 }
   0x9   :  { %70 = vst [vmem:[%s155_s1 + $0x1c] sm:$0xf] %v69_v7  ;;  %71 = vst [vmem:[%s155_s1 + $0x3c] sm:$0xf] %v69_v7 }

// kernel: tile.14
= control target key start
LH: loop header
LB: loop body
LE: loop exit
PB: predicated region body
PF: predicated region fallthrough
CT: control target
= control target key end

     0   :  { %vm82_vm0 = vcmask 1047556   ;;  %vm84_vm1 = vcmask 64512   ;;  %s195_s9 = smov 24   ;;  %s196_s14 = smov 8   ;;  %vm103_vm2 = vcmask 261312   ;;  %vm124_vm3 = vcmask 195712   ;;  %s289_s0 = inlined_call_operand.vmem [shape: f32[2,8,4,8], index: 0, kind: input, shape index: {}]   ;;  %s290_s1 = inlined_call_operand.vmem [shape: f32[16,32], index: 1, kind: output, shape index: {}]  }
   0x1   :  { %v180_v0 = vld [vmem:[%s289_s0 + $0x1c] sm:$0xf]  ;;  %v181_v1 = vld [vmem:[%s289_s0 + $0x18] sm:$0xf]  ;;  %v182_v2 = vld [vmem:[%s289_s0 + $0x14] sm:$0xf] }
   0x2   :  { %48 = vst [vmem:[#allocation0 + $0x38] sm:$0xf] %v180_v0  ;;  %53 = vst [vmem:[#allocation0 + $0x30] sm:$0xf] %v181_v1  ;;  %v183_v3 = vld [vmem:[%s289_s0 + $0x10] sm:$0xf] }
   0x3   :  { %58 = vst [vmem:[#allocation0 + $0x28] sm:$0xf] %v182_v2  ;;  %v184_v4 = vld [vmem:[%s289_s0 + $0xc] sm:$0xf]  ;;  %v185_v5 = vld [vmem:[%s289_s0 + $0x8] sm:$0xf] }
   0x4   :  { %63 = vst [vmem:[#allocation0 + $0x20] sm:$0xf] %v183_v3  ;;  %68 = vst [vmem:[#allocation0 + $0x18] sm:$0xf] %v184_v4  ;;  %v186_v6 = vld [vmem:[%s289_s0 + $0x4] sm:$0xf] }
   0x5   :  { %73 = vst [vmem:[#allocation0 + $0x10] sm:$0xf] %v185_v5  ;;  %v78_v7 = vld [vmem:[%s289_s0] sm:$0xf]  ;;  %77 = vst [vmem:[#allocation0 + $0x8] sm:$0xf] %v186_v6 }
   0x6   :  { %79 = vst [vmem:[#allocation0] sm:$0xf] %v78_v7  ;;  %v172_v8 = vld [vmem:[%s289_s0 + $0x3c] sm:$0xf]  ;;  %v173_v9 = vld [vmem:[%s289_s0 + $0x38] sm:$0xf] }
   0x7   :  { %8 = vst [vmem:[#allocation0 + $0x78] sm:$0xf] %v172_v8  ;;  %13 = vst [vmem:[#allocation0 + $0x70] sm:$0xf] %v173_v9  ;;  %v174_v10 = vld [vmem:[%s289_s0 + $0x34] sm:$0xf] }
   0x8   :  { %v175_v11 = vld [vmem:[%s289_s0 + $0x30] sm:$0xf]  ;;  %v176_v12 = vld [vmem:[%s289_s0 + $0x2c] sm:$0xf]  ;;  %18 = vst [vmem:[#allocation0 + $0x68] sm:$0xf] %v174_v10 }
   0x9   :  { %23 = vst [vmem:[#allocation0 + $0x60] sm:$0xf] %v175_v11  ;;  %28 = vst [vmem:[#allocation0 + $0x58] sm:$0xf] %v176_v12  ;;  %v177_v13 = vld [vmem:[%s289_s0 + $0x28] sm:$0xf] }
   0xa   :  { %v178_v14 = vld [vmem:[%s289_s0 + $0x24] sm:$0xf]  ;;  %v179_v15 = vld [vmem:[%s289_s0 + $0x20] sm:$0xf]  ;;  %33 = vst [vmem:[#allocation0 + $0x50] sm:$0xf] %v177_v13 }
   0xb   :  { %38 = vst [vmem:[#allocation0 + $0x48] sm:$0xf] %v178_v14  ;;  %43 = vst [vmem:[#allocation0 + $0x40] sm:$0xf] %v179_v15  ;;  %s194_s0 = smov 16   ;;  %vm145_vm4 = vcmask 130112  }
   0xc   :  { %v119_v16 = vld [vmem:[#allocation0 + $0x2] ss:$8 sm:$0xf0]   ;;  %v98_v17 = vld [vmem:[#allocation0 + $0x3] ss:$8 sm:$0xf0]  }
   0xd   :  { %v117_v18 = vld [vmem:[#allocation0 + $0x2] ss:$8 sm:$0xf]   ;;  %v96_v19 = vld [vmem:[#allocation0 + $0x3] ss:$8 sm:$0xf]  }
   0xe   :  { %v121_v20 = vsel %vm82_vm0, %v119_v16, %v117_v18  ;;  %v100_v21 = vsel %vm82_vm0, %v98_v17, %v96_v19  ;;  %v138_v24 = vld [vmem:[#allocation0 + $0x1] ss:$8 sm:$0xf]   ;;  %v80_v32 = vld [vmem:[#allocation0] ss:$8 sm:$0xf]  }
   0xf   :  { %122 = vrot.lane.b32.xlu1 %v121_v20, %s194_s0  ;;  %101 = vrot.lane.b32.xlu0 %v100_v21, %s195_s9  ;;  %v140_v25 = vld [vmem:[#allocation0 + $0x1] ss:$8 sm:$0xf0]   ;;  %v81_v33 = vld [vmem:[#allocation0] ss:$8 sm:$0xf0]  }
  0x10   :  { %v129_v22 = vld [vmem:[#allocation0 + $0x42] ss:$8 sm:$0xf0]   ;;  %v108_v23 = vld [vmem:[#allocation0 + $0x43] ss:$8 sm:$0xf0]   ;;  %v83_v34 = vsel %vm82_vm0, %v81_v33, %v80_v32  ;;  %v142_v38 = vsel %vm82_vm0, %v140_v25, %v138_v24 }
  0x11   :  { %v150_v31 = vld [vmem:[#allocation0 + $0x41] ss:$8 sm:$0xf0]   ;;  %v89_v36 = vld [vmem:[#allocation0 + $0x40] ss:$8 sm:$0xf0]  }
  0x12   :  { %v127_v26 = vld [vmem:[#allocation0 + $0x42] ss:$8 sm:$0xf]   ;;  %v106_v27 = vld [vmem:[#allocation0 + $0x43] ss:$8 sm:$0xf]  }
  0x13   :  { %v131_v28 = vsel %vm82_vm0, %v129_v22, %v127_v26  ;;  %v110_v29 = vsel %vm82_vm0, %v108_v23, %v106_v27  ;;  %v148_v30 = vld [vmem:[#allocation0 + $0x41] ss:$8 sm:$0xf]   ;;  %v87_v35 = vld [vmem:[#allocation0 + $0x40] ss:$8 sm:$0xf]  }
  0x14   :  { %132 = vrot.lane.b32.xlu1 %v131_v28, %s194_s0  ;;  %111 = vrot.lane.b32.xlu0 %v110_v29, %s195_s9  ;;  %v152_v37 = vsel %vm82_vm0, %v150_v31, %v148_v30  ;;  %85 = vst.msk [vmem:[%s290_s1] sm:$0xff] %vm84_vm1, %v83_v34   ;;  %v91_v39 = vsel %vm82_vm0, %v89_v36, %v87_v35 }
  0x15   :  { %187 = vst.msk [vmem:[%s290_s1 + $0x8] sm:$0xff] %vm84_vm1, %v91_v39  }
  0x18   :  { %153 = vrot.lane.b32.xlu1 %v152_v37, %s196_s14  ;;  %143 = vrot.lane.b32.xlu0 %v142_v38, %s196_s14 }
  0x81   :  { %v123_v40 = vpop.permute.xlu1 %122   ;;  %v102_v41 = vpop.permute.xlu0 %101  }
  0x82   :  { %104 = vst.msk [vmem:[%s290_s1] sm:$0xff] %vm103_vm2, %v102_v41  }
  0x83   :  { %125 = vst.msk [vmem:[%s290_s1] sm:$0xff] %vm124_vm3, %v123_v40  }
  0x86   :  { %v133_v42 = vpop.permute.xlu1 %132   ;;  %v112_v43 = vpop.permute.xlu0 %111  }
  0x87   :  { %188 = vst.msk [vmem:[%s290_s1 + $0x8] sm:$0xff] %vm103_vm2, %v112_v43  }
  0x88   :  { %189 = vst.msk [vmem:[%s290_s1 + $0x8] sm:$0xff] %vm124_vm3, %v133_v42  }
  0x8a   :  { %v154_v44 = vpop.permute.xlu1 %153   ;;  %v144_v45 = vpop.permute.xlu0 %143  }
  0x8b   :  { %190 = vst.msk [vmem:[%s290_s1 + $0x8] sm:$0xff] %vm145_vm4, %v154_v44   ;;  %146 = vst.msk [vmem:[%s290_s1] sm:$0xff] %vm145_vm4, %v144_v45  }

// kernel: part1_forward.1
= control target key start
LH: loop header
LB: loop body
LE: loop exit
PB: predicated region body
PF: predicated region fallthrough
CT: control target
= control target key end

     0   :  { %15 = vsyncpa [#allocation3], 0  ;;  %s17657_s0 = inlined_call_operand.vmem [shape: s32[16,1], index: 0, kind: input, shape index: {}]   ;;  %s17658_s1 = inlined_call_operand.vmem [shape: f32[64,32], index: 1, kind: input, shape index: {}]   ;;  %s17659_s2 = inlined_call_operand.vmem [shape: f32[16,32], index: 2, kind: input, shape index: {}]   ;;  %s17660_s3 = inlined_call_operand.vmem [shape: f32[16,32], index: 3, kind: input, shape index: {}]   ;;  %s17661_s4 = inlined_call_operand.vmem [shape: f32[7,1,32], index: 4, kind: input, shape index: {}]   ;;  %s17662_s5 = inlined_call_operand.vmem [shape: f32[7,32,160], index: 5, kind: input, shape index: {}]   ;;  %s17663_s6 = inlined_call_operand.vmem [shape: f32[7,32,32], index: 6, kind: input, shape index: {}]   ;;  %s17664_s7 = inlined_call_operand.hbm [shape: f32[7,1,32], index: 7, kind: input, shape index: {}]   ;;  %s17665_s8 = inlined_call_operand.vmem [shape: f32[7,32,128], index: 8, kind: input, shape index: {}]   ;;  %s17666_s9 = inlined_call_operand.vmem [shape: f32[7,64,32], index: 9, kind: input, shape index: {}]   ;;  %s17667_s10 = inlined_call_operand.hbm [shape: f32[16,32], index: 10, kind: output, shape index: {}]  }
   0x1   :  { %16 = vsyncpa [#allocation4], 0  ;;  %s15329_s13 = smov [#allocation2]   ;;  %s15281_s17 = scalar_lea.hbm %s17664_s7, 112 }
   0x2   :  { %s36_s14 = sshll.u32 %s15329_s13, 4  ;;  %p15282_p0 = scmp.ne.s32.totalorder %s17664_s7, %s15281_s17  ;;  %s37_s14 = int_to_ptr.vmem [resolvable:$true] %s36_s14 }
   0x3   :  { %p15285_p1 = scmp.lt.u32.totalorder %s15281_s17, %s17664_s7 }
   0x5   :  { %p15287_p2 = pnand %p15285_p1, %p15282_p0 }
   0x7   :  { %15290 = shalt.err (!%p15287_p2)
}
   0x8   :  { %s15291_s22 = scalar_lea.vmem %s37_s14, 112  ;;  %s15295_s23 = scalar_lea.vmem %s37_s14, 128 }
   0x9   :  { %p15292_p3 = scmp.ne.s32.totalorder %s37_s14, %s15291_s22  ;;  %p15296_p4 = scmp.lt.s32.totalorder %s37_s14, %s37_s14 }
   0xa   :  { %p15297_p5 = scmp.lt.s32.totalorder %s15295_s23, %s15291_s22 }
   0xc   :  { %p15298_p6 = por %p15297_p5, %p15296_p4 }
   0xe   :  { %p15299_p7 = pnand %p15298_p6, %p15292_p3 }
  0x10   :  { %15302 = shalt.err (!%p15299_p7)
}
  0x11   :  { %s15330_s24 = smov 16   ;;  %s15331_s25 = smov 1  }
  0x12   :  { %42 = dma.hbm_to_vmem [thread:$0]  %s17664_s7, 112, %s37_s14, [#allocation3], %s15330_s24, %s15330_s24, %s15331_s25  }
  0x13   :  { %15325 = dma.done.wait [#allocation3], 112  }
  0x14   :  { %15326 = vsyncadd [#allocation3], 4294967184  ;;  %v15332_v0 = vmov 0   ;;  %v50_v1 = vld [vmem:[%s17657_s0] sm:$0xff]  ;;  %v67_v3 = vld [vmem:[%s17658_s1 + $0x8] sm:$0xff]  ;;  %v15333_v9 = vmov 0.0   ;;  %v52_v16 = vlaneseq }
  0x15   :  { %14938 = vset.pattern.permute.xlu0 %v15332_v0  ;;  %v66_v2 = vld [vmem:[%s17658_s1] sm:$0xff]  ;;  %v68_v4 = vld [vmem:[%s17658_s1 + $0x10] sm:$0xff]  ;;  %v69_v5 = vld [vmem:[%s17658_s1 + $0x18] sm:$0xff]  ;;  %292 = vmatprep.mubr.f32.mxu1 %v15333_v9  ;;  %vm74_vm0 = vcmask 523264   ;;  %vm192_vm3 = vcmask 261120   ;;  %s15334_s23 = smov 96  }
  0x16   :  { %55 = vperm.xlu0 %14938, %v50_v1   ;;  %v51_v6 = vld [vmem:[%s17657_s0 + $0x8] sm:$0xff]  ;;  %v14618_v7 = vpack.c.bf16 %v67_v3, %v66_v2  ;;  %v14622_v8 = vpack.c.bf16 %v69_v5, %v68_v4  ;;  %v70_v10 = vld [vmem:[%s17658_s1 + $0x20] sm:$0xff]  ;;  %v72_v13 = vld [vmem:[%s17658_s1 + $0x30] sm:$0xff]  ;;  %v15450_v17 = vand.u32 127, %v52_v16  ;;  %s15335_s27 = smov 64   ;;  %vm15337_vm4 = vmmov 0  }
  0x17   :  { %v71_v11 = vld [vmem:[%s17658_s1 + $0x28] sm:$0xff]  ;;  %v73_v14 = vld [vmem:[%s17658_s1 + $0x38] sm:$0xff]  ;;  %v165_v31 = vld [vmem:[%s17662_s5] sm:$0xff]  ;;  %vm352_vm5 = vcmask 64512   ;;  %s15339_s12 = smov 56   ;;  %s15340_s13 = smov 120  }
  0x18   :  { %14619 = vmatprep.subr.bf16.mxu0 %v14618_v7  ;;  %v14626_v12 = vpack.c.bf16 %v71_v11, %v70_v10  ;;  %v14630_v15 = vpack.c.bf16 %v73_v14, %v72_v13  ;;  %v166_v28 = vld [vmem:[%s17662_s5 + $0x8] sm:$0xff]  ;;  %v168_v29 = vld [vmem:[%s17662_s5 + $0x18] sm:$0xff]  ;;  %v167_v32 = vld [vmem:[%s17662_s5 + $0x10] sm:$0xff]  ;;  %s15341_s15 = smov 48   ;;  %s15342_s16 = smov 112   ;;  %vm1711_vm7 = vcmask 195584  }
  0x19   :  { %14621 = vmatpush3.bf16.msra.mxu0 %v14618_v7  ;;  %v14634_v30 = vpack.c.bf16 %v168_v29, %v166_v28  ;;  %v14636_v33 = vpack.c.bf16 %v167_v32, %v165_v31  ;;  %v170_v34 = vld [vmem:[%s17662_s5 + $0x28] sm:$0xff]  ;;  %v172_v35 = vld [vmem:[%s17662_s5 + $0x38] sm:$0xff]  ;;  %v169_v37 = vld [vmem:[%s17662_s5 + $0x20] sm:$0xff]  ;;  %s15343_s7 = smov 40   ;;  %s15344_s14 = smov 104   ;;  %vm1708_vm8 = vcmask 130048  }
  0x1a   :  { %58 = vperm.xlu0 %14938, %v51_v6   ;;  %14623 = vmatprep.subr.bf16.mxu0 %v14622_v8  ;;  %v14638_v36 = vpack.c.bf16 %v172_v35, %v170_v34  ;;  %v171_v38 = vld [vmem:[%s17662_s5 + $0x30] sm:$0xff]  ;;  %v158_v40 = vld [vmem:[%s17660_s3] sm:$0xff]  ;;  %v159_v41 = vld [vmem:[%s17660_s3 + $0x8] sm:$0xff]  ;;  %s15336_s3 = smov 32   ;;  %s15345_s17 = smov 8  }
  0x1b   :  { %14914 = vmatprep.subr.bf16.mxu1 %v14634_v30  ;;  %v14640_v39 = vpack.c.bf16 %v171_v38, %v169_v37  ;;  %v15505_v42 = vld [vmem:[%s17659_s2] sm:$0xff]  ;;  %v15513_v43 = vld [vmem:[%s17659_s2 + $0x8] sm:$0xff]  ;;  %s15346_s1 = smov 24  }
  0x1c   :  { %14916 = vmatpush1.bf16.msra.mxu1 %v14636_v33  ;;  %v12976_v51 = vld [vmem:[%s17661_s4] ss:$0 sm:$0xff] }
  0x1d   :  { %14625 = vmatpush3.bf16.msra.mxu0 %v14622_v8  ;;  %14915 = vmatprep.subr.bf16.mxu1 %v14638_v36 }
  0x1e   :  { %14627 = vmatprep.subr.bf16.mxu0 %v14626_v12  ;;  %331 = vrot.lane.b32.xlu0 %v158_v40, %s15334_s23 }
  0x20   :  { %14917 = vmatpush1.bf16.msra.mxu1 %v14640_v39 }
  0x21   :  { %14629 = vmatpush3.bf16.msra.mxu0 %v14626_v12  ;;  %13771 = vmatprep.subr.mxu1 %v15333_v9 }
  0x22   :  { %14631 = vmatprep.subr.bf16.mxu0 %v14630_v15  ;;  %323 = vrot.lane.b32.xlu0 %v15505_v42, %s15335_s27 }
  0x25   :  { %14633 = vmatpush3.bf16.msra.mxu0 %v14630_v15 }
  0x26   :  { %14635 = vmatprep.subr.bf16.mxu0 %v14634_v30  ;;  %325 = vrot.lane.b32.xlu0 %v15513_v43, %s15335_s27 }
  0x2a   :  { %303 = vrot.lane.b32.xlu0 %v158_v40, %s15336_s3 }
  0x95   :  { %v56_v18 = vpop.permute.xlu0 %55 }
  0x96   :  { %vm60_vm1 = vcmp.eq.s32.totalorder %v15450_v17, %v56_v18 }
  0x97   :  { %v12972_v19 = vsel %vm60_vm1, 1.0, %v15333_v9 }
  0x98   :  { %13768 = vmatprep.mubr.msk.f32.mxu0 %vm74_vm0, %v12972_v19 }
  0x99   :  { %v59_v20 = vpop.permute.xlu0 %58 }
  0x9a   :  { %vm61_vm2 = vcmp.eq.s32.totalorder %v15450_v17, %v59_v20 }
  0x9b   :  { %v12973_v21 = vsel %vm61_vm2, 1.0, %v15333_v9 }
  0x9c   :  { %13769 = vmatmul.mubr.msk.f32.vlgmr.msra.gmra.mrb[0].mxu0 %vm74_vm0, %v12973_v21 }
  0x9d   :  { %286 = vmatprep.mubr.f32.mxu0 %v15333_v9  ;;  %14637 = vmatpush1.bf16.msra.mxu0 %v14636_v33  ;;  %v15525_v57 = vpop.permute.xlu0 %331 }
  0x9e   :  { %14639 = vmatprep.subr.bf16.mxu0 %v14638_v36 }
  0xa1   :  { %14641 = vmatpush1.bf16.msra.mxu0 %v14640_v39  ;;  %v15527_v58 = vpop.permute.xlu0 %323 }
  0xa2   :  { %13776 = vmatprep.subr.mxu0 %v15333_v9 }
  0xa5   :  { %v15529_v59 = vpop.permute.xlu0 %325 }
  0xa9   :  { %v15540_v3 = vpop.permute.xlu0 %303 }
 0x16f   :  { %v15459_v22 = vpop.f32.mrb[0].mxu0 }
 0x170   :  { %v15461_v23 = vpop.f32.mrb[1].mxu0  ;;  %v191_v26 = vmul.f32 %v15459_v22, %v15459_v22 }
 0x171   :  { %v190_v24 = vmul.f32 %v15461_v23, %v15461_v23 }
 0x172   :  { %v196_v27 = vsel %vm192_vm3, %v191_v26, 0.0  ;;  %v161_v26 = vshrl.u32 %v52_v16, 7 }
 0x173   :  { %v193_v25 = vsel %vm192_vm3, %v190_v24, 0.0 }
 0x174   :  { %194 = vadd.xlane.f32.xlu1 %v193_v25  ;;  %vm162_vm6 = vcmp.le.s32.totalorder %v15450_v17, %v161_v26 }
 0x178   :  { %197 = vadd.xlane.f32.xlu1 %v196_v27  ;;  %v15338_v27 = vmov -1e+30  }
 0x179   :  { %v15588_v28 = vsel %vm162_vm6, 0.0, %v15338_v27 }
 0x189   :  { %333 = vrot.lane.b32.xlu1 %v159_v41, %s15334_s23 }
 0x201   :  { %v195_v44 = vpop.xlane.xlu1 %194 }
 0x202   :  { %v200_v45 = vmul.f32 0.03125, %v195_v44 }
 0x204   :  { %v202_v46 = vadd.f32 1e-06, %v200_v45 }
 0x205   :  { %v198_v47 = vpop.xlane.xlu1 %197 }
 0x206   :  { %14939 = vrsqrt.f32 %v202_v46  ;;  %v201_v48 = vmul.f32 0.03125, %v198_v47 }
 0x208   :  { %v203_v49 = vadd.f32 1e-06, %v201_v48 }
 0x209   :  { %v15534_v63 = vpop.permute.xlu1 %333 }
 0x20a   :  { %14941 = vrsqrt.f32 %v203_v49 }
 0x210   :  { %v14940_v50 = vpop.eup %14939 }
 0x211   :  { %v206_v52 = vmul.f32 %v14940_v50, %v15461_v23 }
 0x213   :  { %v214_v53 = vmul.f32 %v12976_v51, %v206_v52 }
 0x214   :  { %v14942_v54 = vpop.eup %14941 }
 0x215   :  { %12977 = vmatmul.mubr.msk.f32.vlgmr.msra.gmra.mrb[2].mxu0 %vm192_vm3, %v214_v53  ;;  %v207_v55 = vmul.f32 %v14942_v54, %v15459_v22 }
 0x216   :  { %13778 = vmatprep.mubr.msk.f32.mxu0 %vm15337_vm4, %v15333_v9 }
 0x217   :  { %v215_v56 = vmul.f32 %v12976_v51, %v207_v55 }
 0x219   :  { %12978 = vmatmul.mubr.msk.f32.vlgmr.msra.gmra.mrb[0].mxu1 %vm192_vm3, %v215_v56 }
 0x21a   :  { %13773 = vmatprep.mubr.msk.f32.mxu1 %vm15337_vm4, %v15333_v9 }
 0x2e8   :  { %v288_v60 = vpop.f32.mrb[2].mxu0 }
 0x2e9   :  { %v15531_v61 = vpop.f32.mrb[3].mxu0  ;;  %v337_v62 = vmul.f32 %v15525_v57, %v288_v60  ;;  %v309_v4 = vmul.f32 %v15540_v3, %v288_v60  ;;  %v329_v5 = vmul.f32 %v15527_v58, %v288_v60  ;;  %v299_v15 = vmul.f32 %v288_v60, %v15505_v42 }
 0x2eb   :  { %341 = vrot.lane.b32.xlu0 %v337_v62, %s15334_s23 }
 0x2ec   :  { %v294_v0 = vpop.f32.mrb[0].mxu1 }
 0x2ed   :  { %v15537_v1 = vpop.f32.mrb[1].mxu1  ;;  %v338_v2 = vmul.f32 %v15534_v63, %v294_v0  ;;  %v330_v8 = vmul.f32 %v15529_v59, %v294_v0  ;;  %v300_v20 = vmul.f32 %v294_v0, %v15513_v43 }
 0x2ef   :  { %343 = vrot.lane.b32.xlu1 %v338_v2, %s15334_s23  ;;  %305 = vrot.lane.b32.xlu0 %v159_v41, %s15336_s3 }
 0x2f3   :  { %313 = vrot.lane.b32.xlu0 %v309_v4, %s15334_s23 }
 0x35d   :  { %v342_v6 = vpop.permute.xlu0 %341 }
 0x35e   :  { %v15551_v7 = vadd.f32 %v342_v6, %v329_v5 }
 0x360   :  { %350 = vrot.lane.b32.xlu1 %v15551_v7, %s15335_s27 }
 0x361   :  { %v344_v10 = vpop.permute.xlu1 %343  ;;  %v15556_v11 = vpop.permute.xlu0 %305 }
 0x362   :  { %v15558_v12 = vadd.f32 %v344_v10, %v330_v8  ;;  %v310_v13 = vmul.f32 %v15556_v11, %v294_v0 }
 0x364   :  { %429 = vrot.lane.b32.xlu1 %v15558_v12, %s15335_s27  ;;  %315 = vrot.lane.b32.xlu0 %v310_v13, %s15334_s23 }
 0x365   :  { %v314_v14 = vpop.permute.xlu0 %313 }
 0x366   :  { %v15566_v19 = vadd.f32 %v314_v14, %v299_v15 }
 0x3d2   :  { %v351_v18 = vpop.permute.xlu1 %350 }
 0x3d3   :  { %13772 = vmatpush3.xpose.msk.msra.mxu1 %vm352_vm5, %v351_v18 }
 0x3d4   :  { %13781 = vmatprep.subr.mxu1 %v15333_v9 }
 0x3d6   :  { %v430_v21 = vpop.permute.xlu1 %429  ;;  %13774 = vmatmul.mubr.msk.f32.vlgmr.msra.gmra.mrb[2].mxu1 %vm352_vm5, %v15566_v19  ;;  %v316_v24 = vpop.permute.xlu0 %315 }
 0x3d7   :  { %v15572_v25 = vadd.f32 %v316_v24, %v300_v20  ;;  %13777 = vmatpush3.xpose.msk.msra.mxu0 %vm352_vm5, %v430_v21  ;;  %13782 = vmatpush3.msra.mxu1 %v15531_v61 }
 0x3d8   :  { %13786 = vmatprep.subr.mxu0 %v15333_v9  ;;  %13783 = vmatprep.mubr.msk.f32.mxu1 %vm15337_vm4, %v15333_v9 }
 0x3d9   :  { %13791 = vmatprep.subr.mxu1 %v15333_v9 }
 0x3da   :  { %13779 = vmatmul.mubr.msk.f32.vlgmr.msra.gmra.mrb[4].mxu0 %vm352_vm5, %v15572_v25 }
 0x3db   :  { %13787 = vmatpush3.msra.mxu0 %v15537_v1  ;;  %13788 = vmatprep.mubr.msk.f32.mxu0 %vm15337_vm4, %v15333_v9 }
 0x3dc   :  { %13796 = vmatprep.subr.mxu0 %v15333_v9 }
 0x4a9   :  { %v424_v29 = vpop.f32.mrb[2].mxu1 }
 0x4aa   :  { %v506_v30 = vmul.f32 0.35355338, %v424_v29  ;;  %v13775_v31 = vpop.f32.mrb[3].mxu1 }
 0x4ac   :  { %v508_v32 = vadd.f32 %v506_v30, %v15588_v28 }
 0x4ad   :  { %v502_v33 = vpop.f32.mrb[4].mxu0 }
 0x4ae   :  { %v507_v34 = vmul.f32 0.35355338, %v502_v33  ;;  %v13780_v35 = vpop.f32.mrb[5].mxu0  ;;  %v510_v36 = vsel %vm352_vm5, %v508_v32, -inf }
 0x4af   :  { %511 = vmax.xlane.f32.xlu1 %v510_v36 }
 0x4b0   :  { %v509_v37 = vadd.f32 %v507_v34, %v15588_v28 }
 0x4b2   :  { %v513_v16 = vsel %vm352_vm5, %v509_v37, -inf }
 0x4b3   :  { %514 = vmax.xlane.f32.xlu0 %v513_v16 }
 0x53c   :  { %v512_v17 = vpop.xlane.xlu1 %511 }
 0x53d   :  { %v516_v38 = vsub.f32 %v508_v32, %v512_v17 }
 0x53f   :  { %v518_v39 = vmul.f32 1.442695, %v516_v38 }
 0x540   :  { %v515_v40 = vpop.xlane.xlu0 %514 }
 0x541   :  { %14943 = vpow2.f32 %v518_v39  ;;  %v517_v41 = vsub.f32 %v509_v37, %v515_v40 }
 0x543   :  { %v520_v44 = vmul.f32 1.442695, %v517_v41 }
 0x545   :  { %14945 = vpow2.f32 %v520_v44 }
 0x54b   :  { %v14944_v45 = vpop.eup %14943 }
 0x54c   :  { %v522_v46 = vsel %vm352_vm5, %v14944_v45, 0.0 }
 0x54d   :  { %523 = vadd.xlane.f32.xlu0 %v522_v46 }
 0x54f   :  { %v14946_v47 = vpop.eup %14945 }
 0x550   :  { %v525_v48 = vsel %vm352_vm5, %v14946_v47, 0.0 }
 0x551   :  { %526 = vadd.xlane.f32.xlu1 %v525_v48 }
 0x562   :  { %758 = vrot.lane.b32.xlu1 %v15558_v12, %s15339_s12 }
 0x563   :  { %680 = vrot.lane.b32.xlu0 %v15551_v7, %s15339_s12 }
 0x566   :  { %678 = vrot.lane.b32.xlu1 %v15566_v19, %s15340_s13 }
 0x567   :  { %756 = vrot.lane.b32.xlu0 %v15572_v25, %s15340_s13 }
 0x5da   :  { %v524_v49 = vpop.xlane.xlu0 %523 }
 0x5db   :  { %14947 = vrcp.f32 %v524_v49 }
 0x5de   :  { %v527_v50 = vpop.xlane.xlu1 %526  ;;  %v681_v54 = vpop.permute.xlu0 %680 }
 0x5df   :  { %14949 = vrcp.f32 %v527_v50 }
 0x5e2   :  { %v759_v52 = vpop.permute.xlu1 %758  ;;  %v757_v62 = vpop.permute.xlu0 %756 }
 0x5e5   :  { %v14948_v51 = vpop.eup %14947 }
 0x5e6   :  { %v530_v53 = vmul.f32 %v14948_v51, %v14944_v45  ;;  %v679_v60 = vpop.permute.xlu1 %678 }
 0x5e8   :  { %13784 = vmatmul.mubr.msk.f32.vlgmr.msra.gmra.mrb[4].mxu1 %vm352_vm5, %v530_v53 }
 0x5e9   :  { %v14950_v55 = vpop.eup %14949  ;;  %13792 = vmatpush3.xpose.msk.msra.mxu1 %vm352_vm5, %v681_v54  ;;  %13793 = vmatprep.mubr.msk.f32.mxu1 %vm15337_vm4, %v15333_v9 }
 0x5ea   :  { %v531_v56 = vmul.f32 %v14950_v55, %v14946_v47  ;;  %13801 = vmatprep.subr.mxu1 %v15333_v9 }
 0x5ec   :  { %13789 = vmatmul.mubr.msk.f32.vlgmr.msra.gmra.mrb[6].mxu0 %vm352_vm5, %v531_v56  ;;  %13794 = vmatmul.mubr.msk.f32.vlgmr.msra.gmra.mrb[6].mxu1 %vm352_vm5, %v679_v60 }
 0x5ed   :  { %13797 = vmatpush3.xpose.msk.msra.mxu0 %vm352_vm5, %v759_v52  ;;  %13798 = vmatprep.mubr.msk.f32.mxu0 %vm15337_vm4, %v15333_v9 }
 0x5ee   :  { %13806 = vmatprep.subr.mxu0 %v15333_v9  ;;  %13803 = vmatprep.mubr.msk.f32.mxu1 %vm15337_vm4, %v15333_v9 }
 0x5f0   :  { %13799 = vmatmul.mubr.msk.f32.vlgmr.msra.gmra.mrb[8].mxu0 %vm352_vm5, %v757_v62 }
 0x5f1   :  { %13808 = vmatprep.mubr.msk.f32.mxu0 %vm15337_vm4, %v15333_v9 }
 0x6bb   :  { %v15620_v0 = vpop.f32.mrb[4].mxu1 }
 0x6bc   :  { %v13785_v2 = vpop.f32.mrb[5].mxu1 }
 0x6bf   :  { %v15622_v4 = vpop.f32.mrb[6].mxu0  ;;  %v752_v5 = vpop.f32.mrb[6].mxu1 }
 0x6c0   :  { %v834_v6 = vmul.f32 0.35355338, %v752_v5  ;;  %v13790_v8 = vpop.f32.mrb[7].mxu0  ;;  %v13795_v10 = vpop.f32.mrb[7].mxu1 }
 0x6c2   :  { %v836_v13 = vadd.f32 %v834_v6, %v15588_v28 }
 0x6c3   :  { %v830_v14 = vpop.f32.mrb[8].mxu0 }
 0x6c4   :  { %v835_v15 = vmul.f32 0.35355338, %v830_v14  ;;  %v13800_v18 = vpop.f32.mrb[9].mxu0  ;;  %v838_v20 = vsel %vm352_vm5, %v836_v13, -inf }
 0x6c5   :  { %839 = vmax.xlane.f32.xlu1 %v838_v20 }
 0x6c6   :  { %v837_v21 = vadd.f32 %v835_v15, %v15588_v28 }
 0x6c8   :  { %v841_v24 = vsel %vm352_vm5, %v837_v21, -inf }
 0x6c9   :  { %842 = vmax.xlane.f32.xlu0 %v841_v24 }
 0x6d6   :  { %938 = vrot.lane.b32.xlu1 %v15537_v1, %s15340_s13 }
 0x6da   :  { %1016 = vrot.lane.b32.xlu1 %v15551_v7, %s15341_s15 }
 0x6df   :  { %861 = vrot.lane.b32.xlu0 %v15531_v61, %s15340_s13 }
 0x752   :  { %v840_v26 = vpop.xlane.xlu1 %839 }
 0x753   :  { %v844_v27 = vsub.f32 %v836_v13, %v840_v26 }
 0x755   :  { %v846_v29 = vmul.f32 1.442695, %v844_v27 }
 0x756   :  { %v939_v30 = vpop.permute.xlu1 %938  ;;  %v843_v31 = vpop.xlane.xlu0 %842 }
 0x757   :  { %14951 = vpow2.f32 %v846_v29  ;;  %v845_v32 = vsub.f32 %v837_v21, %v843_v31  ;;  %13807 = vmatpush3.msra.mxu0 %v939_v30 }
 0x758   :  { %13816 = vmatprep.subr.mxu0 %v15333_v9 }
 0x759   :  { %v848_v33 = vmul.f32 1.442695, %v845_v32 }
 0x75a   :  { %v862_v34 = vpop.permute.xlu0 %861  ;;  %v1017_v17 = vpop.permute.xlu1 %1016 }
 0x75b   :  { %14953 = vpow2.f32 %v848_v33  ;;  %13802 = vmatpush3.msra.mxu1 %v862_v34 }
 0x75c   :  { %13811 = vmatprep.subr.mxu1 %v15333_v9 }
 0x761   :  { %v14952_v35 = vpop.eup %14951 }
 0x762   :  { %v850_v36 = vsel %vm352_vm5, %v14952_v35, 0.0 }
 0x763   :  { %851 = vadd.xlane.f32.xlu0 %v850_v36 }
 0x765   :  { %v14954_v37 = vpop.eup %14953 }
 0x766   :  { %v853_v16 = vsel %vm352_vm5, %v14954_v37, 0.0 }
 0x767   :  { %854 = vadd.xlane.f32.xlu1 %v853_v16 }
 0x778   :  { %1014 = vrot.lane.b32.xlu1 %v15566_v19, %s15342_s16 }
 0x779   :  { %1094 = vrot.lane.b32.xlu0 %v15558_v12, %s15341_s15 }
 0x77d   :  { %1092 = vrot.lane.b32.xlu0 %v15572_v25, %s15342_s16 }
 0x7f0   :  { %v852_v38 = vpop.xlane.xlu0 %851 }
 0x7f1   :  { %14955 = vrcp.f32 %v852_v38 }
 0x7f4   :  { %v855_v39 = vpop.xlane.xlu1 %854  ;;  %v1095_v45 = vpop.permute.xlu0 %1094 }
 0x7f5   :  { %14957 = vrcp.f32 %v855_v39 }
 0x7f8   :  { %v1015_v47 = vpop.permute.xlu1 %1014  ;;  %v1093_v48 = vpop.permute.xlu0 %1092 }
 0x7fb   :  { %v14956_v40 = vpop.eup %14955 }
 0x7fc   :  { %v858_v41 = vmul.f32 %v14956_v40, %v14952_v35 }
 0x7fe   :  { %13804 = vmatmul.mubr.msk.f32.vlgmr.msra.gmra.mrb[8].mxu1 %vm352_vm5, %v858_v41 }
 0x7ff   :  { %v14958_v44 = vpop.eup %14957  ;;  %13812 = vmatpush3.xpose.msk.msra.mxu1 %vm352_vm5, %v1017_v17  ;;  %13813 = vmatprep.mubr.msk.f32.mxu1 %vm15337_vm4, %v15333_v9 }
 0x800   :  { %v859_v46 = vmul.f32 %v14958_v44, %v14954_v37  ;;  %13821 = vmatprep.subr.mxu1 %v15333_v9 }
 0x802   :  { %13809 = vmatmul.mubr.msk.f32.vlgmr.msra.gmra.mrb[10].mxu0 %vm352_vm5, %v859_v46  ;;  %13814 = vmatmul.mubr.msk.f32.vlgmr.msra.gmra.mrb[10].mxu1 %vm352_vm5, %v1015_v47 }
 0x803   :  { %13817 = vmatpush3.xpose.msk.msra.mxu0 %vm352_vm5, %v1095_v45  ;;  %13818 = vmatprep.mubr.msk.f32.mxu0 %vm15337_vm4, %v15333_v9 }
 0x804   :  { %13826 = vmatprep.subr.mxu0 %v15333_v9  ;;  %13823 = vmatprep.mubr.msk.f32.mxu1 %vm15337_vm4, %v15333_v9 }
 0x806   :  { %13819 = vmatmul.mubr.msk.f32.vlgmr.msra.gmra.mrb[12].mxu0 %vm352_vm5, %v1093_v48 }
 0x807   :  { %13828 = vmatprep.mubr.msk.f32.mxu0 %vm15337_vm4, %v15333_v9 }
 0x8d1   :  { %v15660_v49 = vpop.f32.mrb[8].mxu1 }
 0x8d2   :  { %v13805_v50 = vpop.f32.mrb[9].mxu1 }
 0x8d5   :  { %v15662_v51 = vpop.f32.mrb[10].mxu0  ;;  %v1088_v52 = vpop.f32.mrb[10].mxu1 }
 0x8d6   :  { %v1170_v53 = vmul.f32 0.35355338, %v1088_v52  ;;  %v13810_v54 = vpop.f32.mrb[11].mxu0  ;;  %v13815_v55 = vpop.f32.mrb[11].mxu1 }
 0x8d8   :  { %v1172_v56 = vadd.f32 %v1170_v53, %v15588_v28 }
 0x8d9   :  { %v1166_v60 = vpop.f32.mrb[12].mxu0 }
 0x8da   :  { %v1171_v62 = vmul.f32 0.35355338, %v1166_v60  ;;  %v13820_v2 = vpop.f32.mrb[13].mxu0  ;;  %v1174_v5 = vsel %vm352_vm5, %v1172_v56, -inf }
 0x8db   :  { %1175 = vmax.xlane.f32.xlu1 %v1174_v5 }
 0x8dc   :  { %v1173_v6 = vadd.f32 %v1171_v62, %v15588_v28 }
 0x8de   :  { %v1177_v8 = vsel %vm352_vm5, %v1173_v6, -inf }
 0x8df   :  { %1178 = vmax.xlane.f32.xlu0 %v1177_v8 }
 0x8ec   :  { %1272 = vrot.lane.b32.xlu1 %v15537_v1, %s15342_s16 }
 0x8f0   :  { %1350 = vrot.lane.b32.xlu1 %v15551_v7, %s15343_s7 }
 0x8f5   :  { %1196 = vrot.lane.b32.xlu0 %v15531_v61, %s15342_s16 }
 0x968   :  { %v1176_v10 = vpop.xlane.xlu1 %1175 }
 0x969   :  { %v1180_v13 = vsub.f32 %v1172_v56, %v1176_v10 }
 0x96b   :  { %v1182_v14 = vmul.f32 1.442695, %v1180_v13 }
 0x96c   :  { %v1273_v15 = vpop.permute.xlu1 %1272  ;;  %v1179_v18 = vpop.xlane.xlu0 %1178 }
 0x96d   :  { %14959 = vpow2.f32 %v1182_v14  ;;  %v1181_v20 = vsub.f32 %v1173_v6, %v1179_v18  ;;  %13827 = vmatpush3.msra.mxu0 %v1273_v15 }
 0x96e   :  { %13836 = vmatprep.subr.mxu0 %v15333_v9 }
 0x96f   :  { %v1184_v21 = vmul.f32 1.442695, %v1181_v20  ;;  %v174_v20 = vld [vmem:[%s17663_s6 + $0x8] sm:$0xff] }
 0x970   :  { %v1197_v24 = vpop.permute.xlu0 %1196  ;;  %v1351_v30 = vpop.permute.xlu1 %1350 }
 0x971   :  { %14961 = vpow2.f32 %v1184_v21  ;;  %13822 = vmatpush3.msra.mxu1 %v1197_v24  ;;  %v175_v24 = vld [vmem:[%s17663_s6 + $0x10] sm:$0xff] }
 0x972   :  { %13831 = vmatprep.subr.mxu1 %v15333_v9 }
 0x977   :  { %v14960_v7 = vpop.eup %14959 }
 0x978   :  { %v1186_v26 = vsel %vm352_vm5, %v14960_v7, 0.0 }
 0x979   :  { %1187 = vadd.xlane.f32.xlu0 %v1186_v26 }
 0x97b   :  { %v14962_v27 = vpop.eup %14961 }
 0x97c   :  { %v1189_v29 = vsel %vm352_vm5, %v14962_v27, 0.0 }
 0x97d   :  { %1190 = vadd.xlane.f32.xlu1 %v1189_v29 }
 0x98e   :  { %1348 = vrot.lane.b32.xlu1 %v15566_v19, %s15344_s14 }
 0x98f   :  { %1428 = vrot.lane.b32.xlu0 %v15558_v12, %s15343_s7 }
 0x993   :  { %1426 = vrot.lane.b32.xlu0 %v15572_v25, %s15344_s14 }
 0xa06   :  { %v1188_v31 = vpop.xlane.xlu0 %1187 }
 0xa07   :  { %14963 = vrcp.f32 %v1188_v31 }
 0xa0a   :  { %v1191_v32 = vpop.xlane.xlu1 %1190  ;;  %v1429_v36 = vpop.permute.xlu0 %1428 }
 0xa0b   :  { %14965 = vrcp.f32 %v1191_v32 }
 0xa0e   :  { %v1349_v19 = vpop.permute.xlu1 %1348  ;;  %v1427_v25 = vpop.permute.xlu0 %1426 }
 0xa11   :  { %v14964_v33 = vpop.eup %14963 }
 0xa12   :  { %v1194_v34 = vmul.f32 %v14964_v33, %v14960_v7  ;;  %v176_v7 = vld [vmem:[%s17663_s6 + $0x18] sm:$0xff] }
 0xa13   :  { %v14646_v26 = vpack.c.bf16 %v176_v7, %v175_v24  ;;  %v188_v7 = vld [vmem:[%s17666_s9 + $0x30] sm:$0xff] }
 0xa14   :  { %13824 = vmatmul.mubr.msk.f32.vlgmr.msra.gmra.mrb[12].mxu1 %vm352_vm5, %v1194_v34 }
 0xa15   :  { %v14966_v35 = vpop.eup %14965  ;;  %13832 = vmatpush3.xpose.msk.msra.mxu1 %vm352_vm5, %v1351_v30  ;;  %13833 = vmatprep.mubr.msk.f32.mxu1 %vm15337_vm4, %v15333_v9 }
 0xa16   :  { %v1195_v12 = vmul.f32 %v14966_v35, %v14962_v27  ;;  %13841 = vmatprep.subr.mxu1 %v15333_v9 }
 0xa18   :  { %13829 = vmatmul.mubr.msk.f32.vlgmr.msra.gmra.mrb[14].mxu0 %vm352_vm5, %v1195_v12  ;;  %13834 = vmatmul.mubr.msk.f32.vlgmr.msra.gmra.mrb[14].mxu1 %vm352_vm5, %v1349_v19 }
 0xa19   :  { %13837 = vmatpush3.xpose.msk.msra.mxu0 %vm352_vm5, %v1429_v36  ;;  %13838 = vmatprep.mubr.msk.f32.mxu0 %vm15337_vm4, %v15333_v9 }
 0xa1a   :  { %13846 = vmatprep.subr.mxu0 %v15333_v9  ;;  %13843 = vmatprep.mubr.msk.f32.mxu1 %vm15337_vm4, %v15333_v9 }
 0xa1c   :  { %13839 = vmatmul.mubr.msk.f32.vlgmr.msra.gmra.mrb[16].mxu0 %vm352_vm5, %v1427_v25 }
 0xa1d   :  { %13848 = vmatprep.mubr.msk.f32.mxu0 %vm15337_vm4, %v15333_v9 }
 0xae7   :  { %v1268_v37 = vpop.f32.mrb[12].mxu1 }
 0xae8   :  { %v13825_v16 = vpop.f32.mrb[13].mxu1 }
 0xaeb   :  { %v1344_v17 = vpop.f32.mrb[14].mxu0  ;;  %v1422_v38 = vpop.f32.mrb[14].mxu1 }
 0xaec   :  { %v1504_v39 = vmul.f32 0.35355338, %v1422_v38  ;;  %v13830_v40 = vpop.f32.mrb[15].mxu0  ;;  %v13835_v41 = vpop.f32.mrb[15].mxu1 }
 0xaee   :  { %v1506_v44 = vadd.f32 %v1504_v39, %v15588_v28 }
 0xaef   :  { %v1500_v45 = vpop.f32.mrb[16].mxu0 }
 0xaf0   :  { %v1505_v46 = vmul.f32 0.35355338, %v1500_v45  ;;  %v13840_v47 = vpop.f32.mrb[17].mxu0  ;;  %v1508_v48 = vsel %vm352_vm5, %v1506_v44, -inf }
 0xaf1   :  { %1509 = vmax.xlane.f32.xlu1 %v1508_v48  ;;  %v180_v47 = vld [vmem:[%s17665_s8 + $0x10] sm:$0xff] }
 0xaf2   :  { %v1507_v50 = vadd.f32 %v1505_v46, %v15588_v28 }
 0xaf4   :  { %v1511_v52 = vsel %vm352_vm5, %v1507_v50, -inf }
 0xaf5   :  { %1512 = vmax.xlane.f32.xlu0 %v1511_v52 }
 0xb7e   :  { %v1510_v53 = vpop.xlane.xlu1 %1509 }
 0xb7f   :  { %v1514_v54 = vsub.f32 %v1506_v44, %v1510_v53 }
 0xb81   :  { %v1516_v55 = vmul.f32 1.442695, %v1514_v54 }
 0xb82   :  { %v1513_v56 = vpop.xlane.xlu0 %1512 }
 0xb83   :  { %14967 = vpow2.f32 %v1516_v55  ;;  %v1515_v60 = vsub.f32 %v1507_v50, %v1513_v56  ;;  %v181_v50 = vld [vmem:[%s17665_s8 + $0x18] sm:$0xff] }
 0xb84   :  { %v14654_v52 = vpack.c.bf16 %v181_v50, %v180_v47 }
 0xb85   :  { %v1518_v62 = vmul.f32 1.442695, %v1515_v60 }
 0xb87   :  { %14969 = vpow2.f32 %v1518_v62 }
 0xb8d   :  { %v14968_v2 = vpop.eup %14967 }
 0xb8e   :  { %v1520_v5 = vsel %vm352_vm5, %v14968_v2, 0.0 }
 0xb8f   :  { %1521 = vadd.xlane.f32.xlu0 %v1520_v5 }
 0xb91   :  { %v14970_v6 = vpop.eup %14969 }
 0xb92   :  { %v1523_v8 = vsel %vm352_vm5, %v14970_v6, 0.0 }
 0xb93   :  { %1524 = vadd.xlane.f32.xlu1 %v1523_v8 }
 0xba4   :  { %1606 = vrot.lane.b32.xlu1 %v15537_v1, %s15344_s14 }
 0xba5   :  { %1530 = vrot.lane.b32.xlu0 %v15531_v61, %s15344_s14 }
 0xba8   :  { %1684 = vrot.lane.b32.xlu1 %v15660_v49, %s15345_s17 }
 0xba9   :  { %1686 = vrot.lane.b32.xlu0 %v15662_v51, %s15345_s17  ;;  %v173_v51 = vld [vmem:[%s17663_s6] sm:$0xff] }
 0xbaa   :  { %v14642_v21 = vpack.c.bf16 %v174_v20, %v173_v51  ;;  %v186_v20 = vld [vmem:[%s17666_s9 + $0x20] sm:$0xff] }
 0xbac   :  { %1692 = vrot.lane.b32.xlu1 %v1268_v37, %s15330_s24 }
 0xbad   :  { %1694 = vrot.lane.b32.xlu0 %v1344_v17, %s15330_s24 }
 0xc1c   :  { %v1522_v10 = vpop.xlane.xlu0 %1521 }
 0xc1d   :  { %14971 = vrcp.f32 %v1522_v10 }
 0xc20   :  { %v1525_v13 = vpop.xlane.xlu1 %1524  ;;  %v1531_v14 = vpop.permute.xlu0 %1530 }
 0xc21   :  { %14973 = vrcp.f32 %v1525_v13  ;;  %13842 = vmatpush3.msra.mxu1 %v1531_v14 }
 0xc22   :  { %14643 = vmatprep.subr.bf16.mxu1 %v14642_v21 }
 0xc24   :  { %v1607_v1 = vpop.permute.xlu1 %1606  ;;  %v1687_v33 = vpop.permute.xlu0 %1686 }
 0xc25   :  { %13847 = vmatpush3.msra.mxu0 %v1607_v1  ;;  %v1707_v37 = vsel %vm352_vm5, %v15622_v4, %v1687_v33  ;;  %v182_v1 = vld [vmem:[%s17666_s9] sm:$0xff] }
 0xc27   :  { %v14972_v61 = vpop.eup %14971 }
 0xc28   :  { %v1528_v15 = vmul.f32 %v14972_v61, %v14968_v2  ;;  %v1685_v32 = vpop.permute.xlu1 %1684  ;;  %v1695_v36 = vpop.permute.xlu0 %1694  ;;  %v183_v61 = vld [vmem:[%s17666_s9 + $0x8] sm:$0xff] }
 0xc29   :  { %v1706_v35 = vsel %vm352_vm5, %v15620_v0, %v1685_v32  ;;  %v1710_v16 = vsel %vm1708_vm8, %v1707_v37, %v1695_v36 }
 0xc2a   :  { %13844 = vmatmul.mubr.msk.f32.vlgmr.msra.gmra.mrb[16].mxu1 %vm352_vm5, %v1528_v15  ;;  %v184_v15 = vld [vmem:[%s17666_s9 + $0x10] sm:$0xff] }
 0xc2b   :  { %v14974_v49 = vpop.eup %14973  ;;  %14645 = vmatpush3.bf16.msra.mxu1 %v14642_v21  ;;  %v187_v21 = vld [vmem:[%s17666_s9 + $0x28] sm:$0xff] }
 0xc2c   :  { %v1529_v18 = vmul.f32 %v14974_v49, %v14970_v6  ;;  %14647 = vmatprep.subr.bf16.mxu1 %v14646_v26  ;;  %v1693_v34 = vpop.permute.xlu1 %1692  ;;  %v13005_v6 = vld [vmem:[#allocation2] ss:$0 sm:$0xff]  ;;  %v14658_v49 = vpack.c.bf16 %v183_v61, %v182_v1  ;;  %v14666_v24 = vpack.c.bf16 %v187_v21, %v186_v20 }
 0xc2d   :  { %v1709_v12 = vsel %vm1708_vm8, %v1706_v35, %v1693_v34 }
 0xc2e   :  { %13849 = vmatmul.mubr.msk.f32.vlgmr.msra.gmra.mrb[18].mxu0 %vm352_vm5, %v1529_v18  ;;  %v185_v18 = vld [vmem:[%s17666_s9 + $0x18] sm:$0xff] }
 0xc2f   :  { %14649 = vmatpush3.bf16.msra.mxu1 %v14646_v26  ;;  %v14662_v51 = vpack.c.bf16 %v185_v18, %v184_v15  ;;  %v189_v26 = vld [vmem:[%s17666_s9 + $0x38] sm:$0xff]  ;;  %v13035_v18 = vld [vmem:[%s17661_s4 + $0x1] ss:$0 sm:$0xff] }
 0xc30   :  { %14659 = vmatprep.subr.bf16.mxu1 %v14658_v49 }
 0xcfd   :  { %v1602_v27 = vpop.f32.mrb[16].mxu1 }
 0xcfe   :  { %1700 = vrot.lane.b32.xlu1 %v1602_v27, %s15346_s1  ;;  %v13845_v29 = vpop.f32.mrb[17].mxu1  ;;  %v14670_v27 = vpack.c.bf16 %v189_v26, %v188_v7 }
 0xd01   :  { %v1678_v30 = vpop.f32.mrb[18].mxu0 }
 0xd02   :  { %1702 = vrot.lane.b32.xlu0 %v1678_v30, %s15346_s1  ;;  %v13850_v31 = vpop.f32.mrb[19].mxu0 }
 0xd70   :  { %v1701_v19 = vpop.permute.xlu1 %1700 }
 0xd71   :  { %v1712_v25 = vsel %vm1711_vm7, %v1709_v12, %v1701_v19 }
 0xd72   :  { %13859 = vmatprep.mubr.msk.f32.mxu1 %vm192_vm3, %v1712_v25 }
 0xd74   :  { %v1703_v17 = vpop.permute.xlu0 %1702 }
 0xd75   :  { %v1713_v38 = vsel %vm1711_vm7, %v1710_v16, %v1703_v17 }
 0xd76   :  { %13860 = vmatmul.mubr.msk.f32.vlgmr.msra.gmra.mrb[18].mxu1 %vm192_vm3, %v1713_v38 }
 0xd77   :  { %14661 = vmatpush3.bf16.msra.mxu1 %v14658_v49 }
 0xd78   :  { %14663 = vmatprep.subr.bf16.mxu1 %v14662_v51 }
 0xd7b   :  { %14665 = vmatpush3.bf16.msra.mxu1 %v14662_v51 }
 0xd7c   :  { %14667 = vmatprep.subr.bf16.mxu1 %v14666_v24 }
 0xd7f   :  { %14669 = vmatpush3.bf16.msra.mxu1 %v14666_v24 }
 0xd80   :  { %14671 = vmatprep.subr.bf16.mxu1 %v14670_v27 }
 0xd83   :  { %14673 = vmatpush3.bf16.msra.mxu1 %v14670_v27 }
 0xd84   :  { %13897 = vmatprep.subr.mxu1 %v15333_v9 }
 0xe49   :  { %v13861_v0 = vpop.f32.mrb[18].mxu1 }
 0xe4a   :  { %v15743_v39 = vadd.f32 %v13861_v0, %v15459_v22  ;;  %v1786_v40 = vpop.f32.mrb[19].mxu1  ;;  %v178_v22 = vld [vmem:[%s17665_s8] sm:$0xff] }
 0xe4b   :  { %v15746_v41 = vadd.f32 %v1786_v40, %v15461_v23  ;;  %v179_v23 = vld [vmem:[%s17665_s8 + $0x8] sm:$0xff] }
 0xe4c   :  { %v1798_v44 = vmul.f32 %v15743_v39, %v15743_v39  ;;  %v14650_v48 = vpack.c.bf16 %v179_v23, %v178_v22 }
 0xe4d   :  { %v1797_v4 = vmul.f32 %v15746_v41, %v15746_v41 }
 0xe4e   :  { %v1802_v45 = vsel %vm192_vm3, %v1798_v44, 0.0  ;;  %14651 = vmatprep.subr.bf16.mxu0 %v14650_v48 }
 0xe4f   :  { %1803 = vadd.xlane.f32.xlu0 %v1802_v45  ;;  %v1799_v46 = vsel %vm192_vm3, %v1797_v4, 0.0  ;;  %14653 = vmatpush3.bf16.msra.mxu0 %v14650_v48 }
 0xe50   :  { %1800 = vadd.xlane.f32.xlu1 %v1799_v46  ;;  %14655 = vmatprep.subr.bf16.mxu0 %v14654_v52 }
 0xe53   :  { %14657 = vmatpush3.bf16.msra.mxu0 %v14654_v52 }
 0xedc   :  { %v1804_v53 = vpop.xlane.xlu0 %1803 }
 0xedd   :  { %v1806_v54 = vmul.f32 0.03125, %v1804_v53  ;;  %v1801_v55 = vpop.xlane.xlu1 %1800  ;;  %v13011_v53 = vld [vmem:[%s17662_s5 + $0x40] sm:$0xff] }
 0xede   :  { %v1805_v56 = vmul.f32 0.03125, %v1801_v55 }
 0xedf   :  { %v1808_v60 = vadd.f32 1e-06, %v1806_v54  ;;  %v13013_v54 = vld [vmem:[%s17662_s5 + $0x50] sm:$0xff] }
 0xee0   :  { %v1807_v62 = vadd.f32 1e-06, %v1805_v56  ;;  %v14676_v55 = vpack.c.bf16 %v13013_v54, %v13011_v53  ;;  %v13016_v56 = vld [vmem:[%s17662_s5 + $0x68] sm:$0xff] }
 0xee1   :  { %14975 = vrsqrt.f32 %v1808_v60  ;;  %v13018_v60 = vld [vmem:[%s17662_s5 + $0x78] sm:$0xff] }
 0xee2   :  { %14977 = vrsqrt.f32 %v1807_v62  ;;  %v14678_v62 = vpack.c.bf16 %v13018_v60, %v13016_v56 }
 0xeeb   :  { %v14976_v2 = vpop.eup %14975 }
 0xeec   :  { %v14978_v5 = vpop.eup %14977  ;;  %v1812_v8 = vmul.f32 %v14976_v2, %v15743_v39  ;;  %v13015_v2 = vld [vmem:[%s17662_s5 + $0x60] sm:$0xff] }
 0xeed   :  { %v1811_v10 = vmul.f32 %v14978_v5, %v15746_v41  ;;  %v13017_v5 = vld [vmem:[%s17662_s5 + $0x70] sm:$0xff] }
 0xeee   :  { %v1820_v14 = vmul.f32 %v13005_v6, %v1812_v8 }
 0xeef   :  { %v1819_v13 = vmul.f32 %v13005_v6, %v1811_v10  ;;  %v14680_v6 = vpack.c.bf16 %v13017_v5, %v13015_v2 }
 0xef1   :  { %13870 = vmatprep.mubr.msk.f32.mxu0 %vm192_vm3, %v1819_v13 }
 0xef2   :  { %13871 = vmatmul.mubr.msk.f32.vlgmr.msra.gmra.mrb[20].mxu0 %vm192_vm3, %v1820_v14 }
 0xef3   :  { %2135 = vmatprep.mubr.f32.mxu0 %v15333_v9 }
 0xfc5   :  { %v13872_v29 = vpop.f32.mrb[20].mxu0 }
 0xfc6   :  { %1920 = vrot.lane.b32.xlu1 %v13872_v29, %s15335_s27  ;;  %v1893_v30 = vpop.f32.mrb[21].mxu0  ;;  %v1903_v32 = vsub.f32 0.0, %v13872_v29 }
 0xfc7   :  { %1918 = vrot.lane.b32.xlu0 %v1893_v30, %s15335_s27  ;;  %v1902_v31 = vsub.f32 0.0, %v1893_v30 }
 0xfc8   :  { %v1906_v34 = vmul.f32 1.442695, %v1903_v32 }
 0xfc9   :  { %v1904_v33 = vmul.f32 1.442695, %v1902_v31 }
 0xfcb   :  { %14979 = vpow2.f32 %v1904_v33 }
 0xfcc   :  { %14981 = vpow2.f32 %v1906_v34 }
 0xfd5   :  { %v14980_v35 = vpop.eup %14979 }
 0xfd6   :  { %v14982_v36 = vpop.eup %14981  ;;  %v1908_v12 = vadd.f32 1.0, %v14980_v35 }
 0xfd7   :  { %v1909_v19 = vadd.f32 1.0, %v14982_v36 }
 0xfd8   :  { %14983 = vrcp.f32 %v1908_v12 }
 0xfd9   :  { %14985 = vrcp.f32 %v1909_v19 }
 0xfe2   :  { %v14984_v25 = vpop.eup %14983 }
 0xfe3   :  { %v14986_v37 = vpop.eup %14985  ;;  %v1914_v16 = vmul.f32 %v14984_v25, %v1893_v30 }
 0xfe4   :  { %v1915_v38 = vmul.f32 %v14986_v37, %v13872_v29 }
0x1038   :  { %v1921_v17 = vpop.permute.xlu1 %1920 }
0x1039   :  { %v1919_v0 = vpop.permute.xlu0 %1918  ;;  %v1925_v44 = vmul.f32 %v1921_v17, %v1915_v38 }
0x103a   :  { %v1924_v40 = vmul.f32 %v1919_v0, %v1914_v16 }
0x103c   :  { %13889 = vmatprep.mubr.msk.f32.mxu1 %vm74_vm0, %v1924_v40 }
0x103d   :  { %13890 = vmatmul.mubr.msk.f32.vlgmr.msra.gmra.mrb[20].mxu1 %vm74_vm0, %v1925_v44 }
0x103e   :  { %13899 = vmatprep.mubr.msk.f32.mxu1 %vm15337_vm4, %v15333_v9 }
0x1110   :  { %v13891_v4 = vpop.f32.mrb[20].mxu1 }
0x1111   :  { %v15803_v45 = vadd.f32 %v13891_v4, %v15743_v39  ;;  %v1998_v46 = vpop.f32.mrb[21].mxu1  ;;  %v13012_v39 = vld [vmem:[%s17662_s5 + $0x48] sm:$0xff] }
0x1112   :  { %v15806_v22 = vadd.f32 %v1998_v46, %v15746_v41  ;;  %v13014_v41 = vld [vmem:[%s17662_s5 + $0x58] sm:$0xff] }
0x1113   :  { %v2042_v23 = vmul.f32 %v15803_v45, %v15803_v45  ;;  %v14674_v52 = vpack.c.bf16 %v13014_v41, %v13012_v39 }
0x1114   :  { %v2041_v47 = vmul.f32 %v15806_v22, %v15806_v22 }
0x1115   :  { %v2046_v48 = vsel %vm192_vm3, %v2042_v23, 0.0  ;;  %14675 = vmatprep.subr.bf16.mxu0 %v14674_v52 }
0x1116   :  { %2047 = vadd.xlane.f32.xlu0 %v2046_v48  ;;  %v2043_v50 = vsel %vm192_vm3, %v2041_v47, 0.0  ;;  %14677 = vmatpush1.bf16.msra.mxu0 %v14676_v55 }
0x1117   :  { %2044 = vadd.xlane.f32.xlu1 %v2043_v50  ;;  %14679 = vmatprep.subr.bf16.mxu0 %v14678_v62 }
0x111a   :  { %14681 = vmatpush1.bf16.msra.mxu0 %v14680_v6 }
0x111b   :  { %13892 = vmatprep.subr.mxu0 %v15333_v9 }
0x11a3   :  { %v2048_v8 = vpop.xlane.xlu0 %2047 }
0x11a4   :  { %v2050_v10 = vmul.f32 0.03125, %v2048_v8  ;;  %v2045_v13 = vpop.xlane.xlu1 %2044 }
0x11a5   :  { %v2049_v14 = vmul.f32 0.03125, %v2045_v13 }
0x11a6   :  { %v2052_v1 = vadd.f32 1e-06, %v2050_v10 }
0x11a7   :  { %v2051_v61 = vadd.f32 1e-06, %v2049_v14 }
0x11a8   :  { %14987 = vrsqrt.f32 %v2052_v1 }
0x11a9   :  { %14989 = vrsqrt.f32 %v2051_v61 }
0x11b2   :  { %v14988_v15 = vpop.eup %14987 }
0x11b3   :  { %v14990_v49 = vpop.eup %14989  ;;  %v2056_v21 = vmul.f32 %v14988_v15, %v15803_v45 }
0x11b4   :  { %v2055_v51 = vmul.f32 %v14990_v49, %v15806_v22 }
0x11b5   :  { %v2064_v24 = vmul.f32 %v13035_v18, %v2056_v21 }
0x11b6   :  { %v2063_v20 = vmul.f32 %v13035_v18, %v2055_v51 }
0x11b8   :  { %13036 = vmatmul.mubr.msk.f32.vlgmr.msra.gmra.mrb[22].mxu0 %vm192_vm3, %v2063_v20 }
0x11b9   :  { %2141 = vmatprep.mubr.f32.mxu0 %v15333_v9 }
0x11bc   :  { %13037 = vmatmul.mubr.msk.f32.gmra.mrb[24].mxu0 %vm192_vm3, %v2064_v24 }
0x11bd   :  { %13894 = vmatprep.mubr.msk.f32.mxu0 %vm15337_vm4, %v15333_v9 }
0x128b   :  { %v2137_v7 = vpop.f32.mrb[22].mxu0 }
0x128c   :  { %v15849_v26 = vpop.f32.mrb[23].mxu0  ;;  %v2164_v27 = vmul.f32 %v2137_v7, %v15525_v57  ;;  %v2150_v31 = vmul.f32 %v2137_v7, %v15540_v3  ;;  %v2162_v34 = vmul.f32 %v2137_v7, %v15527_v58  ;;  %v2148_v16 = vmul.f32 %v2137_v7, %v15505_v42 }
0x128e   :  { %2168 = vrot.lane.b32.xlu0 %v2164_v27, %s15334_s23 }
0x128f   :  { %v2143_v29 = vpop.f32.mrb[24].mxu0 }
0x1290   :  { %v15853_v30 = vpop.f32.mrb[25].mxu0  ;;  %v2165_v32 = vmul.f32 %v2143_v29, %v15534_v63  ;;  %v2151_v33 = vmul.f32 %v2143_v29, %v15556_v11  ;;  %v2163_v12 = vmul.f32 %v2143_v29, %v15529_v59  ;;  %v2149_v40 = vmul.f32 %v2143_v29, %v15513_v43 }
0x1292   :  { %2154 = vrot.lane.b32.xlu0 %v2150_v31, %s15334_s23  ;;  %2170 = vrot.lane.b32.xlu1 %v2165_v32, %s15334_s23 }
0x1296   :  { %2156 = vrot.lane.b32.xlu0 %v2151_v33, %s15334_s23 }
0x1300   :  { %v2169_v35 = vpop.permute.xlu0 %2168 }
0x1301   :  { %v15862_v36 = vadd.f32 %v2169_v35, %v2162_v34 }
0x1303   :  { %2177 = vrot.lane.b32.xlu1 %v15862_v36, %s15335_s27 }
0x1304   :  { %v2171_v19 = vpop.permute.xlu1 %2170  ;;  %v2155_v37 = vpop.permute.xlu0 %2154 }
0x1305   :  { %v15867_v25 = vadd.f32 %v2171_v19, %v2163_v12  ;;  %v15873_v38 = vadd.f32 %v2155_v37, %v2148_v16 }
0x1307   :  { %2255 = vrot.lane.b32.xlu1 %v15867_v25, %s15335_s27 }
0x1308   :  { %v2157_v0 = vpop.permute.xlu0 %2156 }
0x1309   :  { %v15881_v4 = vadd.f32 %v2157_v0, %v2149_v40 }
0x1375   :  { %v2178_v17 = vpop.permute.xlu1 %2177 }
0x1376   :  { %13893 = vmatpush3.xpose.msk.msra.mxu0 %vm352_vm5, %v2178_v17 }
0x1377   :  { %13902 = vmatprep.subr.mxu0 %v15333_v9 }
0x1379   :  { %13895 = vmatmul.mubr.msk.f32.vlgmr.msra.gmra.mrb[26].mxu0 %vm352_vm5, %v15873_v38  ;;  %v2256_v44 = vpop.permute.xlu1 %2255 }
0x137a   :  { %13898 = vmatpush3.xpose.msk.msra.mxu1 %vm352_vm5, %v2256_v44  ;;  %13903 = vmatpush3.msra.mxu0 %v15849_v26 }
0x137b   :  { %13907 = vmatprep.subr.mxu1 %v15333_v9  ;;  %13904 = vmatprep.mubr.msk.f32.mxu0 %vm15337_vm4, %v15333_v9 }
0x137c   :  { %13912 = vmatprep.subr.mxu0 %v15333_v9 }
0x137d   :  { %13900 = vmatmul.mubr.msk.f32.vlgmr.msra.gmra.mrb[22].mxu1 %vm352_vm5, %v15881_v4 }
0x137e   :  { %13908 = vmatpush3.msra.mxu1 %v15853_v30  ;;  %13909 = vmatprep.mubr.msk.f32.mxu1 %vm15337_vm4, %v15333_v9 }
0x137f   :  { %13917 = vmatprep.subr.mxu1 %v15333_v9 }
0x144c   :  { %v2250_v42 = vpop.f32.mrb[26].mxu0 }
0x144d   :  { %v2332_v43 = vmul.f32 0.35355338, %v2250_v42  ;;  %v13896_v46 = vpop.f32.mrb[27].mxu0 }
0x144f   :  { %v2334_v23 = vadd.f32 %v2332_v43, %v15588_v28 }
0x1450   :  { %v2328_v47 = vpop.f32.mrb[22].mxu1 }
0x1451   :  { %v2333_v48 = vmul.f32 0.35355338, %v2328_v47  ;;  %v13901_v50 = vpop.f32.mrb[23].mxu1  ;;  %v2336_v39 = vsel %vm352_vm5, %v2334_v23, -inf }
0x1452   :  { %2337 = vmax.xlane.f32.xlu1 %v2336_v39 }
0x1453   :  { %v2335_v41 = vadd.f32 %v2333_v48, %v15588_v28 }
0x1455   :  { %v2339_v52 = vsel %vm352_vm5, %v2335_v41, -inf }
0x1456   :  { %2340 = vmax.xlane.f32.xlu0 %v2339_v52 }
0x1463   :  { %2584 = vrot.lane.b32.xlu1 %v15867_v25, %s15339_s12 }
0x14df   :  { %v2338_v53 = vpop.xlane.xlu1 %2337 }
0x14e0   :  { %v2342_v54 = vsub.f32 %v2334_v23, %v2338_v53 }
0x14e2   :  { %v2344_v55 = vmul.f32 1.442695, %v2342_v54 }
0x14e3   :  { %v2341_v56 = vpop.xlane.xlu0 %2340  ;;  %v2585_v10 = vpop.permute.xlu1 %2584 }
0x14e4   :  { %14991 = vpow2.f32 %v2344_v55  ;;  %v2343_v60 = vsub.f32 %v2335_v41, %v2341_v56 }
0x14e6   :  { %v2346_v62 = vmul.f32 1.442695, %v2343_v60 }
0x14e8   :  { %14993 = vpow2.f32 %v2346_v62 }
0x14ee   :  { %v14992_v2 = vpop.eup %14991 }
0x14ef   :  { %v2348_v5 = vsel %vm352_vm5, %v14992_v2, 0.0 }
0x14f0   :  { %2349 = vadd.xlane.f32.xlu0 %v2348_v5 }
0x14f2   :  { %v14994_v6 = vpop.eup %14993 }
0x14f3   :  { %v2351_v8 = vsel %vm352_vm5, %v14994_v6, 0.0 }
0x14f4   :  { %2352 = vadd.xlane.f32.xlu1 %v2351_v8 }
0x1505   :  { %2504 = vrot.lane.b32.xlu1 %v15873_v38, %s15340_s13 }
0x1506   :  { %2506 = vrot.lane.b32.xlu0 %v15862_v36, %s15339_s12 }
0x150a   :  { %2582 = vrot.lane.b32.xlu0 %v15881_v4, %s15340_s13 }
0x157d   :  { %v2350_v13 = vpop.xlane.xlu0 %2349 }
0x157e   :  { %14995 = vrcp.f32 %v2350_v13 }
0x1581   :  { %v2353_v14 = vpop.xlane.xlu1 %2352  ;;  %v2507_v15 = vpop.permute.xlu0 %2506 }
0x1582   :  { %14997 = vrcp.f32 %v2353_v14 }
0x1585   :  { %v2505_v51 = vpop.permute.xlu1 %2504  ;;  %v2583_v20 = vpop.permute.xlu0 %2582 }
0x1588   :  { %v14996_v1 = vpop.eup %14995 }
0x1589   :  { %v2356_v61 = vmul.f32 %v14996_v1, %v14992_v2 }
0x158b   :  { %13905 = vmatmul.mubr.msk.f32.vlgmr.msra.gmra.mrb[28].mxu0 %vm352_vm5, %v2356_v61 }
0x158c   :  { %v14998_v49 = vpop.eup %14997  ;;  %13913 = vmatpush3.xpose.msk.msra.mxu0 %vm352_vm5, %v2507_v15  ;;  %13914 = vmatprep.mubr.msk.f32.mxu0 %vm15337_vm4, %v15333_v9 }
0x158d   :  { %v2357_v18 = vmul.f32 %v14998_v49, %v14994_v6  ;;  %13922 = vmatprep.subr.mxu0 %v15333_v9 }
0x158f   :  { %13910 = vmatmul.mubr.msk.f32.vlgmr.msra.gmra.mrb[24].mxu1 %vm352_vm5, %v2357_v18  ;;  %13915 = vmatmul.mubr.msk.f32.vlgmr.msra.gmra.mrb[30].mxu0 %vm352_vm5, %v2505_v51 }
0x1590   :  { %13918 = vmatpush3.xpose.msk.msra.mxu1 %vm352_vm5, %v2585_v10  ;;  %13919 = vmatprep.mubr.msk.f32.mxu1 %vm15337_vm4, %v15333_v9 }
0x1591   :  { %13927 = vmatprep.subr.mxu1 %v15333_v9  ;;  %13924 = vmatprep.mubr.msk.f32.mxu0 %vm15337_vm4, %v15333_v9 }
0x1593   :  { %13920 = vmatmul.mubr.msk.f32.vlgmr.msra.gmra.mrb[26].mxu1 %vm352_vm5, %v2583_v20 }
0x1594   :  { %13929 = vmatprep.mubr.msk.f32.mxu1 %vm15337_vm4, %v15333_v9 }
0x165e   :  { %v15923_v21 = vpop.f32.mrb[28].mxu0 }
0x165f   :  { %v13906_v24 = vpop.f32.mrb[29].mxu0 }
0x1662   :  { %v15925_v7 = vpop.f32.mrb[24].mxu1  ;;  %v2578_v27 = vpop.f32.mrb[30].mxu0 }
0x1663   :  { %v2660_v29 = vmul.f32 0.35355338, %v2578_v27  ;;  %v13911_v31 = vpop.f32.mrb[25].mxu1  ;;  %v13916_v32 = vpop.f32.mrb[31].mxu0 }
0x1665   :  { %v2662_v33 = vadd.f32 %v2660_v29, %v15588_v28 }
0x1666   :  { %v2656_v34 = vpop.f32.mrb[26].mxu1 }
0x1667   :  { %v2661_v35 = vmul.f32 0.35355338, %v2656_v34  ;;  %v13921_v12 = vpop.f32.mrb[27].mxu1  ;;  %v2664_v19 = vsel %vm352_vm5, %v2662_v33, -inf }
0x1668   :  { %2665 = vmax.xlane.f32.xlu1 %v2664_v19 }
0x1669   :  { %v2663_v37 = vadd.f32 %v2661_v35, %v15588_v28 }
0x166b   :  { %v2667_v16 = vsel %vm352_vm5, %v2663_v37, -inf }
0x166c   :  { %2668 = vmax.xlane.f32.xlu0 %v2667_v16 }
0x1679   :  { %2764 = vrot.lane.b32.xlu1 %v15853_v30, %s15340_s13 }
0x167d   :  { %2842 = vrot.lane.b32.xlu1 %v15862_v36, %s15341_s15 }
0x1682   :  { %2687 = vrot.lane.b32.xlu0 %v15849_v26, %s15340_s13 }
0x16f5   :  { %v2666_v17 = vpop.xlane.xlu1 %2665 }
0x16f6   :  { %v2670_v0 = vsub.f32 %v2662_v33, %v2666_v17 }
0x16f8   :  { %v2672_v40 = vmul.f32 1.442695, %v2670_v0 }
0x16f9   :  { %v2669_v44 = vpop.xlane.xlu0 %2668  ;;  %v2765_v42 = vpop.permute.xlu1 %2764 }
0x16fa   :  { %14999 = vpow2.f32 %v2672_v40  ;;  %v2671_v43 = vsub.f32 %v2663_v37, %v2669_v44  ;;  %13928 = vmatpush3.msra.mxu1 %v2765_v42 }
0x16fb   :  { %13937 = vmatprep.subr.mxu1 %v15333_v9 }
0x16fc   :  { %v2674_v46 = vmul.f32 1.442695, %v2671_v43 }
0x16fd   :  { %v2688_v23 = vpop.permute.xlu0 %2687  ;;  %v2843_v41 = vpop.permute.xlu1 %2842 }
0x16fe   :  { %15001 = vpow2.f32 %v2674_v46  ;;  %13923 = vmatpush3.msra.mxu0 %v2688_v23 }
0x16ff   :  { %13932 = vmatprep.subr.mxu0 %v15333_v9 }
0x1704   :  { %v15000_v47 = vpop.eup %14999 }
0x1705   :  { %v2676_v48 = vsel %vm352_vm5, %v15000_v47, 0.0 }
0x1706   :  { %2677 = vadd.xlane.f32.xlu0 %v2676_v48 }
0x1708   :  { %v15002_v50 = vpop.eup %15001 }
0x1709   :  { %v2679_v39 = vsel %vm352_vm5, %v15002_v50, 0.0 }
0x170a   :  { %2680 = vadd.xlane.f32.xlu1 %v2679_v39 }
0x171b   :  { %2840 = vrot.lane.b32.xlu1 %v15873_v38, %s15342_s16 }
0x171c   :  { %2920 = vrot.lane.b32.xlu0 %v15867_v25, %s15341_s15 }
0x1720   :  { %2918 = vrot.lane.b32.xlu0 %v15881_v4, %s15342_s16 }
0x1793   :  { %v2678_v52 = vpop.xlane.xlu0 %2677 }
0x1794   :  { %15003 = vrcp.f32 %v2678_v52 }
0x1797   :  { %v2681_v53 = vpop.xlane.xlu1 %2680  ;;  %v2921_v60 = vpop.permute.xlu0 %2920 }
0x1798   :  { %15005 = vrcp.f32 %v2681_v53 }
0x179b   :  { %v2841_v2 = vpop.permute.xlu1 %2840  ;;  %v2919_v5 = vpop.permute.xlu0 %2918 }
0x179e   :  { %v15004_v54 = vpop.eup %15003 }
0x179f   :  { %v2684_v55 = vmul.f32 %v15004_v54, %v15000_v47 }
0x17a1   :  { %13925 = vmatmul.mubr.msk.f32.vlgmr.msra.gmra.mrb[32].mxu0 %vm352_vm5, %v2684_v55 }
0x17a2   :  { %v15006_v56 = vpop.eup %15005  ;;  %13933 = vmatpush3.xpose.msk.msra.mxu0 %vm352_vm5, %v2843_v41  ;;  %13934 = vmatprep.mubr.msk.f32.mxu0 %vm15337_vm4, %v15333_v9 }
0x17a3   :  { %v2685_v62 = vmul.f32 %v15006_v56, %v15002_v50  ;;  %13942 = vmatprep.subr.mxu0 %v15333_v9 }
0x17a5   :  { %13930 = vmatmul.mubr.msk.f32.vlgmr.msra.gmra.mrb[28].mxu1 %vm352_vm5, %v2685_v62  ;;  %13935 = vmatmul.mubr.msk.f32.vlgmr.msra.gmra.mrb[34].mxu0 %vm352_vm5, %v2841_v2 }
0x17a6   :  { %13938 = vmatpush3.xpose.msk.msra.mxu1 %vm352_vm5, %v2921_v60  ;;  %13939 = vmatprep.mubr.msk.f32.mxu1 %vm15337_vm4, %v15333_v9 }
0x17a7   :  { %13947 = vmatprep.subr.mxu1 %v15333_v9  ;;  %13944 = vmatprep.mubr.msk.f32.mxu0 %vm15337_vm4, %v15333_v9 }
0x17a9   :  { %13940 = vmatmul.mubr.msk.f32.vlgmr.msra.gmra.mrb[30].mxu1 %vm352_vm5, %v2919_v5 }
0x17aa   :  { %13949 = vmatprep.mubr.msk.f32.mxu1 %vm15337_vm4, %v15333_v9 }
0x1874   :  { %v15963_v6 = vpop.f32.mrb[32].mxu0 }
0x1875   :  { %v13926_v8 = vpop.f32.mrb[33].mxu0 }
0x1878   :  { %v15965_v10 = vpop.f32.mrb[28].mxu1  ;;  %v2914_v13 = vpop.f32.mrb[34].mxu0 }
0x1879   :  { %v2996_v14 = vmul.f32 0.35355338, %v2914_v13  ;;  %v13931_v1 = vpop.f32.mrb[29].mxu1  ;;  %v13936_v61 = vpop.f32.mrb[35].mxu0 }
0x187b   :  { %v2998_v15 = vadd.f32 %v2996_v14, %v15588_v28 }
0x187c   :  { %v2992_v49 = vpop.f32.mrb[30].mxu1 }
0x187d   :  { %v2997_v18 = vmul.f32 0.35355338, %v2992_v49  ;;  %v13941_v51 = vpop.f32.mrb[31].mxu1  ;;  %v3000_v20 = vsel %vm352_vm5, %v2998_v15, -inf }
0x187e   :  { %3001 = vmax.xlane.f32.xlu1 %v3000_v20 }
0x187f   :  { %v2999_v24 = vadd.f32 %v2997_v18, %v15588_v28 }
0x1881   :  { %v3003_v27 = vsel %vm352_vm5, %v2999_v24, -inf }
0x1882   :  { %3004 = vmax.xlane.f32.xlu0 %v3003_v27 }
0x188f   :  { %3098 = vrot.lane.b32.xlu1 %v15853_v30, %s15342_s16 }
0x1893   :  { %3176 = vrot.lane.b32.xlu1 %v15862_v36, %s15343_s7 }
0x1898   :  { %3022 = vrot.lane.b32.xlu0 %v15849_v26, %s15342_s16 }
0x190b   :  { %v3002_v29 = vpop.xlane.xlu1 %3001 }
0x190c   :  { %v3006_v31 = vsub.f32 %v2998_v15, %v3002_v29 }
0x190e   :  { %v3008_v32 = vmul.f32 1.442695, %v3006_v31 }
0x190f   :  { %v3005_v33 = vpop.xlane.xlu0 %3004  ;;  %v3099_v34 = vpop.permute.xlu1 %3098 }
0x1910   :  { %15007 = vpow2.f32 %v3008_v32  ;;  %v3007_v35 = vsub.f32 %v2999_v24, %v3005_v33  ;;  %13948 = vmatpush3.msra.mxu1 %v3099_v34  ;;  %v13020_v33 = vld [vmem:[%s17663_s6 + $0x28] sm:$0xff] }
0x1911   :  { %13957 = vmatprep.subr.mxu1 %v15333_v9 }
0x1912   :  { %v3010_v12 = vmul.f32 1.442695, %v3007_v35  ;;  %v13021_v35 = vld [vmem:[%s17663_s6 + $0x30] sm:$0xff] }
0x1913   :  { %v3023_v19 = vpop.permute.xlu0 %3022  ;;  %v3177_v0 = vpop.permute.xlu1 %3176 }
0x1914   :  { %15009 = vpow2.f32 %v3010_v12  ;;  %13943 = vmatpush3.msra.mxu0 %v3023_v19  ;;  %v13022_v12 = vld [vmem:[%s17663_s6 + $0x38] sm:$0xff] }
0x1915   :  { %13952 = vmatprep.subr.mxu0 %v15333_v9  ;;  %v14686_v19 = vpack.c.bf16 %v13022_v12, %v13021_v35  ;;  %v13034_v35 = vld [vmem:[%s17666_s9 + $0x78] sm:$0xff] }
0x191a   :  { %v15008_v36 = vpop.eup %15007 }
0x191b   :  { %v3012_v37 = vsel %vm352_vm5, %v15008_v36, 0.0 }
0x191c   :  { %3013 = vadd.xlane.f32.xlu0 %v3012_v37 }
0x191e   :  { %v15010_v16 = vpop.eup %15009 }
0x191f   :  { %v3015_v17 = vsel %vm352_vm5, %v15010_v16, 0.0 }
0x1920   :  { %3016 = vadd.xlane.f32.xlu1 %v3015_v17 }
0x1931   :  { %3174 = vrot.lane.b32.xlu1 %v15873_v38, %s15344_s14 }
0x1932   :  { %3254 = vrot.lane.b32.xlu0 %v15867_v25, %s15343_s7 }
0x1936   :  { %3252 = vrot.lane.b32.xlu0 %v15881_v4, %s15344_s14 }
0x19a9   :  { %v3014_v40 = vpop.xlane.xlu0 %3013 }
0x19aa   :  { %15011 = vrcp.f32 %v3014_v40 }
0x19ad   :  { %v3017_v44 = vpop.xlane.xlu1 %3016  ;;  %v3255_v23 = vpop.permute.xlu0 %3254 }
0x19ae   :  { %15013 = vrcp.f32 %v3017_v44 }
0x19b1   :  { %v3175_v38 = vpop.permute.xlu1 %3174  ;;  %v3253_v4 = vpop.permute.xlu0 %3252 }
0x19b4   :  { %v15012_v42 = vpop.eup %15011 }
0x19b5   :  { %v3020_v43 = vmul.f32 %v15012_v42, %v15008_v36 }
0x19b7   :  { %13945 = vmatmul.mubr.msk.f32.vlgmr.msra.gmra.mrb[36].mxu0 %vm352_vm5, %v3020_v43 }
0x19b8   :  { %v15014_v46 = vpop.eup %15013  ;;  %13953 = vmatpush3.xpose.msk.msra.mxu0 %vm352_vm5, %v3177_v0  ;;  %13954 = vmatprep.mubr.msk.f32.mxu0 %vm15337_vm4, %v15333_v9 }
0x19b9   :  { %v3021_v25 = vmul.f32 %v15014_v46, %v15010_v16  ;;  %13962 = vmatprep.subr.mxu0 %v15333_v9 }
0x19bb   :  { %13950 = vmatmul.mubr.msk.f32.vlgmr.msra.gmra.mrb[32].mxu1 %vm352_vm5, %v3021_v25  ;;  %13955 = vmatmul.mubr.msk.f32.vlgmr.msra.gmra.mrb[38].mxu0 %vm352_vm5, %v3175_v38 }
0x19bc   :  { %13958 = vmatpush3.xpose.msk.msra.mxu1 %vm352_vm5, %v3255_v23  ;;  %13959 = vmatprep.mubr.msk.f32.mxu1 %vm15337_vm4, %v15333_v9 }
0x19bd   :  { %13967 = vmatprep.subr.mxu1 %v15333_v9  ;;  %13964 = vmatprep.mubr.msk.f32.mxu0 %vm15337_vm4, %v15333_v9 }
0x19bf   :  { %13960 = vmatmul.mubr.msk.f32.vlgmr.msra.gmra.mrb[34].mxu1 %vm352_vm5, %v3253_v4 }
0x19c0   :  { %13969 = vmatprep.mubr.msk.f32.mxu1 %vm15337_vm4, %v15333_v9 }
0x1a8a   :  { %v3094_v47 = vpop.f32.mrb[36].mxu0 }
0x1a8b   :  { %v13946_v48 = vpop.f32.mrb[37].mxu0 }
0x1a8e   :  { %v3170_v50 = vpop.f32.mrb[32].mxu1  ;;  %v3248_v39 = vpop.f32.mrb[38].mxu0 }
0x1a8f   :  { %v3330_v41 = vmul.f32 0.35355338, %v3248_v39  ;;  %v13951_v52 = vpop.f32.mrb[33].mxu1  ;;  %v13956_v53 = vpop.f32.mrb[39].mxu0 }
0x1a91   :  { %v3332_v54 = vadd.f32 %v3330_v41, %v15588_v28 }
0x1a92   :  { %v3326_v55 = vpop.f32.mrb[34].mxu1 }
0x1a93   :  { %v3331_v56 = vmul.f32 0.35355338, %v3326_v55  ;;  %v13961_v60 = vpop.f32.mrb[35].mxu1  ;;  %v3334_v62 = vsel %vm352_vm5, %v3332_v54, -inf  ;;  %v13025_v55 = vld [vmem:[%s17665_s8 + $0x30] sm:$0xff] }
0x1a94   :  { %3335 = vmax.xlane.f32.xlu1 %v3334_v62  ;;  %v13026_v60 = vld [vmem:[%s17665_s8 + $0x38] sm:$0xff] }
0x1a95   :  { %v3333_v2 = vadd.f32 %v3331_v56, %v15588_v28  ;;  %v14694_v62 = vpack.c.bf16 %v13026_v60, %v13025_v55  ;;  %v13070_v60 = vld [vmem:[%s17662_s5 + $0x80] sm:$0xff] }
0x1a97   :  { %v3337_v5 = vsel %vm352_vm5, %v3333_v2, -inf }
0x1a98   :  { %3338 = vmax.xlane.f32.xlu0 %v3337_v5 }
0x1b21   :  { %v3336_v8 = vpop.xlane.xlu1 %3335 }
0x1b22   :  { %v3340_v13 = vsub.f32 %v3332_v54, %v3336_v8 }
0x1b24   :  { %v3342_v14 = vmul.f32 1.442695, %v3340_v13 }
0x1b25   :  { %v3339_v1 = vpop.xlane.xlu0 %3338 }
0x1b26   :  { %15015 = vpow2.f32 %v3342_v14  ;;  %v3341_v61 = vsub.f32 %v3333_v2, %v3339_v1 }
0x1b28   :  { %v3344_v15 = vmul.f32 1.442695, %v3341_v61 }
0x1b2a   :  { %15017 = vpow2.f32 %v3344_v15 }
0x1b30   :  { %v15016_v49 = vpop.eup %15015 }
0x1b31   :  { %v3346_v18 = vsel %vm352_vm5, %v15016_v49, 0.0 }
0x1b32   :  { %3347 = vadd.xlane.f32.xlu0 %v3346_v18 }
0x1b34   :  { %v15018_v51 = vpop.eup %15017 }
0x1b35   :  { %v3349_v20 = vsel %vm352_vm5, %v15018_v51, 0.0 }
0x1b36   :  { %3350 = vadd.xlane.f32.xlu1 %v3349_v20 }
0x1b47   :  { %3432 = vrot.lane.b32.xlu1 %v15853_v30, %s15344_s14 }
0x1b48   :  { %3356 = vrot.lane.b32.xlu0 %v15849_v26, %s15344_s14 }
0x1b4b   :  { %3510 = vrot.lane.b32.xlu1 %v15963_v6, %s15345_s17 }
0x1b4c   :  { %3512 = vrot.lane.b32.xlu0 %v15965_v10, %s15345_s17  ;;  %v13019_v10 = vld [vmem:[%s17663_s6 + $0x20] sm:$0xff] }
0x1b4d   :  { %v14682_v34 = vpack.c.bf16 %v13020_v33, %v13019_v10  ;;  %v13032_v10 = vld [vmem:[%s17666_s9 + $0x68] sm:$0xff] }
0x1b4f   :  { %3518 = vrot.lane.b32.xlu1 %v3094_v47, %s15330_s24 }
0x1b50   :  { %3520 = vrot.lane.b32.xlu0 %v3170_v50, %s15330_s24 }
0x1bbf   :  { %v3348_v24 = vpop.xlane.xlu0 %3347 }
0x1bc0   :  { %15019 = vrcp.f32 %v3348_v24 }
0x1bc3   :  { %v3357_v27 = vpop.permute.xlu0 %3356  ;;  %v3351_v29 = vpop.xlane.xlu1 %3350 }
0x1bc4   :  { %15021 = vrcp.f32 %v3351_v29  ;;  %13963 = vmatpush3.msra.mxu0 %v3357_v27  ;;  %v13027_v27 = vld [vmem:[%s17666_s9 + $0x40] sm:$0xff]  ;;  %v13028_v29 = vld [vmem:[%s17666_s9 + $0x48] sm:$0xff] }
0x1bc5   :  { %14683 = vmatprep.subr.bf16.mxu0 %v14682_v34 }
0x1bc7   :  { %v3433_v30 = vpop.permute.xlu1 %3432  ;;  %v3513_v40 = vpop.permute.xlu0 %3512 }
0x1bc8   :  { %13968 = vmatpush3.msra.mxu1 %v3433_v30  ;;  %v3533_v38 = vsel %vm352_vm5, %v15925_v7, %v3513_v40  ;;  %v13029_v30 = vld [vmem:[%s17666_s9 + $0x50] sm:$0xff] }
0x1bca   :  { %v15020_v31 = vpop.eup %15019 }
0x1bcb   :  { %v3354_v26 = vmul.f32 %v15020_v31, %v15016_v49  ;;  %v3511_v0 = vpop.permute.xlu1 %3510  ;;  %v3521_v43 = vpop.permute.xlu0 %3520  ;;  %v13064_v49 = vld [vmem:[#allocation2 + $0x1] ss:$0 sm:$0xff]  ;;  %v14698_v31 = vpack.c.bf16 %v13028_v29, %v13027_v27 }
0x1bcc   :  { %v3532_v42 = vsel %vm352_vm5, %v15923_v21, %v3511_v0  ;;  %v3535_v4 = vsel %vm1708_vm8, %v3533_v38, %v3521_v43 }
0x1bcd   :  { %13965 = vmatmul.mubr.msk.f32.vlgmr.msra.gmra.mrb[40].mxu0 %vm352_vm5, %v3354_v26  ;;  %v13030_v26 = vld [vmem:[%s17666_s9 + $0x58] sm:$0xff] }
0x1bce   :  { %v15022_v6 = vpop.eup %15021  ;;  %14685 = vmatpush3.bf16.msra.mxu0 %v14682_v34  ;;  %v13033_v34 = vld [vmem:[%s17666_s9 + $0x70] sm:$0xff] }
0x1bcf   :  { %v3355_v32 = vmul.f32 %v15022_v6, %v15018_v51  ;;  %14687 = vmatprep.subr.bf16.mxu0 %v14686_v19  ;;  %v3519_v44 = vpop.permute.xlu1 %3518  ;;  %v14702_v6 = vpack.c.bf16 %v13030_v26, %v13029_v30  ;;  %v14710_v12 = vpack.c.bf16 %v13034_v35, %v13033_v34  ;;  %v13094_v30 = vld [vmem:[%s17661_s4 + $0x2] ss:$0 sm:$0xff] }
0x1bd0   :  { %v3534_v46 = vsel %vm1708_vm8, %v3532_v42, %v3519_v44 }
0x1bd1   :  { %13970 = vmatmul.mubr.msk.f32.vlgmr.msra.gmra.mrb[36].mxu1 %vm352_vm5, %v3355_v32  ;;  %v13031_v32 = vld [vmem:[%s17666_s9 + $0x60] sm:$0xff] }
0x1bd2   :  { %14689 = vmatpush3.bf16.msra.mxu0 %v14686_v19  ;;  %v14706_v33 = vpack.c.bf16 %v13032_v10, %v13031_v32 }
0x1bd3   :  { %14699 = vmatprep.subr.bf16.mxu0 %v14698_v31 }
0x1ca0   :  { %v3428_v36 = vpop.f32.mrb[40].mxu0 }
0x1ca1   :  { %3526 = vrot.lane.b32.xlu1 %v3428_v36, %s15346_s1  ;;  %v13966_v37 = vpop.f32.mrb[41].mxu0 }
0x1ca4   :  { %v3504_v16 = vpop.f32.mrb[36].mxu1 }
0x1ca5   :  { %3528 = vrot.lane.b32.xlu0 %v3504_v16, %s15346_s1  ;;  %v13971_v17 = vpop.f32.mrb[37].mxu1 }
0x1d13   :  { %v3527_v23 = vpop.permute.xlu1 %3526 }
0x1d14   :  { %v3536_v25 = vsel %vm1711_vm7, %v3534_v46, %v3527_v23 }
0x1d15   :  { %13980 = vmatprep.mubr.msk.f32.mxu0 %vm192_vm3, %v3536_v25 }
0x1d17   :  { %v3529_v47 = vpop.permute.xlu0 %3528 }
0x1d18   :  { %v3537_v48 = vsel %vm1711_vm7, %v3535_v4, %v3529_v47 }
0x1d19   :  { %13981 = vmatmul.mubr.msk.f32.vlgmr.msra.gmra.mrb[42].mxu0 %vm192_vm3, %v3537_v48 }
0x1d1a   :  { %14701 = vmatpush3.bf16.msra.mxu0 %v14698_v31 }
0x1d1b   :  { %14703 = vmatprep.subr.bf16.mxu0 %v14702_v6 }
0x1d1e   :  { %14705 = vmatpush3.bf16.msra.mxu0 %v14702_v6 }
0x1d1f   :  { %14707 = vmatprep.subr.bf16.mxu0 %v14706_v33 }
0x1d22   :  { %14709 = vmatpush3.bf16.msra.mxu0 %v14706_v33 }
0x1d23   :  { %14711 = vmatprep.subr.bf16.mxu0 %v14710_v12 }
0x1d26   :  { %14713 = vmatpush3.bf16.msra.mxu0 %v14710_v12 }
0x1d27   :  { %14018 = vmatprep.subr.mxu0 %v15333_v9 }
0x1dec   :  { %v13982_v50 = vpop.f32.mrb[42].mxu0 }
0x1ded   :  { %v16046_v21 = vadd.f32 %v13982_v50, %v15803_v45  ;;  %v3610_v39 = vpop.f32.mrb[43].mxu0  ;;  %v13023_v45 = vld [vmem:[%s17665_s8 + $0x20] sm:$0xff] }
0x1dee   :  { %v16049_v41 = vadd.f32 %v3610_v39, %v15806_v22  ;;  %v13024_v22 = vld [vmem:[%s17665_s8 + $0x28] sm:$0xff] }
0x1def   :  { %v3622_v52 = vmul.f32 %v16046_v21, %v16046_v21  ;;  %v14690_v56 = vpack.c.bf16 %v13024_v22, %v13023_v45 }
0x1df0   :  { %v3621_v7 = vmul.f32 %v16049_v41, %v16049_v41 }
0x1df1   :  { %v3626_v53 = vsel %vm192_vm3, %v3622_v52, 0.0  ;;  %14691 = vmatprep.subr.bf16.mxu1 %v14690_v56 }
0x1df2   :  { %3627 = vadd.xlane.f32.xlu0 %v3626_v53  ;;  %v3623_v54 = vsel %vm192_vm3, %v3621_v7, 0.0  ;;  %14693 = vmatpush3.bf16.msra.mxu1 %v14690_v56 }
0x1df3   :  { %3624 = vadd.xlane.f32.xlu1 %v3623_v54  ;;  %14695 = vmatprep.subr.bf16.mxu1 %v14694_v62 }
0x1df6   :  { %14697 = vmatpush3.bf16.msra.mxu1 %v14694_v62  ;;  %v13072_v62 = vld [vmem:[%s17662_s5 + $0x90] sm:$0xff] }
0x1e7f   :  { %v3628_v2 = vpop.xlane.xlu0 %3627 }
0x1e80   :  { %v3630_v5 = vmul.f32 0.03125, %v3628_v2  ;;  %v3625_v8 = vpop.xlane.xlu1 %3624  ;;  %v14716_v2 = vpack.c.bf16 %v13072_v62, %v13070_v60 }
0x1e81   :  { %v3629_v13 = vmul.f32 0.03125, %v3625_v8  ;;  %v13077_v8 = vld [vmem:[%s17662_s5 + $0xb8] sm:$0xff] }
0x1e82   :  { %v3632_v14 = vadd.f32 1e-06, %v3630_v5  ;;  %v13075_v5 = vld [vmem:[%s17662_s5 + $0xa8] sm:$0xff] }
0x1e83   :  { %v3631_v1 = vadd.f32 1e-06, %v3629_v13  ;;  %v14718_v13 = vpack.c.bf16 %v13077_v8, %v13075_v5 }
0x1e84   :  { %15023 = vrsqrt.f32 %v3632_v14  ;;  %v13074_v14 = vld [vmem:[%s17662_s5 + $0xa0] sm:$0xff] }
0x1e85   :  { %15025 = vrsqrt.f32 %v3631_v1  ;;  %v13076_v1 = vld [vmem:[%s17662_s5 + $0xb0] sm:$0xff] }
0x1e8e   :  { %v15024_v61 = vpop.eup %15023 }
0x1e8f   :  { %v15026_v15 = vpop.eup %15025  ;;  %v3636_v18 = vmul.f32 %v15024_v61, %v16046_v21  ;;  %v14720_v61 = vpack.c.bf16 %v13076_v1, %v13074_v14 }
0x1e90   :  { %v3635_v51 = vmul.f32 %v15026_v15, %v16049_v41 }
0x1e91   :  { %v3644_v24 = vmul.f32 %v13064_v49, %v3636_v18 }
0x1e92   :  { %v3643_v20 = vmul.f32 %v13064_v49, %v3635_v51 }
0x1e94   :  { %13991 = vmatprep.mubr.msk.f32.mxu1 %vm192_vm3, %v3643_v20 }
0x1e95   :  { %13992 = vmatmul.mubr.msk.f32.vlgmr.msra.gmra.mrb[38].mxu1 %vm192_vm3, %v3644_v24 }
0x1e96   :  { %3959 = vmatprep.mubr.f32.mxu1 %v15333_v9 }
0x1f68   :  { %v13993_v19 = vpop.f32.mrb[38].mxu1 }
0x1f69   :  { %3744 = vrot.lane.b32.xlu1 %v13993_v19, %s15335_s27  ;;  %v3717_v36 = vpop.f32.mrb[39].mxu1  ;;  %v3727_v16 = vsub.f32 0.0, %v13993_v19 }
0x1f6a   :  { %3742 = vrot.lane.b32.xlu0 %v3717_v36, %s15335_s27  ;;  %v3726_v37 = vsub.f32 0.0, %v3717_v36 }
0x1f6b   :  { %v3730_v0 = vmul.f32 1.442695, %v3727_v16 }
0x1f6c   :  { %v3728_v17 = vmul.f32 1.442695, %v3726_v37 }
0x1f6e   :  { %15027 = vpow2.f32 %v3728_v17 }
0x1f6f   :  { %15029 = vpow2.f32 %v3730_v0 }
0x1f78   :  { %v15028_v40 = vpop.eup %15027 }
0x1f79   :  { %v15030_v44 = vpop.eup %15029  ;;  %v3732_v42 = vadd.f32 1.0, %v15028_v40 }
0x1f7a   :  { %v3733_v43 = vadd.f32 1.0, %v15030_v44 }
0x1f7b   :  { %15031 = vrcp.f32 %v3732_v42 }
0x1f7c   :  { %15033 = vrcp.f32 %v3733_v43 }
0x1f85   :  { %v15032_v46 = vpop.eup %15031 }
0x1f86   :  { %v15034_v23 = vpop.eup %15033  ;;  %v3738_v25 = vmul.f32 %v15032_v46, %v3717_v36  ;;  %v16177_v46 = vld [vmem:[%s17659_s2] sm:$0xff] }
0x1f87   :  { %v3739_v4 = vmul.f32 %v15034_v23, %v13993_v19 }
0x1fdb   :  { %v3745_v38 = vpop.permute.xlu1 %3744 }
0x1fdc   :  { %v3743_v47 = vpop.permute.xlu0 %3742  ;;  %v3749_v50 = vmul.f32 %v3745_v38, %v3739_v4 }
0x1fdd   :  { %v3748_v48 = vmul.f32 %v3743_v47, %v3738_v25  ;;  %v16187_v47 = vld [vmem:[%s17659_s2 + $0x8] sm:$0xff] }
0x1fdf   :  { %14010 = vmatprep.mubr.msk.f32.mxu0 %vm74_vm0, %v3748_v48 }
0x1fe0   :  { %14011 = vmatmul.mubr.msk.f32.vlgmr.msra.gmra.mrb[44].mxu0 %vm74_vm0, %v3749_v50 }
0x1fe1   :  { %14020 = vmatprep.mubr.msk.f32.mxu0 %vm15337_vm4, %v15333_v9 }
0x20b3   :  { %v14012_v39 = vpop.f32.mrb[44].mxu0 }
0x20b4   :  { %v16106_v52 = vadd.f32 %v14012_v39, %v16046_v21  ;;  %v3822_v7 = vpop.f32.mrb[45].mxu0  ;;  %v13071_v21 = vld [vmem:[%s17662_s5 + $0x88] sm:$0xff] }
0x20b5   :  { %v16109_v53 = vadd.f32 %v3822_v7, %v16049_v41  ;;  %v13073_v41 = vld [vmem:[%s17662_s5 + $0x98] sm:$0xff] }
0x20b6   :  { %v3866_v54 = vmul.f32 %v16106_v52, %v16106_v52  ;;  %v14714_v56 = vpack.c.bf16 %v13073_v41, %v13071_v21 }
0x20b7   :  { %v3865_v45 = vmul.f32 %v16109_v53, %v16109_v53 }
0x20b8   :  { %v3870_v22 = vsel %vm192_vm3, %v3866_v54, 0.0  ;;  %14715 = vmatprep.subr.bf16.mxu1 %v14714_v56 }
0x20b9   :  { %3871 = vadd.xlane.f32.xlu0 %v3870_v22  ;;  %v3867_v55 = vsel %vm192_vm3, %v3865_v45, 0.0  ;;  %14717 = vmatpush1.bf16.msra.mxu1 %v14716_v2 }
0x20ba   :  { %3868 = vadd.xlane.f32.xlu1 %v3867_v55  ;;  %14719 = vmatprep.subr.bf16.mxu1 %v14718_v13 }
0x20bd   :  { %14721 = vmatpush1.bf16.msra.mxu1 %v14720_v61 }
0x20be   :  { %14013 = vmatprep.subr.mxu1 %v15333_v9 }
0x2146   :  { %v3872_v15 = vpop.xlane.xlu0 %3871 }
0x2147   :  { %v3874_v49 = vmul.f32 0.03125, %v3872_v15  ;;  %v3869_v18 = vpop.xlane.xlu1 %3868 }
0x2148   :  { %v3873_v51 = vmul.f32 0.03125, %v3869_v18 }
0x2149   :  { %v3876_v20 = vadd.f32 1e-06, %v3874_v49 }
0x214a   :  { %v3875_v24 = vadd.f32 1e-06, %v3873_v51 }
0x214b   :  { %15035 = vrsqrt.f32 %v3876_v20 }
0x214c   :  { %15037 = vrsqrt.f32 %v3875_v24 }
0x2155   :  { %v15036_v27 = vpop.eup %15035 }
0x2156   :  { %v15038_v29 = vpop.eup %15037  ;;  %v3880_v6 = vmul.f32 %v15036_v27, %v16106_v52 }
0x2157   :  { %v3879_v31 = vmul.f32 %v15038_v29, %v16109_v53 }
0x2158   :  { %v3888_v32 = vmul.f32 %v13094_v30, %v3880_v6 }
0x2159   :  { %v3887_v26 = vmul.f32 %v13094_v30, %v3879_v31 }
0x215b   :  { %13095 = vmatmul.mubr.msk.f32.vlgmr.msra.gmra.mrb[40].mxu1 %vm192_vm3, %v3887_v26 }
0x215c   :  { %3965 = vmatprep.mubr.f32.mxu1 %v15333_v9 }
0x215f   :  { %13096 = vmatmul.mubr.msk.f32.gmra.mrb[42].mxu1 %vm192_vm3, %v3888_v32 }
0x2160   :  { %14015 = vmatprep.mubr.msk.f32.mxu1 %vm15337_vm4, %v15333_v9 }
0x222e   :  { %v3961_v10 = vpop.f32.mrb[40].mxu1 }
0x222f   :  { %v3988_v33 = vmul.f32 %v3961_v10, %v15525_v57  ;;  %v16153_v34 = vpop.f32.mrb[41].mxu1  ;;  %v3974_v12 = vmul.f32 %v3961_v10, %v15540_v3  ;;  %v3986_v16 = vmul.f32 %v3961_v10, %v15527_v58  ;;  %v3972_v23 = vmul.f32 %v16177_v46, %v3961_v10 }
0x2231   :  { %3992 = vrot.lane.b32.xlu0 %v3988_v33, %s15334_s23 }
0x2232   :  { %v3967_v35 = vpop.f32.mrb[42].mxu1 }
0x2233   :  { %v3989_v19 = vmul.f32 %v3967_v35, %v15534_v63  ;;  %v16158_v36 = vpop.f32.mrb[43].mxu1  ;;  %v3975_v37 = vmul.f32 %v3967_v35, %v15556_v11  ;;  %v3987_v40 = vmul.f32 %v3967_v35, %v15529_v59  ;;  %v3973_v48 = vmul.f32 %v16187_v47, %v3967_v35 }
0x2235   :  { %3978 = vrot.lane.b32.xlu0 %v3974_v12, %s15334_s23  ;;  %3994 = vrot.lane.b32.xlu1 %v3989_v19, %s15334_s23 }
0x2239   :  { %3980 = vrot.lane.b32.xlu0 %v3975_v37, %s15334_s23 }
0x22a3   :  { %v3993_v17 = vpop.permute.xlu0 %3992 }
0x22a4   :  { %v16165_v0 = vadd.f32 %v3993_v17, %v3986_v16 }
0x22a6   :  { %4001 = vrot.lane.b32.xlu1 %v16165_v0, %s15335_s27 }
0x22a7   :  { %v3995_v44 = vpop.permute.xlu1 %3994  ;;  %v3979_v43 = vpop.permute.xlu0 %3978 }
0x22a8   :  { %v16170_v42 = vadd.f32 %v3995_v44, %v3987_v40  ;;  %v16181_v38 = vadd.f32 %v3979_v43, %v3972_v23 }
0x22aa   :  { %4079 = vrot.lane.b32.xlu1 %v16170_v42, %s15335_s27 }
0x22ab   :  { %v3981_v4 = vpop.permute.xlu0 %3980 }
0x22ac   :  { %v16194_v39 = vadd.f32 %v3981_v4, %v3973_v48 }
0x2318   :  { %v4002_v25 = vpop.permute.xlu1 %4001 }
0x2319   :  { %14014 = vmatpush3.xpose.msk.msra.mxu1 %vm352_vm5, %v4002_v25 }
0x231a   :  { %14023 = vmatprep.subr.mxu1 %v15333_v9 }
0x231c   :  { %14016 = vmatmul.mubr.msk.f32.vlgmr.msra.gmra.mrb[44].mxu1 %vm352_vm5, %v16181_v38  ;;  %v4080_v50 = vpop.permute.xlu1 %4079 }
0x231d   :  { %14019 = vmatpush3.xpose.msk.msra.mxu0 %vm352_vm5, %v4080_v50  ;;  %14024 = vmatpush3.msra.mxu1 %v16153_v34 }
0x231e   :  { %14028 = vmatprep.subr.mxu0 %v15333_v9  ;;  %14025 = vmatprep.mubr.msk.f32.mxu1 %vm15337_vm4, %v15333_v9 }
0x231f   :  { %14033 = vmatprep.subr.mxu1 %v15333_v9 }
0x2320   :  { %14021 = vmatmul.mubr.msk.f32.vlgmr.msra.gmra.mrb[46].mxu0 %vm352_vm5, %v16194_v39 }
0x2321   :  { %14029 = vmatpush3.msra.mxu0 %v16158_v36  ;;  %14030 = vmatprep.mubr.msk.f32.mxu0 %vm15337_vm4, %v15333_v9 }
0x2322   :  { %14038 = vmatprep.subr.mxu0 %v15333_v9 }
0x23ef   :  { %v4074_v7 = vpop.f32.mrb[44].mxu1 }
0x23f0   :  { %v4156_v54 = vmul.f32 0.35355338, %v4074_v7  ;;  %v14017_v45 = vpop.f32.mrb[45].mxu1 }
0x23f2   :  { %v4158_v22 = vadd.f32 %v4156_v54, %v15588_v28 }
0x23f3   :  { %v4152_v55 = vpop.f32.mrb[46].mxu0 }
0x23f4   :  { %v4157_v21 = vmul.f32 0.35355338, %v4152_v55  ;;  %v14022_v41 = vpop.f32.mrb[47].mxu0  ;;  %v4160_v56 = vsel %vm352_vm5, %v4158_v22, -inf }
0x23f5   :  { %4161 = vmax.xlane.f32.xlu1 %v4160_v56 }
0x23f6   :  { %v4159_v60 = vadd.f32 %v4157_v21, %v15588_v28 }
0x23f8   :  { %v4163_v62 = vsel %vm352_vm5, %v4159_v60, -inf }
0x23f9   :  { %4164 = vmax.xlane.f32.xlu0 %v4163_v62 }
0x2406   :  { %4408 = vrot.lane.b32.xlu1 %v16170_v42, %s15339_s12 }
0x2482   :  { %v4162_v2 = vpop.xlane.xlu1 %4161 }
0x2483   :  { %v4166_v5 = vsub.f32 %v4158_v22, %v4162_v2 }
0x2485   :  { %v4168_v8 = vmul.f32 1.442695, %v4166_v5 }
0x2486   :  { %v4165_v13 = vpop.xlane.xlu0 %4164  ;;  %v4409_v51 = vpop.permute.xlu1 %4408 }
0x2487   :  { %15039 = vpow2.f32 %v4168_v8  ;;  %v4167_v14 = vsub.f32 %v4159_v60, %v4165_v13 }
0x2489   :  { %v4170_v1 = vmul.f32 1.442695, %v4167_v14 }
0x248b   :  { %15041 = vpow2.f32 %v4170_v1 }
0x2491   :  { %v15040_v61 = vpop.eup %15039 }
0x2492   :  { %v4172_v15 = vsel %vm352_vm5, %v15040_v61, 0.0 }
0x2493   :  { %4173 = vadd.xlane.f32.xlu0 %v4172_v15 }
0x2495   :  { %v15042_v49 = vpop.eup %15041 }
0x2496   :  { %v4175_v18 = vsel %vm352_vm5, %v15042_v49, 0.0 }
0x2497   :  { %4176 = vadd.xlane.f32.xlu1 %v4175_v18 }
0x24a8   :  { %4328 = vrot.lane.b32.xlu1 %v16181_v38, %s15340_s13 }
0x24a9   :  { %4330 = vrot.lane.b32.xlu0 %v16165_v0, %s15339_s12 }
0x24ad   :  { %4406 = vrot.lane.b32.xlu0 %v16194_v39, %s15340_s13 }
0x2520   :  { %v4174_v20 = vpop.xlane.xlu0 %4173 }
0x2521   :  { %15043 = vrcp.f32 %v4174_v20 }
0x2524   :  { %v4177_v24 = vpop.xlane.xlu1 %4176  ;;  %v4331_v30 = vpop.permute.xlu0 %4330 }
0x2525   :  { %15045 = vrcp.f32 %v4177_v24 }
0x2528   :  { %v4329_v6 = vpop.permute.xlu1 %4328  ;;  %v4407_v32 = vpop.permute.xlu0 %4406 }
0x252b   :  { %v15044_v27 = vpop.eup %15043 }
0x252c   :  { %v4180_v29 = vmul.f32 %v15044_v27, %v15040_v61 }
0x252e   :  { %14026 = vmatmul.mubr.msk.f32.vlgmr.msra.gmra.mrb[46].mxu1 %vm352_vm5, %v4180_v29 }
0x252f   :  { %v15046_v31 = vpop.eup %15045  ;;  %14034 = vmatpush3.xpose.msk.msra.mxu1 %vm352_vm5, %v4331_v30  ;;  %14035 = vmatprep.mubr.msk.f32.mxu1 %vm15337_vm4, %v15333_v9 }
0x2530   :  { %v4181_v26 = vmul.f32 %v15046_v31, %v15042_v49  ;;  %14043 = vmatprep.subr.mxu1 %v15333_v9 }
0x2532   :  { %14031 = vmatmul.mubr.msk.f32.vlgmr.msra.gmra.mrb[48].mxu0 %vm352_vm5, %v4181_v26  ;;  %14036 = vmatmul.mubr.msk.f32.vlgmr.msra.gmra.mrb[48].mxu1 %vm352_vm5, %v4329_v6 }
0x2533   :  { %14039 = vmatpush3.xpose.msk.msra.mxu0 %vm352_vm5, %v4409_v51  ;;  %14040 = vmatprep.mubr.msk.f32.mxu0 %vm15337_vm4, %v15333_v9 }
0x2534   :  { %14048 = vmatprep.subr.mxu0 %v15333_v9  ;;  %14045 = vmatprep.mubr.msk.f32.mxu1 %vm15337_vm4, %v15333_v9 }
0x2536   :  { %14041 = vmatmul.mubr.msk.f32.vlgmr.msra.gmra.mrb[50].mxu0 %vm352_vm5, %v4407_v32 }
0x2537   :  { %14050 = vmatprep.mubr.msk.f32.mxu0 %vm15337_vm4, %v15333_v9 }
0x2601   :  { %v16236_v10 = vpop.f32.mrb[46].mxu1 }
0x2602   :  { %v14027_v33 = vpop.f32.mrb[47].mxu1 }
0x2605   :  { %v16238_v35 = vpop.f32.mrb[48].mxu0  ;;  %v4402_v12 = vpop.f32.mrb[48].mxu1 }
0x2606   :  { %v4484_v19 = vmul.f32 0.35355338, %v4402_v12  ;;  %v14032_v37 = vpop.f32.mrb[49].mxu0  ;;  %v14037_v16 = vpop.f32.mrb[49].mxu1 }
0x2608   :  { %v4486_v17 = vadd.f32 %v4484_v19, %v15588_v28 }
0x2609   :  { %v4480_v40 = vpop.f32.mrb[50].mxu0 }
0x260a   :  { %v4485_v44 = vmul.f32 0.35355338, %v4480_v40  ;;  %v14042_v43 = vpop.f32.mrb[51].mxu0  ;;  %v4488_v23 = vsel %vm352_vm5, %v4486_v17, -inf }
0x260b   :  { %4489 = vmax.xlane.f32.xlu1 %v4488_v23 }
0x260c   :  { %v4487_v25 = vadd.f32 %v4485_v44, %v15588_v28 }
0x260e   :  { %v4491_v4 = vsel %vm352_vm5, %v4487_v25, -inf }
0x260f   :  { %4492 = vmax.xlane.f32.xlu0 %v4491_v4 }
0x261c   :  { %4588 = vrot.lane.b32.xlu1 %v16158_v36, %s15340_s13 }
0x2620   :  { %4666 = vrot.lane.b32.xlu1 %v16165_v0, %s15341_s15 }
0x2625   :  { %4511 = vrot.lane.b32.xlu0 %v16153_v34, %s15340_s13 }
0x2698   :  { %v4490_v48 = vpop.xlane.xlu1 %4489 }
0x2699   :  { %v4494_v50 = vsub.f32 %v4486_v17, %v4490_v48 }
0x269b   :  { %v4496_v7 = vmul.f32 1.442695, %v4494_v50 }
0x269c   :  { %v4493_v54 = vpop.xlane.xlu0 %4492  ;;  %v4589_v45 = vpop.permute.xlu1 %4588 }
0x269d   :  { %15047 = vpow2.f32 %v4496_v7  ;;  %v4495_v22 = vsub.f32 %v4487_v25, %v4493_v54  ;;  %14049 = vmatpush3.msra.mxu0 %v4589_v45 }
0x269e   :  { %14058 = vmatprep.subr.mxu0 %v15333_v9 }
0x269f   :  { %v4498_v55 = vmul.f32 1.442695, %v4495_v22 }
0x26a0   :  { %v4512_v21 = vpop.permute.xlu0 %4511  ;;  %v4667_v2 = vpop.permute.xlu1 %4666 }
0x26a1   :  { %15049 = vpow2.f32 %v4498_v55  ;;  %14044 = vmatpush3.msra.mxu1 %v4512_v21 }
0x26a2   :  { %14053 = vmatprep.subr.mxu1 %v15333_v9 }
0x26a7   :  { %v15048_v41 = vpop.eup %15047 }
0x26a8   :  { %v4500_v56 = vsel %vm352_vm5, %v15048_v41, 0.0 }
0x26a9   :  { %4501 = vadd.xlane.f32.xlu0 %v4500_v56 }
0x26ab   :  { %v15050_v60 = vpop.eup %15049 }
0x26ac   :  { %v4503_v62 = vsel %vm352_vm5, %v15050_v60, 0.0 }
0x26ad   :  { %4504 = vadd.xlane.f32.xlu1 %v4503_v62 }
0x26be   :  { %4664 = vrot.lane.b32.xlu1 %v16181_v38, %s15342_s16 }
0x26bf   :  { %4744 = vrot.lane.b32.xlu0 %v16170_v42, %s15341_s15 }
0x26c3   :  { %4742 = vrot.lane.b32.xlu0 %v16194_v39, %s15342_s16 }
0x2736   :  { %v4502_v5 = vpop.xlane.xlu0 %4501 }
0x2737   :  { %15051 = vrcp.f32 %v4502_v5 }
0x273a   :  { %v4505_v8 = vpop.xlane.xlu1 %4504  ;;  %v4745_v61 = vpop.permute.xlu0 %4744 }
0x273b   :  { %15053 = vrcp.f32 %v4505_v8 }
0x273e   :  { %v4665_v49 = vpop.permute.xlu1 %4664  ;;  %v4743_v18 = vpop.permute.xlu0 %4742 }
0x2741   :  { %v15052_v13 = vpop.eup %15051 }
0x2742   :  { %v4508_v14 = vmul.f32 %v15052_v13, %v15048_v41 }
0x2744   :  { %14046 = vmatmul.mubr.msk.f32.vlgmr.msra.gmra.mrb[50].mxu1 %vm352_vm5, %v4508_v14 }
0x2745   :  { %v15054_v1 = vpop.eup %15053  ;;  %14054 = vmatpush3.xpose.msk.msra.mxu1 %vm352_vm5, %v4667_v2  ;;  %14055 = vmatprep.mubr.msk.f32.mxu1 %vm15337_vm4, %v15333_v9 }
0x2746   :  { %v4509_v15 = vmul.f32 %v15054_v1, %v15050_v60  ;;  %14063 = vmatprep.subr.mxu1 %v15333_v9 }
0x2748   :  { %14051 = vmatmul.mubr.msk.f32.vlgmr.msra.gmra.mrb[52].mxu0 %vm352_vm5, %v4509_v15  ;;  %14056 = vmatmul.mubr.msk.f32.vlgmr.msra.gmra.mrb[52].mxu1 %vm352_vm5, %v4665_v49 }
0x2749   :  { %14059 = vmatpush3.xpose.msk.msra.mxu0 %vm352_vm5, %v4745_v61  ;;  %14060 = vmatprep.mubr.msk.f32.mxu0 %vm15337_vm4, %v15333_v9 }
0x274a   :  { %14068 = vmatprep.subr.mxu0 %v15333_v9  ;;  %14065 = vmatprep.mubr.msk.f32.mxu1 %vm15337_vm4, %v15333_v9 }
0x274c   :  { %14061 = vmatmul.mubr.msk.f32.vlgmr.msra.gmra.mrb[54].mxu0 %vm352_vm5, %v4743_v18 }
0x274d   :  { %14070 = vmatprep.mubr.msk.f32.mxu0 %vm15337_vm4, %v15333_v9 }
0x2817   :  { %v16276_v51 = vpop.f32.mrb[50].mxu1 }
0x2818   :  { %v14047_v20 = vpop.f32.mrb[51].mxu1 }
0x281b   :  { %v16278_v24 = vpop.f32.mrb[52].mxu0  ;;  %v4738_v27 = vpop.f32.mrb[52].mxu1 }
0x281c   :  { %v4820_v29 = vmul.f32 0.35355338, %v4738_v27  ;;  %v14052_v30 = vpop.f32.mrb[53].mxu0  ;;  %v14057_v31 = vpop.f32.mrb[53].mxu1 }
0x281e   :  { %v4822_v26 = vadd.f32 %v4820_v29, %v15588_v28 }
0x281f   :  { %v4816_v6 = vpop.f32.mrb[54].mxu0 }
0x2820   :  { %v4821_v32 = vmul.f32 0.35355338, %v4816_v6  ;;  %v14062_v33 = vpop.f32.mrb[55].mxu0  ;;  %v4824_v12 = vsel %vm352_vm5, %v4822_v26, -inf }
0x2821   :  { %4825 = vmax.xlane.f32.xlu1 %v4824_v12 }
0x2822   :  { %v4823_v19 = vadd.f32 %v4821_v32, %v15588_v28 }
0x2824   :  { %v4827_v37 = vsel %vm352_vm5, %v4823_v19, -inf }
0x2825   :  { %4828 = vmax.xlane.f32.xlu0 %v4827_v37 }
0x2832   :  { %4922 = vrot.lane.b32.xlu1 %v16158_v36, %s15342_s16 }
0x2836   :  { %5000 = vrot.lane.b32.xlu1 %v16165_v0, %s15343_s7 }
0x283b   :  { %4846 = vrot.lane.b32.xlu0 %v16153_v34, %s15342_s16 }
0x28ae   :  { %v4826_v16 = vpop.xlane.xlu1 %4825 }
0x28af   :  { %v4830_v17 = vsub.f32 %v4822_v26, %v4826_v16 }
0x28b1   :  { %v4832_v40 = vmul.f32 1.442695, %v4830_v17 }
0x28b2   :  { %v4829_v44 = vpop.xlane.xlu0 %4828  ;;  %v4923_v43 = vpop.permute.xlu1 %4922 }
0x28b3   :  { %15055 = vpow2.f32 %v4832_v40  ;;  %v4831_v23 = vsub.f32 %v4823_v19, %v4829_v44  ;;  %14069 = vmatpush3.msra.mxu0 %v4923_v43 }
0x28b4   :  { %14078 = vmatprep.subr.mxu0 %v15333_v9 }
0x28b5   :  { %v4834_v25 = vmul.f32 1.442695, %v4831_v23  ;;  %v13079_v23 = vld [vmem:[%s17663_s6 + $0x48] sm:$0xff] }
0x28b6   :  { %v4847_v4 = vpop.permute.xlu0 %4846  ;;  %v5001_v54 = vpop.permute.xlu1 %5000 }
0x28b7   :  { %15057 = vpow2.f32 %v4834_v25  ;;  %14064 = vmatpush3.msra.mxu1 %v4847_v4  ;;  %v13080_v4 = vld [vmem:[%s17663_s6 + $0x50] sm:$0xff] }
0x28b8   :  { %14073 = vmatprep.subr.mxu1 %v15333_v9 }
0x28bd   :  { %v15056_v0 = vpop.eup %15055 }
0x28be   :  { %v4836_v48 = vsel %vm352_vm5, %v15056_v0, 0.0 }
0x28bf   :  { %4837 = vadd.xlane.f32.xlu0 %v4836_v48 }
0x28c1   :  { %v15058_v50 = vpop.eup %15057 }
0x28c2   :  { %v4839_v7 = vsel %vm352_vm5, %v15058_v50, 0.0 }
0x28c3   :  { %4840 = vadd.xlane.f32.xlu1 %v4839_v7 }
0x28d4   :  { %4998 = vrot.lane.b32.xlu1 %v16181_v38, %s15344_s14 }
0x28d5   :  { %5078 = vrot.lane.b32.xlu0 %v16170_v42, %s15343_s7 }
0x28d9   :  { %5076 = vrot.lane.b32.xlu0 %v16194_v39, %s15344_s14 }
0x294c   :  { %v4838_v45 = vpop.xlane.xlu0 %4837 }
0x294d   :  { %15059 = vrcp.f32 %v4838_v45 }
0x2950   :  { %v4841_v22 = vpop.xlane.xlu1 %4840  ;;  %v5079_v56 = vpop.permute.xlu0 %5078 }
0x2951   :  { %15061 = vrcp.f32 %v4841_v22 }
0x2954   :  { %v4999_v38 = vpop.permute.xlu1 %4998  ;;  %v5077_v39 = vpop.permute.xlu0 %5076 }
0x2957   :  { %v15060_v55 = vpop.eup %15059 }
0x2958   :  { %v4844_v21 = vmul.f32 %v15060_v55, %v15056_v0  ;;  %v13081_v0 = vld [vmem:[%s17663_s6 + $0x58] sm:$0xff] }
0x2959   :  { %v14726_v48 = vpack.c.bf16 %v13081_v0, %v13080_v4  ;;  %v13092_v0 = vld [vmem:[%s17666_s9 + $0xb0] sm:$0xff] }
0x295a   :  { %14066 = vmatmul.mubr.msk.f32.vlgmr.msra.gmra.mrb[54].mxu1 %vm352_vm5, %v4844_v21 }
0x295b   :  { %v15062_v41 = vpop.eup %15061  ;;  %14074 = vmatpush3.xpose.msk.msra.mxu1 %vm352_vm5, %v5001_v54  ;;  %14075 = vmatprep.mubr.msk.f32.mxu1 %vm15337_vm4, %v15333_v9 }
0x295c   :  { %v4845_v42 = vmul.f32 %v15062_v41, %v15058_v50  ;;  %14083 = vmatprep.subr.mxu1 %v15333_v9 }
0x295e   :  { %14071 = vmatmul.mubr.msk.f32.vlgmr.msra.gmra.mrb[56].mxu0 %vm352_vm5, %v4845_v42  ;;  %14076 = vmatmul.mubr.msk.f32.vlgmr.msra.gmra.mrb[56].mxu1 %vm352_vm5, %v4999_v38 }
0x295f   :  { %14079 = vmatpush3.xpose.msk.msra.mxu0 %vm352_vm5, %v5079_v56  ;;  %14080 = vmatprep.mubr.msk.f32.mxu0 %vm15337_vm4, %v15333_v9 }
0x2960   :  { %14088 = vmatprep.subr.mxu0 %v15333_v9  ;;  %14085 = vmatprep.mubr.msk.f32.mxu1 %vm15337_vm4, %v15333_v9 }
0x2962   :  { %14081 = vmatmul.mubr.msk.f32.vlgmr.msra.gmra.mrb[58].mxu0 %vm352_vm5, %v5077_v39 }
0x2963   :  { %14090 = vmatprep.mubr.msk.f32.mxu0 %vm15337_vm4, %v15333_v9 }
0x2a2d   :  { %v4918_v60 = vpop.f32.mrb[54].mxu1 }
0x2a2e   :  { %v14067_v62 = vpop.f32.mrb[55].mxu1 }
0x2a31   :  { %v4994_v2 = vpop.f32.mrb[56].mxu0  ;;  %v5072_v5 = vpop.f32.mrb[56].mxu1 }
0x2a32   :  { %v5154_v8 = vmul.f32 0.35355338, %v5072_v5  ;;  %v14072_v13 = vpop.f32.mrb[57].mxu0  ;;  %v14077_v14 = vpop.f32.mrb[57].mxu1 }
0x2a34   :  { %v5156_v1 = vadd.f32 %v5154_v8, %v15588_v28 }
0x2a35   :  { %v5150_v61 = vpop.f32.mrb[58].mxu0 }
0x2a36   :  { %v5155_v15 = vmul.f32 0.35355338, %v5150_v61  ;;  %v14082_v49 = vpop.f32.mrb[59].mxu0  ;;  %v5158_v18 = vsel %vm352_vm5, %v5156_v1, -inf }
0x2a37   :  { %5159 = vmax.xlane.f32.xlu1 %v5158_v18  ;;  %v13084_v49 = vld [vmem:[%s17665_s8 + $0x50] sm:$0xff] }
0x2a38   :  { %v5157_v20 = vadd.f32 %v5155_v15, %v15588_v28 }
0x2a3a   :  { %v5161_v27 = vsel %vm352_vm5, %v5157_v20, -inf }
0x2a3b   :  { %5162 = vmax.xlane.f32.xlu0 %v5161_v27 }
0x2ac4   :  { %v5160_v29 = vpop.xlane.xlu1 %5159 }
0x2ac5   :  { %v5164_v30 = vsub.f32 %v5156_v1, %v5160_v29 }
0x2ac7   :  { %v5166_v31 = vmul.f32 1.442695, %v5164_v30 }
0x2ac8   :  { %v5163_v26 = vpop.xlane.xlu0 %5162 }
0x2ac9   :  { %15063 = vpow2.f32 %v5166_v31  ;;  %v5165_v6 = vsub.f32 %v5157_v20, %v5163_v26  ;;  %v13085_v20 = vld [vmem:[%s17665_s8 + $0x58] sm:$0xff] }
0x2aca   :  { %v14734_v27 = vpack.c.bf16 %v13085_v20, %v13084_v49 }
0x2acb   :  { %v5168_v32 = vmul.f32 1.442695, %v5165_v6 }
0x2acd   :  { %15065 = vpow2.f32 %v5168_v32 }
0x2ad3   :  { %v15064_v33 = vpop.eup %15063 }
0x2ad4   :  { %v5170_v12 = vsel %vm352_vm5, %v15064_v33, 0.0 }
0x2ad5   :  { %5171 = vadd.xlane.f32.xlu0 %v5170_v12 }
0x2ad7   :  { %v15066_v19 = vpop.eup %15065 }
0x2ad8   :  { %v5173_v37 = vsel %vm352_vm5, %v15066_v19, 0.0 }
0x2ad9   :  { %5174 = vadd.xlane.f32.xlu1 %v5173_v37 }
0x2aea   :  { %5256 = vrot.lane.b32.xlu1 %v16158_v36, %s15344_s14 }
0x2aeb   :  { %5180 = vrot.lane.b32.xlu0 %v16153_v34, %s15344_s14 }
0x2aee   :  { %5334 = vrot.lane.b32.xlu1 %v16276_v51, %s15345_s17 }
0x2aef   :  { %5336 = vrot.lane.b32.xlu0 %v16278_v24, %s15345_s17  ;;  %v13078_v24 = vld [vmem:[%s17663_s6 + $0x40] sm:$0xff] }
0x2af0   :  { %v14722_v25 = vpack.c.bf16 %v13079_v23, %v13078_v24  ;;  %v13090_v23 = vld [vmem:[%s17666_s9 + $0xa0] sm:$0xff] }
0x2af2   :  { %5342 = vrot.lane.b32.xlu1 %v4918_v60, %s15330_s24 }
0x2af3   :  { %5344 = vrot.lane.b32.xlu0 %v4994_v2, %s15330_s24 }
0x2b62   :  { %v5172_v16 = vpop.xlane.xlu0 %5171 }
0x2b63   :  { %15067 = vrcp.f32 %v5172_v16 }
0x2b66   :  { %v5181_v17 = vpop.permute.xlu0 %5180  ;;  %v5175_v40 = vpop.xlane.xlu1 %5174 }
0x2b67   :  { %15069 = vrcp.f32 %v5175_v40  ;;  %14084 = vmatpush3.msra.mxu1 %v5181_v17 }
0x2b68   :  { %14723 = vmatprep.subr.bf16.mxu1 %v14722_v25 }
0x2b6a   :  { %v5257_v36 = vpop.permute.xlu1 %5256  ;;  %v5337_v55 = vpop.permute.xlu0 %5336 }
0x2b6b   :  { %14089 = vmatpush3.msra.mxu0 %v5257_v36  ;;  %v5357_v60 = vsel %vm352_vm5, %v16238_v35, %v5337_v55  ;;  %v13086_v36 = vld [vmem:[%s17666_s9 + $0x80] sm:$0xff] }
0x2b6d   :  { %v15068_v44 = vpop.eup %15067 }
0x2b6e   :  { %v5178_v34 = vmul.f32 %v15068_v44, %v15064_v33  ;;  %v5335_v22 = vpop.permute.xlu1 %5334  ;;  %v5345_v56 = vpop.permute.xlu0 %5344  ;;  %v13087_v44 = vld [vmem:[%s17666_s9 + $0x88] sm:$0xff] }
0x2b6f   :  { %v5356_v41 = vsel %vm352_vm5, %v16236_v10, %v5335_v22  ;;  %v5359_v62 = vsel %vm1708_vm8, %v5357_v60, %v5345_v56 }
0x2b70   :  { %14086 = vmatmul.mubr.msk.f32.vlgmr.msra.gmra.mrb[58].mxu1 %vm352_vm5, %v5178_v34  ;;  %v13088_v34 = vld [vmem:[%s17666_s9 + $0x90] sm:$0xff] }
0x2b71   :  { %v15070_v51 = vpop.eup %15069  ;;  %14725 = vmatpush3.bf16.msra.mxu1 %v14722_v25  ;;  %v13091_v25 = vld [vmem:[%s17666_s9 + $0xa8] sm:$0xff] }
0x2b72   :  { %v5179_v43 = vmul.f32 %v15070_v51, %v15066_v19  ;;  %14727 = vmatprep.subr.bf16.mxu1 %v14726_v48  ;;  %v5343_v21 = vpop.permute.xlu1 %5342  ;;  %v13123_v19 = vld [vmem:[#allocation2 + $0x2] ss:$0 sm:$0xff]  ;;  %v14738_v51 = vpack.c.bf16 %v13087_v44, %v13086_v36  ;;  %v14746_v4 = vpack.c.bf16 %v13091_v25, %v13090_v23 }
0x2b73   :  { %v5358_v42 = vsel %vm1708_vm8, %v5356_v41, %v5343_v21 }
0x2b74   :  { %14091 = vmatmul.mubr.msk.f32.vlgmr.msra.gmra.mrb[60].mxu0 %vm352_vm5, %v5179_v43  ;;  %v13089_v43 = vld [vmem:[%s17666_s9 + $0x98] sm:$0xff] }
0x2b75   :  { %14729 = vmatpush3.bf16.msra.mxu1 %v14726_v48  ;;  %v14742_v24 = vpack.c.bf16 %v13089_v43, %v13088_v34  ;;  %v13093_v48 = vld [vmem:[%s17666_s9 + $0xb8] sm:$0xff]  ;;  %v13153_v43 = vld [vmem:[%s17661_s4 + $0x3] ss:$0 sm:$0xff] }
0x2b76   :  { %14739 = vmatprep.subr.bf16.mxu1 %v14738_v51 }
0x2c43   :  { %v5252_v50 = vpop.f32.mrb[58].mxu1 }
0x2c44   :  { %5350 = vrot.lane.b32.xlu1 %v5252_v50, %s15346_s1  ;;  %v14087_v7 = vpop.f32.mrb[59].mxu1  ;;  %v14750_v50 = vpack.c.bf16 %v13093_v48, %v13092_v0 }
0x2c47   :  { %v5328_v54 = vpop.f32.mrb[60].mxu0 }
0x2c48   :  { %5352 = vrot.lane.b32.xlu0 %v5328_v54, %s15346_s1  ;;  %v14092_v45 = vpop.f32.mrb[61].mxu0 }
0x2cb6   :  { %v5351_v38 = vpop.permute.xlu1 %5350 }
0x2cb7   :  { %v5360_v39 = vsel %vm1711_vm7, %v5358_v42, %v5351_v38 }
0x2cb8   :  { %14101 = vmatprep.mubr.msk.f32.mxu1 %vm192_vm3, %v5360_v39 }
0x2cba   :  { %v5353_v2 = vpop.permute.xlu0 %5352 }
0x2cbb   :  { %v5361_v5 = vsel %vm1711_vm7, %v5359_v62, %v5353_v2 }
0x2cbc   :  { %14102 = vmatmul.mubr.msk.f32.vlgmr.msra.gmra.mrb[60].mxu1 %vm192_vm3, %v5361_v5 }
0x2cbd   :  { %14741 = vmatpush3.bf16.msra.mxu1 %v14738_v51 }
0x2cbe   :  { %14743 = vmatprep.subr.bf16.mxu1 %v14742_v24 }
0x2cc1   :  { %14745 = vmatpush3.bf16.msra.mxu1 %v14742_v24 }
0x2cc2   :  { %14747 = vmatprep.subr.bf16.mxu1 %v14746_v4 }
0x2cc5   :  { %14749 = vmatpush3.bf16.msra.mxu1 %v14746_v4 }
0x2cc6   :  { %14751 = vmatprep.subr.bf16.mxu1 %v14750_v50 }
0x2cc9   :  { %14753 = vmatpush3.bf16.msra.mxu1 %v14750_v50 }
0x2cca   :  { %14139 = vmatprep.subr.mxu1 %v15333_v9 }
0x2d8f   :  { %v14103_v8 = vpop.f32.mrb[60].mxu1 }
0x2d90   :  { %v16359_v10 = vadd.f32 %v14103_v8, %v16106_v52  ;;  %v5434_v13 = vpop.f32.mrb[61].mxu1  ;;  %v13082_v52 = vld [vmem:[%s17665_s8 + $0x40] sm:$0xff] }
0x2d91   :  { %v16362_v14 = vadd.f32 %v5434_v13, %v16109_v53  ;;  %v13083_v53 = vld [vmem:[%s17665_s8 + $0x48] sm:$0xff] }
0x2d92   :  { %v5446_v1 = vmul.f32 %v16359_v10, %v16359_v10  ;;  %v14730_v18 = vpack.c.bf16 %v13083_v53, %v13082_v52 }
0x2d93   :  { %v5445_v35 = vmul.f32 %v16362_v14, %v16362_v14 }
0x2d94   :  { %v5450_v61 = vsel %vm192_vm3, %v5446_v1, 0.0  ;;  %14731 = vmatprep.subr.bf16.mxu0 %v14730_v18 }
0x2d95   :  { %5451 = vadd.xlane.f32.xlu0 %v5450_v61  ;;  %v5447_v15 = vsel %vm192_vm3, %v5445_v35, 0.0  ;;  %14733 = vmatpush3.bf16.msra.mxu0 %v14730_v18 }
0x2d96   :  { %5448 = vadd.xlane.f32.xlu1 %v5447_v15  ;;  %14735 = vmatprep.subr.bf16.mxu0 %v14734_v27 }
0x2d99   :  { %14737 = vmatpush3.bf16.msra.mxu0 %v14734_v27 }
0x2e22   :  { %v5452_v29 = vpop.xlane.xlu0 %5451 }
0x2e23   :  { %v5454_v30 = vmul.f32 0.03125, %v5452_v29  ;;  %v5449_v31 = vpop.xlane.xlu1 %5448  ;;  %v13129_v29 = vld [vmem:[%s17662_s5 + $0xc0] sm:$0xff] }
0x2e24   :  { %v5453_v26 = vmul.f32 0.03125, %v5449_v31 }
0x2e25   :  { %v5456_v6 = vadd.f32 1e-06, %v5454_v30  ;;  %v13131_v30 = vld [vmem:[%s17662_s5 + $0xd0] sm:$0xff] }
0x2e26   :  { %v5455_v32 = vadd.f32 1e-06, %v5453_v26  ;;  %v14756_v31 = vpack.c.bf16 %v13131_v30, %v13129_v29  ;;  %v13134_v26 = vld [vmem:[%s17662_s5 + $0xe8] sm:$0xff] }
0x2e27   :  { %15071 = vrsqrt.f32 %v5456_v6  ;;  %v13136_v6 = vld [vmem:[%s17662_s5 + $0xf8] sm:$0xff] }
0x2e28   :  { %15073 = vrsqrt.f32 %v5455_v32  ;;  %v14758_v32 = vpack.c.bf16 %v13136_v6, %v13134_v26 }
0x2e31   :  { %v15072_v33 = vpop.eup %15071 }
0x2e32   :  { %v15074_v12 = vpop.eup %15073  ;;  %v5460_v37 = vmul.f32 %v15072_v33, %v16359_v10  ;;  %v13133_v33 = vld [vmem:[%s17662_s5 + $0xe0] sm:$0xff] }
0x2e33   :  { %v5459_v16 = vmul.f32 %v15074_v12, %v16362_v14  ;;  %v13135_v12 = vld [vmem:[%s17662_s5 + $0xf0] sm:$0xff] }
0x2e34   :  { %v5468_v40 = vmul.f32 %v13123_v19, %v5460_v37 }
0x2e35   :  { %v5467_v17 = vmul.f32 %v13123_v19, %v5459_v16  ;;  %v14760_v19 = vpack.c.bf16 %v13135_v12, %v13133_v33 }
0x2e37   :  { %14112 = vmatprep.mubr.msk.f32.mxu0 %vm192_vm3, %v5467_v17 }
0x2e38   :  { %14113 = vmatmul.mubr.msk.f32.vlgmr.msra.gmra.mrb[62].mxu0 %vm192_vm3, %v5468_v40 }
0x2e39   :  { %5783 = vmatprep.mubr.f32.mxu0 %v15333_v9 }
0x2f0b   :  { %v14114_v7 = vpop.f32.mrb[62].mxu0 }
0x2f0c   :  { %5568 = vrot.lane.b32.xlu1 %v14114_v7, %s15335_s27  ;;  %v5541_v54 = vpop.f32.mrb[63].mxu0  ;;  %v5551_v22 = vsub.f32 0.0, %v14114_v7 }
0x2f0d   :  { %5566 = vrot.lane.b32.xlu0 %v5541_v54, %s15335_s27  ;;  %v5550_v45 = vsub.f32 0.0, %v5541_v54 }
0x2f0e   :  { %v5554_v21 = vmul.f32 1.442695, %v5551_v22 }
0x2f0f   :  { %v5552_v55 = vmul.f32 1.442695, %v5550_v45 }
0x2f11   :  { %15075 = vpow2.f32 %v5552_v55 }
0x2f12   :  { %15077 = vpow2.f32 %v5554_v21 }
0x2f1b   :  { %v15076_v41 = vpop.eup %15075 }
0x2f1c   :  { %v15078_v56 = vpop.eup %15077  ;;  %v5556_v42 = vadd.f32 1.0, %v15076_v41 }
0x2f1d   :  { %v5557_v38 = vadd.f32 1.0, %v15078_v56 }
0x2f1e   :  { %15079 = vrcp.f32 %v5556_v42 }
0x2f1f   :  { %15081 = vrcp.f32 %v5557_v38 }
0x2f28   :  { %v15080_v39 = vpop.eup %15079 }
0x2f29   :  { %v15082_v60 = vpop.eup %15081  ;;  %v5562_v62 = vmul.f32 %v15080_v39, %v5541_v54 }
0x2f2a   :  { %v5563_v5 = vmul.f32 %v15082_v60, %v14114_v7 }
0x2f7e   :  { %v5569_v2 = vpop.permute.xlu1 %5568 }
0x2f7f   :  { %v5567_v8 = vpop.permute.xlu0 %5566  ;;  %v5573_v1 = vmul.f32 %v5569_v2, %v5563_v5 }
0x2f80   :  { %v5572_v13 = vmul.f32 %v5567_v8, %v5562_v62 }
0x2f82   :  { %14131 = vmatprep.mubr.msk.f32.mxu1 %vm74_vm0, %v5572_v13 }
0x2f83   :  { %14132 = vmatmul.mubr.msk.f32.vlgmr.msra.gmra.mrb[62].mxu1 %vm74_vm0, %v5573_v1 }
0x2f84   :  { %14141 = vmatprep.mubr.msk.f32.mxu1 %vm15337_vm4, %v15333_v9 }
0x3056   :  { %v14133_v35 = vpop.f32.mrb[62].mxu1 }
0x3057   :  { %v16419_v61 = vadd.f32 %v14133_v35, %v16359_v10  ;;  %v5646_v15 = vpop.f32.mrb[63].mxu1  ;;  %v13130_v10 = vld [vmem:[%s17662_s5 + $0xc8] sm:$0xff] }
0x3058   :  { %v16422_v52 = vadd.f32 %v5646_v15, %v16362_v14  ;;  %v13132_v14 = vld [vmem:[%s17662_s5 + $0xd8] sm:$0xff] }
0x3059   :  { %v5690_v53 = vmul.f32 %v16419_v61, %v16419_v61  ;;  %v14754_v27 = vpack.c.bf16 %v13132_v14, %v13130_v10 }
0x305a   :  { %v5689_v49 = vmul.f32 %v16422_v52, %v16422_v52 }
0x305b   :  { %v5694_v18 = vsel %vm192_vm3, %v5690_v53, 0.0  ;;  %14755 = vmatprep.subr.bf16.mxu0 %v14754_v27 }
0x305c   :  { %5695 = vadd.xlane.f32.xlu0 %v5694_v18  ;;  %v5691_v20 = vsel %vm192_vm3, %v5689_v49, 0.0  ;;  %14757 = vmatpush1.bf16.msra.mxu0 %v14756_v31 }
0x305d   :  { %5692 = vadd.xlane.f32.xlu1 %v5691_v20  ;;  %14759 = vmatprep.subr.bf16.mxu0 %v14758_v32 }
0x3060   :  { %14761 = vmatpush1.bf16.msra.mxu0 %v14760_v19 }
0x3061   :  { %14134 = vmatprep.subr.mxu0 %v15333_v9 }
0x30e9   :  { %v5696_v37 = vpop.xlane.xlu0 %5695 }
0x30ea   :  { %v5698_v16 = vmul.f32 0.03125, %v5696_v37  ;;  %v5693_v17 = vpop.xlane.xlu1 %5692 }
0x30eb   :  { %v5697_v40 = vmul.f32 0.03125, %v5693_v17 }
0x30ec   :  { %v5700_v36 = vadd.f32 1e-06, %v5698_v16 }
0x30ed   :  { %v5699_v44 = vadd.f32 1e-06, %v5697_v40 }
0x30ee   :  { %15083 = vrsqrt.f32 %v5700_v36 }
0x30ef   :  { %15085 = vrsqrt.f32 %v5699_v44 }
0x30f8   :  { %v15084_v34 = vpop.eup %15083 }
0x30f9   :  { %v15086_v51 = vpop.eup %15085  ;;  %v5704_v25 = vmul.f32 %v15084_v34, %v16419_v61 }
0x30fa   :  { %v5703_v24 = vmul.f32 %v15086_v51, %v16422_v52 }
0x30fb   :  { %v5712_v4 = vmul.f32 %v13153_v43, %v5704_v25 }
0x30fc   :  { %v5711_v23 = vmul.f32 %v13153_v43, %v5703_v24 }
0x30fe   :  { %13154 = vmatmul.mubr.msk.f32.vlgmr.msra.gmra.mrb[64].mxu0 %vm192_vm3, %v5711_v23 }
0x30ff   :  { %5789 = vmatprep.mubr.f32.mxu0 %v15333_v9 }
0x3102   :  { %13155 = vmatmul.mubr.msk.f32.gmra.mrb[66].mxu0 %vm192_vm3, %v5712_v4 }
0x3103   :  { %14136 = vmatprep.mubr.msk.f32.mxu0 %vm15337_vm4, %v15333_v9 }
0x31d1   :  { %v5785_v0 = vpop.f32.mrb[64].mxu0 }
0x31d2   :  { %v5812_v48 = vmul.f32 %v5785_v0, %v15525_v57  ;;  %v16466_v50 = vpop.f32.mrb[65].mxu0  ;;  %v5798_v54 = vmul.f32 %v5785_v0, %v15540_v3  ;;  %v5810_v21 = vmul.f32 %v5785_v0, %v15527_v58  ;;  %v5796_v62 = vmul.f32 %v16177_v46, %v5785_v0 }
0x31d4   :  { %5816 = vrot.lane.b32.xlu0 %v5812_v48, %s15334_s23 }
0x31d5   :  { %v5791_v7 = vpop.f32.mrb[66].mxu0 }
0x31d6   :  { %v5813_v45 = vmul.f32 %v5791_v7, %v15534_v63  ;;  %v16471_v22 = vpop.f32.mrb[67].mxu0  ;;  %v5799_v55 = vmul.f32 %v5791_v7, %v15556_v11  ;;  %v5811_v42 = vmul.f32 %v5791_v7, %v15529_v59  ;;  %v5797_v13 = vmul.f32 %v16187_v47, %v5791_v7 }
0x31d8   :  { %5802 = vrot.lane.b32.xlu0 %v5798_v54, %s15334_s23  ;;  %5818 = vrot.lane.b32.xlu1 %v5813_v45, %s15334_s23 }
0x31dc   :  { %5804 = vrot.lane.b32.xlu0 %v5799_v55, %s15334_s23 }
0x3246   :  { %v5817_v41 = vpop.permute.xlu0 %5816 }
0x3247   :  { %v16478_v56 = vadd.f32 %v5817_v41, %v5810_v21 }
0x3249   :  { %5825 = vrot.lane.b32.xlu1 %v16478_v56, %s15335_s27 }
0x324a   :  { %v5819_v38 = vpop.permute.xlu1 %5818  ;;  %v5803_v60 = vpop.permute.xlu0 %5802 }
0x324b   :  { %v16483_v39 = vadd.f32 %v5819_v38, %v5811_v42  ;;  %v16489_v5 = vadd.f32 %v5803_v60, %v5796_v62 }
0x324d   :  { %5903 = vrot.lane.b32.xlu1 %v16483_v39, %s15335_s27 }
0x324e   :  { %v5805_v8 = vpop.permute.xlu0 %5804 }
0x324f   :  { %v16497_v35 = vadd.f32 %v5805_v8, %v5797_v13 }
0x32bb   :  { %v5826_v2 = vpop.permute.xlu1 %5825 }
0x32bc   :  { %14135 = vmatpush3.xpose.msk.msra.mxu0 %vm352_vm5, %v5826_v2 }
0x32bd   :  { %14144 = vmatprep.subr.mxu0 %v15333_v9 }
0x32bf   :  { %14137 = vmatmul.mubr.msk.f32.vlgmr.msra.gmra.mrb[68].mxu0 %vm352_vm5, %v16489_v5  ;;  %v5904_v1 = vpop.permute.xlu1 %5903 }
0x32c0   :  { %14140 = vmatpush3.xpose.msk.msra.mxu1 %vm352_vm5, %v5904_v1  ;;  %14145 = vmatpush3.msra.mxu0 %v16466_v50 }
0x32c1   :  { %14149 = vmatprep.subr.mxu1 %v15333_v9  ;;  %14146 = vmatprep.mubr.msk.f32.mxu0 %vm15337_vm4, %v15333_v9 }
0x32c2   :  { %14154 = vmatprep.subr.mxu0 %v15333_v9 }
0x32c3   :  { %14142 = vmatmul.mubr.msk.f32.vlgmr.msra.gmra.mrb[64].mxu1 %vm352_vm5, %v16497_v35 }
0x32c4   :  { %14150 = vmatpush3.msra.mxu1 %v16471_v22  ;;  %14151 = vmatprep.mubr.msk.f32.mxu1 %vm15337_vm4, %v15333_v9 }
0x32c5   :  { %14159 = vmatprep.subr.mxu1 %v15333_v9 }
0x3392   :  { %v5898_v46 = vpop.f32.mrb[68].mxu0 }
0x3393   :  { %v5980_v47 = vmul.f32 0.35355338, %v5898_v46  ;;  %v14138_v15 = vpop.f32.mrb[69].mxu0 }
0x3395   :  { %v5982_v53 = vadd.f32 %v5980_v47, %v15588_v28 }
0x3396   :  { %v5976_v49 = vpop.f32.mrb[64].mxu1 }
0x3397   :  { %v5981_v18 = vmul.f32 0.35355338, %v5976_v49  ;;  %v14143_v20 = vpop.f32.mrb[65].mxu1  ;;  %v5984_v10 = vsel %vm352_vm5, %v5982_v53, -inf }
0x3398   :  { %5985 = vmax.xlane.f32.xlu1 %v5984_v10 }
0x3399   :  { %v5983_v14 = vadd.f32 %v5981_v18, %v15588_v28 }
0x339b   :  { %v5987_v27 = vsel %vm352_vm5, %v5983_v14, -inf }
0x339c   :  { %5988 = vmax.xlane.f32.xlu0 %v5987_v27 }
0x33a9   :  { %6232 = vrot.lane.b32.xlu1 %v16483_v39, %s15339_s12 }
0x3425   :  { %v5986_v29 = vpop.xlane.xlu1 %5985 }
0x3426   :  { %v5990_v30 = vsub.f32 %v5982_v53, %v5986_v29 }
0x3428   :  { %v5992_v31 = vmul.f32 1.442695, %v5990_v30 }
0x3429   :  { %v5989_v26 = vpop.xlane.xlu0 %5988  ;;  %v6233_v16 = vpop.permute.xlu1 %6232 }
0x342a   :  { %15087 = vpow2.f32 %v5992_v31  ;;  %v5991_v6 = vsub.f32 %v5983_v14, %v5989_v26 }
0x342c   :  { %v5994_v32 = vmul.f32 1.442695, %v5991_v6 }
0x342e   :  { %15089 = vpow2.f32 %v5994_v32 }
0x3434   :  { %v15088_v33 = vpop.eup %15087 }
0x3435   :  { %v5996_v12 = vsel %vm352_vm5, %v15088_v33, 0.0 }
0x3436   :  { %5997 = vadd.xlane.f32.xlu0 %v5996_v12 }
0x3438   :  { %v15090_v19 = vpop.eup %15089 }
0x3439   :  { %v5999_v37 = vsel %vm352_vm5, %v15090_v19, 0.0 }
0x343a   :  { %6000 = vadd.xlane.f32.xlu1 %v5999_v37 }
0x344b   :  { %6152 = vrot.lane.b32.xlu1 %v16489_v5, %s15340_s13 }
0x344c   :  { %6154 = vrot.lane.b32.xlu0 %v16478_v56, %s15339_s12 }
0x3450   :  { %6230 = vrot.lane.b32.xlu0 %v16497_v35, %s15340_s13 }
0x34c3   :  { %v5998_v17 = vpop.xlane.xlu0 %5997 }
0x34c4   :  { %15091 = vrcp.f32 %v5998_v17 }
0x34c7   :  { %v6001_v40 = vpop.xlane.xlu1 %6000  ;;  %v6155_v34 = vpop.permute.xlu0 %6154 }
0x34c8   :  { %15093 = vrcp.f32 %v6001_v40 }
0x34cb   :  { %v6153_v24 = vpop.permute.xlu1 %6152  ;;  %v6231_v23 = vpop.permute.xlu0 %6230 }
0x34ce   :  { %v15092_v36 = vpop.eup %15091 }
0x34cf   :  { %v6004_v44 = vmul.f32 %v15092_v36, %v15088_v33 }
0x34d1   :  { %14147 = vmatmul.mubr.msk.f32.vlgmr.msra.gmra.mrb[70].mxu0 %vm352_vm5, %v6004_v44 }
0x34d2   :  { %v15094_v51 = vpop.eup %15093  ;;  %14155 = vmatpush3.xpose.msk.msra.mxu0 %vm352_vm5, %v6155_v34  ;;  %14156 = vmatprep.mubr.msk.f32.mxu0 %vm15337_vm4, %v15333_v9 }
0x34d3   :  { %v6005_v43 = vmul.f32 %v15094_v51, %v15090_v19  ;;  %14164 = vmatprep.subr.mxu0 %v15333_v9 }
0x34d5   :  { %14152 = vmatmul.mubr.msk.f32.vlgmr.msra.gmra.mrb[66].mxu1 %vm352_vm5, %v6005_v43  ;;  %14157 = vmatmul.mubr.msk.f32.vlgmr.msra.gmra.mrb[72].mxu0 %vm352_vm5, %v6153_v24 }
0x34d6   :  { %14160 = vmatpush3.xpose.msk.msra.mxu1 %vm352_vm5, %v6233_v16  ;;  %14161 = vmatprep.mubr.msk.f32.mxu1 %vm15337_vm4, %v15333_v9 }
0x34d7   :  { %14169 = vmatprep.subr.mxu1 %v15333_v9  ;;  %14166 = vmatprep.mubr.msk.f32.mxu0 %vm15337_vm4, %v15333_v9 }
0x34d9   :  { %14162 = vmatmul.mubr.msk.f32.vlgmr.msra.gmra.mrb[68].mxu1 %vm352_vm5, %v6231_v23 }
0x34da   :  { %14171 = vmatprep.mubr.msk.f32.mxu1 %vm15337_vm4, %v15333_v9 }
0x35a4   :  { %v16539_v25 = vpop.f32.mrb[70].mxu0 }
0x35a5   :  { %v14148_v4 = vpop.f32.mrb[71].mxu0 }
0x35a8   :  { %v16541_v0 = vpop.f32.mrb[66].mxu1  ;;  %v6226_v48 = vpop.f32.mrb[72].mxu0 }
0x35a9   :  { %v6308_v7 = vmul.f32 0.35355338, %v6226_v48  ;;  %v14153_v54 = vpop.f32.mrb[67].mxu1  ;;  %v14158_v45 = vpop.f32.mrb[73].mxu0 }
0x35ab   :  { %v6310_v55 = vadd.f32 %v6308_v7, %v15588_v28 }
0x35ac   :  { %v6304_v21 = vpop.f32.mrb[68].mxu1 }
0x35ad   :  { %v6309_v41 = vmul.f32 0.35355338, %v6304_v21  ;;  %v14163_v42 = vpop.f32.mrb[69].mxu1  ;;  %v6312_v38 = vsel %vm352_vm5, %v6310_v55, -inf }
0x35ae   :  { %6313 = vmax.xlane.f32.xlu1 %v6312_v38 }
0x35af   :  { %v6311_v60 = vadd.f32 %v6309_v41, %v15588_v28 }
0x35b1   :  { %v6315_v62 = vsel %vm352_vm5, %v6311_v60, -inf }
0x35b2   :  { %6316 = vmax.xlane.f32.xlu0 %v6315_v62 }
0x35bf   :  { %6412 = vrot.lane.b32.xlu1 %v16471_v22, %s15340_s13 }
0x35c3   :  { %6490 = vrot.lane.b32.xlu1 %v16478_v56, %s15341_s15 }
0x35c8   :  { %6335 = vrot.lane.b32.xlu0 %v16466_v50, %s15340_s13 }
0x363b   :  { %v6314_v2 = vpop.xlane.xlu1 %6313 }
0x363c   :  { %v6318_v8 = vsub.f32 %v6310_v55, %v6314_v2 }
0x363e   :  { %v6320_v13 = vmul.f32 1.442695, %v6318_v8 }
0x363f   :  { %v6317_v1 = vpop.xlane.xlu0 %6316  ;;  %v6413_v46 = vpop.permute.xlu1 %6412 }
0x3640   :  { %15095 = vpow2.f32 %v6320_v13  ;;  %v6319_v47 = vsub.f32 %v6311_v60, %v6317_v1  ;;  %14170 = vmatpush3.msra.mxu1 %v6413_v46 }
0x3641   :  { %14179 = vmatprep.subr.mxu1 %v15333_v9 }
0x3642   :  { %v6322_v15 = vmul.f32 1.442695, %v6319_v47 }
0x3643   :  { %v6336_v53 = vpop.permute.xlu0 %6335  ;;  %v6491_v14 = vpop.permute.xlu1 %6490 }
0x3644   :  { %15097 = vpow2.f32 %v6322_v15  ;;  %14165 = vmatpush3.msra.mxu0 %v6336_v53 }
0x3645   :  { %14174 = vmatprep.subr.mxu0 %v15333_v9 }
0x364a   :  { %v15096_v49 = vpop.eup %15095 }
0x364b   :  { %v6324_v18 = vsel %vm352_vm5, %v15096_v49, 0.0 }
0x364c   :  { %6325 = vadd.xlane.f32.xlu0 %v6324_v18 }
0x364e   :  { %v15098_v20 = vpop.eup %15097 }
0x364f   :  { %v6327_v10 = vsel %vm352_vm5, %v15098_v20, 0.0 }
0x3650   :  { %6328 = vadd.xlane.f32.xlu1 %v6327_v10 }
0x3661   :  { %6488 = vrot.lane.b32.xlu1 %v16489_v5, %s15342_s16 }
0x3662   :  { %6568 = vrot.lane.b32.xlu0 %v16483_v39, %s15341_s15 }
0x3666   :  { %6566 = vrot.lane.b32.xlu0 %v16497_v35, %s15342_s16 }
0x36d9   :  { %v6326_v27 = vpop.xlane.xlu0 %6325 }
0x36da   :  { %15099 = vrcp.f32 %v6326_v27 }
0x36dd   :  { %v6329_v29 = vpop.xlane.xlu1 %6328  ;;  %v6569_v6 = vpop.permute.xlu0 %6568 }
0x36de   :  { %15101 = vrcp.f32 %v6329_v29 }
0x36e1   :  { %v6489_v33 = vpop.permute.xlu1 %6488  ;;  %v6567_v12 = vpop.permute.xlu0 %6566 }
0x36e4   :  { %v15100_v30 = vpop.eup %15099 }
0x36e5   :  { %v6332_v31 = vmul.f32 %v15100_v30, %v15096_v49 }
0x36e7   :  { %14167 = vmatmul.mubr.msk.f32.vlgmr.msra.gmra.mrb[74].mxu0 %vm352_vm5, %v6332_v31 }
0x36e8   :  { %v15102_v26 = vpop.eup %15101  ;;  %14175 = vmatpush3.xpose.msk.msra.mxu0 %vm352_vm5, %v6491_v14  ;;  %14176 = vmatprep.mubr.msk.f32.mxu0 %vm15337_vm4, %v15333_v9 }
0x36e9   :  { %v6333_v32 = vmul.f32 %v15102_v26, %v15098_v20  ;;  %14184 = vmatprep.subr.mxu0 %v15333_v9 }
0x36eb   :  { %14172 = vmatmul.mubr.msk.f32.vlgmr.msra.gmra.mrb[70].mxu1 %vm352_vm5, %v6333_v32  ;;  %14177 = vmatmul.mubr.msk.f32.vlgmr.msra.gmra.mrb[76].mxu0 %vm352_vm5, %v6489_v33 }
0x36ec   :  { %14180 = vmatpush3.xpose.msk.msra.mxu1 %vm352_vm5, %v6569_v6  ;;  %14181 = vmatprep.mubr.msk.f32.mxu1 %vm15337_vm4, %v15333_v9 }
0x36ed   :  { %14189 = vmatprep.subr.mxu1 %v15333_v9  ;;  %14186 = vmatprep.mubr.msk.f32.mxu0 %vm15337_vm4, %v15333_v9 }
0x36ef   :  { %14182 = vmatmul.mubr.msk.f32.vlgmr.msra.gmra.mrb[72].mxu1 %vm352_vm5, %v6567_v12 }
0x36f0   :  { %14191 = vmatprep.mubr.msk.f32.mxu1 %vm15337_vm4, %v15333_v9 }
0x37ba   :  { %v16579_v19 = vpop.f32.mrb[74].mxu0 }
0x37bb   :  { %v14168_v37 = vpop.f32.mrb[75].mxu0 }
0x37be   :  { %v16581_v16 = vpop.f32.mrb[70].mxu1  ;;  %v6562_v17 = vpop.f32.mrb[76].mxu0 }
0x37bf   :  { %v6644_v40 = vmul.f32 0.35355338, %v6562_v17  ;;  %v14173_v36 = vpop.f32.mrb[71].mxu1  ;;  %v14178_v44 = vpop.f32.mrb[77].mxu0 }
0x37c1   :  { %v6646_v34 = vadd.f32 %v6644_v40, %v15588_v28 }
0x37c2   :  { %v6640_v51 = vpop.f32.mrb[72].mxu1 }
0x37c3   :  { %v6645_v43 = vmul.f32 0.35355338, %v6640_v51  ;;  %v14183_v24 = vpop.f32.mrb[73].mxu1  ;;  %v6648_v23 = vsel %vm352_vm5, %v6646_v34, -inf }
0x37c4   :  { %6649 = vmax.xlane.f32.xlu1 %v6648_v23 }
0x37c5   :  { %v6647_v4 = vadd.f32 %v6645_v43, %v15588_v28 }
0x37c7   :  { %v6651_v48 = vsel %vm352_vm5, %v6647_v4, -inf }
0x37c8   :  { %6652 = vmax.xlane.f32.xlu0 %v6651_v48 }
0x37d5   :  { %6746 = vrot.lane.b32.xlu1 %v16471_v22, %s15342_s16 }
0x37d9   :  { %6824 = vrot.lane.b32.xlu1 %v16478_v56, %s15343_s7 }
0x37de   :  { %6670 = vrot.lane.b32.xlu0 %v16466_v50, %s15342_s16 }
0x3851   :  { %v6650_v7 = vpop.xlane.xlu1 %6649 }
0x3852   :  { %v6654_v54 = vsub.f32 %v6646_v34, %v6650_v7 }
0x3854   :  { %v6656_v45 = vmul.f32 1.442695, %v6654_v54 }
0x3855   :  { %v6653_v55 = vpop.xlane.xlu0 %6652  ;;  %v6747_v21 = vpop.permute.xlu1 %6746 }
0x3856   :  { %15103 = vpow2.f32 %v6656_v45  ;;  %v6655_v41 = vsub.f32 %v6647_v4, %v6653_v55  ;;  %14190 = vmatpush3.msra.mxu1 %v6747_v21  ;;  %v13138_v55 = vld [vmem:[%s17663_s6 + $0x68] sm:$0xff] }
0x3857   :  { %14199 = vmatprep.subr.mxu1 %v15333_v9 }
0x3858   :  { %v6658_v42 = vmul.f32 1.442695, %v6655_v41  ;;  %v13139_v41 = vld [vmem:[%s17663_s6 + $0x70] sm:$0xff] }
0x3859   :  { %v6671_v38 = vpop.permute.xlu0 %6670  ;;  %v6825_v8 = vpop.permute.xlu1 %6824 }
0x385a   :  { %15105 = vpow2.f32 %v6658_v42  ;;  %14185 = vmatpush3.msra.mxu0 %v6671_v38  ;;  %v13140_v42 = vld [vmem:[%s17663_s6 + $0x78] sm:$0xff] }
0x385b   :  { %14194 = vmatprep.subr.mxu0 %v15333_v9  ;;  %v14766_v38 = vpack.c.bf16 %v13140_v42, %v13139_v41  ;;  %v13152_v41 = vld [vmem:[%s17666_s9 + $0xf8] sm:$0xff] }
0x3860   :  { %v15104_v56 = vpop.eup %15103 }
0x3861   :  { %v6660_v60 = vsel %vm352_vm5, %v15104_v56, 0.0 }
0x3862   :  { %6661 = vadd.xlane.f32.xlu0 %v6660_v60 }
0x3864   :  { %v15106_v62 = vpop.eup %15105 }
0x3865   :  { %v6663_v2 = vsel %vm352_vm5, %v15106_v62, 0.0 }
0x3866   :  { %6664 = vadd.xlane.f32.xlu1 %v6663_v2 }
0x3877   :  { %6822 = vrot.lane.b32.xlu1 %v16489_v5, %s15344_s14 }
0x3878   :  { %6902 = vrot.lane.b32.xlu0 %v16483_v39, %s15343_s7 }
0x387c   :  { %6900 = vrot.lane.b32.xlu0 %v16497_v35, %s15344_s14 }
0x38ef   :  { %v6662_v13 = vpop.xlane.xlu0 %6661 }
0x38f0   :  { %15107 = vrcp.f32 %v6662_v13 }
0x38f3   :  { %v6665_v1 = vpop.xlane.xlu1 %6664  ;;  %v6903_v53 = vpop.permute.xlu0 %6902 }
0x38f4   :  { %15109 = vrcp.f32 %v6665_v1 }
0x38f7   :  { %v6823_v5 = vpop.permute.xlu1 %6822  ;;  %v6901_v35 = vpop.permute.xlu0 %6900 }
0x38fa   :  { %v15108_v46 = vpop.eup %15107 }
0x38fb   :  { %v6668_v47 = vmul.f32 %v15108_v46, %v15104_v56 }
0x38fd   :  { %14187 = vmatmul.mubr.msk.f32.vlgmr.msra.gmra.mrb[78].mxu0 %vm352_vm5, %v6668_v47 }
0x38fe   :  { %v15110_v15 = vpop.eup %15109  ;;  %14195 = vmatpush3.xpose.msk.msra.mxu0 %vm352_vm5, %v6825_v8  ;;  %14196 = vmatprep.mubr.msk.f32.mxu0 %vm15337_vm4, %v15333_v9 }
0x38ff   :  { %v6669_v39 = vmul.f32 %v15110_v15, %v15106_v62  ;;  %14204 = vmatprep.subr.mxu0 %v15333_v9 }
0x3901   :  { %14192 = vmatmul.mubr.msk.f32.vlgmr.msra.gmra.mrb[74].mxu1 %vm352_vm5, %v6669_v39  ;;  %14197 = vmatmul.mubr.msk.f32.vlgmr.msra.gmra.mrb[80].mxu0 %vm352_vm5, %v6823_v5 }
0x3902   :  { %14200 = vmatpush3.xpose.msk.msra.mxu1 %vm352_vm5, %v6903_v53  ;;  %14201 = vmatprep.mubr.msk.f32.mxu1 %vm15337_vm4, %v15333_v9 }
0x3903   :  { %14209 = vmatprep.subr.mxu1 %v15333_v9  ;;  %14206 = vmatprep.mubr.msk.f32.mxu0 %vm15337_vm4, %v15333_v9 }
0x3905   :  { %14202 = vmatmul.mubr.msk.f32.vlgmr.msra.gmra.mrb[76].mxu1 %vm352_vm5, %v6901_v35 }
0x3906   :  { %14211 = vmatprep.mubr.msk.f32.mxu1 %vm15337_vm4, %v15333_v9 }
0x39d0   :  { %v6742_v49 = vpop.f32.mrb[78].mxu0 }
0x39d1   :  { %v14188_v18 = vpop.f32.mrb[79].mxu0 }
0x39d4   :  { %v6818_v20 = vpop.f32.mrb[74].mxu1  ;;  %v6896_v10 = vpop.f32.mrb[80].mxu0 }
0x39d5   :  { %v6978_v14 = vmul.f32 0.35355338, %v6896_v10  ;;  %v14193_v27 = vpop.f32.mrb[75].mxu1  ;;  %v14198_v29 = vpop.f32.mrb[81].mxu0 }
0x39d7   :  { %v6980_v30 = vadd.f32 %v6978_v14, %v15588_v28 }
0x39d8   :  { %v6974_v31 = vpop.f32.mrb[76].mxu1 }
0x39d9   :  { %v6979_v26 = vmul.f32 0.35355338, %v6974_v31  ;;  %v14203_v6 = vpop.f32.mrb[77].mxu1  ;;  %v6982_v32 = vsel %vm352_vm5, %v6980_v30, -inf  ;;  %v13143_v31 = vld [vmem:[%s17665_s8 + $0x70] sm:$0xff] }
0x39da   :  { %6983 = vmax.xlane.f32.xlu1 %v6982_v32  ;;  %v13144_v6 = vld [vmem:[%s17665_s8 + $0x78] sm:$0xff] }
0x39db   :  { %v6981_v33 = vadd.f32 %v6979_v26, %v15588_v28  ;;  %v14774_v32 = vpack.c.bf16 %v13144_v6, %v13143_v31  ;;  %v13188_v6 = vld [vmem:[%s17662_s5 + $0x100] sm:$0xff] }
0x39dd   :  { %v6985_v12 = vsel %vm352_vm5, %v6981_v33, -inf }
0x39de   :  { %6986 = vmax.xlane.f32.xlu0 %v6985_v12 }
0x3a67   :  { %v6984_v37 = vpop.xlane.xlu1 %6983 }
0x3a68   :  { %v6988_v17 = vsub.f32 %v6980_v30, %v6984_v37 }
0x3a6a   :  { %v6990_v40 = vmul.f32 1.442695, %v6988_v17 }
0x3a6b   :  { %v6987_v36 = vpop.xlane.xlu0 %6986 }
0x3a6c   :  { %15111 = vpow2.f32 %v6990_v40  ;;  %v6989_v44 = vsub.f32 %v6981_v33, %v6987_v36 }
0x3a6e   :  { %v6992_v34 = vmul.f32 1.442695, %v6989_v44 }
0x3a70   :  { %15113 = vpow2.f32 %v6992_v34 }
0x3a76   :  { %v15112_v51 = vpop.eup %15111 }
0x3a77   :  { %v6994_v43 = vsel %vm352_vm5, %v15112_v51, 0.0 }
0x3a78   :  { %6995 = vadd.xlane.f32.xlu0 %v6994_v43 }
0x3a7a   :  { %v15114_v24 = vpop.eup %15113 }
0x3a7b   :  { %v6997_v23 = vsel %vm352_vm5, %v15114_v24, 0.0 }
0x3a7c   :  { %6998 = vadd.xlane.f32.xlu1 %v6997_v23 }
0x3a8d   :  { %7080 = vrot.lane.b32.xlu1 %v16471_v22, %s15344_s14 }
0x3a8e   :  { %7004 = vrot.lane.b32.xlu0 %v16466_v50, %s15344_s14 }
0x3a91   :  { %7158 = vrot.lane.b32.xlu1 %v16579_v19, %s15345_s17 }
0x3a92   :  { %7160 = vrot.lane.b32.xlu0 %v16581_v16, %s15345_s17  ;;  %v13137_v16 = vld [vmem:[%s17663_s6 + $0x60] sm:$0xff] }
0x3a93   :  { %v14762_v21 = vpack.c.bf16 %v13138_v55, %v13137_v16  ;;  %v13150_v16 = vld [vmem:[%s17666_s9 + $0xe8] sm:$0xff] }
0x3a95   :  { %7166 = vrot.lane.b32.xlu1 %v6742_v49, %s15330_s24 }
0x3a96   :  { %7168 = vrot.lane.b32.xlu0 %v6818_v20, %s15330_s24 }
0x3b05   :  { %v6996_v4 = vpop.xlane.xlu0 %6995 }
0x3b06   :  { %15115 = vrcp.f32 %v6996_v4 }
0x3b09   :  { %v7005_v48 = vpop.permute.xlu0 %7004  ;;  %v6999_v7 = vpop.xlane.xlu1 %6998 }
0x3b0a   :  { %15117 = vrcp.f32 %v6999_v7  ;;  %14205 = vmatpush3.msra.mxu0 %v7005_v48  ;;  %v13145_v48 = vld [vmem:[%s17666_s9 + $0xc0] sm:$0xff]  ;;  %v13146_v7 = vld [vmem:[%s17666_s9 + $0xc8] sm:$0xff] }
0x3b0b   :  { %14763 = vmatprep.subr.bf16.mxu0 %v14762_v21 }
0x3b0d   :  { %v7081_v22 = vpop.permute.xlu1 %7080  ;;  %v7161_v13 = vpop.permute.xlu0 %7160 }
0x3b0e   :  { %14210 = vmatpush3.msra.mxu1 %v7081_v22  ;;  %v7181_v5 = vsel %vm352_vm5, %v16541_v0, %v7161_v13  ;;  %v13147_v22 = vld [vmem:[%s17666_s9 + $0xd0] sm:$0xff] }
0x3b10   :  { %v15116_v54 = vpop.eup %15115 }
0x3b11   :  { %v7002_v50 = vmul.f32 %v15116_v54, %v15112_v51  ;;  %v7159_v8 = vpop.permute.xlu1 %7158  ;;  %v7169_v47 = vpop.permute.xlu0 %7168  ;;  %v13182_v51 = vld [vmem:[#allocation2 + $0x3] ss:$0 sm:$0xff]  ;;  %v14778_v54 = vpack.c.bf16 %v13146_v7, %v13145_v48 }
0x3b12   :  { %v7180_v46 = vsel %vm352_vm5, %v16539_v25, %v7159_v8  ;;  %v7183_v35 = vsel %vm1708_vm8, %v7181_v5, %v7169_v47 }
0x3b13   :  { %14207 = vmatmul.mubr.msk.f32.vlgmr.msra.gmra.mrb[82].mxu0 %vm352_vm5, %v7002_v50  ;;  %v13148_v50 = vld [vmem:[%s17666_s9 + $0xd8] sm:$0xff] }
0x3b14   :  { %v15118_v19 = vpop.eup %15117  ;;  %14765 = vmatpush3.bf16.msra.mxu0 %v14762_v21  ;;  %v13151_v21 = vld [vmem:[%s17666_s9 + $0xf0] sm:$0xff] }
0x3b15   :  { %v7003_v45 = vmul.f32 %v15118_v19, %v15114_v24  ;;  %14767 = vmatprep.subr.bf16.mxu0 %v14766_v38  ;;  %v7167_v1 = vpop.permute.xlu1 %7166  ;;  %v14782_v19 = vpack.c.bf16 %v13148_v50, %v13147_v22  ;;  %v14790_v42 = vpack.c.bf16 %v13152_v41, %v13151_v21  ;;  %v13212_v22 = vld [vmem:[%s17661_s4 + $0x4] ss:$0 sm:$0xff] }
0x3b16   :  { %v7182_v15 = vsel %vm1708_vm8, %v7180_v46, %v7167_v1 }
0x3b17   :  { %14212 = vmatmul.mubr.msk.f32.vlgmr.msra.gmra.mrb[78].mxu1 %vm352_vm5, %v7003_v45  ;;  %v13149_v45 = vld [vmem:[%s17666_s9 + $0xe0] sm:$0xff] }
0x3b18   :  { %14769 = vmatpush3.bf16.msra.mxu0 %v14766_v38  ;;  %v14786_v55 = vpack.c.bf16 %v13150_v16, %v13149_v45 }
0x3b19   :  { %14779 = vmatprep.subr.bf16.mxu0 %v14778_v54 }
0x3be6   :  { %v7076_v56 = vpop.f32.mrb[82].mxu0 }
0x3be7   :  { %7174 = vrot.lane.b32.xlu1 %v7076_v56, %s15346_s1  ;;  %v14208_v60 = vpop.f32.mrb[83].mxu0 }
0x3bea   :  { %v7152_v62 = vpop.f32.mrb[78].mxu1 }
0x3beb   :  { %7176 = vrot.lane.b32.xlu0 %v7152_v62, %s15346_s1  ;;  %v14213_v2 = vpop.f32.mrb[79].mxu1 }
0x3c59   :  { %v7175_v53 = vpop.permute.xlu1 %7174 }
0x3c5a   :  { %v7184_v39 = vsel %vm1711_vm7, %v7182_v15, %v7175_v53 }
0x3c5b   :  { %14222 = vmatprep.mubr.msk.f32.mxu0 %vm192_vm3, %v7184_v39 }
0x3c5d   :  { %v7177_v49 = vpop.permute.xlu0 %7176 }
0x3c5e   :  { %v7185_v18 = vsel %vm1711_vm7, %v7183_v35, %v7177_v49 }
0x3c5f   :  { %14223 = vmatmul.mubr.msk.f32.vlgmr.msra.gmra.mrb[84].mxu0 %vm192_vm3, %v7185_v18 }
0x3c60   :  { %14781 = vmatpush3.bf16.msra.mxu0 %v14778_v54 }
0x3c61   :  { %14783 = vmatprep.subr.bf16.mxu0 %v14782_v19 }
0x3c64   :  { %14785 = vmatpush3.bf16.msra.mxu0 %v14782_v19 }
0x3c65   :  { %14787 = vmatprep.subr.bf16.mxu0 %v14786_v55 }
0x3c68   :  { %14789 = vmatpush3.bf16.msra.mxu0 %v14786_v55 }
0x3c69   :  { %14791 = vmatprep.subr.bf16.mxu0 %v14790_v42 }
0x3c6c   :  { %14793 = vmatpush3.bf16.msra.mxu0 %v14790_v42 }
0x3c6d   :  { %14260 = vmatprep.subr.mxu0 %v15333_v9 }
0x3d32   :  { %v14224_v20 = vpop.f32.mrb[84].mxu0 }
0x3d33   :  { %v16662_v25 = vadd.f32 %v14224_v20, %v16419_v61  ;;  %v7258_v10 = vpop.f32.mrb[85].mxu0  ;;  %v13141_v61 = vld [vmem:[%s17665_s8 + $0x60] sm:$0xff] }
0x3d34   :  { %v16665_v14 = vadd.f32 %v7258_v10, %v16422_v52  ;;  %v13142_v52 = vld [vmem:[%s17665_s8 + $0x68] sm:$0xff] }
0x3d35   :  { %v7270_v27 = vmul.f32 %v16662_v25, %v16662_v25  ;;  %v14770_v26 = vpack.c.bf16 %v13142_v52, %v13141_v61 }
0x3d36   :  { %v7269_v0 = vmul.f32 %v16665_v14, %v16665_v14 }
0x3d37   :  { %v7274_v29 = vsel %vm192_vm3, %v7270_v27, 0.0  ;;  %14771 = vmatprep.subr.bf16.mxu1 %v14770_v26 }
0x3d38   :  { %7275 = vadd.xlane.f32.xlu0 %v7274_v29  ;;  %v7271_v30 = vsel %vm192_vm3, %v7269_v0, 0.0  ;;  %14773 = vmatpush3.bf16.msra.mxu1 %v14770_v26 }
0x3d39   :  { %7272 = vadd.xlane.f32.xlu1 %v7271_v30  ;;  %14775 = vmatprep.subr.bf16.mxu1 %v14774_v32 }
0x3d3c   :  { %14777 = vmatpush3.bf16.msra.mxu1 %v14774_v32  ;;  %v13190_v32 = vld [vmem:[%s17662_s5 + $0x110] sm:$0xff] }
0x3dc5   :  { %v7276_v33 = vpop.xlane.xlu0 %7275 }
0x3dc6   :  { %v7278_v12 = vmul.f32 0.03125, %v7276_v33  ;;  %v7273_v37 = vpop.xlane.xlu1 %7272  ;;  %v14796_v33 = vpack.c.bf16 %v13190_v32, %v13188_v6 }
0x3dc7   :  { %v7277_v17 = vmul.f32 0.03125, %v7273_v37  ;;  %v13195_v37 = vld [vmem:[%s17662_s5 + $0x138] sm:$0xff] }
0x3dc8   :  { %v7280_v40 = vadd.f32 1e-06, %v7278_v12  ;;  %v13193_v12 = vld [vmem:[%s17662_s5 + $0x128] sm:$0xff] }
0x3dc9   :  { %v7279_v36 = vadd.f32 1e-06, %v7277_v17  ;;  %v14798_v17 = vpack.c.bf16 %v13195_v37, %v13193_v12 }
0x3dca   :  { %15119 = vrsqrt.f32 %v7280_v40  ;;  %v13192_v40 = vld [vmem:[%s17662_s5 + $0x120] sm:$0xff] }
0x3dcb   :  { %15121 = vrsqrt.f32 %v7279_v36  ;;  %v13194_v36 = vld [vmem:[%s17662_s5 + $0x130] sm:$0xff] }
0x3dd4   :  { %v15120_v44 = vpop.eup %15119 }
0x3dd5   :  { %v15122_v34 = vpop.eup %15121  ;;  %v7284_v43 = vmul.f32 %v15120_v44, %v16662_v25  ;;  %v14800_v44 = vpack.c.bf16 %v13194_v36, %v13192_v40 }
0x3dd6   :  { %v7283_v24 = vmul.f32 %v15122_v34, %v16665_v14 }
0x3dd7   :  { %v7292_v4 = vmul.f32 %v13182_v51, %v7284_v43 }
0x3dd8   :  { %v7291_v23 = vmul.f32 %v13182_v51, %v7283_v24 }
0x3dda   :  { %14233 = vmatprep.mubr.msk.f32.mxu1 %vm192_vm3, %v7291_v23 }
0x3ddb   :  { %14234 = vmatmul.mubr.msk.f32.vlgmr.msra.gmra.mrb[80].mxu1 %vm192_vm3, %v7292_v4 }
0x3ddc   :  { %7607 = vmatprep.mubr.f32.mxu1 %v15333_v9 }
0x3eae   :  { %v14235_v38 = vpop.f32.mrb[80].mxu1 }
0x3eaf   :  { %7392 = vrot.lane.b32.xlu1 %v14235_v38, %s15335_s27  ;;  %v7365_v56 = vpop.f32.mrb[81].mxu1  ;;  %v7375_v62 = vsub.f32 0.0, %v14235_v38 }
0x3eb0   :  { %7390 = vrot.lane.b32.xlu0 %v7365_v56, %s15335_s27  ;;  %v7374_v60 = vsub.f32 0.0, %v7365_v56 }
0x3eb1   :  { %v7378_v8 = vmul.f32 1.442695, %v7375_v62 }
0x3eb2   :  { %v7376_v2 = vmul.f32 1.442695, %v7374_v60 }
0x3eb4   :  { %15123 = vpow2.f32 %v7376_v2 }
0x3eb5   :  { %15125 = vpow2.f32 %v7378_v8 }
0x3ebe   :  { %v15124_v13 = vpop.eup %15123 }
0x3ebf   :  { %v15126_v1 = vpop.eup %15125  ;;  %v7380_v46 = vadd.f32 1.0, %v15124_v13 }
0x3ec0   :  { %v7381_v47 = vadd.f32 1.0, %v15126_v1 }
0x3ec1   :  { %15127 = vrcp.f32 %v7380_v46 }
0x3ec2   :  { %15129 = vrcp.f32 %v7381_v47 }
0x3ecb   :  { %v15128_v15 = vpop.eup %15127 }
0x3ecc   :  { %v15130_v53 = vpop.eup %15129  ;;  %v7386_v39 = vmul.f32 %v15128_v15, %v7365_v56  ;;  %v16793_v15 = vld [vmem:[%s17659_s2] sm:$0xff] }
0x3ecd   :  { %v7387_v35 = vmul.f32 %v15130_v53, %v14235_v38 }
0x3f21   :  { %v7393_v5 = vpop.permute.xlu1 %7392 }
0x3f22   :  { %v7391_v49 = vpop.permute.xlu0 %7390  ;;  %v7397_v20 = vmul.f32 %v7393_v5, %v7387_v35 }
0x3f23   :  { %v7396_v18 = vmul.f32 %v7391_v49, %v7386_v39  ;;  %v16803_v49 = vld [vmem:[%s17659_s2 + $0x8] sm:$0xff] }
0x3f25   :  { %14252 = vmatprep.mubr.msk.f32.mxu0 %vm74_vm0, %v7396_v18 }
0x3f26   :  { %14253 = vmatmul.mubr.msk.f32.vlgmr.msra.gmra.mrb[86].mxu0 %vm74_vm0, %v7397_v20 }
0x3f27   :  { %14262 = vmatprep.mubr.msk.f32.mxu0 %vm15337_vm4, %v15333_v9 }
0x3ff9   :  { %v14254_v10 = vpop.f32.mrb[86].mxu0 }
0x3ffa   :  { %v16722_v27 = vadd.f32 %v14254_v10, %v16662_v25  ;;  %v7470_v0 = vpop.f32.mrb[87].mxu0  ;;  %v13189_v25 = vld [vmem:[%s17662_s5 + $0x108] sm:$0xff] }
0x3ffb   :  { %v16725_v29 = vadd.f32 %v7470_v0, %v16665_v14  ;;  %v13191_v14 = vld [vmem:[%s17662_s5 + $0x118] sm:$0xff] }
0x3ffc   :  { %v7514_v30 = vmul.f32 %v16722_v27, %v16722_v27  ;;  %v14794_v26 = vpack.c.bf16 %v13191_v14, %v13189_v25 }
0x3ffd   :  { %v7513_v61 = vmul.f32 %v16725_v29, %v16725_v29 }
0x3ffe   :  { %v7518_v52 = vsel %vm192_vm3, %v7514_v30, 0.0  ;;  %14795 = vmatprep.subr.bf16.mxu1 %v14794_v26 }
0x3fff   :  { %7519 = vadd.xlane.f32.xlu0 %v7518_v52  ;;  %v7515_v31 = vsel %vm192_vm3, %v7513_v61, 0.0  ;;  %14797 = vmatpush1.bf16.msra.mxu1 %v14796_v33 }
0x4000   :  { %7516 = vadd.xlane.f32.xlu1 %v7515_v31  ;;  %14799 = vmatprep.subr.bf16.mxu1 %v14798_v17 }
0x4003   :  { %14801 = vmatpush1.bf16.msra.mxu1 %v14800_v44 }
0x4004   :  { %14255 = vmatprep.subr.mxu1 %v15333_v9 }
0x408c   :  { %v7520_v34 = vpop.xlane.xlu0 %7519 }
0x408d   :  { %v7522_v51 = vmul.f32 0.03125, %v7520_v34  ;;  %v7517_v43 = vpop.xlane.xlu1 %7516 }
0x408e   :  { %v7521_v24 = vmul.f32 0.03125, %v7517_v43 }
0x408f   :  { %v7524_v23 = vadd.f32 1e-06, %v7522_v51 }
0x4090   :  { %v7523_v4 = vadd.f32 1e-06, %v7521_v24 }
0x4091   :  { %15131 = vrsqrt.f32 %v7524_v23 }
0x4092   :  { %15133 = vrsqrt.f32 %v7523_v4 }
0x409b   :  { %v15132_v48 = vpop.eup %15131 }
0x409c   :  { %v15134_v7 = vpop.eup %15133  ;;  %v7528_v19 = vmul.f32 %v15132_v48, %v16722_v27 }
0x409d   :  { %v7527_v54 = vmul.f32 %v15134_v7, %v16725_v29 }
0x409e   :  { %v7536_v45 = vmul.f32 %v13212_v22, %v7528_v19 }
0x409f   :  { %v7535_v50 = vmul.f32 %v13212_v22, %v7527_v54 }
0x40a1   :  { %13213 = vmatmul.mubr.msk.f32.vlgmr.msra.gmra.mrb[82].mxu1 %vm192_vm3, %v7535_v50 }
0x40a2   :  { %7613 = vmatprep.mubr.f32.mxu1 %v15333_v9 }
0x40a5   :  { %13214 = vmatmul.mubr.msk.f32.gmra.mrb[84].mxu1 %vm192_vm3, %v7536_v45 }
0x40a6   :  { %14257 = vmatprep.mubr.msk.f32.mxu1 %vm15337_vm4, %v15333_v9 }
0x4174   :  { %v7609_v16 = vpop.f32.mrb[82].mxu1 }
0x4175   :  { %v7636_v55 = vmul.f32 %v7609_v16, %v15525_v57  ;;  %v16769_v21 = vpop.f32.mrb[83].mxu1  ;;  %v7622_v42 = vmul.f32 %v7609_v16, %v15540_v3  ;;  %v7634_v62 = vmul.f32 %v7609_v16, %v15527_v58  ;;  %v7620_v53 = vmul.f32 %v16793_v15, %v7609_v16 }
0x4177   :  { %7640 = vrot.lane.b32.xlu0 %v7636_v55, %s15334_s23 }
0x4178   :  { %v7615_v41 = vpop.f32.mrb[84].mxu1 }
0x4179   :  { %v7637_v38 = vmul.f32 %v7615_v41, %v15534_v63  ;;  %v16774_v56 = vpop.f32.mrb[85].mxu1  ;;  %v7623_v60 = vmul.f32 %v7615_v41, %v15556_v11  ;;  %v7635_v13 = vmul.f32 %v7615_v41, %v15529_v59  ;;  %v7621_v18 = vmul.f32 %v16803_v49, %v7615_v41 }
0x417b   :  { %7626 = vrot.lane.b32.xlu0 %v7622_v42, %s15334_s23  ;;  %7642 = vrot.lane.b32.xlu1 %v7637_v38, %s15334_s23 }
0x417f   :  { %7628 = vrot.lane.b32.xlu0 %v7623_v60, %s15334_s23 }
0x41e9   :  { %v7641_v2 = vpop.permute.xlu0 %7640 }
0x41ea   :  { %v16781_v8 = vadd.f32 %v7641_v2, %v7634_v62 }
0x41ec   :  { %7649 = vrot.lane.b32.xlu1 %v16781_v8, %s15335_s27 }
0x41ed   :  { %v7643_v1 = vpop.permute.xlu1 %7642  ;;  %v7627_v47 = vpop.permute.xlu0 %7626 }
0x41ee   :  { %v16786_v46 = vadd.f32 %v7643_v1, %v7635_v13  ;;  %v16797_v5 = vadd.f32 %v7627_v47, %v7620_v53 }
0x41f0   :  { %7727 = vrot.lane.b32.xlu1 %v16786_v46, %s15335_s27 }
0x41f1   :  { %v7629_v35 = vpop.permute.xlu0 %7628 }
0x41f2   :  { %v16810_v10 = vadd.f32 %v7629_v35, %v7621_v18 }
0x425e   :  { %v7650_v39 = vpop.permute.xlu1 %7649 }
0x425f   :  { %14256 = vmatpush3.xpose.msk.msra.mxu1 %vm352_vm5, %v7650_v39 }
0x4260   :  { %14265 = vmatprep.subr.mxu1 %v15333_v9 }
0x4262   :  { %14258 = vmatmul.mubr.msk.f32.vlgmr.msra.gmra.mrb[86].mxu1 %vm352_vm5, %v16797_v5  ;;  %v7728_v20 = vpop.permute.xlu1 %7727 }
0x4263   :  { %14261 = vmatpush3.xpose.msk.msra.mxu0 %vm352_vm5, %v7728_v20  ;;  %14266 = vmatpush3.msra.mxu1 %v16769_v21 }
0x4264   :  { %14270 = vmatprep.subr.mxu0 %v15333_v9  ;;  %14267 = vmatprep.mubr.msk.f32.mxu1 %vm15337_vm4, %v15333_v9 }
0x4265   :  { %14275 = vmatprep.subr.mxu1 %v15333_v9 }
0x4266   :  { %14263 = vmatmul.mubr.msk.f32.vlgmr.msra.gmra.mrb[88].mxu0 %vm352_vm5, %v16810_v10 }
0x4267   :  { %14271 = vmatpush3.msra.mxu0 %v16774_v56  ;;  %14272 = vmatprep.mubr.msk.f32.mxu0 %vm15337_vm4, %v15333_v9 }
0x4268   :  { %14280 = vmatprep.subr.mxu0 %v15333_v9 }
0x4335   :  { %v7722_v0 = vpop.f32.mrb[86].mxu1 }
0x4336   :  { %v7804_v30 = vmul.f32 0.35355338, %v7722_v0  ;;  %v14259_v61 = vpop.f32.mrb[87].mxu1 }
0x4338   :  { %v7806_v52 = vadd.f32 %v7804_v30, %v15588_v28 }
0x4339   :  { %v7800_v31 = vpop.f32.mrb[88].mxu0 }
0x433a   :  { %v7805_v25 = vmul.f32 0.35355338, %v7800_v31  ;;  %v14264_v14 = vpop.f32.mrb[89].mxu0  ;;  %v7808_v26 = vsel %vm352_vm5, %v7806_v52, -inf }
0x433b   :  { %7809 = vmax.xlane.f32.xlu1 %v7808_v26 }
0x433c   :  { %v7807_v6 = vadd.f32 %v7805_v25, %v15588_v28 }
0x433e   :  { %v7811_v32 = vsel %vm352_vm5, %v7807_v6, -inf }
0x433f   :  { %7812 = vmax.xlane.f32.xlu0 %v7811_v32 }
0x434c   :  { %8056 = vrot.lane.b32.xlu1 %v16786_v46, %s15339_s12 }
0x43c8   :  { %v7810_v33 = vpop.xlane.xlu1 %7809 }
0x43c9   :  { %v7814_v12 = vsub.f32 %v7806_v52, %v7810_v33 }
0x43cb   :  { %v7816_v37 = vmul.f32 1.442695, %v7814_v12 }
0x43cc   :  { %v7813_v17 = vpop.xlane.xlu0 %7812  ;;  %v8057_v24 = vpop.permute.xlu1 %8056 }
0x43cd   :  { %15135 = vpow2.f32 %v7816_v37  ;;  %v7815_v40 = vsub.f32 %v7807_v6, %v7813_v17 }
0x43cf   :  { %v7818_v36 = vmul.f32 1.442695, %v7815_v40 }
0x43d1   :  { %15137 = vpow2.f32 %v7818_v36 }
0x43d7   :  { %v15136_v44 = vpop.eup %15135 }
0x43d8   :  { %v7820_v34 = vsel %vm352_vm5, %v15136_v44, 0.0 }
0x43d9   :  { %7821 = vadd.xlane.f32.xlu0 %v7820_v34 }
0x43db   :  { %v15138_v51 = vpop.eup %15137 }
0x43dc   :  { %v7823_v43 = vsel %vm352_vm5, %v15138_v51, 0.0 }
0x43dd   :  { %7824 = vadd.xlane.f32.xlu1 %v7823_v43 }
0x43ee   :  { %7976 = vrot.lane.b32.xlu1 %v16797_v5, %s15340_s13 }
0x43ef   :  { %7978 = vrot.lane.b32.xlu0 %v16781_v8, %s15339_s12 }
0x43f3   :  { %8054 = vrot.lane.b32.xlu0 %v16810_v10, %s15340_s13 }
0x4466   :  { %v7822_v23 = vpop.xlane.xlu0 %7821 }
0x4467   :  { %15139 = vrcp.f32 %v7822_v23 }
0x446a   :  { %v7825_v4 = vpop.xlane.xlu1 %7824  ;;  %v7979_v22 = vpop.permute.xlu0 %7978 }
0x446b   :  { %15141 = vrcp.f32 %v7825_v4 }
0x446e   :  { %v7977_v19 = vpop.permute.xlu1 %7976  ;;  %v8055_v45 = vpop.permute.xlu0 %8054 }
0x4471   :  { %v15140_v48 = vpop.eup %15139 }
0x4472   :  { %v7828_v7 = vmul.f32 %v15140_v48, %v15136_v44 }
0x4474   :  { %14268 = vmatmul.mubr.msk.f32.vlgmr.msra.gmra.mrb[88].mxu1 %vm352_vm5, %v7828_v7 }
0x4475   :  { %v15142_v54 = vpop.eup %15141  ;;  %14276 = vmatpush3.xpose.msk.msra.mxu1 %vm352_vm5, %v7979_v22  ;;  %14277 = vmatprep.mubr.msk.f32.mxu1 %vm15337_vm4, %v15333_v9 }
0x4476   :  { %v7829_v50 = vmul.f32 %v15142_v54, %v15138_v51  ;;  %14285 = vmatprep.subr.mxu1 %v15333_v9 }
0x4478   :  { %14273 = vmatmul.mubr.msk.f32.vlgmr.msra.gmra.mrb[90].mxu0 %vm352_vm5, %v7829_v50  ;;  %14278 = vmatmul.mubr.msk.f32.vlgmr.msra.gmra.mrb[90].mxu1 %vm352_vm5, %v7977_v19 }
0x4479   :  { %14281 = vmatpush3.xpose.msk.msra.mxu0 %vm352_vm5, %v8057_v24  ;;  %14282 = vmatprep.mubr.msk.f32.mxu0 %vm15337_vm4, %v15333_v9 }
0x447a   :  { %14290 = vmatprep.subr.mxu0 %v15333_v9  ;;  %14287 = vmatprep.mubr.msk.f32.mxu1 %vm15337_vm4, %v15333_v9 }
0x447c   :  { %14283 = vmatmul.mubr.msk.f32.vlgmr.msra.gmra.mrb[92].mxu0 %vm352_vm5, %v8055_v45 }
0x447d   :  { %14292 = vmatprep.mubr.msk.f32.mxu0 %vm15337_vm4, %v15333_v9 }
0x4547   :  { %v16852_v16 = vpop.f32.mrb[88].mxu1 }
0x4548   :  { %v14269_v55 = vpop.f32.mrb[89].mxu1 }
0x454b   :  { %v16854_v41 = vpop.f32.mrb[90].mxu0  ;;  %v8050_v42 = vpop.f32.mrb[90].mxu1 }
0x454c   :  { %v8132_v38 = vmul.f32 0.35355338, %v8050_v42  ;;  %v14274_v60 = vpop.f32.mrb[91].mxu0  ;;  %v14279_v62 = vpop.f32.mrb[91].mxu1 }
0x454e   :  { %v8134_v2 = vadd.f32 %v8132_v38, %v15588_v28 }
0x454f   :  { %v8128_v13 = vpop.f32.mrb[92].mxu0 }
0x4550   :  { %v8133_v1 = vmul.f32 0.35355338, %v8128_v13  ;;  %v14284_v47 = vpop.f32.mrb[93].mxu0  ;;  %v8136_v53 = vsel %vm352_vm5, %v8134_v2, -inf }
0x4551   :  { %8137 = vmax.xlane.f32.xlu1 %v8136_v53 }
0x4552   :  { %v8135_v39 = vadd.f32 %v8133_v1, %v15588_v28 }
0x4554   :  { %v8139_v35 = vsel %vm352_vm5, %v8135_v39, -inf }
0x4555   :  { %8140 = vmax.xlane.f32.xlu0 %v8139_v35 }
0x4562   :  { %8236 = vrot.lane.b32.xlu1 %v16774_v56, %s15340_s13 }
0x4566   :  { %8314 = vrot.lane.b32.xlu1 %v16781_v8, %s15341_s15 }
0x456b   :  { %8159 = vrot.lane.b32.xlu0 %v16769_v21, %s15340_s13 }
0x45de   :  { %v8138_v18 = vpop.xlane.xlu1 %8137 }
0x45df   :  { %v8142_v20 = vsub.f32 %v8134_v2, %v8138_v18 }
0x45e1   :  { %v8144_v0 = vmul.f32 1.442695, %v8142_v20 }
0x45e2   :  { %v8141_v30 = vpop.xlane.xlu0 %8140  ;;  %v8237_v61 = vpop.permute.xlu1 %8236 }
0x45e3   :  { %15143 = vpow2.f32 %v8144_v0  ;;  %v8143_v52 = vsub.f32 %v8135_v39, %v8141_v30  ;;  %14291 = vmatpush3.msra.mxu0 %v8237_v61 }
0x45e4   :  { %14300 = vmatprep.subr.mxu0 %v15333_v9 }
0x45e5   :  { %v8146_v31 = vmul.f32 1.442695, %v8143_v52 }
0x45e6   :  { %v8160_v25 = vpop.permute.xlu0 %8159  ;;  %v8315_v33 = vpop.permute.xlu1 %8314 }
0x45e7   :  { %15145 = vpow2.f32 %v8146_v31  ;;  %14286 = vmatpush3.msra.mxu1 %v8160_v25 }
0x45e8   :  { %14295 = vmatprep.subr.mxu1 %v15333_v9 }
0x45ed   :  { %v15144_v14 = vpop.eup %15143 }
0x45ee   :  { %v8148_v26 = vsel %vm352_vm5, %v15144_v14, 0.0 }
0x45ef   :  { %8149 = vadd.xlane.f32.xlu0 %v8148_v26 }
0x45f1   :  { %v15146_v6 = vpop.eup %15145 }
0x45f2   :  { %v8151_v32 = vsel %vm352_vm5, %v15146_v6, 0.0 }
0x45f3   :  { %8152 = vadd.xlane.f32.xlu1 %v8151_v32 }
0x4604   :  { %8312 = vrot.lane.b32.xlu1 %v16797_v5, %s15342_s16 }
0x4605   :  { %8392 = vrot.lane.b32.xlu0 %v16786_v46, %s15341_s15 }
0x4609   :  { %8390 = vrot.lane.b32.xlu0 %v16810_v10, %s15342_s16 }
0x467c   :  { %v8150_v12 = vpop.xlane.xlu0 %8149 }
0x467d   :  { %15147 = vrcp.f32 %v8150_v12 }
0x4680   :  { %v8153_v37 = vpop.xlane.xlu1 %8152  ;;  %v8393_v44 = vpop.permute.xlu0 %8392 }
0x4681   :  { %15149 = vrcp.f32 %v8153_v37 }
0x4684   :  { %v8313_v51 = vpop.permute.xlu1 %8312  ;;  %v8391_v43 = vpop.permute.xlu0 %8390 }
0x4687   :  { %v15148_v17 = vpop.eup %15147 }
0x4688   :  { %v8156_v40 = vmul.f32 %v15148_v17, %v15144_v14 }
0x468a   :  { %14288 = vmatmul.mubr.msk.f32.vlgmr.msra.gmra.mrb[92].mxu1 %vm352_vm5, %v8156_v40 }
0x468b   :  { %v15150_v36 = vpop.eup %15149  ;;  %14296 = vmatpush3.xpose.msk.msra.mxu1 %vm352_vm5, %v8315_v33  ;;  %14297 = vmatprep.mubr.msk.f32.mxu1 %vm15337_vm4, %v15333_v9 }
0x468c   :  { %v8157_v34 = vmul.f32 %v15150_v36, %v15146_v6  ;;  %14305 = vmatprep.subr.mxu1 %v15333_v9 }
0x468e   :  { %14293 = vmatmul.mubr.msk.f32.vlgmr.msra.gmra.mrb[94].mxu0 %vm352_vm5, %v8157_v34  ;;  %14298 = vmatmul.mubr.msk.f32.vlgmr.msra.gmra.mrb[94].mxu1 %vm352_vm5, %v8313_v51 }
0x468f   :  { %14301 = vmatpush3.xpose.msk.msra.mxu0 %vm352_vm5, %v8393_v44  ;;  %14302 = vmatprep.mubr.msk.f32.mxu0 %vm15337_vm4, %v15333_v9 }
0x4690   :  { %14310 = vmatprep.subr.mxu0 %v15333_v9  ;;  %14307 = vmatprep.mubr.msk.f32.mxu1 %vm15337_vm4, %v15333_v9 }
0x4692   :  { %14303 = vmatmul.mubr.msk.f32.vlgmr.msra.gmra.mrb[96].mxu0 %vm352_vm5, %v8391_v43 }
0x4693   :  { %14312 = vmatprep.mubr.msk.f32.mxu0 %vm15337_vm4, %v15333_v9 }
0x475d   :  { %v16892_v24 = vpop.f32.mrb[92].mxu1 }
0x475e   :  { %v14289_v23 = vpop.f32.mrb[93].mxu1 }
0x4761   :  { %v16894_v4 = vpop.f32.mrb[94].mxu0  ;;  %v8386_v48 = vpop.f32.mrb[94].mxu1 }
0x4762   :  { %v8468_v7 = vmul.f32 0.35355338, %v8386_v48  ;;  %v14294_v22 = vpop.f32.mrb[95].mxu0  ;;  %v14299_v54 = vpop.f32.mrb[95].mxu1 }
0x4764   :  { %v8470_v50 = vadd.f32 %v8468_v7, %v15588_v28 }
0x4765   :  { %v8464_v19 = vpop.f32.mrb[96].mxu0 }
0x4766   :  { %v8469_v45 = vmul.f32 0.35355338, %v8464_v19  ;;  %v14304_v55 = vpop.f32.mrb[97].mxu0  ;;  %v8472_v42 = vsel %vm352_vm5, %v8470_v50, -inf }
0x4767   :  { %8473 = vmax.xlane.f32.xlu1 %v8472_v42 }
0x4768   :  { %v8471_v38 = vadd.f32 %v8469_v45, %v15588_v28 }
0x476a   :  { %v8475_v60 = vsel %vm352_vm5, %v8471_v38, -inf }
0x476b   :  { %8476 = vmax.xlane.f32.xlu0 %v8475_v60 }
0x4778   :  { %8570 = vrot.lane.b32.xlu1 %v16774_v56, %s15342_s16 }
0x477c   :  { %8648 = vrot.lane.b32.xlu1 %v16781_v8, %s15343_s7 }
0x4781   :  { %8494 = vrot.lane.b32.xlu0 %v16769_v21, %s15342_s16 }
0x47f4   :  { %v8474_v62 = vpop.xlane.xlu1 %8473 }
0x47f5   :  { %v8478_v2 = vsub.f32 %v8470_v50, %v8474_v62 }
0x47f7   :  { %v8480_v13 = vmul.f32 1.442695, %v8478_v2 }
0x47f8   :  { %v8477_v1 = vpop.xlane.xlu0 %8476  ;;  %v8571_v47 = vpop.permute.xlu1 %8570 }
0x47f9   :  { %15151 = vpow2.f32 %v8480_v13  ;;  %v8479_v53 = vsub.f32 %v8471_v38, %v8477_v1  ;;  %14311 = vmatpush3.msra.mxu0 %v8571_v47 }
0x47fa   :  { %14320 = vmatprep.subr.mxu0 %v15333_v9 }
0x47fb   :  { %v8482_v39 = vmul.f32 1.442695, %v8479_v53  ;;  %v13197_v53 = vld [vmem:[%s17663_s6 + $0x88] sm:$0xff] }
0x47fc   :  { %v8495_v35 = vpop.permute.xlu0 %8494  ;;  %v8649_v30 = vpop.permute.xlu1 %8648 }
0x47fd   :  { %15153 = vpow2.f32 %v8482_v39  ;;  %14306 = vmatpush3.msra.mxu1 %v8495_v35  ;;  %v13198_v35 = vld [vmem:[%s17663_s6 + $0x90] sm:$0xff] }
0x47fe   :  { %14315 = vmatprep.subr.mxu1 %v15333_v9 }
0x4803   :  { %v15152_v8 = vpop.eup %15151 }
0x4804   :  { %v8484_v18 = vsel %vm352_vm5, %v15152_v8, 0.0 }
0x4805   :  { %8485 = vadd.xlane.f32.xlu0 %v8484_v18 }
0x4807   :  { %v15154_v20 = vpop.eup %15153 }
0x4808   :  { %v8487_v0 = vsel %vm352_vm5, %v15154_v20, 0.0 }
0x4809   :  { %8488 = vadd.xlane.f32.xlu1 %v8487_v0 }
0x481a   :  { %8646 = vrot.lane.b32.xlu1 %v16797_v5, %s15344_s14 }
0x481b   :  { %8726 = vrot.lane.b32.xlu0 %v16786_v46, %s15343_s7 }
0x481f   :  { %8724 = vrot.lane.b32.xlu0 %v16810_v10, %s15344_s14 }
0x4892   :  { %v8486_v61 = vpop.xlane.xlu0 %8485 }
0x4893   :  { %15155 = vrcp.f32 %v8486_v61 }
0x4896   :  { %v8489_v52 = vpop.xlane.xlu1 %8488  ;;  %v8727_v26 = vpop.permute.xlu0 %8726 }
0x4897   :  { %15157 = vrcp.f32 %v8489_v52 }
0x489a   :  { %v8647_v5 = vpop.permute.xlu1 %8646  ;;  %v8725_v10 = vpop.permute.xlu0 %8724 }
0x489d   :  { %v15156_v31 = vpop.eup %15155 }
0x489e   :  { %v8492_v25 = vmul.f32 %v15156_v31, %v15152_v8  ;;  %v13199_v8 = vld [vmem:[%s17663_s6 + $0x98] sm:$0xff] }
0x489f   :  { %v14806_v18 = vpack.c.bf16 %v13199_v8, %v13198_v35  ;;  %v13210_v8 = vld [vmem:[%s17666_s9 + $0x130] sm:$0xff] }
0x48a0   :  { %14308 = vmatmul.mubr.msk.f32.vlgmr.msra.gmra.mrb[96].mxu1 %vm352_vm5, %v8492_v25 }
0x48a1   :  { %v15158_v14 = vpop.eup %15157  ;;  %14316 = vmatpush3.xpose.msk.msra.mxu1 %vm352_vm5, %v8649_v30  ;;  %14317 = vmatprep.mubr.msk.f32.mxu1 %vm15337_vm4, %v15333_v9 }
0x48a2   :  { %v8493_v46 = vmul.f32 %v15158_v14, %v15154_v20  ;;  %14325 = vmatprep.subr.mxu1 %v15333_v9 }
0x48a4   :  { %14313 = vmatmul.mubr.msk.f32.vlgmr.msra.gmra.mrb[98].mxu0 %vm352_vm5, %v8493_v46  ;;  %14318 = vmatmul.mubr.msk.f32.vlgmr.msra.gmra.mrb[98].mxu1 %vm352_vm5, %v8647_v5 }
0x48a5   :  { %14321 = vmatpush3.xpose.msk.msra.mxu0 %vm352_vm5, %v8727_v26  ;;  %14322 = vmatprep.mubr.msk.f32.mxu0 %vm15337_vm4, %v15333_v9 }
0x48a6   :  { %14330 = vmatprep.subr.mxu0 %v15333_v9  ;;  %14327 = vmatprep.mubr.msk.f32.mxu1 %vm15337_vm4, %v15333_v9 }
0x48a8   :  { %14323 = vmatmul.mubr.msk.f32.vlgmr.msra.gmra.mrb[100].mxu0 %vm352_vm5, %v8725_v10 }
0x48a9   :  { %14332 = vmatprep.mubr.msk.f32.mxu0 %vm15337_vm4, %v15333_v9 }
0x4973   :  { %v8566_v6 = vpop.f32.mrb[96].mxu1 }
0x4974   :  { %v14309_v32 = vpop.f32.mrb[97].mxu1 }
0x4977   :  { %v8642_v33 = vpop.f32.mrb[98].mxu0  ;;  %v8720_v12 = vpop.f32.mrb[98].mxu1 }
0x4978   :  { %v8802_v37 = vmul.f32 0.35355338, %v8720_v12  ;;  %v14314_v17 = vpop.f32.mrb[99].mxu0  ;;  %v14319_v40 = vpop.f32.mrb[99].mxu1 }
0x497a   :  { %v8804_v36 = vadd.f32 %v8802_v37, %v15588_v28 }
0x497b   :  { %v8798_v44 = vpop.f32.mrb[100].mxu0 }
0x497c   :  { %v8803_v34 = vmul.f32 0.35355338, %v8798_v44  ;;  %v14324_v51 = vpop.f32.mrb[101].mxu0  ;;  %v8806_v43 = vsel %vm352_vm5, %v8804_v36, -inf }
0x497d   :  { %8807 = vmax.xlane.f32.xlu1 %v8806_v43  ;;  %v13202_v51 = vld [vmem:[%s17665_s8 + $0x90] sm:$0xff] }
0x497e   :  { %v8805_v23 = vadd.f32 %v8803_v34, %v15588_v28 }
0x4980   :  { %v8809_v48 = vsel %vm352_vm5, %v8805_v23, -inf }
0x4981   :  { %8810 = vmax.xlane.f32.xlu0 %v8809_v48 }
0x4a0a   :  { %v8808_v7 = vpop.xlane.xlu1 %8807 }
0x4a0b   :  { %v8812_v22 = vsub.f32 %v8804_v36, %v8808_v7 }
0x4a0d   :  { %v8814_v54 = vmul.f32 1.442695, %v8812_v22 }
0x4a0e   :  { %v8811_v50 = vpop.xlane.xlu0 %8810 }
0x4a0f   :  { %15159 = vpow2.f32 %v8814_v54  ;;  %v8813_v19 = vsub.f32 %v8805_v23, %v8811_v50  ;;  %v13203_v23 = vld [vmem:[%s17665_s8 + $0x98] sm:$0xff] }
0x4a10   :  { %v14814_v48 = vpack.c.bf16 %v13203_v23, %v13202_v51 }
0x4a11   :  { %v8816_v45 = vmul.f32 1.442695, %v8813_v19 }
0x4a13   :  { %15161 = vpow2.f32 %v8816_v45 }
0x4a19   :  { %v15160_v55 = vpop.eup %15159 }
0x4a1a   :  { %v8818_v42 = vsel %vm352_vm5, %v15160_v55, 0.0 }
0x4a1b   :  { %8819 = vadd.xlane.f32.xlu0 %v8818_v42 }
0x4a1d   :  { %v15162_v38 = vpop.eup %15161 }
0x4a1e   :  { %v8821_v60 = vsel %vm352_vm5, %v15162_v38, 0.0 }
0x4a1f   :  { %8822 = vadd.xlane.f32.xlu1 %v8821_v60 }
0x4a30   :  { %8904 = vrot.lane.b32.xlu1 %v16774_v56, %s15344_s14 }
0x4a31   :  { %8828 = vrot.lane.b32.xlu0 %v16769_v21, %s15344_s14 }
0x4a34   :  { %8982 = vrot.lane.b32.xlu1 %v16892_v24, %s15345_s17 }
0x4a35   :  { %8984 = vrot.lane.b32.xlu0 %v16894_v4, %s15345_s17  ;;  %v13196_v4 = vld [vmem:[%s17663_s6 + $0x80] sm:$0xff] }
0x4a36   :  { %v14802_v39 = vpack.c.bf16 %v13197_v53, %v13196_v4  ;;  %v13208_v53 = vld [vmem:[%s17666_s9 + $0x120] sm:$0xff] }
0x4a38   :  { %8990 = vrot.lane.b32.xlu1 %v8566_v6, %s15330_s24 }
0x4a39   :  { %8992 = vrot.lane.b32.xlu0 %v8642_v33, %s15330_s24 }
0x4aa8   :  { %v8820_v62 = vpop.xlane.xlu0 %8819 }
0x4aa9   :  { %15163 = vrcp.f32 %v8820_v62 }
0x4aac   :  { %v8829_v2 = vpop.permute.xlu0 %8828  ;;  %v8823_v13 = vpop.xlane.xlu1 %8822 }
0x4aad   :  { %15165 = vrcp.f32 %v8823_v13  ;;  %14326 = vmatpush3.msra.mxu1 %v8829_v2 }
0x4aae   :  { %14803 = vmatprep.subr.bf16.mxu1 %v14802_v39 }
0x4ab0   :  { %v8905_v56 = vpop.permute.xlu1 %8904  ;;  %v8985_v31 = vpop.permute.xlu0 %8984 }
0x4ab1   :  { %14331 = vmatpush3.msra.mxu0 %v8905_v56  ;;  %v9005_v6 = vsel %vm352_vm5, %v16854_v41, %v8985_v31  ;;  %v13204_v56 = vld [vmem:[%s17666_s9 + $0x100] sm:$0xff] }
0x4ab3   :  { %v15164_v1 = vpop.eup %15163 }
0x4ab4   :  { %v8826_v21 = vmul.f32 %v15164_v1, %v15160_v55  ;;  %v8983_v52 = vpop.permute.xlu1 %8982  ;;  %v8993_v26 = vpop.permute.xlu0 %8992  ;;  %v13205_v1 = vld [vmem:[%s17666_s9 + $0x108] sm:$0xff] }
0x4ab5   :  { %v9004_v14 = vsel %vm352_vm5, %v16852_v16, %v8983_v52  ;;  %v9007_v32 = vsel %vm1708_vm8, %v9005_v6, %v8993_v26 }
0x4ab6   :  { %14328 = vmatmul.mubr.msk.f32.vlgmr.msra.gmra.mrb[100].mxu1 %vm352_vm5, %v8826_v21  ;;  %v13206_v21 = vld [vmem:[%s17666_s9 + $0x110] sm:$0xff] }
0x4ab7   :  { %v15166_v24 = vpop.eup %15165  ;;  %14805 = vmatpush3.bf16.msra.mxu1 %v14802_v39  ;;  %v13209_v39 = vld [vmem:[%s17666_s9 + $0x128] sm:$0xff] }
0x4ab8   :  { %v8827_v47 = vmul.f32 %v15166_v24, %v15162_v38  ;;  %14807 = vmatprep.subr.bf16.mxu1 %v14806_v18  ;;  %v8991_v25 = vpop.permute.xlu1 %8990  ;;  %v13241_v38 = vld [vmem:[#allocation2 + $0x4] ss:$0 sm:$0xff]  ;;  %v14818_v24 = vpack.c.bf16 %v13205_v1, %v13204_v56  ;;  %v14826_v35 = vpack.c.bf16 %v13209_v39, %v13208_v53 }
0x4ab9   :  { %v9006_v46 = vsel %vm1708_vm8, %v9004_v14, %v8991_v25 }
0x4aba   :  { %14333 = vmatmul.mubr.msk.f32.vlgmr.msra.gmra.mrb[102].mxu0 %vm352_vm5, %v8827_v47  ;;  %v13207_v47 = vld [vmem:[%s17666_s9 + $0x118] sm:$0xff] }
0x4abb   :  { %14809 = vmatpush3.bf16.msra.mxu1 %v14806_v18  ;;  %v14822_v4 = vpack.c.bf16 %v13207_v47, %v13206_v21  ;;  %v13211_v18 = vld [vmem:[%s17666_s9 + $0x138] sm:$0xff]  ;;  %v13271_v47 = vld [vmem:[%s17661_s4 + $0x5] ss:$0 sm:$0xff] }
0x4abc   :  { %14819 = vmatprep.subr.bf16.mxu1 %v14818_v24 }
0x4b89   :  { %v8900_v20 = vpop.f32.mrb[100].mxu1 }
0x4b8a   :  { %8998 = vrot.lane.b32.xlu1 %v8900_v20, %s15346_s1  ;;  %v14329_v0 = vpop.f32.mrb[101].mxu1  ;;  %v14830_v20 = vpack.c.bf16 %v13211_v18, %v13210_v8 }
0x4b8d   :  { %v8976_v30 = vpop.f32.mrb[102].mxu0 }
0x4b8e   :  { %9000 = vrot.lane.b32.xlu0 %v8976_v30, %s15346_s1  ;;  %v14334_v61 = vpop.f32.mrb[103].mxu0 }
0x4bfc   :  { %v8999_v5 = vpop.permute.xlu1 %8998 }
0x4bfd   :  { %v9008_v10 = vsel %vm1711_vm7, %v9006_v46, %v8999_v5 }
0x4bfe   :  { %14343 = vmatprep.mubr.msk.f32.mxu1 %vm192_vm3, %v9008_v10 }
0x4c00   :  { %v9001_v33 = vpop.permute.xlu0 %9000 }
0x4c01   :  { %v9009_v12 = vsel %vm1711_vm7, %v9007_v32, %v9001_v33 }
0x4c02   :  { %14344 = vmatmul.mubr.msk.f32.vlgmr.msra.gmra.mrb[102].mxu1 %vm192_vm3, %v9009_v12 }
0x4c03   :  { %14821 = vmatpush3.bf16.msra.mxu1 %v14818_v24 }
0x4c04   :  { %14823 = vmatprep.subr.bf16.mxu1 %v14822_v4 }
0x4c07   :  { %14825 = vmatpush3.bf16.msra.mxu1 %v14822_v4 }
0x4c08   :  { %14827 = vmatprep.subr.bf16.mxu1 %v14826_v35 }
0x4c0b   :  { %14829 = vmatpush3.bf16.msra.mxu1 %v14826_v35 }
0x4c0c   :  { %14831 = vmatprep.subr.bf16.mxu1 %v14830_v20 }
0x4c0f   :  { %14833 = vmatpush3.bf16.msra.mxu1 %v14830_v20 }
0x4c10   :  { %14381 = vmatprep.subr.mxu1 %v15333_v9 }
0x4cd5   :  { %v14345_v37 = vpop.f32.mrb[102].mxu1 }
0x4cd6   :  { %v16975_v16 = vadd.f32 %v14345_v37, %v16722_v27  ;;  %v9082_v17 = vpop.f32.mrb[103].mxu1  ;;  %v13200_v27 = vld [vmem:[%s17665_s8 + $0x80] sm:$0xff] }
0x4cd7   :  { %v16978_v40 = vadd.f32 %v9082_v17, %v16725_v29  ;;  %v13201_v29 = vld [vmem:[%s17665_s8 + $0x88] sm:$0xff] }
0x4cd8   :  { %v9094_v36 = vmul.f32 %v16975_v16, %v16975_v16  ;;  %v14810_v43 = vpack.c.bf16 %v13201_v29, %v13200_v27 }
0x4cd9   :  { %v9093_v41 = vmul.f32 %v16978_v40, %v16978_v40 }
0x4cda   :  { %v9098_v44 = vsel %vm192_vm3, %v9094_v36, 0.0  ;;  %14811 = vmatprep.subr.bf16.mxu0 %v14810_v43 }
0x4cdb   :  { %9099 = vadd.xlane.f32.xlu0 %v9098_v44  ;;  %v9095_v34 = vsel %vm192_vm3, %v9093_v41, 0.0  ;;  %14813 = vmatpush3.bf16.msra.mxu0 %v14810_v43 }
0x4cdc   :  { %9096 = vadd.xlane.f32.xlu1 %v9095_v34  ;;  %14815 = vmatprep.subr.bf16.mxu0 %v14814_v48 }
0x4cdf   :  { %14817 = vmatpush3.bf16.msra.mxu0 %v14814_v48 }
0x4d68   :  { %v9100_v7 = vpop.xlane.xlu0 %9099 }
0x4d69   :  { %v9102_v22 = vmul.f32 0.03125, %v9100_v7  ;;  %v9097_v54 = vpop.xlane.xlu1 %9096  ;;  %v13247_v7 = vld [vmem:[%s17662_s5 + $0x140] sm:$0xff] }
0x4d6a   :  { %v9101_v50 = vmul.f32 0.03125, %v9097_v54 }
0x4d6b   :  { %v9104_v19 = vadd.f32 1e-06, %v9102_v22  ;;  %v13249_v22 = vld [vmem:[%s17662_s5 + $0x150] sm:$0xff] }
0x4d6c   :  { %v9103_v45 = vadd.f32 1e-06, %v9101_v50  ;;  %v14836_v54 = vpack.c.bf16 %v13249_v22, %v13247_v7  ;;  %v13252_v50 = vld [vmem:[%s17662_s5 + $0x168] sm:$0xff] }
0x4d6d   :  { %15167 = vrsqrt.f32 %v9104_v19  ;;  %v13254_v19 = vld [vmem:[%s17662_s5 + $0x178] sm:$0xff] }
0x4d6e   :  { %15169 = vrsqrt.f32 %v9103_v45  ;;  %v14838_v45 = vpack.c.bf16 %v13254_v19, %v13252_v50 }
0x4d77   :  { %v15168_v55 = vpop.eup %15167 }
0x4d78   :  { %v15170_v42 = vpop.eup %15169  ;;  %v9108_v60 = vmul.f32 %v15168_v55, %v16975_v16  ;;  %v13251_v55 = vld [vmem:[%s17662_s5 + $0x160] sm:$0xff] }
0x4d79   :  { %v9107_v62 = vmul.f32 %v15170_v42, %v16978_v40  ;;  %v13253_v42 = vld [vmem:[%s17662_s5 + $0x170] sm:$0xff] }
0x4d7a   :  { %v9116_v13 = vmul.f32 %v13241_v38, %v9108_v60 }
0x4d7b   :  { %v9115_v2 = vmul.f32 %v13241_v38, %v9107_v62  ;;  %v14840_v38 = vpack.c.bf16 %v13253_v42, %v13251_v55 }
0x4d7d   :  { %14354 = vmatprep.mubr.msk.f32.mxu0 %vm192_vm3, %v9115_v2 }
0x4d7e   :  { %14355 = vmatmul.mubr.msk.f32.vlgmr.msra.gmra.mrb[104].mxu0 %vm192_vm3, %v9116_v13 }
0x4d7f   :  { %9431 = vmatprep.mubr.f32.mxu0 %v15333_v9 }
0x4e51   :  { %v14356_v0 = vpop.f32.mrb[104].mxu0 }
0x4e52   :  { %9216 = vrot.lane.b32.xlu1 %v14356_v0, %s15335_s27  ;;  %v9189_v30 = vpop.f32.mrb[105].mxu0  ;;  %v9199_v52 = vsub.f32 0.0, %v14356_v0 }
0x4e53   :  { %9214 = vrot.lane.b32.xlu0 %v9189_v30, %s15335_s27  ;;  %v9198_v61 = vsub.f32 0.0, %v9189_v30 }
0x4e54   :  { %v9202_v25 = vmul.f32 1.442695, %v9199_v52 }
0x4e55   :  { %v9200_v31 = vmul.f32 1.442695, %v9198_v61 }
0x4e57   :  { %15171 = vpow2.f32 %v9200_v31 }
0x4e58   :  { %15173 = vpow2.f32 %v9202_v25 }
0x4e61   :  { %v15172_v14 = vpop.eup %15171 }
0x4e62   :  { %v15174_v26 = vpop.eup %15173  ;;  %v9204_v46 = vadd.f32 1.0, %v15172_v14 }
0x4e63   :  { %v9205_v5 = vadd.f32 1.0, %v15174_v26 }
0x4e64   :  { %15175 = vrcp.f32 %v9204_v46 }
0x4e65   :  { %15177 = vrcp.f32 %v9205_v5 }
0x4e6e   :  { %v15176_v10 = vpop.eup %15175 }
0x4e6f   :  { %v15178_v6 = vpop.eup %15177  ;;  %v9210_v32 = vmul.f32 %v15176_v10, %v9189_v30 }
0x4e70   :  { %v9211_v12 = vmul.f32 %v15178_v6, %v14356_v0 }
0x4ec4   :  { %v9217_v33 = vpop.permute.xlu1 %9216 }
0x4ec5   :  { %v9215_v37 = vpop.permute.xlu0 %9214  ;;  %v9221_v36 = vmul.f32 %v9217_v33, %v9211_v12 }
0x4ec6   :  { %v9220_v17 = vmul.f32 %v9215_v37, %v9210_v32 }
0x4ec8   :  { %14373 = vmatprep.mubr.msk.f32.mxu1 %vm74_vm0, %v9220_v17 }
0x4ec9   :  { %14374 = vmatmul.mubr.msk.f32.vlgmr.msra.gmra.mrb[104].mxu1 %vm74_vm0, %v9221_v36 }
0x4eca   :  { %14383 = vmatprep.mubr.msk.f32.mxu1 %vm15337_vm4, %v15333_v9 }
0x4f9c   :  { %v14375_v41 = vpop.f32.mrb[104].mxu1 }
0x4f9d   :  { %v17035_v44 = vadd.f32 %v14375_v41, %v16975_v16  ;;  %v9294_v34 = vpop.f32.mrb[105].mxu1  ;;  %v13248_v16 = vld [vmem:[%s17662_s5 + $0x148] sm:$0xff] }
0x4f9e   :  { %v17038_v27 = vadd.f32 %v9294_v34, %v16978_v40  ;;  %v13250_v40 = vld [vmem:[%s17662_s5 + $0x158] sm:$0xff] }
0x4f9f   :  { %v9338_v29 = vmul.f32 %v17035_v44, %v17035_v44  ;;  %v14834_v48 = vpack.c.bf16 %v13250_v40, %v13248_v16 }
0x4fa0   :  { %v9337_v51 = vmul.f32 %v17038_v27, %v17038_v27 }
0x4fa1   :  { %v9342_v43 = vsel %vm192_vm3, %v9338_v29, 0.0  ;;  %14835 = vmatprep.subr.bf16.mxu0 %v14834_v48 }
0x4fa2   :  { %9343 = vadd.xlane.f32.xlu0 %v9342_v43  ;;  %v9339_v23 = vsel %vm192_vm3, %v9337_v51, 0.0  ;;  %14837 = vmatpush1.bf16.msra.mxu0 %v14836_v54 }
0x4fa3   :  { %9340 = vadd.xlane.f32.xlu1 %v9339_v23  ;;  %14839 = vmatprep.subr.bf16.mxu0 %v14838_v45 }
0x4fa6   :  { %14841 = vmatpush1.bf16.msra.mxu0 %v14840_v38 }
0x4fa7   :  { %14376 = vmatprep.subr.mxu0 %v15333_v9 }
0x502f   :  { %v9344_v60 = vpop.xlane.xlu0 %9343 }
0x5030   :  { %v9346_v62 = vmul.f32 0.03125, %v9344_v60  ;;  %v9341_v2 = vpop.xlane.xlu1 %9340 }
0x5031   :  { %v9345_v13 = vmul.f32 0.03125, %v9341_v2 }
0x5032   :  { %v9348_v56 = vadd.f32 1e-06, %v9346_v62 }
0x5033   :  { %v9347_v1 = vadd.f32 1e-06, %v9345_v13 }
0x5034   :  { %15179 = vrsqrt.f32 %v9348_v56 }
0x5035   :  { %15181 = vrsqrt.f32 %v9347_v1 }
0x503e   :  { %v15180_v21 = vpop.eup %15179 }
0x503f   :  { %v15182_v24 = vpop.eup %15181  ;;  %v9352_v39 = vmul.f32 %v15180_v21, %v17035_v44 }
0x5040   :  { %v9351_v4 = vmul.f32 %v15182_v24, %v17038_v27 }
0x5041   :  { %v9360_v35 = vmul.f32 %v13271_v47, %v9352_v39 }
0x5042   :  { %v9359_v53 = vmul.f32 %v13271_v47, %v9351_v4 }
0x5044   :  { %13272 = vmatmul.mubr.msk.f32.vlgmr.msra.gmra.mrb[106].mxu0 %vm192_vm3, %v9359_v53 }
0x5045   :  { %9437 = vmatprep.mubr.f32.mxu0 %v15333_v9 }
0x5048   :  { %13273 = vmatmul.mubr.msk.f32.gmra.mrb[108].mxu0 %vm192_vm3, %v9360_v35 }
0x5049   :  { %14378 = vmatprep.mubr.msk.f32.mxu0 %vm15337_vm4, %v15333_v9 }
0x5117   :  { %v9433_v8 = vpop.f32.mrb[106].mxu0 }
0x5118   :  { %v9460_v18 = vmul.f32 %v9433_v8, %v15525_v57  ;;  %v17082_v20 = vpop.f32.mrb[107].mxu0  ;;  %v9446_v30 = vmul.f32 %v9433_v8, %v15540_v3  ;;  %v9458_v25 = vmul.f32 %v9433_v8, %v15527_v58  ;;  %v9444_v32 = vmul.f32 %v16793_v15, %v9433_v8 }
0x511a   :  { %9464 = vrot.lane.b32.xlu0 %v9460_v18, %s15334_s23 }
0x511b   :  { %v9439_v0 = vpop.f32.mrb[108].mxu0 }
0x511c   :  { %v9461_v61 = vmul.f32 %v9439_v0, %v15534_v63  ;;  %v17087_v52 = vpop.f32.mrb[109].mxu0  ;;  %v9447_v31 = vmul.f32 %v9439_v0, %v15556_v11  ;;  %v9459_v46 = vmul.f32 %v9439_v0, %v15529_v59  ;;  %v9445_v17 = vmul.f32 %v16803_v49, %v9439_v0 }
0x511e   :  { %9450 = vrot.lane.b32.xlu0 %v9446_v30, %s15334_s23  ;;  %9466 = vrot.lane.b32.xlu1 %v9461_v61, %s15334_s23 }
0x5122   :  { %9452 = vrot.lane.b32.xlu0 %v9447_v31, %s15334_s23 }
0x518c   :  { %v9465_v14 = vpop.permute.xlu0 %9464 }
0x518d   :  { %v17094_v26 = vadd.f32 %v9465_v14, %v9458_v25 }
0x518f   :  { %9473 = vrot.lane.b32.xlu1 %v17094_v26, %s15335_s27 }
0x5190   :  { %v9467_v5 = vpop.permute.xlu1 %9466  ;;  %v9451_v6 = vpop.permute.xlu0 %9450 }
0x5191   :  { %v17099_v10 = vadd.f32 %v9467_v5, %v9459_v46  ;;  %v17105_v12 = vadd.f32 %v9451_v6, %v9444_v32 }
0x5193   :  { %9551 = vrot.lane.b32.xlu1 %v17099_v10, %s15335_s27 }
0x5194   :  { %v9453_v37 = vpop.permute.xlu0 %9452 }
0x5195   :  { %v17113_v41 = vadd.f32 %v9453_v37, %v9445_v17 }
0x5201   :  { %v9474_v33 = vpop.permute.xlu1 %9473 }
0x5202   :  { %14377 = vmatpush3.xpose.msk.msra.mxu0 %vm352_vm5, %v9474_v33 }
0x5203   :  { %14386 = vmatprep.subr.mxu0 %v15333_v9 }
0x5205   :  { %14379 = vmatmul.mubr.msk.f32.vlgmr.msra.gmra.mrb[110].mxu0 %vm352_vm5, %v17105_v12  ;;  %v9552_v36 = vpop.permute.xlu1 %9551 }
0x5206   :  { %14382 = vmatpush3.xpose.msk.msra.mxu1 %vm352_vm5, %v9552_v36  ;;  %14387 = vmatpush3.msra.mxu0 %v17082_v20 }
0x5207   :  { %14391 = vmatprep.subr.mxu1 %v15333_v9  ;;  %14388 = vmatprep.mubr.msk.f32.mxu0 %vm15337_vm4, %v15333_v9 }
0x5208   :  { %14396 = vmatprep.subr.mxu0 %v15333_v9 }
0x5209   :  { %14384 = vmatmul.mubr.msk.f32.vlgmr.msra.gmra.mrb[106].mxu1 %vm352_vm5, %v17113_v41 }
0x520a   :  { %14392 = vmatpush3.msra.mxu1 %v17087_v52  ;;  %14393 = vmatprep.mubr.msk.f32.mxu1 %vm15337_vm4, %v15333_v9 }
0x520b   :  { %14401 = vmatprep.subr.mxu1 %v15333_v9 }
0x52d8   :  { %v9546_v15 = vpop.f32.mrb[110].mxu0 }
0x52d9   :  { %v9628_v49 = vmul.f32 0.35355338, %v9546_v15  ;;  %v14380_v34 = vpop.f32.mrb[111].mxu0 }
0x52db   :  { %v9630_v29 = vadd.f32 %v9628_v49, %v15588_v28 }
0x52dc   :  { %v9624_v51 = vpop.f32.mrb[106].mxu1 }
0x52dd   :  { %v9629_v43 = vmul.f32 0.35355338, %v9624_v51  ;;  %v14385_v23 = vpop.f32.mrb[107].mxu1  ;;  %v9632_v16 = vsel %vm352_vm5, %v9630_v29, -inf }
0x52de   :  { %9633 = vmax.xlane.f32.xlu1 %v9632_v16 }
0x52df   :  { %v9631_v40 = vadd.f32 %v9629_v43, %v15588_v28 }
0x52e1   :  { %v9635_v48 = vsel %vm352_vm5, %v9631_v40, -inf }
0x52e2   :  { %9636 = vmax.xlane.f32.xlu0 %v9635_v48 }
0x52ef   :  { %9880 = vrot.lane.b32.xlu1 %v17099_v10, %s15339_s12 }
0x536b   :  { %v9634_v7 = vpop.xlane.xlu1 %9633 }
0x536c   :  { %v9638_v22 = vsub.f32 %v9630_v29, %v9634_v7 }
0x536e   :  { %v9640_v54 = vmul.f32 1.442695, %v9638_v22 }
0x536f   :  { %v9637_v50 = vpop.xlane.xlu0 %9636  ;;  %v9881_v62 = vpop.permute.xlu1 %9880 }
0x5370   :  { %15183 = vpow2.f32 %v9640_v54  ;;  %v9639_v19 = vsub.f32 %v9631_v40, %v9637_v50 }
0x5372   :  { %v9642_v45 = vmul.f32 1.442695, %v9639_v19 }
0x5374   :  { %15185 = vpow2.f32 %v9642_v45 }
0x537a   :  { %v15184_v55 = vpop.eup %15183 }
0x537b   :  { %v9644_v42 = vsel %vm352_vm5, %v15184_v55, 0.0 }
0x537c   :  { %9645 = vadd.xlane.f32.xlu0 %v9644_v42 }
0x537e   :  { %v15186_v38 = vpop.eup %15185 }
0x537f   :  { %v9647_v60 = vsel %vm352_vm5, %v15186_v38, 0.0 }
0x5380   :  { %9648 = vadd.xlane.f32.xlu1 %v9647_v60 }
0x5391   :  { %9800 = vrot.lane.b32.xlu1 %v17105_v12, %s15340_s13 }
0x5392   :  { %9802 = vrot.lane.b32.xlu0 %v17094_v26, %s15339_s12 }
0x5396   :  { %9878 = vrot.lane.b32.xlu0 %v17113_v41, %s15340_s13 }
0x5409   :  { %v9646_v2 = vpop.xlane.xlu0 %9645 }
0x540a   :  { %15187 = vrcp.f32 %v9646_v2 }
0x540d   :  { %v9649_v13 = vpop.xlane.xlu1 %9648  ;;  %v9803_v21 = vpop.permute.xlu0 %9802 }
0x540e   :  { %15189 = vrcp.f32 %v9649_v13 }
0x5411   :  { %v9801_v4 = vpop.permute.xlu1 %9800  ;;  %v9879_v53 = vpop.permute.xlu0 %9878 }
0x5414   :  { %v15188_v56 = vpop.eup %15187 }
0x5415   :  { %v9652_v1 = vmul.f32 %v15188_v56, %v15184_v55 }
0x5417   :  { %14389 = vmatmul.mubr.msk.f32.vlgmr.msra.gmra.mrb[112].mxu0 %vm352_vm5, %v9652_v1 }
0x5418   :  { %v15190_v24 = vpop.eup %15189  ;;  %14397 = vmatpush3.xpose.msk.msra.mxu0 %vm352_vm5, %v9803_v21  ;;  %14398 = vmatprep.mubr.msk.f32.mxu0 %vm15337_vm4, %v15333_v9 }
0x5419   :  { %v9653_v47 = vmul.f32 %v15190_v24, %v15186_v38  ;;  %14406 = vmatprep.subr.mxu0 %v15333_v9 }
0x541b   :  { %14394 = vmatmul.mubr.msk.f32.vlgmr.msra.gmra.mrb[108].mxu1 %vm352_vm5, %v9653_v47  ;;  %14399 = vmatmul.mubr.msk.f32.vlgmr.msra.gmra.mrb[114].mxu0 %vm352_vm5, %v9801_v4 }
0x541c   :  { %14402 = vmatpush3.xpose.msk.msra.mxu1 %vm352_vm5, %v9881_v62  ;;  %14403 = vmatprep.mubr.msk.f32.mxu1 %vm15337_vm4, %v15333_v9 }
0x541d   :  { %14411 = vmatprep.subr.mxu1 %v15333_v9  ;;  %14408 = vmatprep.mubr.msk.f32.mxu0 %vm15337_vm4, %v15333_v9 }
0x541f   :  { %14404 = vmatmul.mubr.msk.f32.vlgmr.msra.gmra.mrb[110].mxu1 %vm352_vm5, %v9879_v53 }
0x5420   :  { %14413 = vmatprep.mubr.msk.f32.mxu1 %vm15337_vm4, %v15333_v9 }
0x54ea   :  { %v17155_v39 = vpop.f32.mrb[112].mxu0 }
0x54eb   :  { %v14390_v35 = vpop.f32.mrb[113].mxu0 }
0x54ee   :  { %v17157_v8 = vpop.f32.mrb[108].mxu1  ;;  %v9874_v18 = vpop.f32.mrb[114].mxu0 }
0x54ef   :  { %v9956_v0 = vmul.f32 0.35355338, %v9874_v18  ;;  %v14395_v30 = vpop.f32.mrb[109].mxu1  ;;  %v14400_v61 = vpop.f32.mrb[115].mxu0 }
0x54f1   :  { %v9958_v31 = vadd.f32 %v9956_v0, %v15588_v28 }
0x54f2   :  { %v9952_v25 = vpop.f32.mrb[110].mxu1 }
0x54f3   :  { %v9957_v14 = vmul.f32 0.35355338, %v9952_v25  ;;  %v14405_v46 = vpop.f32.mrb[111].mxu1  ;;  %v9960_v5 = vsel %vm352_vm5, %v9958_v31, -inf }
0x54f4   :  { %9961 = vmax.xlane.f32.xlu1 %v9960_v5 }
0x54f5   :  { %v9959_v6 = vadd.f32 %v9957_v14, %v15588_v28 }
0x54f7   :  { %v9963_v32 = vsel %vm352_vm5, %v9959_v6, -inf }
0x54f8   :  { %9964 = vmax.xlane.f32.xlu0 %v9963_v32 }
0x5505   :  { %10060 = vrot.lane.b32.xlu1 %v17087_v52, %s15340_s13 }
0x5509   :  { %10138 = vrot.lane.b32.xlu1 %v17094_v26, %s15341_s15 }
0x550e   :  { %9983 = vrot.lane.b32.xlu0 %v17082_v20, %s15340_s13 }
0x5581   :  { %v9962_v33 = vpop.xlane.xlu1 %9961 }
0x5582   :  { %v9966_v37 = vsub.f32 %v9958_v31, %v9962_v33 }
0x5584   :  { %v9968_v17 = vmul.f32 1.442695, %v9966_v37 }
0x5585   :  { %v9965_v36 = vpop.xlane.xlu0 %9964  ;;  %v10061_v15 = vpop.permute.xlu1 %10060 }
0x5586   :  { %15191 = vpow2.f32 %v9968_v17  ;;  %v9967_v49 = vsub.f32 %v9959_v6, %v9965_v36  ;;  %14412 = vmatpush3.msra.mxu1 %v10061_v15 }
0x5587   :  { %14421 = vmatprep.subr.mxu1 %v15333_v9 }
0x5588   :  { %v9970_v34 = vmul.f32 1.442695, %v9967_v49 }
0x5589   :  { %v9984_v29 = vpop.permute.xlu0 %9983  ;;  %v10139_v40 = vpop.permute.xlu1 %10138 }
0x558a   :  { %15193 = vpow2.f32 %v9970_v34  ;;  %14407 = vmatpush3.msra.mxu0 %v9984_v29 }
0x558b   :  { %14416 = vmatprep.subr.mxu0 %v15333_v9 }
0x5590   :  { %v15192_v51 = vpop.eup %15191 }
0x5591   :  { %v9972_v43 = vsel %vm352_vm5, %v15192_v51, 0.0 }
0x5592   :  { %9973 = vadd.xlane.f32.xlu0 %v9972_v43 }
0x5594   :  { %v15194_v23 = vpop.eup %15193 }
0x5595   :  { %v9975_v16 = vsel %vm352_vm5, %v15194_v23, 0.0 }
0x5596   :  { %9976 = vadd.xlane.f32.xlu1 %v9975_v16 }
0x55a7   :  { %10136 = vrot.lane.b32.xlu1 %v17105_v12, %s15342_s16 }
0x55a8   :  { %10216 = vrot.lane.b32.xlu0 %v17099_v10, %s15341_s15 }
0x55ac   :  { %10214 = vrot.lane.b32.xlu0 %v17113_v41, %s15342_s16 }
0x561f   :  { %v9974_v48 = vpop.xlane.xlu0 %9973 }
0x5620   :  { %15195 = vrcp.f32 %v9974_v48 }
0x5623   :  { %v9977_v7 = vpop.xlane.xlu1 %9976  ;;  %v10217_v19 = vpop.permute.xlu0 %10216 }
0x5624   :  { %15197 = vrcp.f32 %v9977_v7 }
0x5627   :  { %v10137_v55 = vpop.permute.xlu1 %10136  ;;  %v10215_v42 = vpop.permute.xlu0 %10214 }
0x562a   :  { %v15196_v22 = vpop.eup %15195 }
0x562b   :  { %v9980_v54 = vmul.f32 %v15196_v22, %v15192_v51 }
0x562d   :  { %14409 = vmatmul.mubr.msk.f32.vlgmr.msra.gmra.mrb[116].mxu0 %vm352_vm5, %v9980_v54 }
0x562e   :  { %v15198_v50 = vpop.eup %15197  ;;  %14417 = vmatpush3.xpose.msk.msra.mxu0 %vm352_vm5, %v10139_v40  ;;  %14418 = vmatprep.mubr.msk.f32.mxu0 %vm15337_vm4, %v15333_v9 }
0x562f   :  { %v9981_v45 = vmul.f32 %v15198_v50, %v15194_v23  ;;  %14426 = vmatprep.subr.mxu0 %v15333_v9 }
0x5631   :  { %14414 = vmatmul.mubr.msk.f32.vlgmr.msra.gmra.mrb[112].mxu1 %vm352_vm5, %v9981_v45  ;;  %14419 = vmatmul.mubr.msk.f32.vlgmr.msra.gmra.mrb[118].mxu0 %vm352_vm5, %v10137_v55 }
0x5632   :  { %14422 = vmatpush3.xpose.msk.msra.mxu1 %vm352_vm5, %v10217_v19  ;;  %14423 = vmatprep.mubr.msk.f32.mxu1 %vm15337_vm4, %v15333_v9 }
0x5633   :  { %14431 = vmatprep.subr.mxu1 %v15333_v9  ;;  %14428 = vmatprep.mubr.msk.f32.mxu0 %vm15337_vm4, %v15333_v9 }
0x5635   :  { %14424 = vmatmul.mubr.msk.f32.vlgmr.msra.gmra.mrb[114].mxu1 %vm352_vm5, %v10215_v42 }
0x5636   :  { %14433 = vmatprep.mubr.msk.f32.mxu1 %vm15337_vm4, %v15333_v9 }
0x5700   :  { %v17195_v38 = vpop.f32.mrb[116].mxu0 }
0x5701   :  { %v14410_v60 = vpop.f32.mrb[117].mxu0 }
0x5704   :  { %v17197_v62 = vpop.f32.mrb[112].mxu1  ;;  %v10210_v2 = vpop.f32.mrb[118].mxu0 }
0x5705   :  { %v10292_v13 = vmul.f32 0.35355338, %v10210_v2  ;;  %v14415_v56 = vpop.f32.mrb[113].mxu1  ;;  %v14420_v1 = vpop.f32.mrb[119].mxu0 }
0x5707   :  { %v10294_v21 = vadd.f32 %v10292_v13, %v15588_v28 }
0x5708   :  { %v10288_v24 = vpop.f32.mrb[114].mxu1 }
0x5709   :  { %v10293_v47 = vmul.f32 0.35355338, %v10288_v24  ;;  %v14425_v4 = vpop.f32.mrb[115].mxu1  ;;  %v10296_v53 = vsel %vm352_vm5, %v10294_v21, -inf }
0x570a   :  { %10297 = vmax.xlane.f32.xlu1 %v10296_v53 }
0x570b   :  { %v10295_v35 = vadd.f32 %v10293_v47, %v15588_v28 }
0x570d   :  { %v10299_v18 = vsel %vm352_vm5, %v10295_v35, -inf }
0x570e   :  { %10300 = vmax.xlane.f32.xlu0 %v10299_v18 }
0x571b   :  { %10394 = vrot.lane.b32.xlu1 %v17087_v52, %s15342_s16 }
0x571f   :  { %10472 = vrot.lane.b32.xlu1 %v17094_v26, %s15343_s7 }
0x5724   :  { %10318 = vrot.lane.b32.xlu0 %v17082_v20, %s15342_s16 }
0x5797   :  { %v10298_v0 = vpop.xlane.xlu1 %10297 }
0x5798   :  { %v10302_v30 = vsub.f32 %v10294_v21, %v10298_v0 }
0x579a   :  { %v10304_v61 = vmul.f32 1.442695, %v10302_v30 }
0x579b   :  { %v10301_v31 = vpop.xlane.xlu0 %10300  ;;  %v10395_v25 = vpop.permute.xlu1 %10394 }
0x579c   :  { %15199 = vpow2.f32 %v10304_v61  ;;  %v10303_v14 = vsub.f32 %v10295_v35, %v10301_v31  ;;  %14432 = vmatpush3.msra.mxu1 %v10395_v25  ;;  %v13256_v31 = vld [vmem:[%s17663_s6 + $0xa8] sm:$0xff] }
0x579d   :  { %14441 = vmatprep.subr.mxu1 %v15333_v9 }
0x579e   :  { %v10306_v46 = vmul.f32 1.442695, %v10303_v14  ;;  %v13257_v14 = vld [vmem:[%s17663_s6 + $0xb0] sm:$0xff] }
0x579f   :  { %v10319_v5 = vpop.permute.xlu0 %10318  ;;  %v10473_v37 = vpop.permute.xlu1 %10472 }
0x57a0   :  { %15201 = vpow2.f32 %v10306_v46  ;;  %14427 = vmatpush3.msra.mxu0 %v10319_v5  ;;  %v13258_v46 = vld [vmem:[%s17663_s6 + $0xb8] sm:$0xff] }
0x57a1   :  { %14436 = vmatprep.subr.mxu0 %v15333_v9  ;;  %v14846_v5 = vpack.c.bf16 %v13258_v46, %v13257_v14  ;;  %v13270_v14 = vld [vmem:[%s17666_s9 + $0x178] sm:$0xff] }
0x57a6   :  { %v15200_v26 = vpop.eup %15199 }
0x57a7   :  { %v10308_v6 = vsel %vm352_vm5, %v15200_v26, 0.0 }
0x57a8   :  { %10309 = vadd.xlane.f32.xlu0 %v10308_v6 }
0x57aa   :  { %v15202_v32 = vpop.eup %15201 }
0x57ab   :  { %v10311_v33 = vsel %vm352_vm5, %v15202_v32, 0.0 }
0x57ac   :  { %10312 = vadd.xlane.f32.xlu1 %v10311_v33 }
0x57bd   :  { %10470 = vrot.lane.b32.xlu1 %v17105_v12, %s15344_s14 }
0x57be   :  { %10550 = vrot.lane.b32.xlu0 %v17099_v10, %s15343_s7 }
0x57c2   :  { %10548 = vrot.lane.b32.xlu0 %v17113_v41, %s15344_s14 }
0x5835   :  { %v10310_v17 = vpop.xlane.xlu0 %10309 }
0x5836   :  { %15203 = vrcp.f32 %v10310_v17 }
0x5839   :  { %v10313_v36 = vpop.xlane.xlu1 %10312  ;;  %v10551_v29 = vpop.permute.xlu0 %10550 }
0x583a   :  { %15205 = vrcp.f32 %v10313_v36 }
0x583d   :  { %v10471_v12 = vpop.permute.xlu1 %10470  ;;  %v10549_v41 = vpop.permute.xlu0 %10548 }
0x5840   :  { %v15204_v15 = vpop.eup %15203 }
0x5841   :  { %v10316_v49 = vmul.f32 %v15204_v15, %v15200_v26 }
0x5843   :  { %14429 = vmatmul.mubr.msk.f32.vlgmr.msra.gmra.mrb[120].mxu0 %vm352_vm5, %v10316_v49 }
0x5844   :  { %v15206_v34 = vpop.eup %15205  ;;  %14437 = vmatpush3.xpose.msk.msra.mxu0 %vm352_vm5, %v10473_v37  ;;  %14438 = vmatprep.mubr.msk.f32.mxu0 %vm15337_vm4, %v15333_v9 }
0x5845   :  { %v10317_v10 = vmul.f32 %v15206_v34, %v15202_v32  ;;  %14446 = vmatprep.subr.mxu0 %v15333_v9 }
0x5847   :  { %14434 = vmatmul.mubr.msk.f32.vlgmr.msra.gmra.mrb[116].mxu1 %vm352_vm5, %v10317_v10  ;;  %14439 = vmatmul.mubr.msk.f32.vlgmr.msra.gmra.mrb[122].mxu0 %vm352_vm5, %v10471_v12 }
0x5848   :  { %14442 = vmatpush3.xpose.msk.msra.mxu1 %vm352_vm5, %v10551_v29  ;;  %14443 = vmatprep.mubr.msk.f32.mxu1 %vm15337_vm4, %v15333_v9 }
0x5849   :  { %14451 = vmatprep.subr.mxu1 %v15333_v9  ;;  %14448 = vmatprep.mubr.msk.f32.mxu0 %vm15337_vm4, %v15333_v9 }
0x584b   :  { %14444 = vmatmul.mubr.msk.f32.vlgmr.msra.gmra.mrb[118].mxu1 %vm352_vm5, %v10549_v41 }
0x584c   :  { %14453 = vmatprep.mubr.msk.f32.mxu1 %vm15337_vm4, %v15333_v9 }
0x5916   :  { %v10390_v51 = vpop.f32.mrb[120].mxu0 }
0x5917   :  { %v14430_v43 = vpop.f32.mrb[121].mxu0 }
0x591a   :  { %v10466_v23 = vpop.f32.mrb[116].mxu1  ;;  %v10544_v16 = vpop.f32.mrb[122].mxu0 }
0x591b   :  { %v10626_v40 = vmul.f32 0.35355338, %v10544_v16  ;;  %v14435_v48 = vpop.f32.mrb[117].mxu1  ;;  %v14440_v7 = vpop.f32.mrb[123].mxu0 }
0x591d   :  { %v10628_v22 = vadd.f32 %v10626_v40, %v15588_v28 }
0x591e   :  { %v10622_v54 = vpop.f32.mrb[118].mxu1 }
0x591f   :  { %v10627_v50 = vmul.f32 0.35355338, %v10622_v54  ;;  %v14445_v19 = vpop.f32.mrb[119].mxu1  ;;  %v10630_v45 = vsel %vm352_vm5, %v10628_v22, -inf  ;;  %v13261_v54 = vld [vmem:[%s17665_s8 + $0xb0] sm:$0xff] }
0x5920   :  { %10631 = vmax.xlane.f32.xlu1 %v10630_v45  ;;  %v13262_v19 = vld [vmem:[%s17665_s8 + $0xb8] sm:$0xff] }
0x5921   :  { %v10629_v55 = vadd.f32 %v10627_v50, %v15588_v28  ;;  %v14854_v45 = vpack.c.bf16 %v13262_v19, %v13261_v54  ;;  %v13306_v19 = vld [vmem:[%s17662_s5 + $0x180] sm:$0xff] }
0x5923   :  { %v10633_v42 = vsel %vm352_vm5, %v10629_v55, -inf }
0x5924   :  { %10634 = vmax.xlane.f32.xlu0 %v10633_v42 }
0x59ad   :  { %v10632_v60 = vpop.xlane.xlu1 %10631 }
0x59ae   :  { %v10636_v2 = vsub.f32 %v10628_v22, %v10632_v60 }
0x59b0   :  { %v10638_v13 = vmul.f32 1.442695, %v10636_v2 }
0x59b1   :  { %v10635_v56 = vpop.xlane.xlu0 %10634 }
0x59b2   :  { %15207 = vpow2.f32 %v10638_v13  ;;  %v10637_v1 = vsub.f32 %v10629_v55, %v10635_v56 }
0x59b4   :  { %v10640_v21 = vmul.f32 1.442695, %v10637_v1 }
0x59b6   :  { %15209 = vpow2.f32 %v10640_v21 }
0x59bc   :  { %v15208_v24 = vpop.eup %15207 }
0x59bd   :  { %v10642_v47 = vsel %vm352_vm5, %v15208_v24, 0.0 }
0x59be   :  { %10643 = vadd.xlane.f32.xlu0 %v10642_v47 }
0x59c0   :  { %v15210_v4 = vpop.eup %15209 }
0x59c1   :  { %v10645_v53 = vsel %vm352_vm5, %v15210_v4, 0.0 }
0x59c2   :  { %10646 = vadd.xlane.f32.xlu1 %v10645_v53 }
0x59d3   :  { %10728 = vrot.lane.b32.xlu1 %v17087_v52, %s15344_s14 }
0x59d4   :  { %10652 = vrot.lane.b32.xlu0 %v17082_v20, %s15344_s14 }
0x59d7   :  { %10806 = vrot.lane.b32.xlu1 %v17195_v38, %s15345_s17 }
0x59d8   :  { %10808 = vrot.lane.b32.xlu0 %v17197_v62, %s15345_s17  ;;  %v13255_v62 = vld [vmem:[%s17663_s6 + $0xa0] sm:$0xff] }
0x59d9   :  { %v14842_v25 = vpack.c.bf16 %v13256_v31, %v13255_v62  ;;  %v13268_v62 = vld [vmem:[%s17666_s9 + $0x168] sm:$0xff] }
0x59db   :  { %10814 = vrot.lane.b32.xlu1 %v10390_v51, %s15330_s24 }
0x59dc   :  { %10816 = vrot.lane.b32.xlu0 %v10466_v23, %s15330_s24 }
0x5a4b   :  { %v10644_v35 = vpop.xlane.xlu0 %10643 }
0x5a4c   :  { %15211 = vrcp.f32 %v10644_v35 }
0x5a4f   :  { %v10653_v18 = vpop.permute.xlu0 %10652  ;;  %v10647_v0 = vpop.xlane.xlu1 %10646 }
0x5a50   :  { %15213 = vrcp.f32 %v10647_v0  ;;  %14447 = vmatpush3.msra.mxu0 %v10653_v18  ;;  %v13263_v18 = vld [vmem:[%s17666_s9 + $0x140] sm:$0xff]  ;;  %v13264_v0 = vld [vmem:[%s17666_s9 + $0x148] sm:$0xff] }
0x5a51   :  { %14843 = vmatprep.subr.bf16.mxu0 %v14842_v25 }
0x5a53   :  { %v10729_v52 = vpop.permute.xlu1 %10728  ;;  %v10809_v17 = vpop.permute.xlu0 %10808 }
0x5a54   :  { %14452 = vmatpush3.msra.mxu1 %v10729_v52  ;;  %v10829_v12 = vsel %vm352_vm5, %v17157_v8, %v10809_v17  ;;  %v13265_v52 = vld [vmem:[%s17666_s9 + $0x150] sm:$0xff] }
0x5a56   :  { %v15212_v30 = vpop.eup %15211 }
0x5a57   :  { %v10650_v20 = vmul.f32 %v15212_v30, %v15208_v24  ;;  %v10807_v37 = vpop.permute.xlu1 %10806  ;;  %v10817_v49 = vpop.permute.xlu0 %10816  ;;  %v13300_v24 = vld [vmem:[#allocation2 + $0x5] ss:$0 sm:$0xff]  ;;  %v14858_v30 = vpack.c.bf16 %v13264_v0, %v13263_v18 }
0x5a58   :  { %v10828_v15 = vsel %vm352_vm5, %v17155_v39, %v10807_v37  ;;  %v10831_v41 = vsel %vm1708_vm8, %v10829_v12, %v10817_v49 }
0x5a59   :  { %14449 = vmatmul.mubr.msk.f32.vlgmr.msra.gmra.mrb[124].mxu0 %vm352_vm5, %v10650_v20  ;;  %v13266_v20 = vld [vmem:[%s17666_s9 + $0x158] sm:$0xff] }
0x5a5a   :  { %v15214_v38 = vpop.eup %15213  ;;  %14845 = vmatpush3.bf16.msra.mxu0 %v14842_v25  ;;  %v13269_v25 = vld [vmem:[%s17666_s9 + $0x170] sm:$0xff] }
0x5a5b   :  { %v10651_v61 = vmul.f32 %v15214_v38, %v15210_v4  ;;  %14847 = vmatprep.subr.bf16.mxu0 %v14846_v5  ;;  %v10815_v36 = vpop.permute.xlu1 %10814  ;;  %v14862_v38 = vpack.c.bf16 %v13266_v20, %v13265_v52  ;;  %v14870_v46 = vpack.c.bf16 %v13270_v14, %v13269_v25  ;;  %v13330_v52 = vld [vmem:[%s17661_s4 + $0x6] ss:$0 sm:$0xff] }
0x5a5c   :  { %v10830_v34 = vsel %vm1708_vm8, %v10828_v15, %v10815_v36 }
0x5a5d   :  { %14454 = vmatmul.mubr.msk.f32.vlgmr.msra.gmra.mrb[120].mxu1 %vm352_vm5, %v10651_v61  ;;  %v13267_v61 = vld [vmem:[%s17666_s9 + $0x160] sm:$0xff] }
0x5a5e   :  { %14849 = vmatpush3.bf16.msra.mxu0 %v14846_v5  ;;  %v14866_v31 = vpack.c.bf16 %v13268_v62, %v13267_v61 }
0x5a5f   :  { %14859 = vmatprep.subr.bf16.mxu0 %v14858_v30 }
0x5b2c   :  { %v10724_v26 = vpop.f32.mrb[124].mxu0 }
0x5b2d   :  { %10822 = vrot.lane.b32.xlu1 %v10724_v26, %s15346_s1  ;;  %v14450_v6 = vpop.f32.mrb[125].mxu0 }
0x5b30   :  { %v10800_v32 = vpop.f32.mrb[120].mxu1 }
0x5b31   :  { %10824 = vrot.lane.b32.xlu0 %v10800_v32, %s15346_s1  ;;  %v14455_v33 = vpop.f32.mrb[121].mxu1 }
0x5b9f   :  { %v10823_v29 = vpop.permute.xlu1 %10822 }
0x5ba0   :  { %v10832_v10 = vsel %vm1711_vm7, %v10830_v34, %v10823_v29 }
0x5ba1   :  { %14464 = vmatprep.mubr.msk.f32.mxu0 %vm192_vm3, %v10832_v10 }
0x5ba3   :  { %v10825_v51 = vpop.permute.xlu0 %10824 }
0x5ba4   :  { %v10833_v43 = vsel %vm1711_vm7, %v10831_v41, %v10825_v51 }
0x5ba5   :  { %14465 = vmatmul.mubr.msk.f32.vlgmr.msra.gmra.mrb[126].mxu0 %vm192_vm3, %v10833_v43 }
0x5ba6   :  { %14861 = vmatpush3.bf16.msra.mxu0 %v14858_v30 }
0x5ba7   :  { %14863 = vmatprep.subr.bf16.mxu0 %v14862_v38 }
0x5baa   :  { %14865 = vmatpush3.bf16.msra.mxu0 %v14862_v38 }
0x5bab   :  { %14867 = vmatprep.subr.bf16.mxu0 %v14866_v31 }
0x5bae   :  { %14869 = vmatpush3.bf16.msra.mxu0 %v14866_v31 }
0x5baf   :  { %14871 = vmatprep.subr.bf16.mxu0 %v14870_v46 }
0x5bb2   :  { %14873 = vmatpush3.bf16.msra.mxu0 %v14870_v46 }
0x5bb3   :  { %14502 = vmatprep.subr.mxu0 %v15333_v9 }
0x5c78   :  { %v14466_v23 = vpop.f32.mrb[126].mxu0 }
0x5c79   :  { %v17278_v39 = vadd.f32 %v14466_v23, %v17035_v44  ;;  %v10906_v16 = vpop.f32.mrb[127].mxu0  ;;  %v13259_v44 = vld [vmem:[%s17665_s8 + $0xa0] sm:$0xff] }
0x5c7a   :  { %v17281_v40 = vadd.f32 %v10906_v16, %v17038_v27  ;;  %v13260_v27 = vld [vmem:[%s17665_s8 + $0xa8] sm:$0xff] }
0x5c7b   :  { %v10918_v48 = vmul.f32 %v17278_v39, %v17278_v39  ;;  %v14850_v50 = vpack.c.bf16 %v13260_v27, %v13259_v44 }
0x5c7c   :  { %v10917_v8 = vmul.f32 %v17281_v40, %v17281_v40 }
0x5c7d   :  { %v10922_v7 = vsel %vm192_vm3, %v10918_v48, 0.0  ;;  %14851 = vmatprep.subr.bf16.mxu1 %v14850_v50 }
0x5c7e   :  { %10923 = vadd.xlane.f32.xlu0 %v10922_v7  ;;  %v10919_v22 = vsel %vm192_vm3, %v10917_v8, 0.0  ;;  %14853 = vmatpush3.bf16.msra.mxu1 %v14850_v50 }
0x5c7f   :  { %10920 = vadd.xlane.f32.xlu1 %v10919_v22  ;;  %14855 = vmatprep.subr.bf16.mxu1 %v14854_v45 }
0x5c82   :  { %14857 = vmatpush3.bf16.msra.mxu1 %v14854_v45  ;;  %v13308_v45 = vld [vmem:[%s17662_s5 + $0x190] sm:$0xff] }
0x5d0b   :  { %v10924_v55 = vpop.xlane.xlu0 %10923 }
0x5d0c   :  { %v10926_v42 = vmul.f32 0.03125, %v10924_v55  ;;  %v10921_v60 = vpop.xlane.xlu1 %10920  ;;  %v14876_v55 = vpack.c.bf16 %v13308_v45, %v13306_v19 }
0x5d0d   :  { %v10925_v2 = vmul.f32 0.03125, %v10921_v60  ;;  %v13313_v60 = vld [vmem:[%s17662_s5 + $0x1b8] sm:$0xff] }
0x5d0e   :  { %v10928_v13 = vadd.f32 1e-06, %v10926_v42  ;;  %v13311_v42 = vld [vmem:[%s17662_s5 + $0x1a8] sm:$0xff] }
0x5d0f   :  { %v10927_v56 = vadd.f32 1e-06, %v10925_v2  ;;  %v14878_v2 = vpack.c.bf16 %v13313_v60, %v13311_v42 }
0x5d10   :  { %15215 = vrsqrt.f32 %v10928_v13  ;;  %v13310_v13 = vld [vmem:[%s17662_s5 + $0x1a0] sm:$0xff] }
0x5d11   :  { %15217 = vrsqrt.f32 %v10927_v56  ;;  %v13312_v56 = vld [vmem:[%s17662_s5 + $0x1b0] sm:$0xff] }
0x5d1a   :  { %v15216_v1 = vpop.eup %15215 }
0x5d1b   :  { %v15218_v21 = vpop.eup %15217  ;;  %v10932_v47 = vmul.f32 %v15216_v1, %v17278_v39  ;;  %v14880_v1 = vpack.c.bf16 %v13312_v56, %v13310_v13 }
0x5d1c   :  { %v10931_v4 = vmul.f32 %v15218_v21, %v17281_v40 }
0x5d1d   :  { %v10940_v35 = vmul.f32 %v13300_v24, %v10932_v47 }
0x5d1e   :  { %v10939_v53 = vmul.f32 %v13300_v24, %v10931_v4 }
0x5d20   :  { %14475 = vmatprep.mubr.msk.f32.mxu1 %vm192_vm3, %v10939_v53 }
0x5d21   :  { %14476 = vmatmul.mubr.msk.f32.vlgmr.msra.gmra.mrb[122].mxu1 %vm192_vm3, %v10940_v35 }
0x5d22   :  { %11255 = vmatprep.mubr.f32.mxu1 %v15333_v9 }
0x5df4   :  { %v14477_v5 = vpop.f32.mrb[122].mxu1 }
0x5df5   :  { %11040 = vrot.lane.b32.xlu1 %v14477_v5, %s15335_s27  ;;  %v11013_v26 = vpop.f32.mrb[123].mxu1  ;;  %v11023_v32 = vsub.f32 0.0, %v14477_v5 }
0x5df6   :  { %11038 = vrot.lane.b32.xlu0 %v11013_v26, %s15335_s27  ;;  %v11022_v6 = vsub.f32 0.0, %v11013_v26 }
0x5df7   :  { %v11026_v37 = vmul.f32 1.442695, %v11023_v32 }
0x5df8   :  { %v11024_v33 = vmul.f32 1.442695, %v11022_v6 }
0x5dfa   :  { %15219 = vpow2.f32 %v11024_v33 }
0x5dfb   :  { %15221 = vpow2.f32 %v11026_v37 }
0x5e04   :  { %v15220_v17 = vpop.eup %15219 }
0x5e05   :  { %v15222_v36 = vpop.eup %15221  ;;  %v11028_v15 = vadd.f32 1.0, %v15220_v17 }
0x5e06   :  { %v11029_v49 = vadd.f32 1.0, %v15222_v36 }
0x5e07   :  { %15223 = vrcp.f32 %v11028_v15 }
0x5e08   :  { %15225 = vrcp.f32 %v11029_v49  ;;  %v15280_v49 = vld [vmem:[%s17659_s2 + $0x8] sm:$0xff] }
0x5e11   :  { %v15224_v34 = vpop.eup %15223 }
0x5e12   :  { %v15226_v29 = vpop.eup %15225  ;;  %v11034_v12 = vmul.f32 %v15224_v34, %v11013_v26 }
0x5e13   :  { %v11035_v41 = vmul.f32 %v15226_v29, %v14477_v5 }
0x5e67   :  { %v11041_v10 = vpop.permute.xlu1 %11040 }
0x5e68   :  { %v11039_v51 = vpop.permute.xlu0 %11038  ;;  %v11045_v23 = vmul.f32 %v11041_v10, %v11035_v41 }
0x5e69   :  { %v11044_v43 = vmul.f32 %v11039_v51, %v11034_v12 }
0x5e6b   :  { %14494 = vmatprep.mubr.msk.f32.mxu0 %vm74_vm0, %v11044_v43 }
0x5e6c   :  { %14495 = vmatmul.mubr.msk.f32.vlgmr.msra.gmra.mrb[128].mxu0 %vm74_vm0, %v11045_v23 }
0x5e6d   :  { %14504 = vmatprep.mubr.msk.f32.mxu0 %vm15337_vm4, %v15333_v9 }
0x5f3f   :  { %v14496_v16 = vpop.f32.mrb[128].mxu0 }
0x5f40   :  { %v17338_v48 = vadd.f32 %v14496_v16, %v17278_v39  ;;  %v11118_v8 = vpop.f32.mrb[129].mxu0  ;;  %v13307_v39 = vld [vmem:[%s17662_s5 + $0x188] sm:$0xff] }
0x5f41   :  { %v17341_v7 = vadd.f32 %v11118_v8, %v17281_v40  ;;  %v13309_v40 = vld [vmem:[%s17662_s5 + $0x198] sm:$0xff] }
0x5f42   :  { %v11162_v22 = vmul.f32 %v17338_v48, %v17338_v48  ;;  %v14874_v50 = vpack.c.bf16 %v13309_v40, %v13307_v39 }
0x5f43   :  { %v11161_v44 = vmul.f32 %v17341_v7, %v17341_v7 }
0x5f44   :  { %v11166_v27 = vsel %vm192_vm3, %v11162_v22, 0.0  ;;  %14875 = vmatprep.subr.bf16.mxu1 %v14874_v50 }
0x5f45   :  { %11167 = vadd.xlane.f32.xlu0 %v11166_v27  ;;  %v11163_v54 = vsel %vm192_vm3, %v11161_v44, 0.0  ;;  %14877 = vmatpush1.bf16.msra.mxu1 %v14876_v55 }
0x5f46   :  { %11164 = vadd.xlane.f32.xlu1 %v11163_v54  ;;  %14879 = vmatprep.subr.bf16.mxu1 %v14878_v2 }
0x5f49   :  { %14881 = vmatpush1.bf16.msra.mxu1 %v14880_v1 }
0x5f4a   :  { %14497 = vmatprep.subr.mxu1 %v15333_v9 }
0x5fd2   :  { %v11168_v21 = vpop.xlane.xlu0 %11167 }
0x5fd3   :  { %v11170_v24 = vmul.f32 0.03125, %v11168_v21  ;;  %v11165_v47 = vpop.xlane.xlu1 %11164 }
0x5fd4   :  { %v11169_v4 = vmul.f32 0.03125, %v11165_v47 }
0x5fd5   :  { %v11172_v53 = vadd.f32 1e-06, %v11170_v24 }
0x5fd6   :  { %v11171_v35 = vadd.f32 1e-06, %v11169_v4 }
0x5fd7   :  { %15227 = vrsqrt.f32 %v11172_v53 }
0x5fd8   :  { %15229 = vrsqrt.f32 %v11171_v35 }
0x5fe1   :  { %v15228_v18 = vpop.eup %15227 }
0x5fe2   :  { %v15230_v0 = vpop.eup %15229  ;;  %v11176_v38 = vmul.f32 %v15228_v18, %v17338_v48 }
0x5fe3   :  { %v11175_v30 = vmul.f32 %v15230_v0, %v17341_v7 }
0x5fe4   :  { %v11184_v61 = vmul.f32 %v13330_v52, %v11176_v38 }
0x5fe5   :  { %v11183_v20 = vmul.f32 %v13330_v52, %v11175_v30 }
0x5fe7   :  { %13331 = vmatmul.mubr.msk.f32.vlgmr.msra.gmra.mrb[124].mxu1 %vm192_vm3, %v11183_v20 }
0x5fe8   :  { %11261 = vmatprep.mubr.f32.mxu1 %v15333_v9 }
0x5feb   :  { %13332 = vmatmul.mubr.msk.f32.gmra.mrb[126].mxu1 %vm192_vm3, %v11184_v61 }
0x5fec   :  { %14499 = vmatprep.mubr.msk.f32.mxu1 %vm15337_vm4, %v15333_v9 }
0x60ba   :  { %v11257_v62 = vpop.f32.mrb[124].mxu1 }
0x60bb   :  { %v11284_v31 = vmul.f32 %v11257_v62, %v15525_v57  ;;  %v17385_v25 = vpop.f32.mrb[125].mxu1  ;;  %v11270_v46 = vmul.f32 %v11257_v62, %v15540_v3  ;;  %v11282_v57 = vmul.f32 %v11257_v62, %v15527_v58 }
0x60bd   :  { %11288 = vrot.lane.b32.xlu0 %v11284_v31, %s15334_s23 }
0x60be   :  { %v11263_v14 = vpop.f32.mrb[126].mxu1 }
0x60bf   :  { %v11285_v5 = vmul.f32 %v11263_v14, %v15534_v63  ;;  %v17390_v26 = vpop.f32.mrb[127].mxu1  ;;  %v11271_v6 = vmul.f32 %v11263_v14, %v15556_v11  ;;  %v11283_v63 = vmul.f32 %v11263_v14, %v15529_v59  ;;  %v15279_v11 = vld [vmem:[%s17659_s2] sm:$0xff]  ;;  %v11269_v34 = vmul.f32 %v15280_v49, %v11263_v14 }
0x60c0   :  { %v11268_v58 = vmul.f32 %v15279_v11, %v11257_v62 }
0x60c1   :  { %11274 = vrot.lane.b32.xlu0 %v11270_v46, %s15334_s23  ;;  %11290 = vrot.lane.b32.xlu1 %v11285_v5, %s15334_s23 }
0x60c5   :  { %11276 = vrot.lane.b32.xlu0 %v11271_v6, %s15334_s23 }
0x612f   :  { %v11289_v32 = vpop.permute.xlu0 %11288 }
0x6130   :  { %v17397_v33 = vadd.f32 %v11289_v32, %v11282_v57 }
0x6132   :  { %11297 = vrot.lane.b32.xlu1 %v17397_v33, %s15335_s27 }
0x6133   :  { %v11291_v3 = vpop.permute.xlu1 %11290  ;;  %v11275_v17 = vpop.permute.xlu0 %11274 }
0x6134   :  { %v17402_v37 = vadd.f32 %v11291_v3, %v11283_v63  ;;  %v17410_v15 = vadd.f32 %v11275_v17, %v11268_v58 }
0x6136   :  { %11375 = vrot.lane.b32.xlu1 %v17402_v37, %s15335_s27 }
0x6137   :  { %v11277_v59 = vpop.permute.xlu0 %11276 }
0x6138   :  { %v17420_v10 = vadd.f32 %v11277_v59, %v11269_v34 }
0x61a4   :  { %v11298_v36 = vpop.permute.xlu1 %11297 }
0x61a5   :  { %14498 = vmatpush3.xpose.msk.msra.mxu1 %vm352_vm5, %v11298_v36 }
0x61a6   :  { %14507 = vmatprep.subr.mxu1 %v15333_v9 }
0x61a8   :  { %14500 = vmatmul.mubr.msk.f32.vlgmr.msra.gmra.mrb[128].mxu1 %vm352_vm5, %v17410_v15  ;;  %v11376_v29 = vpop.permute.xlu1 %11375 }
0x61a9   :  { %14503 = vmatpush3.xpose.msk.msra.mxu0 %vm352_vm5, %v11376_v29  ;;  %14508 = vmatpush3.msra.mxu1 %v17385_v25 }
0x61aa   :  { %14512 = vmatprep.subr.mxu0 %v15333_v9  ;;  %14509 = vmatprep.mubr.msk.f32.mxu1 %vm15337_vm4, %v15333_v9 }
0x61ab   :  { %14517 = vmatprep.subr.mxu1 %v15333_v9 }
0x61ac   :  { %14505 = vmatmul.mubr.msk.f32.vlgmr.msra.gmra.mrb[130].mxu0 %vm352_vm5, %v17420_v10 }
0x61ad   :  { %14513 = vmatpush3.msra.mxu0 %v17390_v26  ;;  %14514 = vmatprep.mubr.msk.f32.mxu0 %vm15337_vm4, %v15333_v9 }
0x61ae   :  { %14522 = vmatprep.subr.mxu0 %v15333_v9 }
0x627b   :  { %v11370_v12 = vpop.f32.mrb[128].mxu1 }
0x627c   :  { %v11452_v41 = vmul.f32 0.35355338, %v11370_v12  ;;  %v14501_v51 = vpop.f32.mrb[129].mxu1 }
0x627e   :  { %v11454_v43 = vadd.f32 %v11452_v41, %v15588_v28 }
0x627f   :  { %v11448_v23 = vpop.f32.mrb[130].mxu0 }
0x6280   :  { %v11453_v16 = vmul.f32 0.35355338, %v11448_v23  ;;  %v14506_v8 = vpop.f32.mrb[131].mxu0  ;;  %v11456_v22 = vsel %vm352_vm5, %v11454_v43, -inf }
0x6281   :  { %11457 = vmax.xlane.f32.xlu1 %v11456_v22 }
0x6282   :  { %v11455_v44 = vadd.f32 %v11453_v16, %v15588_v28 }
0x6284   :  { %v11459_v27 = vsel %vm352_vm5, %v11455_v44, -inf }
0x6285   :  { %11460 = vmax.xlane.f32.xlu0 %v11459_v27 }
0x6292   :  { %11704 = vrot.lane.b32.xlu1 %v17402_v37, %s15339_s12 }
0x630e   :  { %v11458_v54 = vpop.xlane.xlu1 %11457 }
0x630f   :  { %v11462_v39 = vsub.f32 %v11454_v43, %v11458_v54 }
0x6311   :  { %v11464_v40 = vmul.f32 1.442695, %v11462_v39 }
0x6312   :  { %v11461_v50 = vpop.xlane.xlu0 %11460  ;;  %v11705_v13 = vpop.permute.xlu1 %11704 }
0x6313   :  { %15231 = vpow2.f32 %v11464_v40  ;;  %v11463_v19 = vsub.f32 %v11455_v44, %v11461_v50 }
0x6315   :  { %v11466_v45 = vmul.f32 1.442695, %v11463_v19 }
0x6317   :  { %15233 = vpow2.f32 %v11466_v45 }
0x631d   :  { %v15232_v55 = vpop.eup %15231 }
0x631e   :  { %v11468_v42 = vsel %vm352_vm5, %v15232_v55, 0.0 }
0x631f   :  { %11469 = vadd.xlane.f32.xlu0 %v11468_v42 }
0x6321   :  { %v15234_v60 = vpop.eup %15233 }
0x6322   :  { %v11471_v2 = vsel %vm352_vm5, %v15234_v60, 0.0 }
0x6323   :  { %11472 = vadd.xlane.f32.xlu1 %v11471_v2 }
0x6334   :  { %11624 = vrot.lane.b32.xlu1 %v17410_v15, %s15340_s13 }
0x6335   :  { %11626 = vrot.lane.b32.xlu0 %v17397_v33, %s15339_s12 }
0x6339   :  { %11702 = vrot.lane.b32.xlu0 %v17420_v10, %s15340_s13 }
0x63ac   :  { %v11470_v56 = vpop.xlane.xlu0 %11469 }
0x63ad   :  { %15235 = vrcp.f32 %v11470_v56 }
0x63b0   :  { %v11473_v1 = vpop.xlane.xlu1 %11472  ;;  %v11627_v47 = vpop.permute.xlu0 %11626 }
0x63b1   :  { %15237 = vrcp.f32 %v11473_v1 }
0x63b4   :  { %v11625_v35 = vpop.permute.xlu1 %11624  ;;  %v11703_v18 = vpop.permute.xlu0 %11702 }
0x63b7   :  { %v15236_v21 = vpop.eup %15235 }
0x63b8   :  { %v11476_v24 = vmul.f32 %v15236_v21, %v15232_v55 }
0x63ba   :  { %14510 = vmatmul.mubr.msk.f32.vlgmr.msra.gmra.mrb[130].mxu1 %vm352_vm5, %v11476_v24 }
0x63bb   :  { %v15238_v4 = vpop.eup %15237  ;;  %14518 = vmatpush3.xpose.msk.msra.mxu1 %vm352_vm5, %v11627_v47  ;;  %14519 = vmatprep.mubr.msk.f32.mxu1 %vm15337_vm4, %v15333_v9 }
0x63bc   :  { %v11477_v53 = vmul.f32 %v15238_v4, %v15234_v60  ;;  %14527 = vmatprep.subr.mxu1 %v15333_v9 }
0x63be   :  { %14515 = vmatmul.mubr.msk.f32.vlgmr.msra.gmra.mrb[132].mxu0 %vm352_vm5, %v11477_v53  ;;  %14520 = vmatmul.mubr.msk.f32.vlgmr.msra.gmra.mrb[132].mxu1 %vm352_vm5, %v11625_v35 }
0x63bf   :  { %14523 = vmatpush3.xpose.msk.msra.mxu0 %vm352_vm5, %v11705_v13  ;;  %14524 = vmatprep.mubr.msk.f32.mxu0 %vm15337_vm4, %v15333_v9 }
0x63c0   :  { %14532 = vmatprep.subr.mxu0 %v15333_v9  ;;  %14529 = vmatprep.mubr.msk.f32.mxu1 %vm15337_vm4, %v15333_v9 }
0x63c2   :  { %14525 = vmatmul.mubr.msk.f32.vlgmr.msra.gmra.mrb[134].mxu0 %vm352_vm5, %v11703_v18 }
0x63c3   :  { %14534 = vmatprep.mubr.msk.f32.mxu0 %vm15337_vm4, %v15333_v9 }
0x648d   :  { %v17462_v0 = vpop.f32.mrb[130].mxu1 }
0x648e   :  { %v14511_v52 = vpop.f32.mrb[131].mxu1 }
0x6491   :  { %v17464_v30 = vpop.f32.mrb[132].mxu0  ;;  %v11698_v20 = vpop.f32.mrb[132].mxu1 }
0x6492   :  { %v11780_v38 = vmul.f32 0.35355338, %v11698_v20  ;;  %v14516_v61 = vpop.f32.mrb[133].mxu0  ;;  %v14521_v62 = vpop.f32.mrb[133].mxu1 }
0x6494   :  { %v11782_v31 = vadd.f32 %v11780_v38, %v15588_v28 }
0x6495   :  { %v11776_v14 = vpop.f32.mrb[134].mxu0 }
0x6496   :  { %v11781_v46 = vmul.f32 0.35355338, %v11776_v14  ;;  %v14526_v5 = vpop.f32.mrb[135].mxu0  ;;  %v11784_v6 = vsel %vm352_vm5, %v11782_v31, -inf }
0x6497   :  { %11785 = vmax.xlane.f32.xlu1 %v11784_v6 }
0x6498   :  { %v11783_v57 = vadd.f32 %v11781_v46, %v15588_v28 }
0x649a   :  { %v11787_v32 = vsel %vm352_vm5, %v11783_v57, -inf }
0x649b   :  { %11788 = vmax.xlane.f32.xlu0 %v11787_v32 }
0x64a8   :  { %11884 = vrot.lane.b32.xlu1 %v17390_v26, %s15340_s13 }
0x64ac   :  { %11962 = vrot.lane.b32.xlu1 %v17397_v33, %s15341_s15 }
0x64b1   :  { %11807 = vrot.lane.b32.xlu0 %v17385_v25, %s15340_s13 }
0x6524   :  { %v11786_v63 = vpop.xlane.xlu1 %11785 }
0x6525   :  { %v11790_v3 = vsub.f32 %v11782_v31, %v11786_v63 }
0x6527   :  { %v11792_v17 = vmul.f32 1.442695, %v11790_v3 }
0x6528   :  { %v11789_v11 = vpop.xlane.xlu0 %11788  ;;  %v11885_v58 = vpop.permute.xlu1 %11884 }
0x6529   :  { %15239 = vpow2.f32 %v11792_v17  ;;  %v11791_v36 = vsub.f32 %v11783_v57, %v11789_v11  ;;  %14533 = vmatpush3.msra.mxu0 %v11885_v58 }
0x652a   :  { %14542 = vmatprep.subr.mxu0 %v15333_v9 }
0x652b   :  { %v11794_v59 = vmul.f32 1.442695, %v11791_v36 }
0x652c   :  { %v11808_v49 = vpop.permute.xlu0 %11807  ;;  %v11963_v51 = vpop.permute.xlu1 %11962 }
0x652d   :  { %15241 = vpow2.f32 %v11794_v59  ;;  %14528 = vmatpush3.msra.mxu1 %v11808_v49 }
0x652e   :  { %14537 = vmatprep.subr.mxu1 %v15333_v9 }
0x6533   :  { %v15240_v34 = vpop.eup %15239 }
0x6534   :  { %v11796_v29 = vsel %vm352_vm5, %v15240_v34, 0.0 }
0x6535   :  { %11797 = vadd.xlane.f32.xlu0 %v11796_v29 }
0x6537   :  { %v15242_v12 = vpop.eup %15241 }
0x6538   :  { %v11799_v41 = vsel %vm352_vm5, %v15242_v12, 0.0 }
0x6539   :  { %11800 = vadd.xlane.f32.xlu1 %v11799_v41 }
0x654a   :  { %11960 = vrot.lane.b32.xlu1 %v17410_v15, %s15342_s16 }
0x654b   :  { %12040 = vrot.lane.b32.xlu0 %v17402_v37, %s15341_s15 }
0x654f   :  { %12038 = vrot.lane.b32.xlu0 %v17420_v10, %s15342_s16 }
0x65c2   :  { %v11798_v43 = vpop.xlane.xlu0 %11797 }
0x65c3   :  { %15243 = vrcp.f32 %v11798_v43 }
0x65c6   :  { %v11801_v23 = vpop.xlane.xlu1 %11800  ;;  %v12041_v44 = vpop.permute.xlu0 %12040 }
0x65c7   :  { %15245 = vrcp.f32 %v11801_v23 }
0x65ca   :  { %v11961_v54 = vpop.permute.xlu1 %11960  ;;  %v12039_v39 = vpop.permute.xlu0 %12038 }
0x65cd   :  { %v15244_v16 = vpop.eup %15243 }
0x65ce   :  { %v11804_v8 = vmul.f32 %v15244_v16, %v15240_v34 }
0x65d0   :  { %14530 = vmatmul.mubr.msk.f32.vlgmr.msra.gmra.mrb[134].mxu1 %vm352_vm5, %v11804_v8 }
0x65d1   :  { %v15246_v22 = vpop.eup %15245  ;;  %14538 = vmatpush3.xpose.msk.msra.mxu1 %vm352_vm5, %v11963_v51  ;;  %14539 = vmatprep.mubr.msk.f32.mxu1 %vm15337_vm4, %v15333_v9 }
0x65d2   :  { %v11805_v27 = vmul.f32 %v15246_v22, %v15242_v12  ;;  %14547 = vmatprep.subr.mxu1 %v15333_v9 }
0x65d4   :  { %14535 = vmatmul.mubr.msk.f32.vlgmr.msra.gmra.mrb[136].mxu0 %vm352_vm5, %v11805_v27  ;;  %14540 = vmatmul.mubr.msk.f32.vlgmr.msra.gmra.mrb[136].mxu1 %vm352_vm5, %v11961_v54 }
0x65d5   :  { %14543 = vmatpush3.xpose.msk.msra.mxu0 %vm352_vm5, %v12041_v44  ;;  %14544 = vmatprep.mubr.msk.f32.mxu0 %vm15337_vm4, %v15333_v9 }
0x65d6   :  { %14552 = vmatprep.subr.mxu0 %v15333_v9  ;;  %14549 = vmatprep.mubr.msk.f32.mxu1 %vm15337_vm4, %v15333_v9 }
0x65d8   :  { %14545 = vmatmul.mubr.msk.f32.vlgmr.msra.gmra.mrb[138].mxu0 %vm352_vm5, %v12039_v39 }
0x65d9   :  { %14554 = vmatprep.mubr.msk.f32.mxu0 %vm15337_vm4, %v15333_v9 }
0x66a3   :  { %v17502_v40 = vpop.f32.mrb[134].mxu1 }
0x66a4   :  { %v14531_v50 = vpop.f32.mrb[135].mxu1 }
0x66a7   :  { %v17504_v19 = vpop.f32.mrb[136].mxu0  ;;  %v12034_v45 = vpop.f32.mrb[136].mxu1 }
0x66a8   :  { %v12116_v55 = vmul.f32 0.35355338, %v12034_v45  ;;  %v14536_v42 = vpop.f32.mrb[137].mxu0  ;;  %v14541_v60 = vpop.f32.mrb[137].mxu1 }
0x66aa   :  { %v12118_v2 = vadd.f32 %v12116_v55, %v15588_v28 }
0x66ab   :  { %v12112_v13 = vpop.f32.mrb[138].mxu0 }
0x66ac   :  { %v12117_v56 = vmul.f32 0.35355338, %v12112_v13  ;;  %v14546_v1 = vpop.f32.mrb[139].mxu0  ;;  %v12120_v21 = vsel %vm352_vm5, %v12118_v2, -inf }
0x66ad   :  { %12121 = vmax.xlane.f32.xlu1 %v12120_v21  ;;  %v13316_v21 = vld [vmem:[%s17663_s6 + $0xd0] sm:$0xff] }
0x66ae   :  { %v12119_v24 = vadd.f32 %v12117_v56, %v15588_v28  ;;  %v13315_v56 = vld [vmem:[%s17663_s6 + $0xc8] sm:$0xff] }
0x66b0   :  { %v12123_v47 = vsel %vm352_vm5, %v12119_v24, -inf }
0x66b1   :  { %12124 = vmax.xlane.f32.xlu0 %v12123_v47 }
0x66be   :  { %12218 = vrot.lane.b32.xlu1 %v17390_v26, %s15342_s16 }
0x66c2   :  { %12296 = vrot.lane.b32.xlu1 %v17397_v33, %s15343_s7 }
0x66c7   :  { %12142 = vrot.lane.b32.xlu0 %v17385_v25, %s15342_s16 }
0x673a   :  { %v12122_v4 = vpop.xlane.xlu1 %12121 }
0x673b   :  { %v12126_v53 = vsub.f32 %v12118_v2, %v12122_v4 }
0x673d   :  { %v12128_v35 = vmul.f32 1.442695, %v12126_v53 }
0x673e   :  { %v12125_v18 = vpop.xlane.xlu0 %12124  ;;  %v12219_v52 = vpop.permute.xlu1 %12218 }
0x673f   :  { %15247 = vpow2.f32 %v12128_v35  ;;  %v12127_v20 = vsub.f32 %v12119_v24, %v12125_v18  ;;  %14553 = vmatpush3.msra.mxu0 %v12219_v52  ;;  %v13317_v24 = vld [vmem:[%s17663_s6 + $0xd8] sm:$0xff] }
0x6740   :  { %14562 = vmatprep.subr.mxu0 %v15333_v9  ;;  %v14886_v47 = vpack.c.bf16 %v13317_v24, %v13316_v21 }
0x6741   :  { %v12130_v38 = vmul.f32 1.442695, %v12127_v20 }
0x6742   :  { %v12143_v61 = vpop.permute.xlu0 %12142  ;;  %v12297_v46 = vpop.permute.xlu1 %12296 }
0x6743   :  { %15249 = vpow2.f32 %v12130_v38  ;;  %14548 = vmatpush3.msra.mxu1 %v12143_v61 }
0x6744   :  { %14557 = vmatprep.subr.mxu1 %v15333_v9 }
0x6749   :  { %v15248_v33 = vpop.eup %15247 }
0x674a   :  { %v12132_v62 = vsel %vm352_vm5, %v15248_v33, 0.0 }
0x674b   :  { %12133 = vadd.xlane.f32.xlu0 %v12132_v62 }
0x674d   :  { %v15250_v31 = vpop.eup %15249 }
0x674e   :  { %v12135_v14 = vsel %vm352_vm5, %v15250_v31, 0.0 }
0x674f   :  { %12136 = vadd.xlane.f32.xlu1 %v12135_v14 }
0x6760   :  { %12294 = vrot.lane.b32.xlu1 %v17410_v15, %s15344_s14 }
0x6761   :  { %12374 = vrot.lane.b32.xlu0 %v17402_v37, %s15343_s7 }
0x6765   :  { %12372 = vrot.lane.b32.xlu0 %v17420_v10, %s15344_s14 }
0x67d8   :  { %v12134_v5 = vpop.xlane.xlu0 %12133 }
0x67d9   :  { %15251 = vrcp.f32 %v12134_v5 }
0x67dc   :  { %v12137_v6 = vpop.xlane.xlu1 %12136  ;;  %v12375_v3 = vpop.permute.xlu0 %12374 }
0x67dd   :  { %15253 = vrcp.f32 %v12137_v6 }
0x67e0   :  { %v12295_v15 = vpop.permute.xlu1 %12294  ;;  %v12373_v10 = vpop.permute.xlu0 %12372 }
0x67e3   :  { %v15252_v57 = vpop.eup %15251 }
0x67e4   :  { %v12140_v32 = vmul.f32 %v15252_v57, %v15248_v33 }
0x67e6   :  { %14550 = vmatmul.mubr.msk.f32.vlgmr.msra.gmra.mrb[138].mxu1 %vm352_vm5, %v12140_v32 }
0x67e7   :  { %v15254_v63 = vpop.eup %15253  ;;  %14558 = vmatpush3.xpose.msk.msra.mxu1 %vm352_vm5, %v12297_v46  ;;  %14559 = vmatprep.mubr.msk.f32.mxu1 %vm15337_vm4, %v15333_v9 }
0x67e8   :  { %v12141_v37 = vmul.f32 %v15254_v63, %v15250_v31  ;;  %14567 = vmatprep.subr.mxu1 %v15333_v9 }
0x67ea   :  { %14555 = vmatmul.mubr.msk.f32.vlgmr.msra.gmra.mrb[140].mxu0 %vm352_vm5, %v12141_v37  ;;  %14560 = vmatmul.mubr.msk.f32.vlgmr.msra.gmra.mrb[140].mxu1 %vm352_vm5, %v12295_v15 }
0x67eb   :  { %14563 = vmatpush3.xpose.msk.msra.mxu0 %vm352_vm5, %v12375_v3  ;;  %14564 = vmatprep.mubr.msk.f32.mxu0 %vm15337_vm4, %v15333_v9 }
0x67ec   :  { %14572 = vmatprep.subr.mxu0 %v15333_v9  ;;  %14569 = vmatprep.mubr.msk.f32.mxu1 %vm15337_vm4, %v15333_v9 }
0x67ee   :  { %14565 = vmatmul.mubr.msk.f32.vlgmr.msra.gmra.mrb[142].mxu0 %vm352_vm5, %v12373_v10 }
0x67ef   :  { %14574 = vmatprep.mubr.msk.f32.mxu0 %vm15337_vm4, %v15333_v9 }
0x68b9   :  { %v12214_v17 = vpop.f32.mrb[138].mxu1 }
0x68ba   :  { %v14551_v11 = vpop.f32.mrb[139].mxu1 }
0x68bd   :  { %v12290_v58 = vpop.f32.mrb[140].mxu0  ;;  %v12368_v36 = vpop.f32.mrb[140].mxu1 }
0x68be   :  { %v12450_v59 = vmul.f32 0.35355338, %v12368_v36  ;;  %v14556_v49 = vpop.f32.mrb[141].mxu0  ;;  %v14561_v34 = vpop.f32.mrb[141].mxu1 }
0x68c0   :  { %v12452_v29 = vadd.f32 %v12450_v59, %v15588_v28 }
0x68c1   :  { %v12446_v12 = vpop.f32.mrb[142].mxu0 }
0x68c2   :  { %v12451_v41 = vmul.f32 0.35355338, %v12446_v12  ;;  %v14566_v51 = vpop.f32.mrb[143].mxu0  ;;  %v12454_v43 = vsel %vm352_vm5, %v12452_v29, -inf }
0x68c3   :  { %12455 = vmax.xlane.f32.xlu1 %v12454_v43 }
0x68c4   :  { %v12453_v23 = vadd.f32 %v12451_v41, %v15588_v28 }
0x68c6   :  { %v12457_v16 = vsel %vm352_vm5, %v12453_v23, -inf }
0x68c7   :  { %12458 = vmax.xlane.f32.xlu0 %v12457_v16 }
0x6950   :  { %v12456_v9 = vpop.xlane.xlu1 %12455 }
0x6951   :  { %v12460_v8 = vsub.f32 %v12452_v29, %v12456_v9 }
0x6953   :  { %v12462_v22 = vmul.f32 1.442695, %v12460_v8 }
0x6954   :  { %v12459_v44 = vpop.xlane.xlu0 %12458 }
0x6955   :  { %15255 = vpow2.f32 %v12462_v22  ;;  %v12461_v27 = vsub.f32 %v12453_v23, %v12459_v44  ;;  %v13359_v23 = vld [vmem:[#allocation2 + $0x6] ss:$0 sm:$0xff] }
0x6956   :  { %v13322_v44 = vld [vmem:[%s17666_s9 + $0x180] sm:$0xff] }
0x6957   :  { %v12464_v54 = vmul.f32 1.442695, %v12461_v27  ;;  %v13323_v27 = vld [vmem:[%s17666_s9 + $0x188] sm:$0xff] }
0x6959   :  { %15257 = vpow2.f32 %v12464_v54  ;;  %v13324_v54 = vld [vmem:[%s17666_s9 + $0x190] sm:$0xff] }
0x695f   :  { %v15256_v39 = vpop.eup %15255 }
0x6960   :  { %v12466_v50 = vsel %vm352_vm5, %v15256_v39, 0.0 }
0x6961   :  { %12467 = vadd.xlane.f32.xlu0 %v12466_v50  ;;  %v13325_v50 = vld [vmem:[%s17666_s9 + $0x198] sm:$0xff] }
0x6963   :  { %v15258_v45 = vpop.eup %15257 }
0x6964   :  { %v12469_v55 = vsel %vm352_vm5, %v15258_v45, 0.0 }
0x6965   :  { %12470 = vadd.xlane.f32.xlu1 %v12469_v55  ;;  %v13326_v55 = vld [vmem:[%s17666_s9 + $0x1a0] sm:$0xff] }
0x6976   :  { %12552 = vrot.lane.b32.xlu1 %v17390_v26, %s15344_s14 }
0x6977   :  { %12476 = vrot.lane.b32.xlu0 %v17385_v25, %s15344_s14 }
0x697a   :  { %12630 = vrot.lane.b32.xlu1 %v17502_v40, %s15345_s17 }
0x697b   :  { %12632 = vrot.lane.b32.xlu0 %v17504_v19, %s15345_s17  ;;  %v13314_v19 = vld [vmem:[%s17663_s6 + $0xc0] sm:$0xff] }
0x697c   :  { %v14882_v1 = vpack.c.bf16 %v13315_v56, %v13314_v19 }
0x697e   :  { %12638 = vrot.lane.b32.xlu1 %v12214_v17, %s15330_s24  ;;  %v13320_v17 = vld [vmem:[%s17665_s8 + $0xd0] sm:$0xff] }
0x697f   :  { %12640 = vrot.lane.b32.xlu0 %v12290_v58, %s15330_s24  ;;  %v13321_v58 = vld [vmem:[%s17665_s8 + $0xd8] sm:$0xff] }
0x6980   :  { %v14894_v36 = vpack.c.bf16 %v13321_v58, %v13320_v17 }
0x69ee   :  { %v12468_v28 = vpop.xlane.xlu0 %12467 }
0x69ef   :  { %15259 = vrcp.f32 %v12468_v28  ;;  %v13327_v28 = vld [vmem:[%s17666_s9 + $0x1a8] sm:$0xff] }
0x69f2   :  { %v12477_v42 = vpop.permute.xlu0 %12476  ;;  %v12471_v60 = vpop.xlane.xlu1 %12470 }
0x69f3   :  { %15261 = vrcp.f32 %v12471_v60  ;;  %14568 = vmatpush3.msra.mxu1 %v12477_v42  ;;  %v14906_v42 = vpack.c.bf16 %v13327_v28, %v13326_v55  ;;  %v13328_v60 = vld [vmem:[%s17666_s9 + $0x1b0] sm:$0xff] }
0x69f4   :  { %14883 = vmatprep.subr.bf16.mxu1 %v14882_v1 }
0x69f6   :  { %v12553_v26 = vpop.permute.xlu1 %12552  ;;  %v12633_v20 = vpop.permute.xlu0 %12632 }
0x69f7   :  { %14573 = vmatpush3.msra.mxu0 %v12553_v26  ;;  %v12653_v46 = vsel %vm352_vm5, %v17464_v30, %v12633_v20  ;;  %v13329_v26 = vld [vmem:[%s17666_s9 + $0x1b8] sm:$0xff]  ;;  %s15347_s9 = smov [#allocation5]  }
0x69f9   :  { %v15260_v2 = vpop.eup %15259 }
0x69fa   :  { %v12474_v25 = vmul.f32 %v15260_v2, %v15256_v39  ;;  %v12631_v52 = vpop.permute.xlu1 %12630  ;;  %v12641_v33 = vpop.permute.xlu0 %12640  ;;  %v14898_v39 = vpack.c.bf16 %v13323_v27, %v13322_v44  ;;  %v14910_v2 = vpack.c.bf16 %v13329_v26, %v13328_v60 }
0x69fb   :  { %v12652_v61 = vsel %vm352_vm5, %v17462_v0, %v12631_v52  ;;  %v12655_v5 = vsel %vm1708_vm8, %v12653_v46, %v12641_v33 }
0x69fc   :  { %14570 = vmatmul.mubr.msk.f32.vlgmr.msra.gmra.mrb[142].mxu1 %vm352_vm5, %v12474_v25 }
0x69fd   :  { %v15262_v40 = vpop.eup %15261  ;;  %14885 = vmatpush3.bf16.msra.mxu1 %v14882_v1 }
0x69fe   :  { %v12475_v13 = vmul.f32 %v15262_v40, %v15258_v45  ;;  %14887 = vmatprep.subr.bf16.mxu1 %v14886_v47  ;;  %v12639_v38 = vpop.permute.xlu1 %12638  ;;  %v14902_v45 = vpack.c.bf16 %v13325_v50, %v13324_v54 }
0x69ff   :  { %v12654_v62 = vsel %vm1708_vm8, %v12652_v61, %v12639_v38 }
0x6a00   :  { %14575 = vmatmul.mubr.msk.f32.vlgmr.msra.gmra.mrb[144].mxu0 %vm352_vm5, %v12475_v13 }
0x6a01   :  { %14889 = vmatpush3.bf16.msra.mxu1 %v14886_v47 }
0x6a02   :  { %14899 = vmatprep.subr.bf16.mxu1 %v14898_v39 }
0x6acf   :  { %v12548_v4 = vpop.f32.mrb[142].mxu1 }
0x6ad0   :  { %12646 = vrot.lane.b32.xlu1 %v12548_v4, %s15346_s1  ;;  %v14571_v53 = vpop.f32.mrb[143].mxu1 }
0x6ad3   :  { %v12624_v35 = vpop.f32.mrb[144].mxu0 }
0x6ad4   :  { %12648 = vrot.lane.b32.xlu0 %v12624_v35, %s15346_s1  ;;  %v14576_v18 = vpop.f32.mrb[145].mxu0 }
0x6b42   :  { %v12647_v31 = vpop.permute.xlu1 %12646 }
0x6b43   :  { %v12656_v14 = vsel %vm1711_vm7, %v12654_v62, %v12647_v31 }
0x6b44   :  { %14585 = vmatprep.mubr.msk.f32.mxu1 %vm192_vm3, %v12656_v14 }
0x6b46   :  { %v12649_v6 = vpop.permute.xlu0 %12648 }
0x6b47   :  { %v12657_v57 = vsel %vm1711_vm7, %v12655_v5, %v12649_v6 }
0x6b48   :  { %14586 = vmatmul.mubr.msk.f32.vlgmr.msra.gmra.mrb[144].mxu1 %vm192_vm3, %v12657_v57 }
0x6b49   :  { %14901 = vmatpush3.bf16.msra.mxu1 %v14898_v39 }
0x6b4a   :  { %14903 = vmatprep.subr.bf16.mxu1 %v14902_v45 }
0x6b4d   :  { %14905 = vmatpush3.bf16.msra.mxu1 %v14902_v45 }
0x6b4e   :  { %14907 = vmatprep.subr.bf16.mxu1 %v14906_v42 }
0x6b51   :  { %14909 = vmatpush3.bf16.msra.mxu1 %v14906_v42 }
0x6b52   :  { %14911 = vmatprep.subr.bf16.mxu1 %v14910_v2 }
0x6b55   :  { %14913 = vmatpush3.bf16.msra.mxu1 %v14910_v2 }
0x6c1b   :  { %v14587_v32 = vpop.f32.mrb[144].mxu1 }
0x6c1c   :  { %v17585_v0 = vadd.f32 %v14587_v32, %v17338_v48  ;;  %v12730_v63 = vpop.f32.mrb[145].mxu1  ;;  %v13318_v48 = vld [vmem:[%s17665_s8 + $0xc0] sm:$0xff] }
0x6c1d   :  { %v17588_v3 = vadd.f32 %v12730_v63, %v17341_v7  ;;  %v13319_v7 = vld [vmem:[%s17665_s8 + $0xc8] sm:$0xff] }
0x6c1e   :  { %v12742_v37 = vmul.f32 %v17585_v0, %v17585_v0  ;;  %v14890_v11 = vpack.c.bf16 %v13319_v7, %v13318_v48 }
0x6c1f   :  { %v12741_v30 = vmul.f32 %v17588_v3, %v17588_v3 }
0x6c20   :  { %v12746_v15 = vsel %vm192_vm3, %v12742_v37, 0.0  ;;  %14891 = vmatprep.subr.bf16.mxu0 %v14890_v11 }
0x6c21   :  { %12747 = vadd.xlane.f32.xlu0 %v12746_v15  ;;  %v12743_v10 = vsel %vm192_vm3, %v12741_v30, 0.0  ;;  %14893 = vmatpush3.bf16.msra.mxu0 %v14890_v11 }
0x6c22   :  { %12744 = vadd.xlane.f32.xlu1 %v12743_v10  ;;  %14895 = vmatprep.subr.bf16.mxu0 %v14894_v36 }
0x6c25   :  { %14897 = vmatpush3.bf16.msra.mxu0 %v14894_v36 }
0x6cae   :  { %v12748_v59 = vpop.xlane.xlu0 %12747 }
0x6caf   :  { %v12750_v49 = vmul.f32 0.03125, %v12748_v59  ;;  %v12745_v34 = vpop.xlane.xlu1 %12744 }
0x6cb0   :  { %v12749_v29 = vmul.f32 0.03125, %v12745_v34 }
0x6cb1   :  { %v12752_v12 = vadd.f32 1e-06, %v12750_v49 }
0x6cb2   :  { %v12751_v41 = vadd.f32 1e-06, %v12749_v29 }
0x6cb3   :  { %15263 = vrsqrt.f32 %v12752_v12 }
0x6cb4   :  { %15265 = vrsqrt.f32 %v12751_v41 }
0x6cbd   :  { %v15264_v51 = vpop.eup %15263 }
0x6cbe   :  { %v15266_v43 = vpop.eup %15265  ;;  %v12756_v16 = vmul.f32 %v15264_v51, %v17585_v0 }
0x6cbf   :  { %v12755_v9 = vmul.f32 %v15266_v43, %v17588_v3 }
0x6cc0   :  { %v12764_v22 = vmul.f32 %v13359_v23, %v12756_v16 }
0x6cc1   :  { %v12763_v8 = vmul.f32 %v13359_v23, %v12755_v9 }
0x6cc3   :  { %14596 = vmatprep.mubr.msk.f32.mxu0 %vm192_vm3, %v12763_v8 }
0x6cc4   :  { %14597 = vmatmul.mubr.msk.f32.vlgmr.msra.gmra.mrb[146].mxu0 %vm192_vm3, %v12764_v22 }
0x6d97   :  { %v14598_v25 = vpop.f32.mrb[146].mxu0 }
0x6d98   :  { %12864 = vrot.lane.b32.xlu1 %v14598_v25, %s15335_s27  ;;  %v12837_v40 = vpop.f32.mrb[147].mxu0  ;;  %v12847_v19 = vsub.f32 0.0, %v14598_v25 }
0x6d99   :  { %12862 = vrot.lane.b32.xlu0 %v12837_v40, %s15335_s27  ;;  %v12846_v13 = vsub.f32 0.0, %v12837_v40  ;;  %s12960_s27 = sshll.u32 %s15347_s9, 4  ;;  %s12961_s27 = int_to_ptr.vmem [resolvable:$true] %s12960_s27 }
0x6d9a   :  { %v12850_v1 = vmul.f32 1.442695, %v12847_v19  ;;  %s15303_s16 = scalar_lea.vmem %s12961_s27, 256  ;;  %p15308_p9 = scmp.lt.s32.totalorder %s12961_s27, %s12961_s27 }
0x6d9b   :  { %v12848_v56 = vmul.f32 1.442695, %v12846_v13  ;;  %p15304_p8 = scmp.ne.s32.totalorder %s12961_s27, %s15303_s16  ;;  %p15309_p10 = scmp.lt.s32.totalorder %s15303_s16, %s15303_s16 }
0x6d9d   :  { %15267 = vpow2.f32 %v12848_v56  ;;  %p15310_p11 = por %p15309_p10, %p15308_p9 }
0x6d9e   :  { %15269 = vpow2.f32 %v12850_v1 }
0x6d9f   :  { %p15311_p12 = pnand %p15310_p11, %p15304_p8 }
0x6da7   :  { %v15268_v21 = vpop.eup %15267 }
0x6da8   :  { %v15270_v24 = vpop.eup %15269  ;;  %v12852_v47 = vadd.f32 1.0, %v15268_v21 }
0x6da9   :  { %v12853_v4 = vadd.f32 1.0, %v15270_v24 }
0x6daa   :  { %15271 = vrcp.f32 %v12852_v47 }
0x6dab   :  { %15273 = vrcp.f32 %v12853_v4 }
0x6db4   :  { %v15272_v53 = vpop.eup %15271 }
0x6db5   :  { %v15274_v35 = vpop.eup %15273  ;;  %v12858_v18 = vmul.f32 %v15272_v53, %v12837_v40 }
0x6db6   :  { %v12859_v20 = vmul.f32 %v15274_v35, %v14598_v25 }
0x6e0a   :  { %v12865_v52 = vpop.permute.xlu1 %12864 }
0x6e0b   :  { %v12863_v38 = vpop.permute.xlu0 %12862  ;;  %v12869_v33 = vmul.f32 %v12865_v52, %v12859_v20 }
0x6e0c   :  { %v12868_v61 = vmul.f32 %v12863_v38, %v12858_v18 }
0x6e0e   :  { %14615 = vmatprep.mubr.msk.f32.mxu1 %vm74_vm0, %v12868_v61 }
0x6e0f   :  { %14616 = vmatmul.mubr.msk.f32.vlgmr.msra.gmra.mrb[146].mxu1 %vm74_vm0, %v12869_v33 }
0x6ee2   :  { %v14617_v62 = vpop.f32.mrb[146].mxu1 }
0x6ee3   :  { %v12952_v31 = vadd.f32 %v14617_v62, %v17585_v0  ;;  %v12942_v14 = vpop.f32.mrb[147].mxu1 }
0x6ee4   :  { %v12951_v46 = vadd.f32 %v12942_v14, %v17588_v3 }
0x6ee5   :  { %12954 = vst.msk [vmem:[#allocation5 + $0x8] sm:$0xff] %vm192_vm3, %v12952_v31 }
0x6ee6   :  { %12953 = vst.msk [vmem:[#allocation5] sm:$0xff] %vm192_vm3, %v12951_v46 }
0x6ee7   :  { %15314 = shalt.err (!%p15311_p12)
}
0x6ee8   :  { %s15315_s6 = scalar_lea.hbm %s17667_s10, 256 }
0x6ee9   :  { %p15316_p13 = scmp.ne.s32.totalorder %s17667_s10, %s15315_s6  ;;  %p15319_p0 = scmp.lt.u32.totalorder %s15315_s6, %s17667_s10 }
0x6eeb   :  { %p15321_p1 = pnand %p15319_p0, %p15316_p13 }
0x6eed   :  { %15324 = shalt.err (!%p15321_p1)
}
0x6eee   :  { %s15348_s18 = smov 128  }
0x6eef   :  { %12966 = dma.vmem_to_hbm [thread:$0]  %s12961_s27, 256, %s17667_s10, [#allocation4], %s15348_s18, %s15348_s18, %s15345_s17  }
0x6ef0   :  { %15327 = dma.done.wait [#allocation4], 256  }
0x6ef1   :  { %15328 = vsyncadd [#allocation4], 4294967040 }
0x6ef2   :  { %12970 = vsyncpa [#allocation3], 1 }
0x6ef3   :  { %12971 = vsyncpa [#allocation4], 1 }

</bundles_post_ra>
